<compile_context>
chip_gen: v6e
topology: v6e:2x2x1
jax: 0.10.0
libtpu: 0.0.40
codegen_flags: <defaults>
</compile_context>

<pallas_src>
import functools

import jax
import jax.numpy as jnp
from jax import lax
from jax.experimental import pallas as pl
from jax.experimental.pallas import tpu as pltpu


# ----------------------------------------------------------------------------
# helpers
# ----------------------------------------------------------------------------
def _round_up(x, m):
    return ((x + m - 1) // m) * m


def _pick_row_tile(m):
    for t in (512, 256, 128, 64, 32, 16, 8):
        if m % t == 0:
            return t
    return m  # small / odd M: single full-array block


# ----------------------------------------------------------------------------
# Pallas kernels
# ----------------------------------------------------------------------------
def _matmul_bias_kernel(a_ref, b_ref, bias_ref, o_ref):
    """M/N/K tiled matmul; bias init at k==0, accumulate directly into o_ref."""
    @pl.when(pl.program_id(2) == 0)
    def _():
        o_ref[...] = jnp.broadcast_to(bias_ref[...], o_ref.shape)

    o_ref[...] += jnp.dot(a_ref[...], b_ref[...],
                          preferred_element_type=jnp.float32)


def _bn_act_kernel(x_ref, scale_ref, shift_ref, o_ref, *, relu):
    y = x_ref[...] * scale_ref[...] + shift_ref[...]
    if relu:
        y = jnp.maximum(y, 0.0)
    o_ref[...] = y


def _bn_act_res_kernel(x_ref, scale_ref, shift_ref, res_ref, o_ref, *, relu):
    y = x_ref[...] * scale_ref[...] + shift_ref[...] + res_ref[...]
    if relu:
        y = jnp.maximum(y, 0.0)
    o_ref[...] = y


def _fc_head_kernel(a_ref, w1_ref, b1_ref, w2_ref, b2_ref, o_ref):
    """Fused fc (512->1000) + head (1000->feature_dim) for tiny M."""
    h = jnp.dot(a_ref[...], w1_ref[...], preferred_element_type=jnp.float32)
    h = h + b1_ref[...]
    o = jnp.dot(h.astype(w2_ref.dtype), w2_ref[...],
                preferred_element_type=jnp.float32)
    o_ref[...] = o + b2_ref[...]


# ----------------------------------------------------------------------------
# prepared (pre-padded, pre-transposed, bf16) linear weights
# ----------------------------------------------------------------------------
class _LinearPack:
    """K-major weight matrix padded to (round_up(K,256), round_up(N,128)), bf16."""
    __slots__ = ("k", "n", "kp", "n_pad", "w", "b")

    def __init__(self, w_kn, bias_n=None):
        k, n = w_kn.shape
        self.k, self.n = int(k), int(n)
        self.kp = _round_up(self.k, 256)
        self.n_pad = _round_up(self.n, 128)
        self.w = jnp.pad(w_kn.astype(jnp.bfloat16),
                         ((0, self.kp - self.k), (0, self.n_pad - self.n)))
        if bias_n is None:
            bias_n = jnp.zeros((self.n,), jnp.float32)
        self.b = jnp.pad(bias_n.astype(jnp.float32),
                         (0, self.n_pad - self.n)).reshape(1, self.n_pad)


def _prep_conv(w_oihw):
    cout, cin, kh, kw = w_oihw.shape
    wmat = jnp.transpose(w_oihw, (2, 3, 1, 0)).reshape(kh * kw * cin, cout)
    return {"mm": _LinearPack(wmat), "kh": int(kh), "kw": int(kw)}


# ----------------------------------------------------------------------------
# Pallas wrappers
# ----------------------------------------------------------------------------
def matmul_bias(a, pack):
    """a:(M,K) @ prepared weight (K,N) + bias, via M/N/K-tiled Pallas MXU matmul."""
    M, K = a.shape
    assert K == pack.k, (K, pack.k)
    Kp, Np = pack.kp, pack.n_pad

    tm = min(256, _round_up(M, 8))
    Mp = _round_up(M, tm)
    tn = 256 if Np % 256 == 0 else 128
    tk = 256 if Kp % 256 == 0 else 128

    a_p = jnp.pad(a, ((0, Mp - M), (0, Kp - K))).astype(jnp.bfloat16)

    out = pl.pallas_call(
        _matmul_bias_kernel,
        out_shape=jax.ShapeDtypeStruct((Mp, Np), jnp.float32),
        grid_spec=pltpu.PrefetchScalarGridSpec(
            num_scalar_prefetch=0,
            grid=(Mp // tm, Np // tn, Kp // tk),
            in_specs=[
                pl.BlockSpec((tm, tk), lambda i, j, k: (i, k)),
                pl.BlockSpec((tk, tn), lambda i, j, k: (k, j)),
                pl.BlockSpec((1, tn), lambda i, j, k: (0, j)),
            ],
            out_specs=pl.BlockSpec((tm, tn), lambda i, j, k: (i, j)),
        ),
        compiler_params=pltpu.CompilerParams(
            dimension_semantics=("parallel", "parallel", "arbitrary")),
    )(a_p, pack.w, pack.b)
    return out[:M, :pack.n]


def bn_act(x2d, scale, shift, residual=None, relu=True):
    """Per-channel affine (+ residual) (+ ReLU); row-tiled, lane-densified."""
    M, C = x2d.shape

    # lane-densify narrow channel counts (e.g. C=64 -> (M/2, 128) slabs)
    fold = 1
    if C < 128 and 128 % C == 0 and M % (128 // C) == 0:
        fold = 128 // C
    if fold > 1:
        x2d = x2d.reshape(M // fold, C * fold)
        scale = jnp.tile(scale, fold)
        shift = jnp.tile(shift, fold)
        if residual is not None:
            residual = residual.reshape(M // fold, C * fold)

    Mf, Cf = x2d.shape
    tm = _pick_row_tile(Mf)
    scale2 = scale.reshape(1, Cf).astype(jnp.float32)
    shift2 = shift.reshape(1, Cf).astype(jnp.float32)

    row_spec = pl.BlockSpec((tm, Cf), lambda i: (i, 0))
    chan_spec = pl.BlockSpec((1, Cf), lambda i: (0, 0))

    if residual is None:
        kernel = functools.partial(_bn_act_kernel, relu=relu)
        args = (x2d, scale2, shift2)
        in_specs = [row_spec, chan_spec, chan_spec]
    else:
        kernel = functools.partial(_bn_act_res_kernel, relu=relu)
        args = (x2d, scale2, shift2, residual.astype(jnp.float32))
        in_specs = [row_spec, chan_spec, chan_spec, row_spec]

    out = pl.pallas_call(
        kernel,
        out_shape=jax.ShapeDtypeStruct((Mf, Cf), jnp.float32),
        grid=(Mf // tm,),
        in_specs=in_specs,
        out_specs=row_spec,
        compiler_params=pltpu.CompilerParams(
            dimension_semantics=("parallel",)),
    )(*args)

    if fold > 1:
        out = out.reshape(M, C)
    return out


def fc_head(feat, fc_pack, head_pack):
    """Fused resnet fc (512->1000) + head (1000->feature_dim) in one pallas_call."""
    M, K = feat.shape
    assert K == fc_pack.k
    assert fc_pack.n_pad == head_pack.kp
    Mp = _round_up(M, 8)
    a_p = jnp.pad(feat, ((0, Mp - M), (0, fc_pack.kp - K))).astype(jnp.bfloat16)
    Np = head_pack.n_pad

    out = pl.pallas_call(
        _fc_head_kernel,
        out_shape=jax.ShapeDtypeStruct((Mp, Np), jnp.float32),
        grid=(1,),
        in_specs=[
            pl.BlockSpec((Mp, fc_pack.kp), lambda i: (0, 0)),
            pl.BlockSpec((fc_pack.kp, fc_pack.n_pad), lambda i: (0, 0)),
            pl.BlockSpec((1, fc_pack.n_pad), lambda i: (0, 0)),
            pl.BlockSpec((head_pack.kp, Np), lambda i: (0, 0)),
            pl.BlockSpec((1, Np), lambda i: (0, 0)),
        ],
        out_specs=pl.BlockSpec((Mp, Np), lambda i: (0, 0)),
    )(a_p, fc_pack.w, fc_pack.b, head_pack.w, head_pack.b)
    return out[:M, :head_pack.n]


# ----------------------------------------------------------------------------
# JAX glue: im2col (bf16), batch-norm statistics (one pass), pooling
# ----------------------------------------------------------------------------
def _im2col(x_nhwc, kh, kw, stride, pad):
    # TODO(synk): stream the kh*kw taps from the NHWC tensor inside the matmul
    # kernel (fold taps into the K grid) to avoid materializing im2col in HBM.
    x = x_nhwc.astype(jnp.bfloat16)          # bf16 halves im2col HBM traffic
    if pad:
        x = jnp.pad(x, ((0, 0), (pad, pad), (pad, pad), (0, 0)))
    N, Hp, Wp, C = x.shape
    Ho = (Hp - kh) // stride + 1
    Wo = (Wp - kw) // stride + 1
    if kh == 1 and kw == 1:
        v = x[:, :Ho * stride:stride, :Wo * stride:stride, :]
        return v.reshape(N * Ho * Wo, C), (N, Ho, Wo)
    cols = []
    for i in range(kh):
        for j in range(kw):
            cols.append(x[:, i:i + Ho * stride:stride,
                          j:j + Wo * stride:stride, :])
    patches = jnp.stack(cols, axis=3)        # (N,Ho,Wo,kh*kw,C)
    return patches.reshape(N * Ho * Wo, kh * kw * C), (N, Ho, Wo)


def conv2d(x_nhwc, cpack, stride, pad):
    cols, shp = _im2col(x_nhwc, cpack["kh"], cpack["kw"], stride, pad)
    out = matmul_bias(cols, cpack["mm"])     # Pallas MXU matmul
    return out, shp


def batchnorm(out2d, gamma, beta, residual2d=None, relu=True, eps=1e-5):
    """Train-mode BN (batch stats over N*H*W), one-pass statistics."""
    m = out2d.shape[0]
    s1 = jnp.sum(out2d, axis=0)
    s2 = jnp.sum(out2d * out2d, axis=0)      # fused with s1 into one HBM pass
    mean = s1 / m
    var = jnp.maximum(s2 / m - mean * mean, 0.0)   # biased variance
    scale = gamma * lax.rsqrt(var + eps)
    shift = beta - mean * scale
    return bn_act(out2d, scale, shift, residual2d, relu)


def maxpool_3x3_s2(x_nhwc):
    return lax.reduce_window(
        x_nhwc, -jnp.inf, lax.max,
        window_dimensions=(1, 3, 3, 1),
        window_strides=(1, 2, 2, 1),
        padding=((0, 0), (1, 1), (1, 1), (0, 0)))


# ----------------------------------------------------------------------------
# ResNet-18 forward
# ----------------------------------------------------------------------------
def basic_block(x_nhwc, p, stride):
    cin = x_nhwc.shape[-1]
    out2d, (N, Ho, Wo) = conv2d(x_nhwc, p["conv1"], stride, 1)
    out2d = batchnorm(out2d, p["bn1_g"], p["bn1_b"], relu=True)
    out = out2d.reshape(N, Ho, Wo, -1)
    out2d, _ = conv2d(out, p["conv2"], 1, 1)

    if "ds" in p:
        id2d, _ = conv2d(x_nhwc, p["ds"], stride, 0)
        id2d = batchnorm(id2d, p["ds_g"], p["ds_b"], relu=False)
    else:
        id2d = x_nhwc.reshape(-1, cin)

    out2d = batchnorm(out2d, p["bn2_g"], p["bn2_b"],
                      residual2d=id2d, relu=True)
    return out2d.reshape(N, Ho, Wo, -1)


def _forward(prep, x_nchw):
    x = jnp.transpose(x_nchw, (0, 2, 3, 1)).astype(jnp.float32)  # NCHW -> NHWC

    # stem
    out2d, (N, Ho, Wo) = conv2d(x, prep["conv1"], stride=2, pad=3)
    out2d = batchnorm(out2d, prep["bn1_g"], prep["bn1_b"], relu=True)
    x = out2d.reshape(N, Ho, Wo, -1)
    x = maxpool_3x3_s2(x)

    # residual stages
    strides = {"layer1": 1, "layer2": 2, "layer3": 2, "layer4": 2}
    for name in ("layer1", "layer2", "layer3", "layer4"):
        blocks = prep[name]
        x = basic_block(x, blocks[0], strides[name])
        x = basic_block(x, blocks[1], 1)

    # adaptive avg pool (1,1) + flatten
    feat = jnp.mean(x, axis=(1, 2))                              # (N, 512)

    # fused resnet fc (512 -> 1000) + head (1000 -> feature_dim)
    return fc_head(feat, prep["fc"], prep["head"])


# ----------------------------------------------------------------------------
# One-time parameter prep (transpose / pad / bf16-cast weight matrices)
# ----------------------------------------------------------------------------
def prepare_params(params):
    prep = {
        "conv1": _prep_conv(params["conv1_w"]),
        "bn1_g": params["bn1_g"], "bn1_b": params["bn1_b"],
    }
    for name in ("layer1", "layer2", "layer3", "layer4"):
        blocks = []
        for bp in params[name]:
            nb = {
                "conv1": _prep_conv(bp["conv1_w"]),
                "bn1_g": bp["bn1_g"], "bn1_b": bp["bn1_b"],
                "conv2": _prep_conv(bp["conv2_w"]),
                "bn2_g": bp["bn2_g"], "bn2_b": bp["bn2_b"],
            }
            if "ds_w" in bp:
                nb["ds"] = _prep_conv(bp["ds_w"])
                nb["ds_g"] = bp["ds_g"]
                nb["ds_b"] = bp["ds_b"]
            blocks.append(nb)
        prep[name] = blocks
    prep["fc"] = _LinearPack(params["fc_w"], params["fc_b"])
    prep["head"] = _LinearPack(params["head_w"], params["head_b"])
    return prep


# ----------------------------------------------------------------------------
# Deterministic synthetic parameter initialization (resnet18 + head shapes)
# ----------------------------------------------------------------------------
def _conv_w(key, cout, cin, k):
    fan_in = cin * k * k
    return jax.random.normal(key, (cout, cin, k, k), jnp.float32) * \
        (2.0 / fan_in) ** 0.5


def init_basic_encoder_params(key, feature_dim):
    keys = iter(jax.random.split(key, 64))
    p = {}
    p["conv1_w"] = _conv_w(next(keys), 64, 3, 7)
    p["bn1_g"] = jnp.ones(64, jnp.float32)
    p["bn1_b"] = jnp.zeros(64, jnp.float32)

    stage_cfg = [("layer1", 64, 64, 1), ("layer2", 64, 128, 2),
                 ("layer3", 128, 256, 2), ("layer4", 256, 512, 2)]
    for name, cin, cout, stride in stage_cfg:
        blocks = []
        for bi in range(2):
            ci = cin if bi == 0 else cout
            s = stride if bi == 0 else 1
            bp = {
                "conv1_w": _conv_w(next(keys), cout, ci, 3),
                "bn1_g": jnp.ones(cout, jnp.float32),
                "bn1_b": jnp.zeros(cout, jnp.float32),
                "conv2_w": _conv_w(next(keys), cout, cout, 3),
                "bn2_g": jnp.ones(cout, jnp.float32),
                "bn2_b": jnp.zeros(cout, jnp.float32),
            }
            if bi == 0 and (s != 1 or ci != cout):
                bp["ds_w"] = _conv_w(next(keys), cout, ci, 1)
                bp["ds_g"] = jnp.ones(cout, jnp.float32)
                bp["ds_b"] = jnp.zeros(cout, jnp.float32)
            blocks.append(bp)
        p[name] = blocks

    p["fc_w"] = jax.random.normal(next(keys), (512, 1000), jnp.float32) * \
        (1.0 / 512) ** 0.5
    p["fc_b"] = jnp.zeros(1000, jnp.float32)
    p["head_w"] = jax.random.normal(next(keys), (1000, feature_dim),
                                    jnp.float32) * (1.0 / 1000) ** 0.5
    p["head_b"] = jnp.zeros(feature_dim, jnp.float32)
    return p


# ----------------------------------------------------------------------------
if __name__ == "__main__":
    key = jax.random.PRNGKey(0)
    feature_dim = 32
    batch, channels, spatial = 2, 3, 32   # resnet18 stem requires 3 channels

    pkey, xkey = jax.random.split(key)
    params = init_basic_encoder_params(pkey, feature_dim)
    prep = prepare_params(params)                     # one-time weight prep
    forward = jax.jit(functools.partial(_forward, prep))

    x = jax.random.normal(xkey, (batch, channels, spatial, spatial),
                          jnp.float32)

    out = forward(x)
    out = jax.block_until_ready(out)

    assert out.shape == (batch, feature_dim), out.shape
    assert bool(jnp.all(jnp.isfinite(out)))
    print("KERNEL_OK")
</pallas_src>

<mosaic_0001>
module attributes {stable_mosaic.version = 11 : i64} {
  func.func @_matmul_bias_kernel(%arg0: i32, %arg1: i32, %arg2: i32, %arg3: memref<256x256xbf16, #tpu.memory_space<vmem>>, %arg4: memref<256x128xbf16, #tpu.memory_space<vmem>>, %arg5: memref<1x128xf32, #tpu.memory_space<vmem>>, %arg6: memref<256x128xf32, #tpu.memory_space<vmem>>) attributes {dimension_semantics = [#tpu.dimension_semantics<parallel>, #tpu.dimension_semantics<parallel>, #tpu.dimension_semantics<arbitrary>], iteration_bounds = array<i64: 2, 1, 1>, scalar_prefetch = 0 : i64, scratch_operands = 0 : i64, tpu.core_type = #tpu.core_type<tc>, window_params = [{transform_indices = @transform_0, window_bounds = array<i64: 256, 256>}, {transform_indices = @transform_1, window_bounds = array<i64: 256, 128>}, {transform_indices = @transform_2, window_bounds = array<i64: 1, 128>}, {transform_indices = @transform_3, window_bounds = array<i64: 256, 128>}]} {
    %c0_i32 = arith.constant 0 : i32
    %0 = arith.cmpi eq, %arg2, %c0_i32 : i32
    %1 = arith.extui %0 : i1 to i32
    %c0_i32_0 = arith.constant 0 : i32
    %2 = arith.cmpi ne, %1, %c0_i32_0 : i32
    scf.if %2 {
      %c0_8 = arith.constant 0 : index
      %c0_9 = arith.constant 0 : index
      %9 = vector.load %arg5[%c0_8, %c0_9] : memref<1x128xf32, #tpu.memory_space<vmem>>, vector<1x128xf32>
      %10 = vector.shape_cast %9 : vector<1x128xf32> to vector<1x128xf32>
      %11 = vector.broadcast %10 : vector<1x128xf32> to vector<256x128xf32>
      %c0_10 = arith.constant 0 : index
      %c0_11 = arith.constant 0 : index
      %12 = vector.load %arg6[%c0_10, %c0_11] : memref<256x128xf32, #tpu.memory_space<vmem>>, vector<256x128xf32>
      tpu.vector_store %arg6[%c0_10, %c0_11], %11 {strides = array<i32>} : memref<256x128xf32, #tpu.memory_space<vmem>>, vector<256x128xf32>,
    } else {
    }
    %c0 = arith.constant 0 : index
    %c0_1 = arith.constant 0 : index
    %3 = vector.load %arg6[%c0, %c0_1] : memref<256x128xf32, #tpu.memory_space<vmem>>, vector<256x128xf32>
    %c0_2 = arith.constant 0 : index
    %c0_3 = arith.constant 0 : index
    %4 = vector.load %arg3[%c0_2, %c0_3] : memref<256x256xbf16, #tpu.memory_space<vmem>>, vector<256x256xbf16>
    %c0_4 = arith.constant 0 : index
    %c0_5 = arith.constant 0 : index
    %5 = vector.load %arg4[%c0_4, %c0_5] : memref<256x128xbf16, #tpu.memory_space<vmem>>, vector<256x128xbf16>
    %cst = arith.constant dense<0.000000e+00> : vector<256x128xf32>
    %6 = tpu.matmul %4, %5, %cst {dimension_numbers = #tpu.dot_dimension_numbers<[1], [0], [0], [1], [0, 0, 1, 1], [], []>} : vector<256x256xbf16>, vector<256x128xbf16>, vector<256x128xf32> -> vector<256x128xf32>
    %7 = arith.addf %3, %6 : vector<256x128xf32>
    %c0_6 = arith.constant 0 : index
    %c0_7 = arith.constant 0 : index
    %8 = vector.load %arg6[%c0_6, %c0_7] : memref<256x128xf32, #tpu.memory_space<vmem>>, vector<256x128xf32>
    tpu.vector_store %arg6[%c0_6, %c0_7], %7 {strides = array<i32>} : memref<256x128xf32, #tpu.memory_space<vmem>>, vector<256x128xf32>,
    return
  }
  func.func @transform_0(%arg0: i32, %arg1: i32, %arg2: i32) -> (i32, i32) {
    %c0_i32 = arith.constant 0 : i32
    return %arg0, %arg2 : i32, i32
  }
  func.func @transform_1(%arg0: i32, %arg1: i32, %arg2: i32) -> (i32, i32) {
    %c0_i32 = arith.constant 0 : i32
    return %arg2, %arg1 : i32, i32
  }
  func.func @transform_2(%arg0: i32, %arg1: i32, %arg2: i32) -> (i32, i32) {
    %c0_i32 = arith.constant 0 : i32
    %c0_i32_0 = arith.constant 0 : i32
    return %c0_i32, %arg1 : i32, i32
  }
  func.func @transform_3(%arg0: i32, %arg1: i32, %arg2: i32) -> (i32, i32) {
    %c0_i32 = arith.constant 0 : i32
    return %arg0, %arg1 : i32, i32
  }
}

module attributes {stable_mosaic.version = 11 : i64} {
  func.func @_bn_act_kernel(%arg0: i32, %arg1: memref<256x128xf32, #tpu.memory_space<vmem>>, %arg2: memref<1x128xf32, #tpu.memory_space<vmem>>, %arg3: memref<1x128xf32, #tpu.memory_space<vmem>>, %arg4: memref<256x128xf32, #tpu.memory_space<vmem>>) attributes {dimension_semantics = [#tpu.dimension_semantics<parallel>], iteration_bounds = array<i64: 1>, scalar_prefetch = 0 : i64, scratch_operands = 0 : i64, tpu.core_type = #tpu.core_type<tc>, window_params = [{transform_indices = @transform_0, window_bounds = array<i64: 256, 128>}, {pipeline_mode = #tpu.pipeline_mode<synchronous>, transform_indices = @transform_1, window_bounds = array<i64: 1, 128>}, {pipeline_mode = #tpu.pipeline_mode<synchronous>, transform_indices = @transform_2, window_bounds = array<i64: 1, 128>}, {transform_indices = @transform_3, window_bounds = array<i64: 256, 128>}]} {
    %c0 = arith.constant 0 : index
    %c0_0 = arith.constant 0 : index
    %0 = vector.load %arg1[%c0, %c0_0] : memref<256x128xf32, #tpu.memory_space<vmem>>, vector<256x128xf32>
    %c0_1 = arith.constant 0 : index
    %c0_2 = arith.constant 0 : index
    %1 = vector.load %arg2[%c0_1, %c0_2] : memref<1x128xf32, #tpu.memory_space<vmem>>, vector<1x128xf32>
    %2 = vector.broadcast %1 : vector<1x128xf32> to vector<256x128xf32>
    %3 = arith.mulf %0, %2 : vector<256x128xf32>
    %c0_3 = arith.constant 0 : index
    %c0_4 = arith.constant 0 : index
    %4 = vector.load %arg3[%c0_3, %c0_4] : memref<1x128xf32, #tpu.memory_space<vmem>>, vector<1x128xf32>
    %5 = vector.broadcast %4 : vector<1x128xf32> to vector<256x128xf32>
    %6 = arith.addf %3, %5 : vector<256x128xf32>
    %cst = arith.constant 0.000000e+00 : f32
    %7 = vector.broadcast %cst : f32 to vector<256x128xf32>
    %8 = arith.maximumf %6, %7 : vector<256x128xf32>
    %c0_5 = arith.constant 0 : index
    %c0_6 = arith.constant 0 : index
    %9 = vector.load %arg4[%c0_5, %c0_6] : memref<256x128xf32, #tpu.memory_space<vmem>>, vector<256x128xf32>
    tpu.vector_store %arg4[%c0_5, %c0_6], %8 {strides = array<i32>} : memref<256x128xf32, #tpu.memory_space<vmem>>, vector<256x128xf32>,
    return
  }
  func.func @transform_0(%arg0: i32) -> (i32, i32) {
    %c0_i32 = arith.constant 0 : i32
    %c0_i32_0 = arith.constant 0 : i32
    return %arg0, %c0_i32 : i32, i32
  }
  func.func @transform_1(%arg0: i32) -> (i32, i32) {
    %c0_i32 = arith.constant 0 : i32
    %c0_i32_0 = arith.constant 0 : i32
    %c0_i32_1 = arith.constant 0 : i32
    return %c0_i32, %c0_i32_0 : i32, i32
  }
  func.func @transform_2(%arg0: i32) -> (i32, i32) {
    %c0_i32 = arith.constant 0 : i32
    %c0_i32_0 = arith.constant 0 : i32
    %c0_i32_1 = arith.constant 0 : i32
    return %c0_i32, %c0_i32_0 : i32, i32
  }
  func.func @transform_3(%arg0: i32) -> (i32, i32) {
    %c0_i32 = arith.constant 0 : i32
    %c0_i32_0 = arith.constant 0 : i32
    return %arg0, %c0_i32 : i32, i32
  }
}

module attributes {stable_mosaic.version = 11 : i64} {
  func.func @_matmul_bias_kernel(%arg0: i32, %arg1: i32, %arg2: i32, %arg3: memref<128x256xbf16, #tpu.memory_space<vmem>>, %arg4: memref<256x128xbf16, #tpu.memory_space<vmem>>, %arg5: memref<1x128xf32, #tpu.memory_space<vmem>>, %arg6: memref<128x128xf32, #tpu.memory_space<vmem>>) attributes {dimension_semantics = [#tpu.dimension_semantics<parallel>, #tpu.dimension_semantics<parallel>, #tpu.dimension_semantics<arbitrary>], iteration_bounds = array<i64: 1, 1, 3>, scalar_prefetch = 0 : i64, scratch_operands = 0 : i64, tpu.core_type = #tpu.core_type<tc>, window_params = [{transform_indices = @transform_0, window_bounds = array<i64: 128, 256>}, {transform_indices = @transform_1, window_bounds = array<i64: 256, 128>}, {transform_indices = @transform_2, window_bounds = array<i64: 1, 128>}, {transform_indices = @transform_3, window_bounds = array<i64: 128, 128>}]} {
    %c0_i32 = arith.constant 0 : i32
    %0 = arith.cmpi eq, %arg2, %c0_i32 : i32
    %1 = arith.extui %0 : i1 to i32
    %c0_i32_0 = arith.constant 0 : i32
    %2 = arith.cmpi ne, %1, %c0_i32_0 : i32
    scf.if %2 {
      %c0_8 = arith.constant 0 : index
      %c0_9 = arith.constant 0 : index
      %9 = vector.load %arg5[%c0_8, %c0_9] : memref<1x128xf32, #tpu.memory_space<vmem>>, vector<1x128xf32>
      %10 = vector.shape_cast %9 : vector<1x128xf32> to vector<1x128xf32>
      %11 = vector.broadcast %10 : vector<1x128xf32> to vector<128x128xf32>
      %c0_10 = arith.constant 0 : index
      %c0_11 = arith.constant 0 : index
      %12 = vector.load %arg6[%c0_10, %c0_11] : memref<128x128xf32, #tpu.memory_space<vmem>>, vector<128x128xf32>
      tpu.vector_store %arg6[%c0_10, %c0_11], %11 {strides = array<i32>} : memref<128x128xf32, #tpu.memory_space<vmem>>, vector<128x128xf32>,
    } else {
    }
    %c0 = arith.constant 0 : index
    %c0_1 = arith.constant 0 : index
    %3 = vector.load %arg6[%c0, %c0_1] : memref<128x128xf32, #tpu.memory_space<vmem>>, vector<128x128xf32>
    %c0_2 = arith.constant 0 : index
    %c0_3 = arith.constant 0 : index
    %4 = vector.load %arg3[%c0_2, %c0_3] : memref<128x256xbf16, #tpu.memory_space<vmem>>, vector<128x256xbf16>
    %c0_4 = arith.constant 0 : index
    %c0_5 = arith.constant 0 : index
    %5 = vector.load %arg4[%c0_4, %c0_5] : memref<256x128xbf16, #tpu.memory_space<vmem>>, vector<256x128xbf16>
    %cst = arith.constant dense<0.000000e+00> : vector<128x128xf32>
    %6 = tpu.matmul %4, %5, %cst {dimension_numbers = #tpu.dot_dimension_numbers<[1], [0], [0], [1], [0, 0, 1, 1], [], []>} : vector<128x256xbf16>, vector<256x128xbf16>, vector<128x128xf32> -> vector<128x128xf32>
    %7 = arith.addf %3, %6 : vector<128x128xf32>
    %c0_6 = arith.constant 0 : index
    %c0_7 = arith.constant 0 : index
    %8 = vector.load %arg6[%c0_6, %c0_7] : memref<128x128xf32, #tpu.memory_space<vmem>>, vector<128x128xf32>
    tpu.vector_store %arg6[%c0_6, %c0_7], %7 {strides = array<i32>} : memref<128x128xf32, #tpu.memory_space<vmem>>, vector<128x128xf32>,
    return
  }
  func.func @transform_0(%arg0: i32, %arg1: i32, %arg2: i32) -> (i32, i32) {
    %c0_i32 = arith.constant 0 : i32
    return %arg0, %arg2 : i32, i32
  }
  func.func @transform_1(%arg0: i32, %arg1: i32, %arg2: i32) -> (i32, i32) {
    %c0_i32 = arith.constant 0 : i32
    return %arg2, %arg1 : i32, i32
  }
  func.func @transform_2(%arg0: i32, %arg1: i32, %arg2: i32) -> (i32, i32) {
    %c0_i32 = arith.constant 0 : i32
    %c0_i32_0 = arith.constant 0 : i32
    return %c0_i32, %arg1 : i32, i32
  }
  func.func @transform_3(%arg0: i32, %arg1: i32, %arg2: i32) -> (i32, i32) {
    %c0_i32 = arith.constant 0 : i32
    return %arg0, %arg1 : i32, i32
  }
}

module attributes {stable_mosaic.version = 11 : i64} {
  func.func @_bn_act_kernel(%arg0: i32, %arg1: memref<64x128xf32, #tpu.memory_space<vmem>>, %arg2: memref<1x128xf32, #tpu.memory_space<vmem>>, %arg3: memref<1x128xf32, #tpu.memory_space<vmem>>, %arg4: memref<64x128xf32, #tpu.memory_space<vmem>>) attributes {dimension_semantics = [#tpu.dimension_semantics<parallel>], iteration_bounds = array<i64: 1>, scalar_prefetch = 0 : i64, scratch_operands = 0 : i64, tpu.core_type = #tpu.core_type<tc>, window_params = [{transform_indices = @transform_0, window_bounds = array<i64: 64, 128>}, {pipeline_mode = #tpu.pipeline_mode<synchronous>, transform_indices = @transform_1, window_bounds = array<i64: 1, 128>}, {pipeline_mode = #tpu.pipeline_mode<synchronous>, transform_indices = @transform_2, window_bounds = array<i64: 1, 128>}, {transform_indices = @transform_3, window_bounds = array<i64: 64, 128>}]} {
    %c0 = arith.constant 0 : index
    %c0_0 = arith.constant 0 : index
    %0 = vector.load %arg1[%c0, %c0_0] : memref<64x128xf32, #tpu.memory_space<vmem>>, vector<64x128xf32>
    %c0_1 = arith.constant 0 : index
    %c0_2 = arith.constant 0 : index
    %1 = vector.load %arg2[%c0_1, %c0_2] : memref<1x128xf32, #tpu.memory_space<vmem>>, vector<1x128xf32>
    %2 = vector.broadcast %1 : vector<1x128xf32> to vector<64x128xf32>
    %3 = arith.mulf %0, %2 : vector<64x128xf32>
    %c0_3 = arith.constant 0 : index
    %c0_4 = arith.constant 0 : index
    %4 = vector.load %arg3[%c0_3, %c0_4] : memref<1x128xf32, #tpu.memory_space<vmem>>, vector<1x128xf32>
    %5 = vector.broadcast %4 : vector<1x128xf32> to vector<64x128xf32>
    %6 = arith.addf %3, %5 : vector<64x128xf32>
    %cst = arith.constant 0.000000e+00 : f32
    %7 = vector.broadcast %cst : f32 to vector<64x128xf32>
    %8 = arith.maximumf %6, %7 : vector<64x128xf32>
    %c0_5 = arith.constant 0 : index
    %c0_6 = arith.constant 0 : index
    %9 = vector.load %arg4[%c0_5, %c0_6] : memref<64x128xf32, #tpu.memory_space<vmem>>, vector<64x128xf32>
    tpu.vector_store %arg4[%c0_5, %c0_6], %8 {strides = array<i32>} : memref<64x128xf32, #tpu.memory_space<vmem>>, vector<64x128xf32>,
    return
  }
  func.func @transform_0(%arg0: i32) -> (i32, i32) {
    %c0_i32 = arith.constant 0 : i32
    %c0_i32_0 = arith.constant 0 : i32
    return %arg0, %c0_i32 : i32, i32
  }
  func.func @transform_1(%arg0: i32) -> (i32, i32) {
    %c0_i32 = arith.constant 0 : i32
    %c0_i32_0 = arith.constant 0 : i32
    %c0_i32_1 = arith.constant 0 : i32
    return %c0_i32, %c0_i32_0 : i32, i32
  }
  func.func @transform_2(%arg0: i32) -> (i32, i32) {
    %c0_i32 = arith.constant 0 : i32
    %c0_i32_0 = arith.constant 0 : i32
    %c0_i32_1 = arith.constant 0 : i32
    return %c0_i32, %c0_i32_0 : i32, i32
  }
  func.func @transform_3(%arg0: i32) -> (i32, i32) {
    %c0_i32 = arith.constant 0 : i32
    %c0_i32_0 = arith.constant 0 : i32
    return %arg0, %c0_i32 : i32, i32
  }
}

module attributes {stable_mosaic.version = 11 : i64} {
  func.func @_bn_act_res_kernel(%arg0: i32, %arg1: memref<64x128xf32, #tpu.memory_space<vmem>>, %arg2: memref<1x128xf32, #tpu.memory_space<vmem>>, %arg3: memref<1x128xf32, #tpu.memory_space<vmem>>, %arg4: memref<64x128xf32, #tpu.memory_space<vmem>>, %arg5: memref<64x128xf32, #tpu.memory_space<vmem>>) attributes {dimension_semantics = [#tpu.dimension_semantics<parallel>], iteration_bounds = array<i64: 1>, scalar_prefetch = 0 : i64, scratch_operands = 0 : i64, tpu.core_type = #tpu.core_type<tc>, window_params = [{transform_indices = @transform_0, window_bounds = array<i64: 64, 128>}, {pipeline_mode = #tpu.pipeline_mode<synchronous>, transform_indices = @transform_1, window_bounds = array<i64: 1, 128>}, {pipeline_mode = #tpu.pipeline_mode<synchronous>, transform_indices = @transform_2, window_bounds = array<i64: 1, 128>}, {transform_indices = @transform_3, window_bounds = array<i64: 64, 128>}, {transform_indices = @transform_4, window_bounds = array<i64: 64, 128>}]} {
    %c0 = arith.constant 0 : index
    %c0_0 = arith.constant 0 : index
    %0 = vector.load %arg1[%c0, %c0_0] : memref<64x128xf32, #tpu.memory_space<vmem>>, vector<64x128xf32>
    %c0_1 = arith.constant 0 : index
    %c0_2 = arith.constant 0 : index
    %1 = vector.load %arg2[%c0_1, %c0_2] : memref<1x128xf32, #tpu.memory_space<vmem>>, vector<1x128xf32>
    %2 = vector.broadcast %1 : vector<1x128xf32> to vector<64x128xf32>
    %3 = arith.mulf %0, %2 : vector<64x128xf32>
    %c0_3 = arith.constant 0 : index
    %c0_4 = arith.constant 0 : index
    %4 = vector.load %arg3[%c0_3, %c0_4] : memref<1x128xf32, #tpu.memory_space<vmem>>, vector<1x128xf32>
    %5 = vector.broadcast %4 : vector<1x128xf32> to vector<64x128xf32>
    %6 = arith.addf %3, %5 : vector<64x128xf32>
    %c0_5 = arith.constant 0 : index
    %c0_6 = arith.constant 0 : index
    %7 = vector.load %arg4[%c0_5, %c0_6] : memref<64x128xf32, #tpu.memory_space<vmem>>, vector<64x128xf32>
    %8 = arith.addf %6, %7 : vector<64x128xf32>
    %cst = arith.constant 0.000000e+00 : f32
    %9 = vector.broadcast %cst : f32 to vector<64x128xf32>
    %10 = arith.maximumf %8, %9 : vector<64x128xf32>
    %c0_7 = arith.constant 0 : index
    %c0_8 = arith.constant 0 : index
    %11 = vector.load %arg5[%c0_7, %c0_8] : memref<64x128xf32, #tpu.memory_space<vmem>>, vector<64x128xf32>
    tpu.vector_store %arg5[%c0_7, %c0_8], %10 {strides = array<i32>} : memref<64x128xf32, #tpu.memory_space<vmem>>, vector<64x128xf32>,
    return
  }
  func.func @transform_0(%arg0: i32) -> (i32, i32) {
    %c0_i32 = arith.constant 0 : i32
    %c0_i32_0 = arith.constant 0 : i32
    return %arg0, %c0_i32 : i32, i32
  }
  func.func @transform_1(%arg0: i32) -> (i32, i32) {
    %c0_i32 = arith.constant 0 : i32
    %c0_i32_0 = arith.constant 0 : i32
    %c0_i32_1 = arith.constant 0 : i32
    return %c0_i32, %c0_i32_0 : i32, i32
  }
  func.func @transform_2(%arg0: i32) -> (i32, i32) {
    %c0_i32 = arith.constant 0 : i32
    %c0_i32_0 = arith.constant 0 : i32
    %c0_i32_1 = arith.constant 0 : i32
    return %c0_i32, %c0_i32_0 : i32, i32
  }
  func.func @transform_3(%arg0: i32) -> (i32, i32) {
    %c0_i32 = arith.constant 0 : i32
    %c0_i32_0 = arith.constant 0 : i32
    return %arg0, %c0_i32 : i32, i32
  }
  func.func @transform_4(%arg0: i32) -> (i32, i32) {
    %c0_i32 = arith.constant 0 : i32
    %c0_i32_0 = arith.constant 0 : i32
    return %arg0, %c0_i32 : i32, i32
  }
}

module attributes {stable_mosaic.version = 11 : i64} {
  func.func @_matmul_bias_kernel(%arg0: i32, %arg1: i32, %arg2: i32, %arg3: memref<32x256xbf16, #tpu.memory_space<vmem>>, %arg4: memref<256x128xbf16, #tpu.memory_space<vmem>>, %arg5: memref<1x128xf32, #tpu.memory_space<vmem>>, %arg6: memref<32x128xf32, #tpu.memory_space<vmem>>) attributes {dimension_semantics = [#tpu.dimension_semantics<parallel>, #tpu.dimension_semantics<parallel>, #tpu.dimension_semantics<arbitrary>], iteration_bounds = array<i64: 1, 1, 1>, scalar_prefetch = 0 : i64, scratch_operands = 0 : i64, tpu.core_type = #tpu.core_type<tc>, window_params = [{transform_indices = @transform_0, window_bounds = array<i64: 32, 256>}, {transform_indices = @transform_1, window_bounds = array<i64: 256, 128>}, {transform_indices = @transform_2, window_bounds = array<i64: 1, 128>}, {transform_indices = @transform_3, window_bounds = array<i64: 32, 128>}]} {
    %c0_i32 = arith.constant 0 : i32
    %0 = arith.cmpi eq, %arg2, %c0_i32 : i32
    %1 = arith.extui %0 : i1 to i32
    %c0_i32_0 = arith.constant 0 : i32
    %2 = arith.cmpi ne, %1, %c0_i32_0 : i32
    scf.if %2 {
      %c0_8 = arith.constant 0 : index
      %c0_9 = arith.constant 0 : index
      %9 = vector.load %arg5[%c0_8, %c0_9] : memref<1x128xf32, #tpu.memory_space<vmem>>, vector<1x128xf32>
      %10 = vector.shape_cast %9 : vector<1x128xf32> to vector<1x128xf32>
      %11 = vector.broadcast %10 : vector<1x128xf32> to vector<32x128xf32>
      %c0_10 = arith.constant 0 : index
      %c0_11 = arith.constant 0 : index
      %12 = vector.load %arg6[%c0_10, %c0_11] : memref<32x128xf32, #tpu.memory_space<vmem>>, vector<32x128xf32>
      tpu.vector_store %arg6[%c0_10, %c0_11], %11 {strides = array<i32>} : memref<32x128xf32, #tpu.memory_space<vmem>>, vector<32x128xf32>,
    } else {
    }
    %c0 = arith.constant 0 : index
    %c0_1 = arith.constant 0 : index
    %3 = vector.load %arg6[%c0, %c0_1] : memref<32x128xf32, #tpu.memory_space<vmem>>, vector<32x128xf32>
    %c0_2 = arith.constant 0 : index
    %c0_3 = arith.constant 0 : index
    %4 = vector.load %arg3[%c0_2, %c0_3] : memref<32x256xbf16, #tpu.memory_space<vmem>>, vector<32x256xbf16>
    %c0_4 = arith.constant 0 : index
    %c0_5 = arith.constant 0 : index
    %5 = vector.load %arg4[%c0_4, %c0_5] : memref<256x128xbf16, #tpu.memory_space<vmem>>, vector<256x128xbf16>
    %cst = arith.constant dense<0.000000e+00> : vector<32x128xf32>
    %6 = tpu.matmul %4, %5, %cst {dimension_numbers = #tpu.dot_dimension_numbers<[1], [0], [0], [1], [0, 0, 1, 1], [], []>} : vector<32x256xbf16>, vector<256x128xbf16>, vector<32x128xf32> -> vector<32x128xf32>
    %7 = arith.addf %3, %6 : vector<32x128xf32>
    %c0_6 = arith.constant 0 : index
    %c0_7 = arith.constant 0 : index
    %8 = vector.load %arg6[%c0_6, %c0_7] : memref<32x128xf32, #tpu.memory_space<vmem>>, vector<32x128xf32>
    tpu.vector_store %arg6[%c0_6, %c0_7], %7 {strides = array<i32>} : memref<32x128xf32, #tpu.memory_space<vmem>>, vector<32x128xf32>,
    return
  }
  func.func @transform_0(%arg0: i32, %arg1: i32, %arg2: i32) -> (i32, i32) {
    %c0_i32 = arith.constant 0 : i32
    return %arg0, %arg2 : i32, i32
  }
  func.func @transform_1(%arg0: i32, %arg1: i32, %arg2: i32) -> (i32, i32) {
    %c0_i32 = arith.constant 0 : i32
    return %arg2, %arg1 : i32, i32
  }
  func.func @transform_2(%arg0: i32, %arg1: i32, %arg2: i32) -> (i32, i32) {
    %c0_i32 = arith.constant 0 : i32
    %c0_i32_0 = arith.constant 0 : i32
    return %c0_i32, %arg1 : i32, i32
  }
  func.func @transform_3(%arg0: i32, %arg1: i32, %arg2: i32) -> (i32, i32) {
    %c0_i32 = arith.constant 0 : i32
    return %arg0, %arg1 : i32, i32
  }
}

module attributes {stable_mosaic.version = 11 : i64} {
  func.func @_bn_act_kernel(%arg0: i32, %arg1: memref<32x128xf32, #tpu.memory_space<vmem>>, %arg2: memref<1x128xf32, #tpu.memory_space<vmem>>, %arg3: memref<1x128xf32, #tpu.memory_space<vmem>>, %arg4: memref<32x128xf32, #tpu.memory_space<vmem>>) attributes {dimension_semantics = [#tpu.dimension_semantics<parallel>], iteration_bounds = array<i64: 1>, scalar_prefetch = 0 : i64, scratch_operands = 0 : i64, tpu.core_type = #tpu.core_type<tc>, window_params = [{transform_indices = @transform_0, window_bounds = array<i64: 32, 128>}, {pipeline_mode = #tpu.pipeline_mode<synchronous>, transform_indices = @transform_1, window_bounds = array<i64: 1, 128>}, {pipeline_mode = #tpu.pipeline_mode<synchronous>, transform_indices = @transform_2, window_bounds = array<i64: 1, 128>}, {transform_indices = @transform_3, window_bounds = array<i64: 32, 128>}]} {
    %c0 = arith.constant 0 : index
    %c0_0 = arith.constant 0 : index
    %0 = vector.load %arg1[%c0, %c0_0] : memref<32x128xf32, #tpu.memory_space<vmem>>, vector<32x128xf32>
    %c0_1 = arith.constant 0 : index
    %c0_2 = arith.constant 0 : index
    %1 = vector.load %arg2[%c0_1, %c0_2] : memref<1x128xf32, #tpu.memory_space<vmem>>, vector<1x128xf32>
    %2 = vector.broadcast %1 : vector<1x128xf32> to vector<32x128xf32>
    %3 = arith.mulf %0, %2 : vector<32x128xf32>
    %c0_3 = arith.constant 0 : index
    %c0_4 = arith.constant 0 : index
    %4 = vector.load %arg3[%c0_3, %c0_4] : memref<1x128xf32, #tpu.memory_space<vmem>>, vector<1x128xf32>
    %5 = vector.broadcast %4 : vector<1x128xf32> to vector<32x128xf32>
    %6 = arith.addf %3, %5 : vector<32x128xf32>
    %c0_5 = arith.constant 0 : index
    %c0_6 = arith.constant 0 : index
    %7 = vector.load %arg4[%c0_5, %c0_6] : memref<32x128xf32, #tpu.memory_space<vmem>>, vector<32x128xf32>
    tpu.vector_store %arg4[%c0_5, %c0_6], %6 {strides = array<i32>} : memref<32x128xf32, #tpu.memory_space<vmem>>, vector<32x128xf32>,
    return
  }
  func.func @transform_0(%arg0: i32) -> (i32, i32) {
    %c0_i32 = arith.constant 0 : i32
    %c0_i32_0 = arith.constant 0 : i32
    return %arg0, %c0_i32 : i32, i32
  }
  func.func @transform_1(%arg0: i32) -> (i32, i32) {
    %c0_i32 = arith.constant 0 : i32
    %c0_i32_0 = arith.constant 0 : i32
    %c0_i32_1 = arith.constant 0 : i32
    return %c0_i32, %c0_i32_0 : i32, i32
  }
  func.func @transform_2(%arg0: i32) -> (i32, i32) {
    %c0_i32 = arith.constant 0 : i32
    %c0_i32_0 = arith.constant 0 : i32
    %c0_i32_1 = arith.constant 0 : i32
    return %c0_i32, %c0_i32_0 : i32, i32
  }
  func.func @transform_3(%arg0: i32) -> (i32, i32) {
    %c0_i32 = arith.constant 0 : i32
    %c0_i32_0 = arith.constant 0 : i32
    return %arg0, %c0_i32 : i32, i32
  }
}

module attributes {stable_mosaic.version = 11 : i64} {
  func.func @_matmul_bias_kernel(%arg0: i32, %arg1: i32, %arg2: i32, %arg3: memref<32x256xbf16, #tpu.memory_space<vmem>>, %arg4: memref<256x128xbf16, #tpu.memory_space<vmem>>, %arg5: memref<1x128xf32, #tpu.memory_space<vmem>>, %arg6: memref<32x128xf32, #tpu.memory_space<vmem>>) attributes {dimension_semantics = [#tpu.dimension_semantics<parallel>, #tpu.dimension_semantics<parallel>, #tpu.dimension_semantics<arbitrary>], iteration_bounds = array<i64: 1, 1, 3>, scalar_prefetch = 0 : i64, scratch_operands = 0 : i64, tpu.core_type = #tpu.core_type<tc>, window_params = [{transform_indices = @transform_0, window_bounds = array<i64: 32, 256>}, {transform_indices = @transform_1, window_bounds = array<i64: 256, 128>}, {transform_indices = @transform_2, window_bounds = array<i64: 1, 128>}, {transform_indices = @transform_3, window_bounds = array<i64: 32, 128>}]} {
    %c0_i32 = arith.constant 0 : i32
    %0 = arith.cmpi eq, %arg2, %c0_i32 : i32
    %1 = arith.extui %0 : i1 to i32
    %c0_i32_0 = arith.constant 0 : i32
    %2 = arith.cmpi ne, %1, %c0_i32_0 : i32
    scf.if %2 {
      %c0_8 = arith.constant 0 : index
      %c0_9 = arith.constant 0 : index
      %9 = vector.load %arg5[%c0_8, %c0_9] : memref<1x128xf32, #tpu.memory_space<vmem>>, vector<1x128xf32>
      %10 = vector.shape_cast %9 : vector<1x128xf32> to vector<1x128xf32>
      %11 = vector.broadcast %10 : vector<1x128xf32> to vector<32x128xf32>
      %c0_10 = arith.constant 0 : index
      %c0_11 = arith.constant 0 : index
      %12 = vector.load %arg6[%c0_10, %c0_11] : memref<32x128xf32, #tpu.memory_space<vmem>>, vector<32x128xf32>
      tpu.vector_store %arg6[%c0_10, %c0_11], %11 {strides = array<i32>} : memref<32x128xf32, #tpu.memory_space<vmem>>, vector<32x128xf32>,
    } else {
    }
    %c0 = arith.constant 0 : index
    %c0_1 = arith.constant 0 : index
    %3 = vector.load %arg6[%c0, %c0_1] : memref<32x128xf32, #tpu.memory_space<vmem>>, vector<32x128xf32>
    %c0_2 = arith.constant 0 : index
    %c0_3 = arith.constant 0 : index
    %4 = vector.load %arg3[%c0_2, %c0_3] : memref<32x256xbf16, #tpu.memory_space<vmem>>, vector<32x256xbf16>
    %c0_4 = arith.constant 0 : index
    %c0_5 = arith.constant 0 : index
    %5 = vector.load %arg4[%c0_4, %c0_5] : memref<256x128xbf16, #tpu.memory_space<vmem>>, vector<256x128xbf16>
    %cst = arith.constant dense<0.000000e+00> : vector<32x128xf32>
    %6 = tpu.matmul %4, %5, %cst {dimension_numbers = #tpu.dot_dimension_numbers<[1], [0], [0], [1], [0, 0, 1, 1], [], []>} : vector<32x256xbf16>, vector<256x128xbf16>, vector<32x128xf32> -> vector<32x128xf32>
    %7 = arith.addf %3, %6 : vector<32x128xf32>
    %c0_6 = arith.constant 0 : index
    %c0_7 = arith.constant 0 : index
    %8 = vector.load %arg6[%c0_6, %c0_7] : memref<32x128xf32, #tpu.memory_space<vmem>>, vector<32x128xf32>
    tpu.vector_store %arg6[%c0_6, %c0_7], %7 {strides = array<i32>} : memref<32x128xf32, #tpu.memory_space<vmem>>, vector<32x128xf32>,
    return
  }
  func.func @transform_0(%arg0: i32, %arg1: i32, %arg2: i32) -> (i32, i32) {
    %c0_i32 = arith.constant 0 : i32
    return %arg0, %arg2 : i32, i32
  }
  func.func @transform_1(%arg0: i32, %arg1: i32, %arg2: i32) -> (i32, i32) {
    %c0_i32 = arith.constant 0 : i32
    return %arg2, %arg1 : i32, i32
  }
  func.func @transform_2(%arg0: i32, %arg1: i32, %arg2: i32) -> (i32, i32) {
    %c0_i32 = arith.constant 0 : i32
    %c0_i32_0 = arith.constant 0 : i32
    return %c0_i32, %arg1 : i32, i32
  }
  func.func @transform_3(%arg0: i32, %arg1: i32, %arg2: i32) -> (i32, i32) {
    %c0_i32 = arith.constant 0 : i32
    return %arg0, %arg1 : i32, i32
  }
}

module attributes {stable_mosaic.version = 11 : i64} {
  func.func @_bn_act_kernel(%arg0: i32, %arg1: memref<32x128xf32, #tpu.memory_space<vmem>>, %arg2: memref<1x128xf32, #tpu.memory_space<vmem>>, %arg3: memref<1x128xf32, #tpu.memory_space<vmem>>, %arg4: memref<32x128xf32, #tpu.memory_space<vmem>>) attributes {dimension_semantics = [#tpu.dimension_semantics<parallel>], iteration_bounds = array<i64: 1>, scalar_prefetch = 0 : i64, scratch_operands = 0 : i64, tpu.core_type = #tpu.core_type<tc>, window_params = [{transform_indices = @transform_0, window_bounds = array<i64: 32, 128>}, {pipeline_mode = #tpu.pipeline_mode<synchronous>, transform_indices = @transform_1, window_bounds = array<i64: 1, 128>}, {pipeline_mode = #tpu.pipeline_mode<synchronous>, transform_indices = @transform_2, window_bounds = array<i64: 1, 128>}, {transform_indices = @transform_3, window_bounds = array<i64: 32, 128>}]} {
    %c0 = arith.constant 0 : index
    %c0_0 = arith.constant 0 : index
    %0 = vector.load %arg1[%c0, %c0_0] : memref<32x128xf32, #tpu.memory_space<vmem>>, vector<32x128xf32>
    %c0_1 = arith.constant 0 : index
    %c0_2 = arith.constant 0 : index
    %1 = vector.load %arg2[%c0_1, %c0_2] : memref<1x128xf32, #tpu.memory_space<vmem>>, vector<1x128xf32>
    %2 = vector.broadcast %1 : vector<1x128xf32> to vector<32x128xf32>
    %3 = arith.mulf %0, %2 : vector<32x128xf32>
    %c0_3 = arith.constant 0 : index
    %c0_4 = arith.constant 0 : index
    %4 = vector.load %arg3[%c0_3, %c0_4] : memref<1x128xf32, #tpu.memory_space<vmem>>, vector<1x128xf32>
    %5 = vector.broadcast %4 : vector<1x128xf32> to vector<32x128xf32>
    %6 = arith.addf %3, %5 : vector<32x128xf32>
    %cst = arith.constant 0.000000e+00 : f32
    %7 = vector.broadcast %cst : f32 to vector<32x128xf32>
    %8 = arith.maximumf %6, %7 : vector<32x128xf32>
    %c0_5 = arith.constant 0 : index
    %c0_6 = arith.constant 0 : index
    %9 = vector.load %arg4[%c0_5, %c0_6] : memref<32x128xf32, #tpu.memory_space<vmem>>, vector<32x128xf32>
    tpu.vector_store %arg4[%c0_5, %c0_6], %8 {strides = array<i32>} : memref<32x128xf32, #tpu.memory_space<vmem>>, vector<32x128xf32>,
    return
  }
  func.func @transform_0(%arg0: i32) -> (i32, i32) {
    %c0_i32 = arith.constant 0 : i32
    %c0_i32_0 = arith.constant 0 : i32
    return %arg0, %c0_i32 : i32, i32
  }
  func.func @transform_1(%arg0: i32) -> (i32, i32) {
    %c0_i32 = arith.constant 0 : i32
    %c0_i32_0 = arith.constant 0 : i32
    %c0_i32_1 = arith.constant 0 : i32
    return %c0_i32, %c0_i32_0 : i32, i32
  }
  func.func @transform_2(%arg0: i32) -> (i32, i32) {
    %c0_i32 = arith.constant 0 : i32
    %c0_i32_0 = arith.constant 0 : i32
    %c0_i32_1 = arith.constant 0 : i32
    return %c0_i32, %c0_i32_0 : i32, i32
  }
  func.func @transform_3(%arg0: i32) -> (i32, i32) {
    %c0_i32 = arith.constant 0 : i32
    %c0_i32_0 = arith.constant 0 : i32
    return %arg0, %c0_i32 : i32, i32
  }
}

module attributes {stable_mosaic.version = 11 : i64} {
  func.func @_bn_act_res_kernel(%arg0: i32, %arg1: memref<32x128xf32, #tpu.memory_space<vmem>>, %arg2: memref<1x128xf32, #tpu.memory_space<vmem>>, %arg3: memref<1x128xf32, #tpu.memory_space<vmem>>, %arg4: memref<32x128xf32, #tpu.memory_space<vmem>>, %arg5: memref<32x128xf32, #tpu.memory_space<vmem>>) attributes {dimension_semantics = [#tpu.dimension_semantics<parallel>], iteration_bounds = array<i64: 1>, scalar_prefetch = 0 : i64, scratch_operands = 0 : i64, tpu.core_type = #tpu.core_type<tc>, window_params = [{transform_indices = @transform_0, window_bounds = array<i64: 32, 128>}, {pipeline_mode = #tpu.pipeline_mode<synchronous>, transform_indices = @transform_1, window_bounds = array<i64: 1, 128>}, {pipeline_mode = #tpu.pipeline_mode<synchronous>, transform_indices = @transform_2, window_bounds = array<i64: 1, 128>}, {transform_indices = @transform_3, window_bounds = array<i64: 32, 128>}, {transform_indices = @transform_4, window_bounds = array<i64: 32, 128>}]} {
    %c0 = arith.constant 0 : index
    %c0_0 = arith.constant 0 : index
    %0 = vector.load %arg1[%c0, %c0_0] : memref<32x128xf32, #tpu.memory_space<vmem>>, vector<32x128xf32>
    %c0_1 = arith.constant 0 : index
    %c0_2 = arith.constant 0 : index
    %1 = vector.load %arg2[%c0_1, %c0_2] : memref<1x128xf32, #tpu.memory_space<vmem>>, vector<1x128xf32>
    %2 = vector.broadcast %1 : vector<1x128xf32> to vector<32x128xf32>
    %3 = arith.mulf %0, %2 : vector<32x128xf32>
    %c0_3 = arith.constant 0 : index
    %c0_4 = arith.constant 0 : index
    %4 = vector.load %arg3[%c0_3, %c0_4] : memref<1x128xf32, #tpu.memory_space<vmem>>, vector<1x128xf32>
    %5 = vector.broadcast %4 : vector<1x128xf32> to vector<32x128xf32>
    %6 = arith.addf %3, %5 : vector<32x128xf32>
    %c0_5 = arith.constant 0 : index
    %c0_6 = arith.constant 0 : index
    %7 = vector.load %arg4[%c0_5, %c0_6] : memref<32x128xf32, #tpu.memory_space<vmem>>, vector<32x128xf32>
    %8 = arith.addf %6, %7 : vector<32x128xf32>
    %cst = arith.constant 0.000000e+00 : f32
    %9 = vector.broadcast %cst : f32 to vector<32x128xf32>
    %10 = arith.maximumf %8, %9 : vector<32x128xf32>
    %c0_7 = arith.constant 0 : index
    %c0_8 = arith.constant 0 : index
    %11 = vector.load %arg5[%c0_7, %c0_8] : memref<32x128xf32, #tpu.memory_space<vmem>>, vector<32x128xf32>
    tpu.vector_store %arg5[%c0_7, %c0_8], %10 {strides = array<i32>} : memref<32x128xf32, #tpu.memory_space<vmem>>, vector<32x128xf32>,
    return
  }
  func.func @transform_0(%arg0: i32) -> (i32, i32) {
    %c0_i32 = arith.constant 0 : i32
    %c0_i32_0 = arith.constant 0 : i32
    return %arg0, %c0_i32 : i32, i32
  }
  func.func @transform_1(%arg0: i32) -> (i32, i32) {
    %c0_i32 = arith.constant 0 : i32
    %c0_i32_0 = arith.constant 0 : i32
    %c0_i32_1 = arith.constant 0 : i32
    return %c0_i32, %c0_i32_0 : i32, i32
  }
  func.func @transform_2(%arg0: i32) -> (i32, i32) {
    %c0_i32 = arith.constant 0 : i32
    %c0_i32_0 = arith.constant 0 : i32
    %c0_i32_1 = arith.constant 0 : i32
    return %c0_i32, %c0_i32_0 : i32, i32
  }
  func.func @transform_3(%arg0: i32) -> (i32, i32) {
    %c0_i32 = arith.constant 0 : i32
    %c0_i32_0 = arith.constant 0 : i32
    return %arg0, %c0_i32 : i32, i32
  }
  func.func @transform_4(%arg0: i32) -> (i32, i32) {
    %c0_i32 = arith.constant 0 : i32
    %c0_i32_0 = arith.constant 0 : i32
    return %arg0, %c0_i32 : i32, i32
  }
}

module attributes {stable_mosaic.version = 11 : i64} {
  func.func @_matmul_bias_kernel(%arg0: i32, %arg1: i32, %arg2: i32, %arg3: memref<32x256xbf16, #tpu.memory_space<vmem>>, %arg4: memref<256x128xbf16, #tpu.memory_space<vmem>>, %arg5: memref<1x128xf32, #tpu.memory_space<vmem>>, %arg6: memref<32x128xf32, #tpu.memory_space<vmem>>) attributes {dimension_semantics = [#tpu.dimension_semantics<parallel>, #tpu.dimension_semantics<parallel>, #tpu.dimension_semantics<arbitrary>], iteration_bounds = array<i64: 1, 1, 5>, scalar_prefetch = 0 : i64, scratch_operands = 0 : i64, tpu.core_type = #tpu.core_type<tc>, window_params = [{transform_indices = @transform_0, window_bounds = array<i64: 32, 256>}, {transform_indices = @transform_1, window_bounds = array<i64: 256, 128>}, {transform_indices = @transform_2, window_bounds = array<i64: 1, 128>}, {transform_indices = @transform_3, window_bounds = array<i64: 32, 128>}]} {
    %c0_i32 = arith.constant 0 : i32
    %0 = arith.cmpi eq, %arg2, %c0_i32 : i32
    %1 = arith.extui %0 : i1 to i32
    %c0_i32_0 = arith.constant 0 : i32
    %2 = arith.cmpi ne, %1, %c0_i32_0 : i32
    scf.if %2 {
      %c0_8 = arith.constant 0 : index
      %c0_9 = arith.constant 0 : index
      %9 = vector.load %arg5[%c0_8, %c0_9] : memref<1x128xf32, #tpu.memory_space<vmem>>, vector<1x128xf32>
      %10 = vector.shape_cast %9 : vector<1x128xf32> to vector<1x128xf32>
      %11 = vector.broadcast %10 : vector<1x128xf32> to vector<32x128xf32>
      %c0_10 = arith.constant 0 : index
      %c0_11 = arith.constant 0 : index
      %12 = vector.load %arg6[%c0_10, %c0_11] : memref<32x128xf32, #tpu.memory_space<vmem>>, vector<32x128xf32>
      tpu.vector_store %arg6[%c0_10, %c0_11], %11 {strides = array<i32>} : memref<32x128xf32, #tpu.memory_space<vmem>>, vector<32x128xf32>,
    } else {
    }
    %c0 = arith.constant 0 : index
    %c0_1 = arith.constant 0 : index
    %3 = vector.load %arg6[%c0, %c0_1] : memref<32x128xf32, #tpu.memory_space<vmem>>, vector<32x128xf32>
    %c0_2 = arith.constant 0 : index
    %c0_3 = arith.constant 0 : index
    %4 = vector.load %arg3[%c0_2, %c0_3] : memref<32x256xbf16, #tpu.memory_space<vmem>>, vector<32x256xbf16>
    %c0_4 = arith.constant 0 : index
    %c0_5 = arith.constant 0 : index
    %5 = vector.load %arg4[%c0_4, %c0_5] : memref<256x128xbf16, #tpu.memory_space<vmem>>, vector<256x128xbf16>
    %cst = arith.constant dense<0.000000e+00> : vector<32x128xf32>
    %6 = tpu.matmul %4, %5, %cst {dimension_numbers = #tpu.dot_dimension_numbers<[1], [0], [0], [1], [0, 0, 1, 1], [], []>} : vector<32x256xbf16>, vector<256x128xbf16>, vector<32x128xf32> -> vector<32x128xf32>
    %7 = arith.addf %3, %6 : vector<32x128xf32>
    %c0_6 = arith.constant 0 : index
    %c0_7 = arith.constant 0 : index
    %8 = vector.load %arg6[%c0_6, %c0_7] : memref<32x128xf32, #tpu.memory_space<vmem>>, vector<32x128xf32>
    tpu.vector_store %arg6[%c0_6, %c0_7], %7 {strides = array<i32>} : memref<32x128xf32, #tpu.memory_space<vmem>>, vector<32x128xf32>,
    return
  }
  func.func @transform_0(%arg0: i32, %arg1: i32, %arg2: i32) -> (i32, i32) {
    %c0_i32 = arith.constant 0 : i32
    return %arg0, %arg2 : i32, i32
  }
  func.func @transform_1(%arg0: i32, %arg1: i32, %arg2: i32) -> (i32, i32) {
    %c0_i32 = arith.constant 0 : i32
    return %arg2, %arg1 : i32, i32
  }
  func.func @transform_2(%arg0: i32, %arg1: i32, %arg2: i32) -> (i32, i32) {
    %c0_i32 = arith.constant 0 : i32
    %c0_i32_0 = arith.constant 0 : i32
    return %c0_i32, %arg1 : i32, i32
  }
  func.func @transform_3(%arg0: i32, %arg1: i32, %arg2: i32) -> (i32, i32) {
    %c0_i32 = arith.constant 0 : i32
    return %arg0, %arg1 : i32, i32
  }
}

module attributes {stable_mosaic.version = 11 : i64} {
  func.func @_matmul_bias_kernel(%arg0: i32, %arg1: i32, %arg2: i32, %arg3: memref<8x256xbf16, #tpu.memory_space<vmem>>, %arg4: memref<256x256xbf16, #tpu.memory_space<vmem>>, %arg5: memref<1x256xf32, #tpu.memory_space<vmem>>, %arg6: memref<8x256xf32, #tpu.memory_space<vmem>>) attributes {dimension_semantics = [#tpu.dimension_semantics<parallel>, #tpu.dimension_semantics<parallel>, #tpu.dimension_semantics<arbitrary>], iteration_bounds = array<i64: 1, 1, 1>, scalar_prefetch = 0 : i64, scratch_operands = 0 : i64, tpu.core_type = #tpu.core_type<tc>, window_params = [{transform_indices = @transform_0, window_bounds = array<i64: 8, 256>}, {transform_indices = @transform_1, window_bounds = array<i64: 256, 256>}, {transform_indices = @transform_2, window_bounds = array<i64: 1, 256>}, {transform_indices = @transform_3, window_bounds = array<i64: 8, 256>}]} {
    %c0_i32 = arith.constant 0 : i32
    %0 = arith.cmpi eq, %arg2, %c0_i32 : i32
    %1 = arith.extui %0 : i1 to i32
    %c0_i32_0 = arith.constant 0 : i32
    %2 = arith.cmpi ne, %1, %c0_i32_0 : i32
    scf.if %2 {
      %c0_8 = arith.constant 0 : index
      %c0_9 = arith.constant 0 : index
      %9 = vector.load %arg5[%c0_8, %c0_9] : memref<1x256xf32, #tpu.memory_space<vmem>>, vector<1x256xf32>
      %10 = vector.shape_cast %9 : vector<1x256xf32> to vector<1x256xf32>
      %11 = vector.broadcast %10 : vector<1x256xf32> to vector<8x256xf32>
      %c0_10 = arith.constant 0 : index
      %c0_11 = arith.constant 0 : index
      %12 = vector.load %arg6[%c0_10, %c0_11] : memref<8x256xf32, #tpu.memory_space<vmem>>, vector<8x256xf32>
      tpu.vector_store %arg6[%c0_10, %c0_11], %11 {strides = array<i32>} : memref<8x256xf32, #tpu.memory_space<vmem>>, vector<8x256xf32>,
    } else {
    }
    %c0 = arith.constant 0 : index
    %c0_1 = arith.constant 0 : index
    %3 = vector.load %arg6[%c0, %c0_1] : memref<8x256xf32, #tpu.memory_space<vmem>>, vector<8x256xf32>
    %c0_2 = arith.constant 0 : index
    %c0_3 = arith.constant 0 : index
    %4 = vector.load %arg3[%c0_2, %c0_3] : memref<8x256xbf16, #tpu.memory_space<vmem>>, vector<8x256xbf16>
    %c0_4 = arith.constant 0 : index
    %c0_5 = arith.constant 0 : index
    %5 = vector.load %arg4[%c0_4, %c0_5] : memref<256x256xbf16, #tpu.memory_space<vmem>>, vector<256x256xbf16>
    %cst = arith.constant dense<0.000000e+00> : vector<8x256xf32>
    %6 = tpu.matmul %4, %5, %cst {dimension_numbers = #tpu.dot_dimension_numbers<[1], [0], [0], [1], [0, 0, 1, 1], [], []>} : vector<8x256xbf16>, vector<256x256xbf16>, vector<8x256xf32> -> vector<8x256xf32>
    %7 = arith.addf %3, %6 : vector<8x256xf32>
    %c0_6 = arith.constant 0 : index
    %c0_7 = arith.constant 0 : index
    %8 = vector.load %arg6[%c0_6, %c0_7] : memref<8x256xf32, #tpu.memory_space<vmem>>, vector<8x256xf32>
    tpu.vector_store %arg6[%c0_6, %c0_7], %7 {strides = array<i32>} : memref<8x256xf32, #tpu.memory_space<vmem>>, vector<8x256xf32>,
    return
  }
  func.func @transform_0(%arg0: i32, %arg1: i32, %arg2: i32) -> (i32, i32) {
    %c0_i32 = arith.constant 0 : i32
    return %arg0, %arg2 : i32, i32
  }
  func.func @transform_1(%arg0: i32, %arg1: i32, %arg2: i32) -> (i32, i32) {
    %c0_i32 = arith.constant 0 : i32
    return %arg2, %arg1 : i32, i32
  }
  func.func @transform_2(%arg0: i32, %arg1: i32, %arg2: i32) -> (i32, i32) {
    %c0_i32 = arith.constant 0 : i32
    %c0_i32_0 = arith.constant 0 : i32
    return %c0_i32, %arg1 : i32, i32
  }
  func.func @transform_3(%arg0: i32, %arg1: i32, %arg2: i32) -> (i32, i32) {
    %c0_i32 = arith.constant 0 : i32
    return %arg0, %arg1 : i32, i32
  }
}

module attributes {stable_mosaic.version = 11 : i64} {
  func.func @_bn_act_kernel(%arg0: i32, %arg1: memref<8x256xf32, #tpu.memory_space<vmem>>, %arg2: memref<1x256xf32, #tpu.memory_space<vmem>>, %arg3: memref<1x256xf32, #tpu.memory_space<vmem>>, %arg4: memref<8x256xf32, #tpu.memory_space<vmem>>) attributes {dimension_semantics = [#tpu.dimension_semantics<parallel>], iteration_bounds = array<i64: 1>, scalar_prefetch = 0 : i64, scratch_operands = 0 : i64, tpu.core_type = #tpu.core_type<tc>, window_params = [{transform_indices = @transform_0, window_bounds = array<i64: 8, 256>}, {pipeline_mode = #tpu.pipeline_mode<synchronous>, transform_indices = @transform_1, window_bounds = array<i64: 1, 256>}, {pipeline_mode = #tpu.pipeline_mode<synchronous>, transform_indices = @transform_2, window_bounds = array<i64: 1, 256>}, {transform_indices = @transform_3, window_bounds = array<i64: 8, 256>}]} {
    %c0 = arith.constant 0 : index
    %c0_0 = arith.constant 0 : index
    %0 = vector.load %arg1[%c0, %c0_0] : memref<8x256xf32, #tpu.memory_space<vmem>>, vector<8x256xf32>
    %c0_1 = arith.constant 0 : index
    %c0_2 = arith.constant 0 : index
    %1 = vector.load %arg2[%c0_1, %c0_2] : memref<1x256xf32, #tpu.memory_space<vmem>>, vector<1x256xf32>
    %2 = vector.broadcast %1 : vector<1x256xf32> to vector<8x256xf32>
    %3 = arith.mulf %0, %2 : vector<8x256xf32>
    %c0_3 = arith.constant 0 : index
    %c0_4 = arith.constant 0 : index
    %4 = vector.load %arg3[%c0_3, %c0_4] : memref<1x256xf32, #tpu.memory_space<vmem>>, vector<1x256xf32>
    %5 = vector.broadcast %4 : vector<1x256xf32> to vector<8x256xf32>
    %6 = arith.addf %3, %5 : vector<8x256xf32>
    %c0_5 = arith.constant 0 : index
    %c0_6 = arith.constant 0 : index
    %7 = vector.load %arg4[%c0_5, %c0_6] : memref<8x256xf32, #tpu.memory_space<vmem>>, vector<8x256xf32>
    tpu.vector_store %arg4[%c0_5, %c0_6], %6 {strides = array<i32>} : memref<8x256xf32, #tpu.memory_space<vmem>>, vector<8x256xf32>,
    return
  }
  func.func @transform_0(%arg0: i32) -> (i32, i32) {
    %c0_i32 = arith.constant 0 : i32
    %c0_i32_0 = arith.constant 0 : i32
    return %arg0, %c0_i32 : i32, i32
  }
  func.func @transform_1(%arg0: i32) -> (i32, i32) {
    %c0_i32 = arith.constant 0 : i32
    %c0_i32_0 = arith.constant 0 : i32
    %c0_i32_1 = arith.constant 0 : i32
    return %c0_i32, %c0_i32_0 : i32, i32
  }
  func.func @transform_2(%arg0: i32) -> (i32, i32) {
    %c0_i32 = arith.constant 0 : i32
    %c0_i32_0 = arith.constant 0 : i32
    %c0_i32_1 = arith.constant 0 : i32
    return %c0_i32, %c0_i32_0 : i32, i32
  }
  func.func @transform_3(%arg0: i32) -> (i32, i32) {
    %c0_i32 = arith.constant 0 : i32
    %c0_i32_0 = arith.constant 0 : i32
    return %arg0, %c0_i32 : i32, i32
  }
}

module attributes {stable_mosaic.version = 11 : i64} {
  func.func @_bn_act_kernel(%arg0: i32, %arg1: memref<8x256xf32, #tpu.memory_space<vmem>>, %arg2: memref<1x256xf32, #tpu.memory_space<vmem>>, %arg3: memref<1x256xf32, #tpu.memory_space<vmem>>, %arg4: memref<8x256xf32, #tpu.memory_space<vmem>>) attributes {dimension_semantics = [#tpu.dimension_semantics<parallel>], iteration_bounds = array<i64: 1>, scalar_prefetch = 0 : i64, scratch_operands = 0 : i64, tpu.core_type = #tpu.core_type<tc>, window_params = [{transform_indices = @transform_0, window_bounds = array<i64: 8, 256>}, {pipeline_mode = #tpu.pipeline_mode<synchronous>, transform_indices = @transform_1, window_bounds = array<i64: 1, 256>}, {pipeline_mode = #tpu.pipeline_mode<synchronous>, transform_indices = @transform_2, window_bounds = array<i64: 1, 256>}, {transform_indices = @transform_3, window_bounds = array<i64: 8, 256>}]} {
    %c0 = arith.constant 0 : index
    %c0_0 = arith.constant 0 : index
    %0 = vector.load %arg1[%c0, %c0_0] : memref<8x256xf32, #tpu.memory_space<vmem>>, vector<8x256xf32>
    %c0_1 = arith.constant 0 : index
    %c0_2 = arith.constant 0 : index
    %1 = vector.load %arg2[%c0_1, %c0_2] : memref<1x256xf32, #tpu.memory_space<vmem>>, vector<1x256xf32>
    %2 = vector.broadcast %1 : vector<1x256xf32> to vector<8x256xf32>
    %3 = arith.mulf %0, %2 : vector<8x256xf32>
    %c0_3 = arith.constant 0 : index
    %c0_4 = arith.constant 0 : index
    %4 = vector.load %arg3[%c0_3, %c0_4] : memref<1x256xf32, #tpu.memory_space<vmem>>, vector<1x256xf32>
    %5 = vector.broadcast %4 : vector<1x256xf32> to vector<8x256xf32>
    %6 = arith.addf %3, %5 : vector<8x256xf32>
    %cst = arith.constant 0.000000e+00 : f32
    %7 = vector.broadcast %cst : f32 to vector<8x256xf32>
    %8 = arith.maximumf %6, %7 : vector<8x256xf32>
    %c0_5 = arith.constant 0 : index
    %c0_6 = arith.constant 0 : index
    %9 = vector.load %arg4[%c0_5, %c0_6] : memref<8x256xf32, #tpu.memory_space<vmem>>, vector<8x256xf32>
    tpu.vector_store %arg4[%c0_5, %c0_6], %8 {strides = array<i32>} : memref<8x256xf32, #tpu.memory_space<vmem>>, vector<8x256xf32>,
    return
  }
  func.func @transform_0(%arg0: i32) -> (i32, i32) {
    %c0_i32 = arith.constant 0 : i32
    %c0_i32_0 = arith.constant 0 : i32
    return %arg0, %c0_i32 : i32, i32
  }
  func.func @transform_1(%arg0: i32) -> (i32, i32) {
    %c0_i32 = arith.constant 0 : i32
    %c0_i32_0 = arith.constant 0 : i32
    %c0_i32_1 = arith.constant 0 : i32
    return %c0_i32, %c0_i32_0 : i32, i32
  }
  func.func @transform_2(%arg0: i32) -> (i32, i32) {
    %c0_i32 = arith.constant 0 : i32
    %c0_i32_0 = arith.constant 0 : i32
    %c0_i32_1 = arith.constant 0 : i32
    return %c0_i32, %c0_i32_0 : i32, i32
  }
  func.func @transform_3(%arg0: i32) -> (i32, i32) {
    %c0_i32 = arith.constant 0 : i32
    %c0_i32_0 = arith.constant 0 : i32
    return %arg0, %c0_i32 : i32, i32
  }
}

module attributes {stable_mosaic.version = 11 : i64} {
  func.func @_matmul_bias_kernel(%arg0: i32, %arg1: i32, %arg2: i32, %arg3: memref<8x256xbf16, #tpu.memory_space<vmem>>, %arg4: memref<256x256xbf16, #tpu.memory_space<vmem>>, %arg5: memref<1x256xf32, #tpu.memory_space<vmem>>, %arg6: memref<8x256xf32, #tpu.memory_space<vmem>>) attributes {dimension_semantics = [#tpu.dimension_semantics<parallel>, #tpu.dimension_semantics<parallel>, #tpu.dimension_semantics<arbitrary>], iteration_bounds = array<i64: 1, 1, 5>, scalar_prefetch = 0 : i64, scratch_operands = 0 : i64, tpu.core_type = #tpu.core_type<tc>, window_params = [{transform_indices = @transform_0, window_bounds = array<i64: 8, 256>}, {transform_indices = @transform_1, window_bounds = array<i64: 256, 256>}, {transform_indices = @transform_2, window_bounds = array<i64: 1, 256>}, {transform_indices = @transform_3, window_bounds = array<i64: 8, 256>}]} {
    %c0_i32 = arith.constant 0 : i32
    %0 = arith.cmpi eq, %arg2, %c0_i32 : i32
    %1 = arith.extui %0 : i1 to i32
    %c0_i32_0 = arith.constant 0 : i32
    %2 = arith.cmpi ne, %1, %c0_i32_0 : i32
    scf.if %2 {
      %c0_8 = arith.constant 0 : index
      %c0_9 = arith.constant 0 : index
      %9 = vector.load %arg5[%c0_8, %c0_9] : memref<1x256xf32, #tpu.memory_space<vmem>>, vector<1x256xf32>
      %10 = vector.shape_cast %9 : vector<1x256xf32> to vector<1x256xf32>
      %11 = vector.broadcast %10 : vector<1x256xf32> to vector<8x256xf32>
      %c0_10 = arith.constant 0 : index
      %c0_11 = arith.constant 0 : index
      %12 = vector.load %arg6[%c0_10, %c0_11] : memref<8x256xf32, #tpu.memory_space<vmem>>, vector<8x256xf32>
      tpu.vector_store %arg6[%c0_10, %c0_11], %11 {strides = array<i32>} : memref<8x256xf32, #tpu.memory_space<vmem>>, vector<8x256xf32>,
    } else {
    }
    %c0 = arith.constant 0 : index
    %c0_1 = arith.constant 0 : index
    %3 = vector.load %arg6[%c0, %c0_1] : memref<8x256xf32, #tpu.memory_space<vmem>>, vector<8x256xf32>
    %c0_2 = arith.constant 0 : index
    %c0_3 = arith.constant 0 : index
    %4 = vector.load %arg3[%c0_2, %c0_3] : memref<8x256xbf16, #tpu.memory_space<vmem>>, vector<8x256xbf16>
    %c0_4 = arith.constant 0 : index
    %c0_5 = arith.constant 0 : index
    %5 = vector.load %arg4[%c0_4, %c0_5] : memref<256x256xbf16, #tpu.memory_space<vmem>>, vector<256x256xbf16>
    %cst = arith.constant dense<0.000000e+00> : vector<8x256xf32>
    %6 = tpu.matmul %4, %5, %cst {dimension_numbers = #tpu.dot_dimension_numbers<[1], [0], [0], [1], [0, 0, 1, 1], [], []>} : vector<8x256xbf16>, vector<256x256xbf16>, vector<8x256xf32> -> vector<8x256xf32>
    %7 = arith.addf %3, %6 : vector<8x256xf32>
    %c0_6 = arith.constant 0 : index
    %c0_7 = arith.constant 0 : index
    %8 = vector.load %arg6[%c0_6, %c0_7] : memref<8x256xf32, #tpu.memory_space<vmem>>, vector<8x256xf32>
    tpu.vector_store %arg6[%c0_6, %c0_7], %7 {strides = array<i32>} : memref<8x256xf32, #tpu.memory_space<vmem>>, vector<8x256xf32>,
    return
  }
  func.func @transform_0(%arg0: i32, %arg1: i32, %arg2: i32) -> (i32, i32) {
    %c0_i32 = arith.constant 0 : i32
    return %arg0, %arg2 : i32, i32
  }
  func.func @transform_1(%arg0: i32, %arg1: i32, %arg2: i32) -> (i32, i32) {
    %c0_i32 = arith.constant 0 : i32
    return %arg2, %arg1 : i32, i32
  }
  func.func @transform_2(%arg0: i32, %arg1: i32, %arg2: i32) -> (i32, i32) {
    %c0_i32 = arith.constant 0 : i32
    %c0_i32_0 = arith.constant 0 : i32
    return %c0_i32, %arg1 : i32, i32
  }
  func.func @transform_3(%arg0: i32, %arg1: i32, %arg2: i32) -> (i32, i32) {
    %c0_i32 = arith.constant 0 : i32
    return %arg0, %arg1 : i32, i32
  }
}

module attributes {stable_mosaic.version = 11 : i64} {
  func.func @_bn_act_res_kernel(%arg0: i32, %arg1: memref<8x256xf32, #tpu.memory_space<vmem>>, %arg2: memref<1x256xf32, #tpu.memory_space<vmem>>, %arg3: memref<1x256xf32, #tpu.memory_space<vmem>>, %arg4: memref<8x256xf32, #tpu.memory_space<vmem>>, %arg5: memref<8x256xf32, #tpu.memory_space<vmem>>) attributes {dimension_semantics = [#tpu.dimension_semantics<parallel>], iteration_bounds = array<i64: 1>, scalar_prefetch = 0 : i64, scratch_operands = 0 : i64, tpu.core_type = #tpu.core_type<tc>, window_params = [{transform_indices = @transform_0, window_bounds = array<i64: 8, 256>}, {pipeline_mode = #tpu.pipeline_mode<synchronous>, transform_indices = @transform_1, window_bounds = array<i64: 1, 256>}, {pipeline_mode = #tpu.pipeline_mode<synchronous>, transform_indices = @transform_2, window_bounds = array<i64: 1, 256>}, {transform_indices = @transform_3, window_bounds = array<i64: 8, 256>}, {transform_indices = @transform_4, window_bounds = array<i64: 8, 256>}]} {
    %c0 = arith.constant 0 : index
    %c0_0 = arith.constant 0 : index
    %0 = vector.load %arg1[%c0, %c0_0] : memref<8x256xf32, #tpu.memory_space<vmem>>, vector<8x256xf32>
    %c0_1 = arith.constant 0 : index
    %c0_2 = arith.constant 0 : index
    %1 = vector.load %arg2[%c0_1, %c0_2] : memref<1x256xf32, #tpu.memory_space<vmem>>, vector<1x256xf32>
    %2 = vector.broadcast %1 : vector<1x256xf32> to vector<8x256xf32>
    %3 = arith.mulf %0, %2 : vector<8x256xf32>
    %c0_3 = arith.constant 0 : index
    %c0_4 = arith.constant 0 : index
    %4 = vector.load %arg3[%c0_3, %c0_4] : memref<1x256xf32, #tpu.memory_space<vmem>>, vector<1x256xf32>
    %5 = vector.broadcast %4 : vector<1x256xf32> to vector<8x256xf32>
    %6 = arith.addf %3, %5 : vector<8x256xf32>
    %c0_5 = arith.constant 0 : index
    %c0_6 = arith.constant 0 : index
    %7 = vector.load %arg4[%c0_5, %c0_6] : memref<8x256xf32, #tpu.memory_space<vmem>>, vector<8x256xf32>
    %8 = arith.addf %6, %7 : vector<8x256xf32>
    %cst = arith.constant 0.000000e+00 : f32
    %9 = vector.broadcast %cst : f32 to vector<8x256xf32>
    %10 = arith.maximumf %8, %9 : vector<8x256xf32>
    %c0_7 = arith.constant 0 : index
    %c0_8 = arith.constant 0 : index
    %11 = vector.load %arg5[%c0_7, %c0_8] : memref<8x256xf32, #tpu.memory_space<vmem>>, vector<8x256xf32>
    tpu.vector_store %arg5[%c0_7, %c0_8], %10 {strides = array<i32>} : memref<8x256xf32, #tpu.memory_space<vmem>>, vector<8x256xf32>,
    return
  }
  func.func @transform_0(%arg0: i32) -> (i32, i32) {
    %c0_i32 = arith.constant 0 : i32
    %c0_i32_0 = arith.constant 0 : i32
    return %arg0, %c0_i32 : i32, i32
  }
  func.func @transform_1(%arg0: i32) -> (i32, i32) {
    %c0_i32 = arith.constant 0 : i32
    %c0_i32_0 = arith.constant 0 : i32
    %c0_i32_1 = arith.constant 0 : i32
    return %c0_i32, %c0_i32_0 : i32, i32
  }
  func.func @transform_2(%arg0: i32) -> (i32, i32) {
    %c0_i32 = arith.constant 0 : i32
    %c0_i32_0 = arith.constant 0 : i32
    %c0_i32_1 = arith.constant 0 : i32
    return %c0_i32, %c0_i32_0 : i32, i32
  }
  func.func @transform_3(%arg0: i32) -> (i32, i32) {
    %c0_i32 = arith.constant 0 : i32
    %c0_i32_0 = arith.constant 0 : i32
    return %arg0, %c0_i32 : i32, i32
  }
  func.func @transform_4(%arg0: i32) -> (i32, i32) {
    %c0_i32 = arith.constant 0 : i32
    %c0_i32_0 = arith.constant 0 : i32
    return %arg0, %c0_i32 : i32, i32
  }
}

module attributes {stable_mosaic.version = 11 : i64} {
  func.func @_matmul_bias_kernel(%arg0: i32, %arg1: i32, %arg2: i32, %arg3: memref<8x256xbf16, #tpu.memory_space<vmem>>, %arg4: memref<256x256xbf16, #tpu.memory_space<vmem>>, %arg5: memref<1x256xf32, #tpu.memory_space<vmem>>, %arg6: memref<8x256xf32, #tpu.memory_space<vmem>>) attributes {dimension_semantics = [#tpu.dimension_semantics<parallel>, #tpu.dimension_semantics<parallel>, #tpu.dimension_semantics<arbitrary>], iteration_bounds = array<i64: 1, 1, 9>, scalar_prefetch = 0 : i64, scratch_operands = 0 : i64, tpu.core_type = #tpu.core_type<tc>, window_params = [{transform_indices = @transform_0, window_bounds = array<i64: 8, 256>}, {transform_indices = @transform_1, window_bounds = array<i64: 256, 256>}, {transform_indices = @transform_2, window_bounds = array<i64: 1, 256>}, {transform_indices = @transform_3, window_bounds = array<i64: 8, 256>}]} {
    %c0_i32 = arith.constant 0 : i32
    %0 = arith.cmpi eq, %arg2, %c0_i32 : i32
    %1 = arith.extui %0 : i1 to i32
    %c0_i32_0 = arith.constant 0 : i32
    %2 = arith.cmpi ne, %1, %c0_i32_0 : i32
    scf.if %2 {
      %c0_8 = arith.constant 0 : index
      %c0_9 = arith.constant 0 : index
      %9 = vector.load %arg5[%c0_8, %c0_9] : memref<1x256xf32, #tpu.memory_space<vmem>>, vector<1x256xf32>
      %10 = vector.shape_cast %9 : vector<1x256xf32> to vector<1x256xf32>
      %11 = vector.broadcast %10 : vector<1x256xf32> to vector<8x256xf32>
      %c0_10 = arith.constant 0 : index
      %c0_11 = arith.constant 0 : index
      %12 = vector.load %arg6[%c0_10, %c0_11] : memref<8x256xf32, #tpu.memory_space<vmem>>, vector<8x256xf32>
      tpu.vector_store %arg6[%c0_10, %c0_11], %11 {strides = array<i32>} : memref<8x256xf32, #tpu.memory_space<vmem>>, vector<8x256xf32>,
    } else {
    }
    %c0 = arith.constant 0 : index
    %c0_1 = arith.constant 0 : index
    %3 = vector.load %arg6[%c0, %c0_1] : memref<8x256xf32, #tpu.memory_space<vmem>>, vector<8x256xf32>
    %c0_2 = arith.constant 0 : index
    %c0_3 = arith.constant 0 : index
    %4 = vector.load %arg3[%c0_2, %c0_3] : memref<8x256xbf16, #tpu.memory_space<vmem>>, vector<8x256xbf16>
    %c0_4 = arith.constant 0 : index
    %c0_5 = arith.constant 0 : index
    %5 = vector.load %arg4[%c0_4, %c0_5] : memref<256x256xbf16, #tpu.memory_space<vmem>>, vector<256x256xbf16>
    %cst = arith.constant dense<0.000000e+00> : vector<8x256xf32>
    %6 = tpu.matmul %4, %5, %cst {dimension_numbers = #tpu.dot_dimension_numbers<[1], [0], [0], [1], [0, 0, 1, 1], [], []>} : vector<8x256xbf16>, vector<256x256xbf16>, vector<8x256xf32> -> vector<8x256xf32>
    %7 = arith.addf %3, %6 : vector<8x256xf32>
    %c0_6 = arith.constant 0 : index
    %c0_7 = arith.constant 0 : index
    %8 = vector.load %arg6[%c0_6, %c0_7] : memref<8x256xf32, #tpu.memory_space<vmem>>, vector<8x256xf32>
    tpu.vector_store %arg6[%c0_6, %c0_7], %7 {strides = array<i32>} : memref<8x256xf32, #tpu.memory_space<vmem>>, vector<8x256xf32>,
    return
  }
  func.func @transform_0(%arg0: i32, %arg1: i32, %arg2: i32) -> (i32, i32) {
    %c0_i32 = arith.constant 0 : i32
    return %arg0, %arg2 : i32, i32
  }
  func.func @transform_1(%arg0: i32, %arg1: i32, %arg2: i32) -> (i32, i32) {
    %c0_i32 = arith.constant 0 : i32
    return %arg2, %arg1 : i32, i32
  }
  func.func @transform_2(%arg0: i32, %arg1: i32, %arg2: i32) -> (i32, i32) {
    %c0_i32 = arith.constant 0 : i32
    %c0_i32_0 = arith.constant 0 : i32
    return %c0_i32, %arg1 : i32, i32
  }
  func.func @transform_3(%arg0: i32, %arg1: i32, %arg2: i32) -> (i32, i32) {
    %c0_i32 = arith.constant 0 : i32
    return %arg0, %arg1 : i32, i32
  }
}

module attributes {stable_mosaic.version = 11 : i64} {
  func.func @_matmul_bias_kernel(%arg0: i32, %arg1: i32, %arg2: i32, %arg3: memref<8x256xbf16, #tpu.memory_space<vmem>>, %arg4: memref<256x256xbf16, #tpu.memory_space<vmem>>, %arg5: memref<1x256xf32, #tpu.memory_space<vmem>>, %arg6: memref<8x256xf32, #tpu.memory_space<vmem>>) attributes {dimension_semantics = [#tpu.dimension_semantics<parallel>, #tpu.dimension_semantics<parallel>, #tpu.dimension_semantics<arbitrary>], iteration_bounds = array<i64: 1, 2, 9>, scalar_prefetch = 0 : i64, scratch_operands = 0 : i64, tpu.core_type = #tpu.core_type<tc>, window_params = [{transform_indices = @transform_0, window_bounds = array<i64: 8, 256>}, {transform_indices = @transform_1, window_bounds = array<i64: 256, 256>}, {transform_indices = @transform_2, window_bounds = array<i64: 1, 256>}, {transform_indices = @transform_3, window_bounds = array<i64: 8, 256>}]} {
    %c0_i32 = arith.constant 0 : i32
    %0 = arith.cmpi eq, %arg2, %c0_i32 : i32
    %1 = arith.extui %0 : i1 to i32
    %c0_i32_0 = arith.constant 0 : i32
    %2 = arith.cmpi ne, %1, %c0_i32_0 : i32
    scf.if %2 {
      %c0_8 = arith.constant 0 : index
      %c0_9 = arith.constant 0 : index
      %9 = vector.load %arg5[%c0_8, %c0_9] : memref<1x256xf32, #tpu.memory_space<vmem>>, vector<1x256xf32>
      %10 = vector.shape_cast %9 : vector<1x256xf32> to vector<1x256xf32>
      %11 = vector.broadcast %10 : vector<1x256xf32> to vector<8x256xf32>
      %c0_10 = arith.constant 0 : index
      %c0_11 = arith.constant 0 : index
      %12 = vector.load %arg6[%c0_10, %c0_11] : memref<8x256xf32, #tpu.memory_space<vmem>>, vector<8x256xf32>
      tpu.vector_store %arg6[%c0_10, %c0_11], %11 {strides = array<i32>} : memref<8x256xf32, #tpu.memory_space<vmem>>, vector<8x256xf32>,
    } else {
    }
    %c0 = arith.constant 0 : index
    %c0_1 = arith.constant 0 : index
    %3 = vector.load %arg6[%c0, %c0_1] : memref<8x256xf32, #tpu.memory_space<vmem>>, vector<8x256xf32>
    %c0_2 = arith.constant 0 : index
    %c0_3 = arith.constant 0 : index
    %4 = vector.load %arg3[%c0_2, %c0_3] : memref<8x256xbf16, #tpu.memory_space<vmem>>, vector<8x256xbf16>
    %c0_4 = arith.constant 0 : index
    %c0_5 = arith.constant 0 : index
    %5 = vector.load %arg4[%c0_4, %c0_5] : memref<256x256xbf16, #tpu.memory_space<vmem>>, vector<256x256xbf16>
    %cst = arith.constant dense<0.000000e+00> : vector<8x256xf32>
    %6 = tpu.matmul %4, %5, %cst {dimension_numbers = #tpu.dot_dimension_numbers<[1], [0], [0], [1], [0, 0, 1, 1], [], []>} : vector<8x256xbf16>, vector<256x256xbf16>, vector<8x256xf32> -> vector<8x256xf32>
    %7 = arith.addf %3, %6 : vector<8x256xf32>
    %c0_6 = arith.constant 0 : index
    %c0_7 = arith.constant 0 : index
    %8 = vector.load %arg6[%c0_6, %c0_7] : memref<8x256xf32, #tpu.memory_space<vmem>>, vector<8x256xf32>
    tpu.vector_store %arg6[%c0_6, %c0_7], %7 {strides = array<i32>} : memref<8x256xf32, #tpu.memory_space<vmem>>, vector<8x256xf32>,
    return
  }
  func.func @transform_0(%arg0: i32, %arg1: i32, %arg2: i32) -> (i32, i32) {
    %c0_i32 = arith.constant 0 : i32
    return %arg0, %arg2 : i32, i32
  }
  func.func @transform_1(%arg0: i32, %arg1: i32, %arg2: i32) -> (i32, i32) {
    %c0_i32 = arith.constant 0 : i32
    return %arg2, %arg1 : i32, i32
  }
  func.func @transform_2(%arg0: i32, %arg1: i32, %arg2: i32) -> (i32, i32) {
    %c0_i32 = arith.constant 0 : i32
    %c0_i32_0 = arith.constant 0 : i32
    return %c0_i32, %arg1 : i32, i32
  }
  func.func @transform_3(%arg0: i32, %arg1: i32, %arg2: i32) -> (i32, i32) {
    %c0_i32 = arith.constant 0 : i32
    return %arg0, %arg1 : i32, i32
  }
}

module attributes {stable_mosaic.version = 11 : i64} {
  func.func @_bn_act_kernel(%arg0: i32, %arg1: memref<2x512xf32, #tpu.memory_space<vmem>>, %arg2: memref<1x512xf32, #tpu.memory_space<vmem>>, %arg3: memref<1x512xf32, #tpu.memory_space<vmem>>, %arg4: memref<2x512xf32, #tpu.memory_space<vmem>>) attributes {dimension_semantics = [#tpu.dimension_semantics<parallel>], iteration_bounds = array<i64: 1>, scalar_prefetch = 0 : i64, scratch_operands = 0 : i64, tpu.core_type = #tpu.core_type<tc>, window_params = [{transform_indices = @transform_0, window_bounds = array<i64: 2, 512>}, {pipeline_mode = #tpu.pipeline_mode<synchronous>, transform_indices = @transform_1, window_bounds = array<i64: 1, 512>}, {pipeline_mode = #tpu.pipeline_mode<synchronous>, transform_indices = @transform_2, window_bounds = array<i64: 1, 512>}, {transform_indices = @transform_3, window_bounds = array<i64: 2, 512>}]} {
    %c0 = arith.constant 0 : index
    %c0_0 = arith.constant 0 : index
    %0 = vector.load %arg1[%c0, %c0_0] : memref<2x512xf32, #tpu.memory_space<vmem>>, vector<2x512xf32>
    %c0_1 = arith.constant 0 : index
    %c0_2 = arith.constant 0 : index
    %1 = vector.load %arg2[%c0_1, %c0_2] : memref<1x512xf32, #tpu.memory_space<vmem>>, vector<1x512xf32>
    %2 = vector.broadcast %1 : vector<1x512xf32> to vector<2x512xf32>
    %3 = arith.mulf %0, %2 : vector<2x512xf32>
    %c0_3 = arith.constant 0 : index
    %c0_4 = arith.constant 0 : index
    %4 = vector.load %arg3[%c0_3, %c0_4] : memref<1x512xf32, #tpu.memory_space<vmem>>, vector<1x512xf32>
    %5 = vector.broadcast %4 : vector<1x512xf32> to vector<2x512xf32>
    %6 = arith.addf %3, %5 : vector<2x512xf32>
    %cst = arith.constant 0.000000e+00 : f32
    %7 = vector.broadcast %cst : f32 to vector<2x512xf32>
    %8 = arith.maximumf %6, %7 : vector<2x512xf32>
    %c0_5 = arith.constant 0 : index
    %c0_6 = arith.constant 0 : index
    %9 = vector.load %arg4[%c0_5, %c0_6] : memref<2x512xf32, #tpu.memory_space<vmem>>, vector<2x512xf32>
    tpu.vector_store %arg4[%c0_5, %c0_6], %8 {strides = array<i32>} : memref<2x512xf32, #tpu.memory_space<vmem>>, vector<2x512xf32>,
    return
  }
  func.func @transform_0(%arg0: i32) -> (i32, i32) {
    %c0_i32 = arith.constant 0 : i32
    %c0_i32_0 = arith.constant 0 : i32
    return %arg0, %c0_i32 : i32, i32
  }
  func.func @transform_1(%arg0: i32) -> (i32, i32) {
    %c0_i32 = arith.constant 0 : i32
    %c0_i32_0 = arith.constant 0 : i32
    %c0_i32_1 = arith.constant 0 : i32
    return %c0_i32, %c0_i32_0 : i32, i32
  }
  func.func @transform_2(%arg0: i32) -> (i32, i32) {
    %c0_i32 = arith.constant 0 : i32
    %c0_i32_0 = arith.constant 0 : i32
    %c0_i32_1 = arith.constant 0 : i32
    return %c0_i32, %c0_i32_0 : i32, i32
  }
  func.func @transform_3(%arg0: i32) -> (i32, i32) {
    %c0_i32 = arith.constant 0 : i32
    %c0_i32_0 = arith.constant 0 : i32
    return %arg0, %c0_i32 : i32, i32
  }
}

module attributes {stable_mosaic.version = 11 : i64} {
  func.func @_matmul_bias_kernel(%arg0: i32, %arg1: i32, %arg2: i32, %arg3: memref<8x256xbf16, #tpu.memory_space<vmem>>, %arg4: memref<256x256xbf16, #tpu.memory_space<vmem>>, %arg5: memref<1x256xf32, #tpu.memory_space<vmem>>, %arg6: memref<8x256xf32, #tpu.memory_space<vmem>>) attributes {dimension_semantics = [#tpu.dimension_semantics<parallel>, #tpu.dimension_semantics<parallel>, #tpu.dimension_semantics<arbitrary>], iteration_bounds = array<i64: 1, 2, 18>, scalar_prefetch = 0 : i64, scratch_operands = 0 : i64, tpu.core_type = #tpu.core_type<tc>, window_params = [{transform_indices = @transform_0, window_bounds = array<i64: 8, 256>}, {transform_indices = @transform_1, window_bounds = array<i64: 256, 256>}, {transform_indices = @transform_2, window_bounds = array<i64: 1, 256>}, {transform_indices = @transform_3, window_bounds = array<i64: 8, 256>}]} {
    %c0_i32 = arith.constant 0 : i32
    %0 = arith.cmpi eq, %arg2, %c0_i32 : i32
    %1 = arith.extui %0 : i1 to i32
    %c0_i32_0 = arith.constant 0 : i32
    %2 = arith.cmpi ne, %1, %c0_i32_0 : i32
    scf.if %2 {
      %c0_8 = arith.constant 0 : index
      %c0_9 = arith.constant 0 : index
      %9 = vector.load %arg5[%c0_8, %c0_9] : memref<1x256xf32, #tpu.memory_space<vmem>>, vector<1x256xf32>
      %10 = vector.shape_cast %9 : vector<1x256xf32> to vector<1x256xf32>
      %11 = vector.broadcast %10 : vector<1x256xf32> to vector<8x256xf32>
      %c0_10 = arith.constant 0 : index
      %c0_11 = arith.constant 0 : index
      %12 = vector.load %arg6[%c0_10, %c0_11] : memref<8x256xf32, #tpu.memory_space<vmem>>, vector<8x256xf32>
      tpu.vector_store %arg6[%c0_10, %c0_11], %11 {strides = array<i32>} : memref<8x256xf32, #tpu.memory_space<vmem>>, vector<8x256xf32>,
    } else {
    }
    %c0 = arith.constant 0 : index
    %c0_1 = arith.constant 0 : index
    %3 = vector.load %arg6[%c0, %c0_1] : memref<8x256xf32, #tpu.memory_space<vmem>>, vector<8x256xf32>
    %c0_2 = arith.constant 0 : index
    %c0_3 = arith.constant 0 : index
    %4 = vector.load %arg3[%c0_2, %c0_3] : memref<8x256xbf16, #tpu.memory_space<vmem>>, vector<8x256xbf16>
    %c0_4 = arith.constant 0 : index
    %c0_5 = arith.constant 0 : index
    %5 = vector.load %arg4[%c0_4, %c0_5] : memref<256x256xbf16, #tpu.memory_space<vmem>>, vector<256x256xbf16>
    %cst = arith.constant dense<0.000000e+00> : vector<8x256xf32>
    %6 = tpu.matmul %4, %5, %cst {dimension_numbers = #tpu.dot_dimension_numbers<[1], [0], [0], [1], [0, 0, 1, 1], [], []>} : vector<8x256xbf16>, vector<256x256xbf16>, vector<8x256xf32> -> vector<8x256xf32>
    %7 = arith.addf %3, %6 : vector<8x256xf32>
    %c0_6 = arith.constant 0 : index
    %c0_7 = arith.constant 0 : index
    %8 = vector.load %arg6[%c0_6, %c0_7] : memref<8x256xf32, #tpu.memory_space<vmem>>, vector<8x256xf32>
    tpu.vector_store %arg6[%c0_6, %c0_7], %7 {strides = array<i32>} : memref<8x256xf32, #tpu.memory_space<vmem>>, vector<8x256xf32>,
    return
  }
  func.func @transform_0(%arg0: i32, %arg1: i32, %arg2: i32) -> (i32, i32) {
    %c0_i32 = arith.constant 0 : i32
    return %arg0, %arg2 : i32, i32
  }
  func.func @transform_1(%arg0: i32, %arg1: i32, %arg2: i32) -> (i32, i32) {
    %c0_i32 = arith.constant 0 : i32
    return %arg2, %arg1 : i32, i32
  }
  func.func @transform_2(%arg0: i32, %arg1: i32, %arg2: i32) -> (i32, i32) {
    %c0_i32 = arith.constant 0 : i32
    %c0_i32_0 = arith.constant 0 : i32
    return %c0_i32, %arg1 : i32, i32
  }
  func.func @transform_3(%arg0: i32, %arg1: i32, %arg2: i32) -> (i32, i32) {
    %c0_i32 = arith.constant 0 : i32
    return %arg0, %arg1 : i32, i32
  }
}

module attributes {stable_mosaic.version = 11 : i64} {
  func.func @_matmul_bias_kernel(%arg0: i32, %arg1: i32, %arg2: i32, %arg3: memref<8x256xbf16, #tpu.memory_space<vmem>>, %arg4: memref<256x256xbf16, #tpu.memory_space<vmem>>, %arg5: memref<1x256xf32, #tpu.memory_space<vmem>>, %arg6: memref<8x256xf32, #tpu.memory_space<vmem>>) attributes {dimension_semantics = [#tpu.dimension_semantics<parallel>, #tpu.dimension_semantics<parallel>, #tpu.dimension_semantics<arbitrary>], iteration_bounds = array<i64: 1, 2, 1>, scalar_prefetch = 0 : i64, scratch_operands = 0 : i64, tpu.core_type = #tpu.core_type<tc>, window_params = [{transform_indices = @transform_0, window_bounds = array<i64: 8, 256>}, {transform_indices = @transform_1, window_bounds = array<i64: 256, 256>}, {transform_indices = @transform_2, window_bounds = array<i64: 1, 256>}, {transform_indices = @transform_3, window_bounds = array<i64: 8, 256>}]} {
    %c0_i32 = arith.constant 0 : i32
    %0 = arith.cmpi eq, %arg2, %c0_i32 : i32
    %1 = arith.extui %0 : i1 to i32
    %c0_i32_0 = arith.constant 0 : i32
    %2 = arith.cmpi ne, %1, %c0_i32_0 : i32
    scf.if %2 {
      %c0_8 = arith.constant 0 : index
      %c0_9 = arith.constant 0 : index
      %9 = vector.load %arg5[%c0_8, %c0_9] : memref<1x256xf32, #tpu.memory_space<vmem>>, vector<1x256xf32>
      %10 = vector.shape_cast %9 : vector<1x256xf32> to vector<1x256xf32>
      %11 = vector.broadcast %10 : vector<1x256xf32> to vector<8x256xf32>
      %c0_10 = arith.constant 0 : index
      %c0_11 = arith.constant 0 : index
      %12 = vector.load %arg6[%c0_10, %c0_11] : memref<8x256xf32, #tpu.memory_space<vmem>>, vector<8x256xf32>
      tpu.vector_store %arg6[%c0_10, %c0_11], %11 {strides = array<i32>} : memref<8x256xf32, #tpu.memory_space<vmem>>, vector<8x256xf32>,
    } else {
    }
    %c0 = arith.constant 0 : index
    %c0_1 = arith.constant 0 : index
    %3 = vector.load %arg6[%c0, %c0_1] : memref<8x256xf32, #tpu.memory_space<vmem>>, vector<8x256xf32>
    %c0_2 = arith.constant 0 : index
    %c0_3 = arith.constant 0 : index
    %4 = vector.load %arg3[%c0_2, %c0_3] : memref<8x256xbf16, #tpu.memory_space<vmem>>, vector<8x256xbf16>
    %c0_4 = arith.constant 0 : index
    %c0_5 = arith.constant 0 : index
    %5 = vector.load %arg4[%c0_4, %c0_5] : memref<256x256xbf16, #tpu.memory_space<vmem>>, vector<256x256xbf16>
    %cst = arith.constant dense<0.000000e+00> : vector<8x256xf32>
    %6 = tpu.matmul %4, %5, %cst {dimension_numbers = #tpu.dot_dimension_numbers<[1], [0], [0], [1], [0, 0, 1, 1], [], []>} : vector<8x256xbf16>, vector<256x256xbf16>, vector<8x256xf32> -> vector<8x256xf32>
    %7 = arith.addf %3, %6 : vector<8x256xf32>
    %c0_6 = arith.constant 0 : index
    %c0_7 = arith.constant 0 : index
    %8 = vector.load %arg6[%c0_6, %c0_7] : memref<8x256xf32, #tpu.memory_space<vmem>>, vector<8x256xf32>
    tpu.vector_store %arg6[%c0_6, %c0_7], %7 {strides = array<i32>} : memref<8x256xf32, #tpu.memory_space<vmem>>, vector<8x256xf32>,
    return
  }
  func.func @transform_0(%arg0: i32, %arg1: i32, %arg2: i32) -> (i32, i32) {
    %c0_i32 = arith.constant 0 : i32
    return %arg0, %arg2 : i32, i32
  }
  func.func @transform_1(%arg0: i32, %arg1: i32, %arg2: i32) -> (i32, i32) {
    %c0_i32 = arith.constant 0 : i32
    return %arg2, %arg1 : i32, i32
  }
  func.func @transform_2(%arg0: i32, %arg1: i32, %arg2: i32) -> (i32, i32) {
    %c0_i32 = arith.constant 0 : i32
    %c0_i32_0 = arith.constant 0 : i32
    return %c0_i32, %arg1 : i32, i32
  }
  func.func @transform_3(%arg0: i32, %arg1: i32, %arg2: i32) -> (i32, i32) {
    %c0_i32 = arith.constant 0 : i32
    return %arg0, %arg1 : i32, i32
  }
}

module attributes {stable_mosaic.version = 11 : i64} {
  func.func @_bn_act_kernel(%arg0: i32, %arg1: memref<2x512xf32, #tpu.memory_space<vmem>>, %arg2: memref<1x512xf32, #tpu.memory_space<vmem>>, %arg3: memref<1x512xf32, #tpu.memory_space<vmem>>, %arg4: memref<2x512xf32, #tpu.memory_space<vmem>>) attributes {dimension_semantics = [#tpu.dimension_semantics<parallel>], iteration_bounds = array<i64: 1>, scalar_prefetch = 0 : i64, scratch_operands = 0 : i64, tpu.core_type = #tpu.core_type<tc>, window_params = [{transform_indices = @transform_0, window_bounds = array<i64: 2, 512>}, {pipeline_mode = #tpu.pipeline_mode<synchronous>, transform_indices = @transform_1, window_bounds = array<i64: 1, 512>}, {pipeline_mode = #tpu.pipeline_mode<synchronous>, transform_indices = @transform_2, window_bounds = array<i64: 1, 512>}, {transform_indices = @transform_3, window_bounds = array<i64: 2, 512>}]} {
    %c0 = arith.constant 0 : index
    %c0_0 = arith.constant 0 : index
    %0 = vector.load %arg1[%c0, %c0_0] : memref<2x512xf32, #tpu.memory_space<vmem>>, vector<2x512xf32>
    %c0_1 = arith.constant 0 : index
    %c0_2 = arith.constant 0 : index
    %1 = vector.load %arg2[%c0_1, %c0_2] : memref<1x512xf32, #tpu.memory_space<vmem>>, vector<1x512xf32>
    %2 = vector.broadcast %1 : vector<1x512xf32> to vector<2x512xf32>
    %3 = arith.mulf %0, %2 : vector<2x512xf32>
    %c0_3 = arith.constant 0 : index
    %c0_4 = arith.constant 0 : index
    %4 = vector.load %arg3[%c0_3, %c0_4] : memref<1x512xf32, #tpu.memory_space<vmem>>, vector<1x512xf32>
    %5 = vector.broadcast %4 : vector<1x512xf32> to vector<2x512xf32>
    %6 = arith.addf %3, %5 : vector<2x512xf32>
    %c0_5 = arith.constant 0 : index
    %c0_6 = arith.constant 0 : index
    %7 = vector.load %arg4[%c0_5, %c0_6] : memref<2x512xf32, #tpu.memory_space<vmem>>, vector<2x512xf32>
    tpu.vector_store %arg4[%c0_5, %c0_6], %6 {strides = array<i32>} : memref<2x512xf32, #tpu.memory_space<vmem>>, vector<2x512xf32>,
    return
  }
  func.func @transform_0(%arg0: i32) -> (i32, i32) {
    %c0_i32 = arith.constant 0 : i32
    %c0_i32_0 = arith.constant 0 : i32
    return %arg0, %c0_i32 : i32, i32
  }
  func.func @transform_1(%arg0: i32) -> (i32, i32) {
    %c0_i32 = arith.constant 0 : i32
    %c0_i32_0 = arith.constant 0 : i32
    %c0_i32_1 = arith.constant 0 : i32
    return %c0_i32, %c0_i32_0 : i32, i32
  }
  func.func @transform_2(%arg0: i32) -> (i32, i32) {
    %c0_i32 = arith.constant 0 : i32
    %c0_i32_0 = arith.constant 0 : i32
    %c0_i32_1 = arith.constant 0 : i32
    return %c0_i32, %c0_i32_0 : i32, i32
  }
  func.func @transform_3(%arg0: i32) -> (i32, i32) {
    %c0_i32 = arith.constant 0 : i32
    %c0_i32_0 = arith.constant 0 : i32
    return %arg0, %c0_i32 : i32, i32
  }
}

module attributes {stable_mosaic.version = 11 : i64} {
  func.func @_bn_act_res_kernel(%arg0: i32, %arg1: memref<2x512xf32, #tpu.memory_space<vmem>>, %arg2: memref<1x512xf32, #tpu.memory_space<vmem>>, %arg3: memref<1x512xf32, #tpu.memory_space<vmem>>, %arg4: memref<2x512xf32, #tpu.memory_space<vmem>>, %arg5: memref<2x512xf32, #tpu.memory_space<vmem>>) attributes {dimension_semantics = [#tpu.dimension_semantics<parallel>], iteration_bounds = array<i64: 1>, scalar_prefetch = 0 : i64, scratch_operands = 0 : i64, tpu.core_type = #tpu.core_type<tc>, window_params = [{transform_indices = @transform_0, window_bounds = array<i64: 2, 512>}, {pipeline_mode = #tpu.pipeline_mode<synchronous>, transform_indices = @transform_1, window_bounds = array<i64: 1, 512>}, {pipeline_mode = #tpu.pipeline_mode<synchronous>, transform_indices = @transform_2, window_bounds = array<i64: 1, 512>}, {transform_indices = @transform_3, window_bounds = array<i64: 2, 512>}, {transform_indices = @transform_4, window_bounds = array<i64: 2, 512>}]} {
    %c0 = arith.constant 0 : index
    %c0_0 = arith.constant 0 : index
    %0 = vector.load %arg1[%c0, %c0_0] : memref<2x512xf32, #tpu.memory_space<vmem>>, vector<2x512xf32>
    %c0_1 = arith.constant 0 : index
    %c0_2 = arith.constant 0 : index
    %1 = vector.load %arg2[%c0_1, %c0_2] : memref<1x512xf32, #tpu.memory_space<vmem>>, vector<1x512xf32>
    %2 = vector.broadcast %1 : vector<1x512xf32> to vector<2x512xf32>
    %3 = arith.mulf %0, %2 : vector<2x512xf32>
    %c0_3 = arith.constant 0 : index
    %c0_4 = arith.constant 0 : index
    %4 = vector.load %arg3[%c0_3, %c0_4] : memref<1x512xf32, #tpu.memory_space<vmem>>, vector<1x512xf32>
    %5 = vector.broadcast %4 : vector<1x512xf32> to vector<2x512xf32>
    %6 = arith.addf %3, %5 : vector<2x512xf32>
    %c0_5 = arith.constant 0 : index
    %c0_6 = arith.constant 0 : index
    %7 = vector.load %arg4[%c0_5, %c0_6] : memref<2x512xf32, #tpu.memory_space<vmem>>, vector<2x512xf32>
    %8 = arith.addf %6, %7 : vector<2x512xf32>
    %cst = arith.constant 0.000000e+00 : f32
    %9 = vector.broadcast %cst : f32 to vector<2x512xf32>
    %10 = arith.maximumf %8, %9 : vector<2x512xf32>
    %c0_7 = arith.constant 0 : index
    %c0_8 = arith.constant 0 : index
    %11 = vector.load %arg5[%c0_7, %c0_8] : memref<2x512xf32, #tpu.memory_space<vmem>>, vector<2x512xf32>
    tpu.vector_store %arg5[%c0_7, %c0_8], %10 {strides = array<i32>} : memref<2x512xf32, #tpu.memory_space<vmem>>, vector<2x512xf32>,
    return
  }
  func.func @transform_0(%arg0: i32) -> (i32, i32) {
    %c0_i32 = arith.constant 0 : i32
    %c0_i32_0 = arith.constant 0 : i32
    return %arg0, %c0_i32 : i32, i32
  }
  func.func @transform_1(%arg0: i32) -> (i32, i32) {
    %c0_i32 = arith.constant 0 : i32
    %c0_i32_0 = arith.constant 0 : i32
    %c0_i32_1 = arith.constant 0 : i32
    return %c0_i32, %c0_i32_0 : i32, i32
  }
  func.func @transform_2(%arg0: i32) -> (i32, i32) {
    %c0_i32 = arith.constant 0 : i32
    %c0_i32_0 = arith.constant 0 : i32
    %c0_i32_1 = arith.constant 0 : i32
    return %c0_i32, %c0_i32_0 : i32, i32
  }
  func.func @transform_3(%arg0: i32) -> (i32, i32) {
    %c0_i32 = arith.constant 0 : i32
    %c0_i32_0 = arith.constant 0 : i32
    return %arg0, %c0_i32 : i32, i32
  }
  func.func @transform_4(%arg0: i32) -> (i32, i32) {
    %c0_i32 = arith.constant 0 : i32
    %c0_i32_0 = arith.constant 0 : i32
    return %arg0, %c0_i32 : i32, i32
  }
}

module attributes {stable_mosaic.version = 11 : i64} {
  func.func @_fc_head_kernel(%arg0: i32, %arg1: memref<8x512xbf16, #tpu.memory_space<vmem>>, %arg2: memref<512x1024xbf16, #tpu.memory_space<vmem>>, %arg3: memref<1x1024xf32, #tpu.memory_space<vmem>>, %arg4: memref<1024x128xbf16, #tpu.memory_space<vmem>>, %arg5: memref<1x128xf32, #tpu.memory_space<vmem>>, %arg6: memref<8x128xf32, #tpu.memory_space<vmem>>) attributes {dimension_semantics = [#tpu.dimension_semantics<arbitrary>], iteration_bounds = array<i64: 1>, scalar_prefetch = 0 : i64, scratch_operands = 0 : i64, tpu.core_type = #tpu.core_type<tc>, window_params = [{pipeline_mode = #tpu.pipeline_mode<synchronous>, transform_indices = @transform_0, window_bounds = array<i64: 8, 512>}, {pipeline_mode = #tpu.pipeline_mode<synchronous>, transform_indices = @transform_1, window_bounds = array<i64: 512, 1024>}, {pipeline_mode = #tpu.pipeline_mode<synchronous>, transform_indices = @transform_2, window_bounds = array<i64: 1, 1024>}, {pipeline_mode = #tpu.pipeline_mode<synchronous>, transform_indices = @transform_3, window_bounds = array<i64: 1024, 128>}, {pipeline_mode = #tpu.pipeline_mode<synchronous>, transform_indices = @transform_4, window_bounds = array<i64: 1, 128>}, {pipeline_mode = #tpu.pipeline_mode<synchronous>, transform_indices = @transform_5, window_bounds = array<i64: 8, 128>}]} {
    %c0 = arith.constant 0 : index
    %c0_0 = arith.constant 0 : index
    %0 = vector.load %arg1[%c0, %c0_0] : memref<8x512xbf16, #tpu.memory_space<vmem>>, vector<8x512xbf16>
    %c0_1 = arith.constant 0 : index
    %c0_2 = arith.constant 0 : index
    %1 = vector.load %arg2[%c0_1, %c0_2] : memref<512x1024xbf16, #tpu.memory_space<vmem>>, vector<512x1024xbf16>
    %cst = arith.constant dense<0.000000e+00> : vector<8x1024xf32>
    %2 = tpu.matmul %0, %1, %cst {dimension_numbers = #tpu.dot_dimension_numbers<[1], [0], [0], [1], [0, 0, 1, 1], [], []>} : vector<8x512xbf16>, vector<512x1024xbf16>, vector<8x1024xf32> -> vector<8x1024xf32>
    %c0_3 = arith.constant 0 : index
    %c0_4 = arith.constant 0 : index
    %3 = vector.load %arg3[%c0_3, %c0_4] : memref<1x1024xf32, #tpu.memory_space<vmem>>, vector<1x1024xf32>
    %4 = vector.broadcast %3 : vector<1x1024xf32> to vector<8x1024xf32>
    %5 = arith.addf %2, %4 : vector<8x1024xf32>
    %6 = arith.truncf %5 : vector<8x1024xf32> to vector<8x1024xbf16>
    %c0_5 = arith.constant 0 : index
    %c0_6 = arith.constant 0 : index
    %7 = vector.load %arg4[%c0_5, %c0_6] : memref<1024x128xbf16, #tpu.memory_space<vmem>>, vector<1024x128xbf16>
    %cst_7 = arith.constant dense<0.000000e+00> : vector<8x128xf32>
    %8 = tpu.matmul %6, %7, %cst_7 {dimension_numbers = #tpu.dot_dimension_numbers<[1], [0], [0], [1], [0, 0, 1, 1], [], []>} : vector<8x1024xbf16>, vector<1024x128xbf16>, vector<8x128xf32> -> vector<8x128xf32>
    %c0_8 = arith.constant 0 : index
    %c0_9 = arith.constant 0 : index
    %9 = vector.load %arg5[%c0_8, %c0_9] : memref<1x128xf32, #tpu.memory_space<vmem>>, vector<1x128xf32>
    %10 = vector.broadcast %9 : vector<1x128xf32> to vector<8x128xf32>
    %11 = arith.addf %8, %10 : vector<8x128xf32>
    %c0_10 = arith.constant 0 : index
    %c0_11 = arith.constant 0 : index
    %12 = vector.load %arg6[%c0_10, %c0_11] : memref<8x128xf32, #tpu.memory_space<vmem>>, vector<8x128xf32>
    tpu.vector_store %arg6[%c0_10, %c0_11], %11 {strides = array<i32>} : memref<8x128xf32, #tpu.memory_space<vmem>>, vector<8x128xf32>,
    return
  }
  func.func @transform_0(%arg0: i32) -> (i32, i32) {
    %c0_i32 = arith.constant 0 : i32
    %c0_i32_0 = arith.constant 0 : i32
    %c0_i32_1 = arith.constant 0 : i32
    return %c0_i32, %c0_i32_0 : i32, i32
  }
  func.func @transform_1(%arg0: i32) -> (i32, i32) {
    %c0_i32 = arith.constant 0 : i32
    %c0_i32_0 = arith.constant 0 : i32
    %c0_i32_1 = arith.constant 0 : i32
    return %c0_i32, %c0_i32_0 : i32, i32
  }
  func.func @transform_2(%arg0: i32) -> (i32, i32) {
    %c0_i32 = arith.constant 0 : i32
    %c0_i32_0 = arith.constant 0 : i32
    %c0_i32_1 = arith.constant 0 : i32
    return %c0_i32, %c0_i32_0 : i32, i32
  }
  func.func @transform_3(%arg0: i32) -> (i32, i32) {
    %c0_i32 = arith.constant 0 : i32
    %c0_i32_0 = arith.constant 0 : i32
    %c0_i32_1 = arith.constant 0 : i32
    return %c0_i32, %c0_i32_0 : i32, i32
  }
  func.func @transform_4(%arg0: i32) -> (i32, i32) {
    %c0_i32 = arith.constant 0 : i32
    %c0_i32_0 = arith.constant 0 : i32
    %c0_i32_1 = arith.constant 0 : i32
    return %c0_i32, %c0_i32_0 : i32, i32
  }
  func.func @transform_5(%arg0: i32) -> (i32, i32) {
    %c0_i32 = arith.constant 0 : i32
    %c0_i32_0 = arith.constant 0 : i32
    %c0_i32_1 = arith.constant 0 : i32
    return %c0_i32, %c0_i32_0 : i32, i32
  }
}

</mosaic_0001>

<bundles_post_ra>
// kernel: tile.53
= control target key start
LH: loop header
LB: loop body
LE: loop exit
PB: predicated region body
PF: predicated region fallthrough
CT: control target
= control target key end

     0   :  { %s22_s0 = inlined_call_operand.vmem [shape: f32[64], index: 0, kind: input, shape index: {}]   ;;  %s23_s1 = inlined_call_operand.vmem [shape: f32[2,64], index: 1, kind: output, shape index: {}]  }
   0x1   :  { %v4_v0 = vld [vmem:[%s22_s0] ss:$0 sm:$0xff] }
   0x2   :  { %5 = vst [vmem:[%s23_s1] sm:$0x3] %v4_v0 }

// kernel: tile.58
= control target key start
LH: loop header
LB: loop body
LE: loop exit
PB: predicated region body
PF: predicated region fallthrough
CT: control target
= control target key end

     0   :  { %vm8_vm0 = vcmask 523264   ;;  %vm14_vm1 = vcmask 1048064   ;;  %s42_s0 = inlined_call_operand.vmem [shape: f32[2,64], index: 0, kind: input, shape index: {}]   ;;  %s43_s1 = inlined_call_operand.vmem [shape: f32[1,128], index: 1, kind: output, shape index: {}]  }
   0x1   :  { %v5_v0 = vld [vmem:[%s42_s0] sm:$0x3]  ;;  %s25_s0 = smov 64  }
   0x2   :  { %6 = vst [vmem:[#allocation1] sm:$0x3] %v5_v0 }
   0x9   :  { %v11_v1 = vld [vmem:[#allocation1 + $0x1] sm:$0x1]   ;;  %v7_v2 = vld [vmem:[#allocation1] sm:$0x1]  }
   0xa   :  { %12 = vrot.lane.b32.xlu0 %v11_v1, %s25_s0  ;;  %9 = vst.msk [vmem:[#allocation0] sm:$0x1] %vm8_vm0, %v7_v2  }
  0x7c   :  { %v13_v3 = vpop.permute.xlu0 %12  }
  0x7d   :  { %15 = vst.msk [vmem:[#allocation0] sm:$0x1] %vm14_vm1, %v13_v3  }
  0x84   :  { %v20_v4 = vld [vmem:[#allocation0] sm:$0x1] }
  0x85   :  { %23 = vst [vmem:[%s43_s1] sm:$0x1] %v20_v4 }

// kernel: _forward.42
= control target key start
LH: loop header
LB: loop body
LE: loop exit
PB: predicated region body
PF: predicated region fallthrough
CT: control target
= control target key end

     0   :  { %s480_s0 = inlined_call_operand.vmem [shape: f32[256,128], index: 0, kind: input, shape index: {}]   ;;  %s481_s1 = inlined_call_operand.vmem [shape: f32[1,128], index: 1, kind: input, shape index: {}]   ;;  %s482_s2 = inlined_call_operand.vmem [shape: f32[1,128], index: 2, kind: input, shape index: {}]   ;;  %s483_s3 = inlined_call_operand.vmem [shape: f32[256,128], index: 3, kind: output, shape index: {}]  }
   0x1   :  { %v14_v0 = vld [vmem:[%s480_s0] sm:$0xff]  ;;  %v15_v4 = vld [vmem:[%s480_s0 + $0x8] sm:$0xff]  ;;  %v16_v5 = vld [vmem:[%s480_s0 + $0x10] sm:$0xff] }
   0x2   :  { %v220_v1 = vld [vmem:[%s481_s1] ss:$0 sm:$0xff]  ;;  %v17_v6 = vld [vmem:[%s480_s0 + $0x18] sm:$0xff]  ;;  %v19_v11 = vld [vmem:[%s480_s0 + $0x28] sm:$0xff] }
   0x3   :  { %v225_v2 = vld [vmem:[%s482_s2] ss:$0 sm:$0xff]  ;;  %v53_v3 = vmul.f32 %v220_v1, %v14_v0  ;;  %v54_v7 = vmul.f32 %v220_v1, %v15_v4  ;;  %v55_v8 = vmul.f32 %v220_v1, %v16_v5  ;;  %v56_v9 = vmul.f32 %v220_v1, %v17_v6  ;;  %v20_v12 = vld [vmem:[%s480_s0 + $0x30] sm:$0xff]  ;;  %v21_v17 = vld [vmem:[%s480_s0 + $0x38] sm:$0xff] }
   0x4   :  { %v18_v10 = vld [vmem:[%s480_s0 + $0x20] sm:$0xff]  ;;  %v58_v15 = vmul.f32 %v220_v1, %v19_v11  ;;  %v59_v16 = vmul.f32 %v220_v1, %v20_v12  ;;  %v60_v21 = vmul.f32 %v220_v1, %v21_v17  ;;  %v23_v27 = vld [vmem:[%s480_s0 + $0x48] sm:$0xff]  ;;  %v24_v28 = vld [vmem:[%s480_s0 + $0x50] sm:$0xff] }
   0x5   :  { %v92_v13 = vadd.f32 %v225_v2, %v53_v3  ;;  %v57_v14 = vmul.f32 %v220_v1, %v18_v10  ;;  %v93_v18 = vadd.f32 %v225_v2, %v54_v7  ;;  %v94_v19 = vadd.f32 %v225_v2, %v55_v8  ;;  %v22_v22 = vld [vmem:[%s480_s0 + $0x40] sm:$0xff]  ;;  %v25_v29 = vld [vmem:[%s480_s0 + $0x58] sm:$0xff]  ;;  %v27_v35 = vld [vmem:[%s480_s0 + $0x68] sm:$0xff] }
   0x6   :  { %v95_v20 = vadd.f32 %v225_v2, %v56_v9  ;;  %v97_v25 = vadd.f32 %v225_v2, %v58_v15  ;;  %v98_v26 = vadd.f32 %v225_v2, %v59_v16  ;;  %v99_v33 = vadd.f32 %v225_v2, %v60_v21  ;;  %v26_v34 = vld [vmem:[%s480_s0 + $0x60] sm:$0xff]  ;;  %v28_v36 = vld [vmem:[%s480_s0 + $0x70] sm:$0xff]  ;;  %v29_v41 = vld [vmem:[%s480_s0 + $0x78] sm:$0xff] }
   0x7   :  { %v124_v23 = vmax.f32 %v92_v13, 0.0  ;;  %v96_v24 = vadd.f32 %v225_v2, %v57_v14  ;;  %v125_v30 = vmax.f32 %v93_v18, 0.0  ;;  %v126_v31 = vmax.f32 %v94_v19, 0.0  ;;  %v30_v54 = vld [vmem:[%s480_s0 + $0x80] sm:$0xff]  ;;  %v31_v59 = vld [vmem:[%s480_s0 + $0x88] sm:$0xff]  ;;  %v32_v60 = vld [vmem:[%s480_s0 + $0x90] sm:$0xff] }
   0x8   :  { %v127_v32 = vmax.f32 %v95_v20, 0.0  ;;  %v129_v38 = vmax.f32 %v97_v25, 0.0  ;;  %v130_v39 = vmax.f32 %v98_v26, 0.0  ;;  %v61_v40 = vmul.f32 %v220_v1, %v22_v22  ;;  %v33_v61 = vld [vmem:[%s480_s0 + $0x98] sm:$0xff]  ;;  %v34_v4 = vld [vmem:[%s480_s0 + $0xa0] sm:$0xff]  ;;  %v35_v5 = vld [vmem:[%s480_s0 + $0xa8] sm:$0xff] }
   0x9   :  { %156 = vst [vmem:[%s483_s3] sm:$0xff] %v124_v23  ;;  %v128_v37 = vmax.f32 %v96_v24, 0.0  ;;  %157 = vst [vmem:[%s483_s3 + $0x8] sm:$0xff] %v125_v30  ;;  %v131_v42 = vmax.f32 %v99_v33, 0.0  ;;  %v62_v43 = vmul.f32 %v220_v1, %v23_v27  ;;  %v63_v44 = vmul.f32 %v220_v1, %v24_v28  ;;  %v36_v6 = vld [vmem:[%s480_s0 + $0xb0] sm:$0xff]  ;;  %v37_v11 = vld [vmem:[%s480_s0 + $0xb8] sm:$0xff] }
   0xa   :  { %158 = vst [vmem:[%s483_s3 + $0x10] sm:$0xff] %v126_v31  ;;  %159 = vst [vmem:[%s483_s3 + $0x18] sm:$0xff] %v127_v32  ;;  %v64_v45 = vmul.f32 %v220_v1, %v25_v29  ;;  %v100_v46 = vadd.f32 %v225_v2, %v61_v40  ;;  %v65_v47 = vmul.f32 %v220_v1, %v26_v34  ;;  %v38_v24 = vld [vmem:[%s480_s0 + $0xc0] sm:$0xff]  ;;  %v39_v29 = vld [vmem:[%s480_s0 + $0xc8] sm:$0xff] }
   0xb   :  { %160 = vst [vmem:[%s483_s3 + $0x20] sm:$0xff] %v128_v37  ;;  %161 = vst [vmem:[%s483_s3 + $0x28] sm:$0xff] %v129_v38  ;;  %v66_v48 = vmul.f32 %v220_v1, %v27_v35  ;;  %v67_v49 = vmul.f32 %v220_v1, %v28_v36  ;;  %v101_v50 = vadd.f32 %v225_v2, %v62_v43  ;;  %v40_v30 = vld [vmem:[%s480_s0 + $0xd0] sm:$0xff]  ;;  %v41_v31 = vld [vmem:[%s480_s0 + $0xd8] sm:$0xff] }
   0xc   :  { %162 = vst [vmem:[%s483_s3 + $0x30] sm:$0xff] %v130_v39  ;;  %163 = vst [vmem:[%s483_s3 + $0x38] sm:$0xff] %v131_v42  ;;  %v102_v51 = vadd.f32 %v225_v2, %v63_v44  ;;  %v103_v52 = vadd.f32 %v225_v2, %v64_v45  ;;  %v68_v53 = vmul.f32 %v220_v1, %v29_v41  ;;  %v132_v55 = vmax.f32 %v100_v46, 0.0  ;;  %v42_v36 = vld [vmem:[%s480_s0 + $0xe0] sm:$0xff]  ;;  %v43_v37 = vld [vmem:[%s480_s0 + $0xe8] sm:$0xff] }
   0xd   :  { %v104_v56 = vadd.f32 %v225_v2, %v65_v47  ;;  %v105_v57 = vadd.f32 %v225_v2, %v66_v48  ;;  %v106_v58 = vadd.f32 %v225_v2, %v67_v49  ;;  %v133_v62 = vmax.f32 %v101_v50, 0.0  ;;  %v44_v38 = vld [vmem:[%s480_s0 + $0xf0] sm:$0xff]  ;;  %v45_v43 = vld [vmem:[%s480_s0 + $0xf8] sm:$0xff] }
   0xe   :  { %v134_v63 = vmax.f32 %v102_v51, 0.0  ;;  %v135_v0 = vmax.f32 %v103_v52, 0.0  ;;  %v107_v3 = vadd.f32 %v225_v2, %v68_v53  ;;  %164 = vst [vmem:[%s483_s3 + $0x40] sm:$0xff] %v132_v55  ;;  %v69_v10 = vmul.f32 %v220_v1, %v30_v54 }
   0xf   :  { %v136_v7 = vmax.f32 %v104_v56, 0.0  ;;  %v137_v8 = vmax.f32 %v105_v57, 0.0  ;;  %v138_v9 = vmax.f32 %v106_v58, 0.0  ;;  %165 = vst [vmem:[%s483_s3 + $0x48] sm:$0xff] %v133_v62  ;;  %v70_v13 = vmul.f32 %v220_v1, %v31_v59 }
  0x10   :  { %166 = vst [vmem:[%s483_s3 + $0x50] sm:$0xff] %v134_v63  ;;  %167 = vst [vmem:[%s483_s3 + $0x58] sm:$0xff] %v135_v0  ;;  %v139_v12 = vmax.f32 %v107_v3, 0.0  ;;  %v71_v14 = vmul.f32 %v220_v1, %v32_v60  ;;  %v72_v15 = vmul.f32 %v220_v1, %v33_v61  ;;  %v108_v16 = vadd.f32 %v225_v2, %v69_v10 }
  0x11   :  { %168 = vst [vmem:[%s483_s3 + $0x60] sm:$0xff] %v136_v7  ;;  %169 = vst [vmem:[%s483_s3 + $0x68] sm:$0xff] %v137_v8  ;;  %v73_v17 = vmul.f32 %v220_v1, %v34_v4  ;;  %v74_v18 = vmul.f32 %v220_v1, %v35_v5  ;;  %v75_v19 = vmul.f32 %v220_v1, %v36_v6 }
  0x12   :  { %170 = vst [vmem:[%s483_s3 + $0x70] sm:$0xff] %v138_v9  ;;  %171 = vst [vmem:[%s483_s3 + $0x78] sm:$0xff] %v139_v12  ;;  %v109_v20 = vadd.f32 %v225_v2, %v70_v13  ;;  %v110_v21 = vadd.f32 %v225_v2, %v71_v14  ;;  %v111_v22 = vadd.f32 %v225_v2, %v72_v15  ;;  %v140_v25 = vmax.f32 %v108_v16, 0.0 }
  0x13   :  { %v76_v23 = vmul.f32 %v220_v1, %v37_v11  ;;  %v112_v26 = vadd.f32 %v225_v2, %v73_v17  ;;  %v113_v27 = vadd.f32 %v225_v2, %v74_v18  ;;  %v114_v28 = vadd.f32 %v225_v2, %v75_v19 }
  0x14   :  { %v141_v32 = vmax.f32 %v109_v20, 0.0  ;;  %v142_v33 = vmax.f32 %v110_v21, 0.0  ;;  %v143_v34 = vmax.f32 %v111_v22, 0.0  ;;  %172 = vst [vmem:[%s483_s3 + $0x80] sm:$0xff] %v140_v25  ;;  %v77_v42 = vmul.f32 %v220_v1, %v38_v24 }
  0x15   :  { %v115_v35 = vadd.f32 %v225_v2, %v76_v23  ;;  %v144_v39 = vmax.f32 %v112_v26, 0.0  ;;  %v145_v40 = vmax.f32 %v113_v27, 0.0  ;;  %v146_v41 = vmax.f32 %v114_v28, 0.0 }
  0x16   :  { %173 = vst [vmem:[%s483_s3 + $0x88] sm:$0xff] %v141_v32  ;;  %174 = vst [vmem:[%s483_s3 + $0x90] sm:$0xff] %v142_v33  ;;  %v78_v45 = vmul.f32 %v220_v1, %v39_v29  ;;  %v79_v46 = vmul.f32 %v220_v1, %v40_v30  ;;  %v80_v47 = vmul.f32 %v220_v1, %v41_v31 }
  0x17   :  { %175 = vst [vmem:[%s483_s3 + $0x98] sm:$0xff] %v143_v34  ;;  %v147_v44 = vmax.f32 %v115_v35, 0.0  ;;  %176 = vst [vmem:[%s483_s3 + $0xa0] sm:$0xff] %v144_v39  ;;  %v116_v48 = vadd.f32 %v225_v2, %v77_v42  ;;  %v81_v49 = vmul.f32 %v220_v1, %v42_v36  ;;  %v82_v50 = vmul.f32 %v220_v1, %v43_v37 }
  0x18   :  { %177 = vst [vmem:[%s483_s3 + $0xa8] sm:$0xff] %v145_v40  ;;  %178 = vst [vmem:[%s483_s3 + $0xb0] sm:$0xff] %v146_v41  ;;  %v83_v51 = vmul.f32 %v220_v1, %v44_v38  ;;  %v117_v52 = vadd.f32 %v225_v2, %v78_v45  ;;  %v118_v53 = vadd.f32 %v225_v2, %v79_v46 }
  0x19   :  { %179 = vst [vmem:[%s483_s3 + $0xb8] sm:$0xff] %v147_v44  ;;  %v119_v54 = vadd.f32 %v225_v2, %v80_v47  ;;  %v84_v55 = vmul.f32 %v220_v1, %v45_v43  ;;  %v148_v56 = vmax.f32 %v116_v48, 0.0  ;;  %v120_v57 = vadd.f32 %v225_v2, %v81_v49 }
  0x1a   :  { %v121_v58 = vadd.f32 %v225_v2, %v82_v50  ;;  %v122_v59 = vadd.f32 %v225_v2, %v83_v51  ;;  %v149_v60 = vmax.f32 %v117_v52, 0.0  ;;  %v150_v61 = vmax.f32 %v118_v53, 0.0 }
  0x1b   :  { %v151_v62 = vmax.f32 %v119_v54, 0.0  ;;  %v123_v63 = vadd.f32 %v225_v2, %v84_v55  ;;  %180 = vst [vmem:[%s483_s3 + $0xc0] sm:$0xff] %v148_v56  ;;  %v152_v0 = vmax.f32 %v120_v57, 0.0 }
  0x1c   :  { %v153_v3 = vmax.f32 %v121_v58, 0.0  ;;  %v154_v4 = vmax.f32 %v122_v59, 0.0  ;;  %181 = vst [vmem:[%s483_s3 + $0xc8] sm:$0xff] %v149_v60  ;;  %182 = vst [vmem:[%s483_s3 + $0xd0] sm:$0xff] %v150_v61 }
  0x1d   :  { %183 = vst [vmem:[%s483_s3 + $0xd8] sm:$0xff] %v151_v62  ;;  %v155_v1 = vmax.f32 %v123_v63, 0.0  ;;  %184 = vst [vmem:[%s483_s3 + $0xe0] sm:$0xff] %v152_v0 }
  0x1e   :  { %185 = vst [vmem:[%s483_s3 + $0xe8] sm:$0xff] %v153_v3  ;;  %186 = vst [vmem:[%s483_s3 + $0xf0] sm:$0xff] %v154_v4 }
  0x1f   :  { %187 = vst [vmem:[%s483_s3 + $0xf8] sm:$0xff] %v155_v1 }

// kernel: _forward.41
= control target key start
LH: loop header
LB: loop body
LE: loop exit
PB: predicated region body
PF: predicated region fallthrough
CT: control target
= control target key end

     0   :  { %s1326_s12 = smov 0   ;;  %s1328_s13 = smov 0   ;;  %s1519_s0 = inlined_call_operand.vmem [shape: bf16[512,256], index: 0, kind: input, shape index: {}]   ;;  %s1520_s1 = inlined_call_operand.vmem [shape: bf16[256,128], index: 1, kind: input, shape index: {}]   ;;  %s1521_s2 = inlined_call_operand.vmem [shape: f32[1,128], index: 2, kind: input, shape index: {}]   ;;  %s1522_s3 = inlined_call_operand.vmem [shape: f32[512,128], index: 3, kind: output, shape index: {}]  }
   0x1   :  { %s1330_s14 = smov 0  }
   0x2 LB: > { %s32_s15 = sadd.s32 1, %s1300_s13  ;;  %p1008_p0 = scmp.ge.s32.totalorder %s1304_s14, 1  ;;  %s1304_s14 = sphi %s1330_s14, %s13_s14   ;;  %s1300_s13 = sphi %s1328_s13, %s1524_s13   ;;  %s1296_s12 = sphi %s1326_s12, %s1523_s12  }
   0x3   : > { %p34_p1 = scmp.ge.s32.totalorder %s32_s15, 2  ;;  %p191_p2 = scmp.lt.s32.totalorder %s1304_s14, 3 }
   0x5   : > { %s1526_s15 = smov (%p34_p1, %s32_s15), 0  ;;  %p192_p3 = pnand %p1008_p0, %p191_p2 }
   0x6   : > { %s1009_s18 = sshll.u32 (!%p192_p3), %s1296_s12, 5 }
   0x7   : > { %195 = sbr.rel (%p192_p3) target bundleno = 305 (0x131), region = 32  ;;  %p236_p4 = scmp.lt.s32.totalorder (!%p192_p3), %s1009_s18, 63 }
   0xc   : > { %v1218_v0 = vld [vmem:[%s1520_s1 + $0x78] sm:$0xff]   ;;  %v1220_v2 = vld [vmem:[%s1520_s1 + $0x70] sm:$0xff]   ;;  %v1222_v4 = vld [vmem:[%s1520_s1 + $0x68] sm:$0xff]   ;;  %s1528_s18 = smov (!%p236_p4, %s1009_s18), 63 }
   0xd   : > { %v1219_v1 = vld [vmem:[%s1520_s1 + $0x38] sm:$0xff]   ;;  %1066 = vmatprep.subr.bf16.mxu0 %v1218_v0  ;;  %1178 = vmatprep.subr.bf16.mxu1 %v1218_v0  ;;  %v1221_v3 = vld [vmem:[%s1520_s1 + $0x30] sm:$0xff]   ;;  %v1223_v5 = vld [vmem:[%s1520_s1 + $0x28] sm:$0xff]   ;;  %s1065_s6 = sshll.u32 %s1528_s18, 3 }
   0xe   : > { %1067 = vmatpush3.bf16.msra.mxu0 %v1219_v1  ;;  %1186 = vmatpush3.bf16.msra.mxu1 %v1219_v1  ;;  %v1224_v6 = vld [vmem:[%s1520_s1 + $0x60] sm:$0xff]   ;;  %v1226_v8 = vld [vmem:[%s1520_s1 + $0x58] sm:$0xff]   ;;  %s1379_s11 = scalar_lea.vmem %s1519_s0, %s1065_s6  ;;  %v1228_v10 = vld [vmem:[%s1520_s1 + $0x50] sm:$0xff]   ;;  %s1444_s8 = scalar_lea.vmem %s1522_s3, %s1065_s6 }
   0xf   : > { %1068 = vmatprep.subr.bf16.mxu0 %v1220_v2  ;;  %1179 = vmatprep.subr.bf16.mxu1 %v1220_v2  ;;  %v1225_v7 = vld [vmem:[%s1520_s1 + $0x20] sm:$0xff]   ;;  %v1227_v9 = vld [vmem:[%s1520_s1 + $0x18] sm:$0xff]   ;;  %v1229_v13 = vld [vmem:[%s1520_s1 + $0x10] sm:$0xff]  }
  0x10   : > { %v1236_v11 = vld [vmem:[%s1379_s11 + $0x4] ss:$8 sps:$4 sm:$0xff]   ;;  %v1234_v18 = vld [vmem:[%s1379_s11] ss:$8 sps:$4 sm:$0xff]   ;;  %v1240_v20 = vld [vmem:[%s1379_s11 + $0x14] ss:$8 sps:$4 sm:$0xff]  }
  0x11   : > { %v1239_v12 = vld [vmem:[%s1379_s11 + $0x84] ss:$8 sps:$4 sm:$0xff]   ;;  %695 = vmatprep.mubr.bf16.mxu0 %v1236_v11  ;;  %v1237_v19 = vld [vmem:[%s1379_s11 + $0x80] ss:$8 sps:$4 sm:$0xff]   ;;  %v1242_v21 = vld [vmem:[%s1379_s11 + $0x94] ss:$8 sps:$4 sm:$0xff]  }
  0x12   : > { %1069 = vmatpush3.bf16.msra.mxu0 %v1221_v3  ;;  %1187 = vmatpush3.bf16.msra.mxu1 %v1221_v3  ;;  %v1230_v14 = vld [vmem:[%s1520_s1 + $0x48] sm:$0xff]   ;;  %v1232_v16 = vld [vmem:[%s1520_s1 + $0x40] sm:$0xff]   ;;  %v1244_v22 = vld [vmem:[%s1379_s11 + $0x10] ss:$8 sps:$4 sm:$0xff]  }
  0x13   : > { %1070 = vmatprep.subr.bf16.mxu0 %v1222_v4  ;;  %1180 = vmatprep.subr.bf16.mxu1 %v1222_v4  ;;  %v1231_v15 = vld [vmem:[%s1520_s1 + $0x8] sm:$0xff]   ;;  %v1233_v17 = vld [vmem:[%s1520_s1] sm:$0xff]   ;;  %v1245_v23 = vld [vmem:[%s1379_s11 + $0x90] ss:$8 sps:$4 sm:$0xff]  }
  0x14   : > { %759 = vmatprep.mubr.bf16.mxu1 %v1239_v12  ;;  %v1246_v24 = vld [vmem:[%s1379_s11 + $0x24] ss:$8 sps:$4 sm:$0xff]   ;;  %v1250_v26 = vld [vmem:[%s1379_s11 + $0x20] ss:$8 sps:$4 sm:$0xff]   ;;  %v1252_v28 = vld [vmem:[%s1379_s11 + $0x34] ss:$8 sps:$4 sm:$0xff]  }
  0x15   : > { %v1248_v25 = vld [vmem:[%s1379_s11 + $0xa4] ss:$8 sps:$4 sm:$0xff]   ;;  %v1251_v27 = vld [vmem:[%s1379_s11 + $0xa0] ss:$8 sps:$4 sm:$0xff]   ;;  %v1254_v29 = vld [vmem:[%s1379_s11 + $0xb4] ss:$8 sps:$4 sm:$0xff]  }
  0x16   : > { %1071 = vmatpush3.bf16.msra.mxu0 %v1223_v5  ;;  %1188 = vmatpush3.bf16.msra.mxu1 %v1223_v5  ;;  %v1256_v30 = vld [vmem:[%s1379_s11 + $0x30] ss:$8 sps:$4 sm:$0xff]   ;;  %v1258_v32 = vld [vmem:[%s1379_s11 + $0x44] ss:$8 sps:$4 sm:$0xff]   ;;  %v1262_v34 = vld [vmem:[%s1379_s11 + $0x40] ss:$8 sps:$4 sm:$0xff]  }
  0x17   : > { %1072 = vmatprep.subr.bf16.mxu0 %v1224_v6  ;;  %1181 = vmatprep.subr.bf16.mxu1 %v1224_v6  ;;  %v1257_v31 = vld [vmem:[%s1379_s11 + $0xb0] ss:$8 sps:$4 sm:$0xff]   ;;  %v1260_v33 = vld [vmem:[%s1379_s11 + $0xc4] ss:$8 sps:$4 sm:$0xff]   ;;  %v1263_v35 = vld [vmem:[%s1379_s11 + $0xc0] ss:$8 sps:$4 sm:$0xff]  }
  0x18   : > { %v1264_v36 = vld [vmem:[%s1379_s11 + $0x54] ss:$8 sps:$4 sm:$0xff]   ;;  %v1268_v38 = vld [vmem:[%s1379_s11 + $0x50] ss:$8 sps:$4 sm:$0xff]   ;;  %v1270_v40 = vld [vmem:[%s1379_s11 + $0x64] ss:$8 sps:$4 sm:$0xff]  }
  0x19   : > { %v1266_v37 = vld [vmem:[%s1379_s11 + $0xd4] ss:$8 sps:$4 sm:$0xff]   ;;  %v1269_v39 = vld [vmem:[%s1379_s11 + $0xd0] ss:$8 sps:$4 sm:$0xff]   ;;  %v1272_v41 = vld [vmem:[%s1379_s11 + $0xe4] ss:$8 sps:$4 sm:$0xff]  }
  0x1a   : > { %1073 = vmatpush3.bf16.msra.mxu0 %v1225_v7  ;;  %1189 = vmatpush3.bf16.msra.mxu1 %v1225_v7  ;;  %v1274_v42 = vld [vmem:[%s1379_s11 + $0x60] ss:$8 sps:$4 sm:$0xff]   ;;  %v1276_v44 = vld [vmem:[%s1379_s11 + $0x74] ss:$8 sps:$4 sm:$0xff]   ;;  %v1280_v46 = vld [vmem:[%s1379_s11 + $0x70] ss:$8 sps:$4 sm:$0xff]  }
  0x1b   : > { %1074 = vmatprep.subr.bf16.mxu0 %v1226_v8  ;;  %1182 = vmatprep.subr.bf16.mxu1 %v1226_v8  ;;  %v1275_v43 = vld [vmem:[%s1379_s11 + $0xe0] ss:$8 sps:$4 sm:$0xff]   ;;  %v1278_v45 = vld [vmem:[%s1379_s11 + $0xf4] ss:$8 sps:$4 sm:$0xff]   ;;  %v1281_v47 = vld [vmem:[%s1379_s11 + $0xf0] ss:$8 sps:$4 sm:$0xff]  }
  0x1c   : > { %v1437_v50 = vld [vmem:[%s1521_s2] ss:$0 sm:$0xff] }
  0x1e   : > { %1075 = vmatpush3.bf16.msra.mxu0 %v1227_v9  ;;  %1190 = vmatpush3.bf16.msra.mxu1 %v1227_v9 }
  0x1f   : > { %1076 = vmatprep.subr.bf16.mxu0 %v1228_v10  ;;  %1183 = vmatprep.subr.bf16.mxu1 %v1228_v10 }
  0x22   : > { %1077 = vmatpush3.bf16.msra.mxu0 %v1229_v13  ;;  %1191 = vmatpush3.bf16.msra.mxu1 %v1229_v13 }
  0x23   : > { %1078 = vmatprep.subr.bf16.mxu0 %v1230_v14  ;;  %1184 = vmatprep.subr.bf16.mxu1 %v1230_v14 }
  0x26   : > { %1079 = vmatpush3.bf16.msra.mxu0 %v1231_v15  ;;  %1192 = vmatpush3.bf16.msra.mxu1 %v1231_v15 }
  0x27   : > { %1080 = vmatprep.subr.bf16.mxu0 %v1232_v16  ;;  %1185 = vmatprep.subr.bf16.mxu1 %v1232_v16 }
  0x2a   : > { %1081 = vmatpush3.bf16.msra.mxu0 %v1233_v17  ;;  %1193 = vmatpush3.bf16.msra.mxu1 %v1233_v17 }
  0x2d   : > { %696 = vmatmul.mubr.bf16.vlgmr.msra.gmra.mxu0 %v1234_v18  ;;  %760 = vmatmul.mubr.bf16.vlgmr.msra.gmra.mxu1 %v1237_v19 }
  0x2e   : > { %703 = vmatprep.mubr.bf16.mxu0 %v1240_v20  ;;  %767 = vmatprep.mubr.bf16.mxu1 %v1242_v21 }
  0x35   : > { %704 = vmatmul.mubr.bf16.gmra.mxu0 %v1244_v22  ;;  %768 = vmatmul.mubr.bf16.gmra.mxu1 %v1245_v23 }
  0x36   : > { %711 = vmatprep.mubr.bf16.mxu0 %v1246_v24  ;;  %775 = vmatprep.mubr.bf16.mxu1 %v1248_v25 }
  0x3d   : > { %712 = vmatmul.mubr.bf16.gmra.mxu0 %v1250_v26  ;;  %776 = vmatmul.mubr.bf16.gmra.mxu1 %v1251_v27 }
  0x3e   : > { %719 = vmatprep.mubr.bf16.mxu0 %v1252_v28  ;;  %783 = vmatprep.mubr.bf16.mxu1 %v1254_v29 }
  0x45   : > { %720 = vmatmul.mubr.bf16.gmra.mxu0 %v1256_v30  ;;  %784 = vmatmul.mubr.bf16.gmra.mxu1 %v1257_v31 }
  0x46   : > { %727 = vmatprep.mubr.bf16.mxu0 %v1258_v32  ;;  %791 = vmatprep.mubr.bf16.mxu1 %v1260_v33 }
  0x4d   : > { %728 = vmatmul.mubr.bf16.gmra.mxu0 %v1262_v34  ;;  %792 = vmatmul.mubr.bf16.gmra.mxu1 %v1263_v35 }
  0x4e   : > { %735 = vmatprep.mubr.bf16.mxu0 %v1264_v36  ;;  %799 = vmatprep.mubr.bf16.mxu1 %v1266_v37 }
  0x55   : > { %736 = vmatmul.mubr.bf16.gmra.mxu0 %v1268_v38  ;;  %800 = vmatmul.mubr.bf16.gmra.mxu1 %v1269_v39 }
  0x56   : > { %743 = vmatprep.mubr.bf16.mxu0 %v1270_v40  ;;  %807 = vmatprep.mubr.bf16.mxu1 %v1272_v41 }
  0x5d   : > { %744 = vmatmul.mubr.bf16.gmra.mxu0 %v1274_v42  ;;  %808 = vmatmul.mubr.bf16.gmra.mxu1 %v1275_v43 }
  0x5e   : > { %751 = vmatprep.mubr.bf16.mxu0 %v1276_v44  ;;  %815 = vmatprep.mubr.bf16.mxu1 %v1278_v45 }
  0x65   : > { %752 = vmatmul.mubr.bf16.gmra.mxu0 %v1280_v46  ;;  %816 = vmatmul.mubr.bf16.gmra.mxu1 %v1281_v47 }
  0xed   : > { %v1082_v48 = vpop.f32.mrf.mxu0  ;;  %v1130_v49 = vpop.f32.mrf.mxu1 }
  0xef   : > { %v1083_v51 = vpop.f32.mrf.mxu0  ;;  %v1131_v52 = vpop.f32.mrf.mxu1 }
  0xf0   : > { %v1084_v53 = vadd.f32 %v1083_v51, %v1082_v48  ;;  %v1132_v54 = vadd.f32 %v1131_v52, %v1130_v49 }
  0xf1   : > { %v1085_v55 = vpop.f32.mrf.mxu0  ;;  %v1133_v56 = vpop.f32.mrf.mxu1 }
  0xf2   : > { %v824_v57 = vadd.f32 %v1084_v53, %v1437_v50  ;;  %v840_v58 = vadd.f32 %v1132_v54, %v1437_v50 }
  0xf3   : > { %v1086_v59 = vpop.f32.mrf.mxu0  ;;  %v1134_v60 = vpop.f32.mrf.mxu1 }
  0xf4   : > { %856 = vst [vmem:[%s1444_s8] sm:$0xff] %v824_v57  ;;  %872 = vst [vmem:[%s1444_s8 + $0x80] sm:$0xff] %v840_v58  ;;  %v1087_v61 = vadd.f32 %v1086_v59, %v1085_v55  ;;  %v1135_v62 = vadd.f32 %v1134_v60, %v1133_v56 }
  0xf5   : > { %v1088_v63 = vpop.f32.mrf.mxu0  ;;  %v1136_v0 = vpop.f32.mrf.mxu1 }
  0xf6   : > { %v825_v1 = vadd.f32 %v1087_v61, %v1437_v50  ;;  %v841_v2 = vadd.f32 %v1135_v62, %v1437_v50 }
  0xf7   : > { %v1089_v3 = vpop.f32.mrf.mxu0  ;;  %v1137_v4 = vpop.f32.mrf.mxu1 }
  0xf8   : > { %857 = vst [vmem:[%s1444_s8 + $0x8] sm:$0xff] %v825_v1  ;;  %873 = vst [vmem:[%s1444_s8 + $0x88] sm:$0xff] %v841_v2  ;;  %v1090_v5 = vadd.f32 %v1089_v3, %v1088_v63  ;;  %v1138_v6 = vadd.f32 %v1137_v4, %v1136_v0 }
  0xf9   : > { %v1091_v7 = vpop.f32.mrf.mxu0  ;;  %v1139_v8 = vpop.f32.mrf.mxu1 }
  0xfa   : > { %v826_v9 = vadd.f32 %v1090_v5, %v1437_v50  ;;  %v842_v10 = vadd.f32 %v1138_v6, %v1437_v50 }
  0xfb   : > { %v1092_v11 = vpop.f32.mrf.mxu0  ;;  %v1140_v12 = vpop.f32.mrf.mxu1 }
  0xfc   : > { %858 = vst [vmem:[%s1444_s8 + $0x10] sm:$0xff] %v826_v9  ;;  %874 = vst [vmem:[%s1444_s8 + $0x90] sm:$0xff] %v842_v10  ;;  %v1093_v13 = vadd.f32 %v1092_v11, %v1091_v7  ;;  %v1141_v14 = vadd.f32 %v1140_v12, %v1139_v8 }
  0xfd   : > { %v1094_v15 = vpop.f32.mrf.mxu0  ;;  %v1142_v16 = vpop.f32.mrf.mxu1 }
  0xfe   : > { %v827_v17 = vadd.f32 %v1093_v13, %v1437_v50  ;;  %v843_v18 = vadd.f32 %v1141_v14, %v1437_v50 }
  0xff   : > { %v1095_v19 = vpop.f32.mrf.mxu0  ;;  %v1143_v20 = vpop.f32.mrf.mxu1 }
 0x100   : > { %859 = vst [vmem:[%s1444_s8 + $0x18] sm:$0xff] %v827_v17  ;;  %875 = vst [vmem:[%s1444_s8 + $0x98] sm:$0xff] %v843_v18  ;;  %v1096_v21 = vadd.f32 %v1095_v19, %v1094_v15  ;;  %v1144_v22 = vadd.f32 %v1143_v20, %v1142_v16 }
 0x101   : > { %v1097_v23 = vpop.f32.mrf.mxu0  ;;  %v1145_v24 = vpop.f32.mrf.mxu1 }
 0x102   : > { %v828_v25 = vadd.f32 %v1096_v21, %v1437_v50  ;;  %v844_v26 = vadd.f32 %v1144_v22, %v1437_v50 }
 0x103   : > { %v1098_v27 = vpop.f32.mrf.mxu0  ;;  %v1146_v28 = vpop.f32.mrf.mxu1 }
 0x104   : > { %860 = vst [vmem:[%s1444_s8 + $0x20] sm:$0xff] %v828_v25  ;;  %876 = vst [vmem:[%s1444_s8 + $0xa0] sm:$0xff] %v844_v26  ;;  %v1099_v29 = vadd.f32 %v1098_v27, %v1097_v23  ;;  %v1147_v30 = vadd.f32 %v1146_v28, %v1145_v24 }
 0x105   : > { %v1100_v31 = vpop.f32.mrf.mxu0  ;;  %v1148_v32 = vpop.f32.mrf.mxu1 }
 0x106   : > { %v829_v33 = vadd.f32 %v1099_v29, %v1437_v50  ;;  %v845_v34 = vadd.f32 %v1147_v30, %v1437_v50 }
 0x107   : > { %v1101_v35 = vpop.f32.mrf.mxu0  ;;  %v1149_v36 = vpop.f32.mrf.mxu1 }
 0x108   : > { %861 = vst [vmem:[%s1444_s8 + $0x28] sm:$0xff] %v829_v33  ;;  %877 = vst [vmem:[%s1444_s8 + $0xa8] sm:$0xff] %v845_v34  ;;  %v1102_v37 = vadd.f32 %v1101_v35, %v1100_v31  ;;  %v1150_v38 = vadd.f32 %v1149_v36, %v1148_v32 }
 0x109   : > { %v1103_v39 = vpop.f32.mrf.mxu0  ;;  %v1151_v40 = vpop.f32.mrf.mxu1 }
 0x10a   : > { %v830_v41 = vadd.f32 %v1102_v37, %v1437_v50  ;;  %v846_v42 = vadd.f32 %v1150_v38, %v1437_v50 }
 0x10b   : > { %v1104_v43 = vpop.f32.mrf.mxu0  ;;  %v1152_v44 = vpop.f32.mrf.mxu1 }
 0x10c   : > { %862 = vst [vmem:[%s1444_s8 + $0x30] sm:$0xff] %v830_v41  ;;  %878 = vst [vmem:[%s1444_s8 + $0xb0] sm:$0xff] %v846_v42  ;;  %v1105_v45 = vadd.f32 %v1104_v43, %v1103_v39  ;;  %v1153_v46 = vadd.f32 %v1152_v44, %v1151_v40 }
 0x10d   : > { %v1106_v47 = vpop.f32.mrf.mxu0  ;;  %v1154_v48 = vpop.f32.mrf.mxu1 }
 0x10e   : > { %v831_v49 = vadd.f32 %v1105_v45, %v1437_v50  ;;  %v847_v51 = vadd.f32 %v1153_v46, %v1437_v50 }
 0x10f   : > { %v1107_v52 = vpop.f32.mrf.mxu0  ;;  %v1155_v53 = vpop.f32.mrf.mxu1 }
 0x110   : > { %863 = vst [vmem:[%s1444_s8 + $0x38] sm:$0xff] %v831_v49  ;;  %879 = vst [vmem:[%s1444_s8 + $0xb8] sm:$0xff] %v847_v51  ;;  %v1108_v54 = vadd.f32 %v1107_v52, %v1106_v47  ;;  %v1156_v55 = vadd.f32 %v1155_v53, %v1154_v48 }
 0x111   : > { %v1109_v56 = vpop.f32.mrf.mxu0  ;;  %v1157_v57 = vpop.f32.mrf.mxu1 }
 0x112   : > { %v832_v58 = vadd.f32 %v1108_v54, %v1437_v50  ;;  %v848_v59 = vadd.f32 %v1156_v55, %v1437_v50 }
 0x113   : > { %v1110_v60 = vpop.f32.mrf.mxu0  ;;  %v1158_v61 = vpop.f32.mrf.mxu1 }
 0x114   : > { %864 = vst [vmem:[%s1444_s8 + $0x40] sm:$0xff] %v832_v58  ;;  %880 = vst [vmem:[%s1444_s8 + $0xc0] sm:$0xff] %v848_v59  ;;  %v1111_v62 = vadd.f32 %v1110_v60, %v1109_v56  ;;  %v1159_v63 = vadd.f32 %v1158_v61, %v1157_v57 }
 0x115   : > { %v1112_v0 = vpop.f32.mrf.mxu0  ;;  %v1160_v1 = vpop.f32.mrf.mxu1 }
 0x116   : > { %v833_v2 = vadd.f32 %v1111_v62, %v1437_v50  ;;  %v849_v3 = vadd.f32 %v1159_v63, %v1437_v50 }
 0x117   : > { %v1113_v4 = vpop.f32.mrf.mxu0  ;;  %v1161_v5 = vpop.f32.mrf.mxu1 }
 0x118   : > { %865 = vst [vmem:[%s1444_s8 + $0x48] sm:$0xff] %v833_v2  ;;  %881 = vst [vmem:[%s1444_s8 + $0xc8] sm:$0xff] %v849_v3  ;;  %v1114_v6 = vadd.f32 %v1113_v4, %v1112_v0  ;;  %v1162_v7 = vadd.f32 %v1161_v5, %v1160_v1 }
 0x119   : > { %v1115_v8 = vpop.f32.mrf.mxu0  ;;  %v1163_v9 = vpop.f32.mrf.mxu1 }
 0x11a   : > { %v834_v10 = vadd.f32 %v1114_v6, %v1437_v50  ;;  %v850_v11 = vadd.f32 %v1162_v7, %v1437_v50 }
 0x11b   : > { %v1116_v12 = vpop.f32.mrf.mxu0  ;;  %v1164_v13 = vpop.f32.mrf.mxu1 }
 0x11c   : > { %866 = vst [vmem:[%s1444_s8 + $0x50] sm:$0xff] %v834_v10  ;;  %882 = vst [vmem:[%s1444_s8 + $0xd0] sm:$0xff] %v850_v11  ;;  %v1117_v14 = vadd.f32 %v1116_v12, %v1115_v8  ;;  %v1165_v15 = vadd.f32 %v1164_v13, %v1163_v9 }
 0x11d   : > { %v1118_v16 = vpop.f32.mrf.mxu0  ;;  %v1166_v17 = vpop.f32.mrf.mxu1 }
 0x11e   : > { %v835_v18 = vadd.f32 %v1117_v14, %v1437_v50  ;;  %v851_v19 = vadd.f32 %v1165_v15, %v1437_v50 }
 0x11f   : > { %v1119_v20 = vpop.f32.mrf.mxu0  ;;  %v1167_v21 = vpop.f32.mrf.mxu1 }
 0x120   : > { %867 = vst [vmem:[%s1444_s8 + $0x58] sm:$0xff] %v835_v18  ;;  %883 = vst [vmem:[%s1444_s8 + $0xd8] sm:$0xff] %v851_v19  ;;  %v1120_v22 = vadd.f32 %v1119_v20, %v1118_v16  ;;  %v1168_v23 = vadd.f32 %v1167_v21, %v1166_v17 }
 0x121   : > { %v1121_v24 = vpop.f32.mrf.mxu0  ;;  %v1169_v25 = vpop.f32.mrf.mxu1 }
 0x122   : > { %v836_v26 = vadd.f32 %v1120_v22, %v1437_v50  ;;  %v852_v27 = vadd.f32 %v1168_v23, %v1437_v50 }
 0x123   : > { %v1122_v28 = vpop.f32.mrf.mxu0  ;;  %v1170_v29 = vpop.f32.mrf.mxu1 }
 0x124   : > { %868 = vst [vmem:[%s1444_s8 + $0x60] sm:$0xff] %v836_v26  ;;  %884 = vst [vmem:[%s1444_s8 + $0xe0] sm:$0xff] %v852_v27  ;;  %v1123_v30 = vadd.f32 %v1122_v28, %v1121_v24  ;;  %v1171_v31 = vadd.f32 %v1170_v29, %v1169_v25 }
 0x125   : > { %v1124_v32 = vpop.f32.mrf.mxu0  ;;  %v1172_v33 = vpop.f32.mrf.mxu1 }
 0x126   : > { %v837_v34 = vadd.f32 %v1123_v30, %v1437_v50  ;;  %v853_v35 = vadd.f32 %v1171_v31, %v1437_v50 }
 0x127   : > { %v1125_v36 = vpop.f32.mrf.mxu0  ;;  %v1173_v37 = vpop.f32.mrf.mxu1 }
 0x128   : > { %869 = vst [vmem:[%s1444_s8 + $0x68] sm:$0xff] %v837_v34  ;;  %885 = vst [vmem:[%s1444_s8 + $0xe8] sm:$0xff] %v853_v35  ;;  %v1126_v38 = vadd.f32 %v1125_v36, %v1124_v32  ;;  %v1174_v39 = vadd.f32 %v1173_v37, %v1172_v33 }
 0x129   : > { %v1127_v40 = vpop.f32.mrf.mxu0  ;;  %v1175_v41 = vpop.f32.mrf.mxu1 }
 0x12a   : > { %v838_v42 = vadd.f32 %v1126_v38, %v1437_v50  ;;  %v854_v43 = vadd.f32 %v1174_v39, %v1437_v50 }
 0x12b   : > { %v1128_v44 = vpop.f32.mrf.mxu0  ;;  %v1176_v45 = vpop.f32.mrf.mxu1 }
 0x12c   : > { %870 = vst [vmem:[%s1444_s8 + $0x70] sm:$0xff] %v838_v42  ;;  %886 = vst [vmem:[%s1444_s8 + $0xf0] sm:$0xff] %v854_v43  ;;  %v1129_v46 = vadd.f32 %v1128_v44, %v1127_v40  ;;  %v1177_v47 = vadd.f32 %v1176_v45, %v1175_v41 }
 0x12e   : > { %v839_v48 = vadd.f32 %v1129_v46, %v1437_v50  ;;  %v855_v49 = vadd.f32 %v1177_v47, %v1437_v50 }
 0x130   : > { %871 = vst [vmem:[%s1444_s8 + $0x78] sm:$0xff] %v839_v48  ;;  %887 = vst [vmem:[%s1444_s8 + $0xf8] sm:$0xff] %v855_v49 }
 0x131 PF: > { %s13_s14 = sadd.s32 1, %s1304_s14   ;;  %s1523_s12 = smov %s1300_s13 }
 0x132   : > { %p10_p5 = scmp.ge.s32.totalorder %s13_s14, 4   ;;  %s1524_s13 = smov %s1526_s15 }
 0x134   :  { %12 = sbr.rel (!%p10_p5) target bundleno = 2 (0x2), region = 72 }

// kernel: _forward.43
= control target key start
LH: loop header
LB: loop body
LE: loop exit
PB: predicated region body
PF: predicated region fallthrough
CT: control target
= control target key end

     0   :  { %s1127_s12 = smov 0   ;;  %s1129_s13 = smov 0   ;;  %s1394_s0 = inlined_call_operand.vmem [shape: bf16[128,768], index: 0, kind: input, shape index: {}]   ;;  %s1395_s1 = inlined_call_operand.vmem [shape: bf16[768,128], index: 1, kind: input, shape index: {}]   ;;  %s1396_s2 = inlined_call_operand.vmem [shape: f32[1,128], index: 2, kind: input, shape index: {}]   ;;  %s1397_s3 = inlined_call_operand.vmem [shape: f32[128,128], index: 3, kind: output, shape index: {}]  }
   0x1   :  { %s1131_s14 = smov 0   ;;  %s1133_s15 = smov 0  }
   0x2   :  { %s1135_s16 = smov 0  }
   0x3 LB: > { %s25_s17 = sadd.s32 1, %s1101_s15  ;;  %p48_p1 = scmp.ne.s32.totalorder %s1093_s13, %s1089_s12  ;;  %s1105_s16 = sphi %s1135_s16, %s13_s16   ;;  %s1101_s15 = sphi %s1133_s15, %s1401_s15   ;;  %s1097_s14 = sphi %s1131_s14, %s1400_s14   ;;  %s1093_s13 = sphi %s1129_s13, %s1399_s13   ;;  %s1089_s12 = sphi %s1127_s12, %s1398_s12  }
   0x4   : > { %p26_p0 = scmp.ge.s32.totalorder %s25_s17, 3  ;;  %p49_p2 = scmp.eq.s32.totalorder %s1105_s16, 0 }
   0x5   : > { %s41_s19 = sadd.s32 1, %s1093_s13  ;;  %p860_p5 = scmp.ge.s32.totalorder %s1105_s16, 3 }
   0x6   : > { %s1403_s17 = smov (%p26_p0, %s25_s17), 0  ;;  %p50_p3 = por %p49_p2, %p48_p1 }
   0x7   : > { %s37_s18 = ssub.s32 %s1101_s15, %s1403_s17  ;;  %162 = sbr.rel (%p860_p5) target bundleno = 24 (0x18), region = 20 }
   0x8   : > { %p39_p4 = scmp.eq.s32.totalorder %s37_s18, 0 }
   0xa   : > { %s1162_s20 = scalar_select %p39_p4, %s1093_s13, %s41_s19  }
   0xc   : > { %165 = sbr.rel (!%p50_p3) target bundleno = 24 (0x18), region = 24  ;;  %s167_s21 = sand.u32 (%p50_p3), 1, %s1093_s13  }
   0xd   : > { %s906_s22 = sshll.u32 (%p50_p3), %s1101_s15, 3  ;;  %s861_s23 = sshll.u32 (%p50_p3), %s167_s21, 7 }
   0xe   : > { %s1170_s26 = scalar_lea.vmem (%p50_p3), %s1394_s0, %s906_s22  ;;  %s169_s27 = scalar_lea.vmem (%p50_p3), [#allocation2], %s861_s23 }
   0xf   : > { %v234_v0 = vld [vmem:[%s1170_s26] sm:$0xff] (%p50_p3)  ;;  %v236_v1 = vld [vmem:[%s1170_s26 + $0x18] sm:$0xff] (%p50_p3)  ;;  %v238_v2 = vld [vmem:[%s1170_s26 + $0x30] sm:$0xff] (%p50_p3) }
  0x10   : > { %235 = vst [vmem:[%s169_s27] sm:$0xff] (%p50_p3), %v234_v0  ;;  %237 = vst [vmem:[%s169_s27 + $0x8] sm:$0xff] (%p50_p3), %v236_v1  ;;  %v240_v3 = vld [vmem:[%s1170_s26 + $0x48] sm:$0xff] (%p50_p3)  ;;  %v242_v4 = vld [vmem:[%s1170_s26 + $0x60] sm:$0xff] (%p50_p3) }
  0x11   : > { %239 = vst [vmem:[%s169_s27 + $0x10] sm:$0xff] %v238_v2  ;;  %v244_v5 = vld [vmem:[%s1170_s26 + $0x78] sm:$0xff]  ;;  %241 = vst [vmem:[%s169_s27 + $0x18] sm:$0xff] %v240_v3  ;;  %v246_v6 = vld [vmem:[%s1170_s26 + $0x90] sm:$0xff] }
  0x12   : > { %243 = vst [vmem:[%s169_s27 + $0x20] sm:$0xff] %v242_v4  ;;  %245 = vst [vmem:[%s169_s27 + $0x28] sm:$0xff] %v244_v5  ;;  %v248_v7 = vld [vmem:[%s1170_s26 + $0xa8] sm:$0xff]  ;;  %v250_v8 = vld [vmem:[%s1170_s26 + $0xc0] sm:$0xff] }
  0x13   : > { %247 = vst [vmem:[%s169_s27 + $0x30] sm:$0xff] %v246_v6  ;;  %249 = vst [vmem:[%s169_s27 + $0x38] sm:$0xff] %v248_v7  ;;  %v252_v9 = vld [vmem:[%s1170_s26 + $0xd8] sm:$0xff]  ;;  %v254_v10 = vld [vmem:[%s1170_s26 + $0xf0] sm:$0xff] }
  0x14   : > { %251 = vst [vmem:[%s169_s27 + $0x40] sm:$0xff] %v250_v8  ;;  %v256_v11 = vld [vmem:[%s1170_s26 + $0x108] sm:$0xff]  ;;  %253 = vst [vmem:[%s169_s27 + $0x48] sm:$0xff] %v252_v9  ;;  %v258_v12 = vld [vmem:[%s1170_s26 + $0x120] sm:$0xff] }
  0x15   : > { %255 = vst [vmem:[%s169_s27 + $0x50] sm:$0xff] %v254_v10  ;;  %257 = vst [vmem:[%s169_s27 + $0x58] sm:$0xff] %v256_v11  ;;  %v260_v13 = vld [vmem:[%s1170_s26 + $0x138] sm:$0xff]  ;;  %v262_v14 = vld [vmem:[%s1170_s26 + $0x150] sm:$0xff] }
  0x16   : > { %259 = vst [vmem:[%s169_s27 + $0x60] sm:$0xff] %v258_v12  ;;  %261 = vst [vmem:[%s169_s27 + $0x68] sm:$0xff] %v260_v13  ;;  %v264_v15 = vld [vmem:[%s1170_s26 + $0x168] sm:$0xff] }
  0x17   : > { %263 = vst [vmem:[%s169_s27 + $0x70] sm:$0xff] %v262_v14  ;;  %265 = vst [vmem:[%s169_s27 + $0x78] sm:$0xff] %v264_v15 }
  0x18 PF: > { %p864_p6 = scmp.ge.s32.totalorder %s1105_s16, 1  ;;  %p282_p7 = scmp.lt.s32.totalorder %s1105_s16, 4 }
  0x1a   : > { %p283_p8 = pnand %p864_p6, %p282_p7 }
  0x1b   : > { %s289_s28 = sand.u32 (!%p283_p8), 1, %s1089_s12   ;;  %s866_s29 = sshll.u32 (!%p283_p8), %s1097_s14, 5 }
  0x1c   : > { %286 = sbr.rel (%p283_p8) target bundleno = 308 (0x134), region = 66  ;;  %s865_s30 = sshll.u32 (!%p283_p8), %s289_s28, 7 }
  0x1d   : > { %p329_p9 = scmp.lt.s32.totalorder (!%p283_p8), %s866_s29, 95  ;;  %s1197_s8 = scalar_lea.vmem (!%p283_p8), [#allocation2], %s865_s30 }
  0x1e   : > { %p868_p10 = scmp.ne.s32.totalorder (!%p283_p8), %s1097_s14, 0 }
  0x21   : > { %s1405_s29 = smov (!%p329_p9, %s866_s29), 95  ;;  %353 = sbr.rel (%p868_p10) target bundleno = 47 (0x2f), region = 74 }
  0x22   : > { %s867_s4 = sshll.u32 %s1405_s29, 2 }
  0x23   : > { %s1195_s7 = scalar_lea.vmem %s1395_s1, %s867_s4 }
  0x26   : > { %v869_v16 = vld [vmem:[%s1396_s2] ss:$0 sm:$0xff] }
  0x27   : > { %361 = vst [vmem:[%s1397_s3] sm:$0xff] %v869_v16  ;;  %362 = vst [vmem:[%s1397_s3 + $0x8] sm:$0xff] %v869_v16 }
  0x28   : > { %363 = vst [vmem:[%s1397_s3 + $0x10] sm:$0xff] %v869_v16  ;;  %364 = vst [vmem:[%s1397_s3 + $0x18] sm:$0xff] %v869_v16 }
  0x29   : > { %365 = vst [vmem:[%s1397_s3 + $0x20] sm:$0xff] %v869_v16  ;;  %366 = vst [vmem:[%s1397_s3 + $0x28] sm:$0xff] %v869_v16 }
  0x2a   : > { %367 = vst [vmem:[%s1397_s3 + $0x30] sm:$0xff] %v869_v16  ;;  %368 = vst [vmem:[%s1397_s3 + $0x38] sm:$0xff] %v869_v16 }
  0x2b   : > { %369 = vst [vmem:[%s1397_s3 + $0x40] sm:$0xff] %v869_v16  ;;  %370 = vst [vmem:[%s1397_s3 + $0x48] sm:$0xff] %v869_v16 }
  0x2c   : > { %371 = vst [vmem:[%s1397_s3 + $0x50] sm:$0xff] %v869_v16  ;;  %372 = vst [vmem:[%s1397_s3 + $0x58] sm:$0xff] %v869_v16 }
  0x2d   : > { %373 = vst [vmem:[%s1397_s3 + $0x60] sm:$0xff] %v869_v16  ;;  %374 = vst [vmem:[%s1397_s3 + $0x68] sm:$0xff] %v869_v16 }
  0x2e   : > { %375 = vst [vmem:[%s1397_s3 + $0x70] sm:$0xff] %v869_v16  ;;  %376 = vst [vmem:[%s1397_s3 + $0x78] sm:$0xff] %v869_v16 }
  0x2f PF: > { %v1027_v17 = vld [vmem:[%s1195_s7 + $0x78] sm:$0xff]   ;;  %v1029_v19 = vld [vmem:[%s1195_s7 + $0x70] sm:$0xff]   ;;  %v1031_v21 = vld [vmem:[%s1195_s7 + $0x68] sm:$0xff]  }
  0x30   : > { %v1028_v18 = vld [vmem:[%s1195_s7 + $0x38] sm:$0xff]   ;;  %907 = vmatprep.subr.bf16.mxu0 %v1027_v17  ;;  %971 = vmatprep.subr.bf16.mxu1 %v1027_v17  ;;  %v1030_v20 = vld [vmem:[%s1195_s7 + $0x30] sm:$0xff]   ;;  %v1032_v22 = vld [vmem:[%s1195_s7 + $0x28] sm:$0xff]  }
  0x31   : > { %908 = vmatpush3.bf16.msra.mxu0 %v1028_v18  ;;  %979 = vmatpush3.bf16.msra.mxu1 %v1028_v18  ;;  %v1033_v23 = vld [vmem:[%s1195_s7 + $0x60] sm:$0xff]   ;;  %v1035_v25 = vld [vmem:[%s1195_s7 + $0x58] sm:$0xff]   ;;  %v1037_v27 = vld [vmem:[%s1195_s7 + $0x50] sm:$0xff]  }
  0x32   : > { %909 = vmatprep.subr.bf16.mxu0 %v1029_v19  ;;  %972 = vmatprep.subr.bf16.mxu1 %v1029_v19  ;;  %v1034_v24 = vld [vmem:[%s1195_s7 + $0x20] sm:$0xff]   ;;  %v1036_v26 = vld [vmem:[%s1195_s7 + $0x18] sm:$0xff]   ;;  %v1038_v30 = vld [vmem:[%s1195_s7 + $0x10] sm:$0xff]  }
  0x33   : > { %v1045_v28 = vld [vmem:[%s1197_s8 + $0x4] ss:$8 sps:$4 sm:$0xff]   ;;  %v1043_v35 = vld [vmem:[%s1197_s8] ss:$8 sps:$4 sm:$0xff]   ;;  %v1049_v37 = vld [vmem:[%s1197_s8 + $0x14] ss:$8 sps:$4 sm:$0xff]  }
  0x34   : > { %v1048_v29 = vld [vmem:[%s1197_s8 + $0x44] ss:$8 sps:$4 sm:$0xff]   ;;  %649 = vmatprep.mubr.bf16.mxu0 %v1045_v28  ;;  %v1046_v36 = vld [vmem:[%s1197_s8 + $0x40] ss:$8 sps:$4 sm:$0xff]   ;;  %v1051_v38 = vld [vmem:[%s1197_s8 + $0x54] ss:$8 sps:$4 sm:$0xff]  }
  0x35   : > { %910 = vmatpush3.bf16.msra.mxu0 %v1030_v20  ;;  %980 = vmatpush3.bf16.msra.mxu1 %v1030_v20  ;;  %v1039_v31 = vld [vmem:[%s1195_s7 + $0x48] sm:$0xff]   ;;  %v1041_v33 = vld [vmem:[%s1195_s7 + $0x40] sm:$0xff]   ;;  %v1053_v39 = vld [vmem:[%s1197_s8 + $0x10] ss:$8 sps:$4 sm:$0xff]  }
  0x36   : > { %911 = vmatprep.subr.bf16.mxu0 %v1031_v21  ;;  %973 = vmatprep.subr.bf16.mxu1 %v1031_v21  ;;  %v1040_v32 = vld [vmem:[%s1195_s7 + $0x8] sm:$0xff]   ;;  %v1042_v34 = vld [vmem:[%s1195_s7] sm:$0xff]   ;;  %v1054_v40 = vld [vmem:[%s1197_s8 + $0x50] ss:$8 sps:$4 sm:$0xff]  }
  0x37   : > { %681 = vmatprep.mubr.bf16.mxu1 %v1048_v29  ;;  %v1055_v41 = vld [vmem:[%s1197_s8 + $0x24] ss:$8 sps:$4 sm:$0xff]   ;;  %v1059_v43 = vld [vmem:[%s1197_s8 + $0x20] ss:$8 sps:$4 sm:$0xff]   ;;  %v1061_v45 = vld [vmem:[%s1197_s8 + $0x34] ss:$8 sps:$4 sm:$0xff]  }
  0x38   : > { %v1057_v42 = vld [vmem:[%s1197_s8 + $0x64] ss:$8 sps:$4 sm:$0xff]   ;;  %v1060_v44 = vld [vmem:[%s1197_s8 + $0x60] ss:$8 sps:$4 sm:$0xff]   ;;  %v1063_v46 = vld [vmem:[%s1197_s8 + $0x74] ss:$8 sps:$4 sm:$0xff]  }
  0x39   : > { %912 = vmatpush3.bf16.msra.mxu0 %v1032_v22  ;;  %981 = vmatpush3.bf16.msra.mxu1 %v1032_v22  ;;  %v1065_v47 = vld [vmem:[%s1197_s8 + $0x30] ss:$8 sps:$4 sm:$0xff]   ;;  %v377_v51 = vld [vmem:[%s1397_s3] sm:$0xff]  ;;  %v378_v61 = vld [vmem:[%s1397_s3 + $0x8] sm:$0xff] }
  0x3a   : > { %913 = vmatprep.subr.bf16.mxu0 %v1033_v23  ;;  %974 = vmatprep.subr.bf16.mxu1 %v1033_v23  ;;  %v1066_v48 = vld [vmem:[%s1197_s8 + $0x70] ss:$8 sps:$4 sm:$0xff]   ;;  %v385_v53 = vld [vmem:[%s1397_s3 + $0x40] sm:$0xff]  ;;  %v386_v63 = vld [vmem:[%s1397_s3 + $0x48] sm:$0xff] }
  0x3b   : > { %v379_v7 = vld [vmem:[%s1397_s3 + $0x10] sm:$0xff]  ;;  %v380_v17 = vld [vmem:[%s1397_s3 + $0x18] sm:$0xff]  ;;  %v389_v29 = vld [vmem:[%s1397_s3 + $0x60] sm:$0xff] }
  0x3c   : > { %v387_v9 = vld [vmem:[%s1397_s3 + $0x50] sm:$0xff]  ;;  %v388_v19 = vld [vmem:[%s1397_s3 + $0x58] sm:$0xff] }
  0x3d   : > { %914 = vmatpush3.bf16.msra.mxu0 %v1034_v24  ;;  %982 = vmatpush3.bf16.msra.mxu1 %v1034_v24 }
  0x3e   : > { %915 = vmatprep.subr.bf16.mxu0 %v1035_v25  ;;  %975 = vmatprep.subr.bf16.mxu1 %v1035_v25 }
  0x41   : > { %916 = vmatpush3.bf16.msra.mxu0 %v1036_v26  ;;  %983 = vmatpush3.bf16.msra.mxu1 %v1036_v26 }
  0x42   : > { %917 = vmatprep.subr.bf16.mxu0 %v1037_v27  ;;  %976 = vmatprep.subr.bf16.mxu1 %v1037_v27  ;;  %v381_v27 = vld [vmem:[%s1397_s3 + $0x20] sm:$0xff] }
  0x45   : > { %918 = vmatpush3.bf16.msra.mxu0 %v1038_v30  ;;  %984 = vmatpush3.bf16.msra.mxu1 %v1038_v30 }
  0x46   : > { %919 = vmatprep.subr.bf16.mxu0 %v1039_v31  ;;  %977 = vmatprep.subr.bf16.mxu1 %v1039_v31 }
  0x49   : > { %920 = vmatpush3.bf16.msra.mxu0 %v1040_v32  ;;  %985 = vmatpush3.bf16.msra.mxu1 %v1040_v32 }
  0x4a   : > { %921 = vmatprep.subr.bf16.mxu0 %v1041_v33  ;;  %978 = vmatprep.subr.bf16.mxu1 %v1041_v33 }
  0x4d   : > { %922 = vmatpush3.bf16.msra.mxu0 %v1042_v34  ;;  %986 = vmatpush3.bf16.msra.mxu1 %v1042_v34 }
  0x50   : > { %650 = vmatmul.mubr.bf16.vlgmr.msra.gmra.mxu0 %v1043_v35  ;;  %682 = vmatmul.mubr.bf16.vlgmr.msra.gmra.mxu1 %v1046_v36 }
  0x51   : > { %657 = vmatprep.mubr.bf16.mxu0 %v1049_v37  ;;  %689 = vmatprep.mubr.bf16.mxu1 %v1051_v38  ;;  %v382_v37 = vld [vmem:[%s1397_s3 + $0x28] sm:$0xff] }
  0x58   : > { %658 = vmatmul.mubr.bf16.gmra.mxu0 %v1053_v39  ;;  %690 = vmatmul.mubr.bf16.gmra.mxu1 %v1054_v40  ;;  %v390_v39 = vld [vmem:[%s1397_s3 + $0x68] sm:$0xff] }
  0x59   : > { %665 = vmatprep.mubr.bf16.mxu0 %v1055_v41  ;;  %697 = vmatprep.mubr.bf16.mxu1 %v1057_v42 }
  0x60   : > { %666 = vmatmul.mubr.bf16.gmra.mxu0 %v1059_v43  ;;  %698 = vmatmul.mubr.bf16.gmra.mxu1 %v1060_v44 }
  0x61   : > { %673 = vmatprep.mubr.bf16.mxu0 %v1061_v45  ;;  %705 = vmatprep.mubr.bf16.mxu1 %v1063_v46 }
  0x68   : > { %674 = vmatmul.mubr.bf16.gmra.mxu0 %v1065_v47  ;;  %706 = vmatmul.mubr.bf16.gmra.mxu1 %v1066_v48  ;;  %v383_v47 = vld [vmem:[%s1397_s3 + $0x30] sm:$0xff] }
 0x110   : > { %v923_v49 = vpop.f32.mrf.mxu0  ;;  %v947_v50 = vpop.f32.mrf.mxu1 }
 0x112   : > { %v924_v52 = vpop.f32.mrf.mxu0  ;;  %v948_v54 = vpop.f32.mrf.mxu1 }
 0x113   : > { %v925_v55 = vadd.f32 %v924_v52, %v923_v49  ;;  %v949_v56 = vadd.f32 %v948_v54, %v947_v50  ;;  %v391_v49 = vld [vmem:[%s1397_s3 + $0x70] sm:$0xff] }
 0x114   : > { %v926_v57 = vpop.f32.mrf.mxu0  ;;  %v950_v58 = vpop.f32.mrf.mxu1 }
 0x115   : > { %v714_v59 = vadd.f32 %v925_v55, %v377_v51  ;;  %v722_v60 = vadd.f32 %v949_v56, %v385_v53 }
 0x116   : > { %v927_v62 = vpop.f32.mrf.mxu0  ;;  %v951_v0 = vpop.f32.mrf.mxu1 }
 0x117   : > { %730 = vst [vmem:[%s1397_s3] sm:$0xff] %v714_v59  ;;  %738 = vst [vmem:[%s1397_s3 + $0x40] sm:$0xff] %v722_v60  ;;  %v928_v1 = vadd.f32 %v927_v62, %v926_v57  ;;  %v952_v2 = vadd.f32 %v951_v0, %v950_v58  ;;  %v384_v57 = vld [vmem:[%s1397_s3 + $0x38] sm:$0xff] }
 0x118   : > { %v929_v3 = vpop.f32.mrf.mxu0  ;;  %v953_v4 = vpop.f32.mrf.mxu1  ;;  %v392_v59 = vld [vmem:[%s1397_s3 + $0x78] sm:$0xff] }
 0x119   : > { %v715_v5 = vadd.f32 %v928_v1, %v378_v61  ;;  %v723_v6 = vadd.f32 %v952_v2, %v386_v63 }
 0x11a   : > { %v930_v8 = vpop.f32.mrf.mxu0  ;;  %v954_v10 = vpop.f32.mrf.mxu1 }
 0x11b   : > { %731 = vst [vmem:[%s1397_s3 + $0x8] sm:$0xff] %v715_v5  ;;  %739 = vst [vmem:[%s1397_s3 + $0x48] sm:$0xff] %v723_v6  ;;  %v931_v11 = vadd.f32 %v930_v8, %v929_v3  ;;  %v955_v12 = vadd.f32 %v954_v10, %v953_v4 }
 0x11c   : > { %v932_v13 = vpop.f32.mrf.mxu0  ;;  %v956_v14 = vpop.f32.mrf.mxu1 }
 0x11d   : > { %v716_v15 = vadd.f32 %v931_v11, %v379_v7  ;;  %v724_v16 = vadd.f32 %v955_v12, %v387_v9 }
 0x11e   : > { %v933_v18 = vpop.f32.mrf.mxu0  ;;  %v957_v20 = vpop.f32.mrf.mxu1 }
 0x11f   : > { %732 = vst [vmem:[%s1397_s3 + $0x10] sm:$0xff] %v716_v15  ;;  %740 = vst [vmem:[%s1397_s3 + $0x50] sm:$0xff] %v724_v16  ;;  %v934_v21 = vadd.f32 %v933_v18, %v932_v13  ;;  %v958_v22 = vadd.f32 %v957_v20, %v956_v14 }
 0x120   : > { %v935_v23 = vpop.f32.mrf.mxu0  ;;  %v959_v24 = vpop.f32.mrf.mxu1 }
 0x121   : > { %v717_v25 = vadd.f32 %v934_v21, %v380_v17  ;;  %v725_v26 = vadd.f32 %v958_v22, %v388_v19 }
 0x122   : > { %v936_v28 = vpop.f32.mrf.mxu0  ;;  %v960_v30 = vpop.f32.mrf.mxu1 }
 0x123   : > { %733 = vst [vmem:[%s1397_s3 + $0x18] sm:$0xff] %v717_v25  ;;  %741 = vst [vmem:[%s1397_s3 + $0x58] sm:$0xff] %v725_v26  ;;  %v937_v31 = vadd.f32 %v936_v28, %v935_v23  ;;  %v961_v32 = vadd.f32 %v960_v30, %v959_v24 }
 0x124   : > { %v938_v33 = vpop.f32.mrf.mxu0  ;;  %v962_v34 = vpop.f32.mrf.mxu1 }
 0x125   : > { %v718_v35 = vadd.f32 %v937_v31, %v381_v27  ;;  %v726_v36 = vadd.f32 %v961_v32, %v389_v29 }
 0x126   : > { %v939_v38 = vpop.f32.mrf.mxu0  ;;  %v963_v40 = vpop.f32.mrf.mxu1 }
 0x127   : > { %734 = vst [vmem:[%s1397_s3 + $0x20] sm:$0xff] %v718_v35  ;;  %742 = vst [vmem:[%s1397_s3 + $0x60] sm:$0xff] %v726_v36  ;;  %v940_v41 = vadd.f32 %v939_v38, %v938_v33  ;;  %v964_v42 = vadd.f32 %v963_v40, %v962_v34 }
 0x128   : > { %v941_v43 = vpop.f32.mrf.mxu0  ;;  %v965_v44 = vpop.f32.mrf.mxu1 }
 0x129   : > { %v719_v45 = vadd.f32 %v940_v41, %v382_v37  ;;  %v727_v46 = vadd.f32 %v964_v42, %v390_v39 }
 0x12a   : > { %v942_v48 = vpop.f32.mrf.mxu0  ;;  %v966_v50 = vpop.f32.mrf.mxu1 }
 0x12b   : > { %735 = vst [vmem:[%s1397_s3 + $0x28] sm:$0xff] %v719_v45  ;;  %743 = vst [vmem:[%s1397_s3 + $0x68] sm:$0xff] %v727_v46  ;;  %v943_v51 = vadd.f32 %v942_v48, %v941_v43  ;;  %v967_v52 = vadd.f32 %v966_v50, %v965_v44 }
 0x12c   : > { %v944_v53 = vpop.f32.mrf.mxu0  ;;  %v968_v54 = vpop.f32.mrf.mxu1 }
 0x12d   : > { %v720_v55 = vadd.f32 %v943_v51, %v383_v47  ;;  %v728_v56 = vadd.f32 %v967_v52, %v391_v49 }
 0x12e   : > { %v945_v58 = vpop.f32.mrf.mxu0  ;;  %v969_v60 = vpop.f32.mrf.mxu1 }
 0x12f   : > { %736 = vst [vmem:[%s1397_s3 + $0x30] sm:$0xff] %v720_v55  ;;  %744 = vst [vmem:[%s1397_s3 + $0x70] sm:$0xff] %v728_v56  ;;  %v946_v61 = vadd.f32 %v945_v58, %v944_v53  ;;  %v970_v62 = vadd.f32 %v969_v60, %v968_v54 }
 0x131   : > { %v721_v63 = vadd.f32 %v946_v61, %v384_v57  ;;  %v729_v0 = vadd.f32 %v970_v62, %v392_v59 }
 0x133   : > { %737 = vst [vmem:[%s1397_s3 + $0x38] sm:$0xff] %v721_v63  ;;  %745 = vst [vmem:[%s1397_s3 + $0x78] sm:$0xff] %v729_v0 }
 0x134 PF: > { %s13_s16 = sadd.s32 1, %s1105_s16   ;;  %s1398_s12 = smov %s1093_s13 }
 0x135   : > { %p10_p11 = scmp.ge.s32.totalorder %s13_s16, 5   ;;  %s1399_s13 = smov %s1162_s20 }
 0x136   : > { %s1400_s14 = smov %s1101_s15  ;;  %s1401_s15 = smov %s1403_s17 }
 0x137   :  { %12 = sbr.rel (!%p10_p11) target bundleno = 3 (0x3), region = 115 }

// kernel: _forward.44
= control target key start
LH: loop header
LB: loop body
LE: loop exit
PB: predicated region body
PF: predicated region fallthrough
CT: control target
= control target key end

     0   :  { %s148_s0 = inlined_call_operand.vmem [shape: f32[64,128], index: 0, kind: input, shape index: {}]   ;;  %s149_s1 = inlined_call_operand.vmem [shape: f32[1,128], index: 1, kind: input, shape index: {}]   ;;  %s150_s2 = inlined_call_operand.vmem [shape: f32[1,128], index: 2, kind: input, shape index: {}]   ;;  %s151_s3 = inlined_call_operand.vmem [shape: f32[64,128], index: 3, kind: output, shape index: {}]  }
   0x1   :  { %v14_v0 = vld [vmem:[%s148_s0] sm:$0xff]  ;;  %v15_v4 = vld [vmem:[%s148_s0 + $0x8] sm:$0xff]  ;;  %v16_v5 = vld [vmem:[%s148_s0 + $0x10] sm:$0xff] }
   0x2   :  { %v72_v1 = vld [vmem:[%s149_s1] ss:$0 sm:$0xff]  ;;  %v17_v6 = vld [vmem:[%s148_s0 + $0x18] sm:$0xff]  ;;  %v19_v11 = vld [vmem:[%s148_s0 + $0x28] sm:$0xff] }
   0x3   :  { %v73_v2 = vld [vmem:[%s150_s2] ss:$0 sm:$0xff]  ;;  %v29_v3 = vmul.f32 %v72_v1, %v14_v0  ;;  %v30_v7 = vmul.f32 %v72_v1, %v15_v4  ;;  %v31_v8 = vmul.f32 %v72_v1, %v16_v5  ;;  %v32_v9 = vmul.f32 %v72_v1, %v17_v6  ;;  %v20_v12 = vld [vmem:[%s148_s0 + $0x30] sm:$0xff]  ;;  %v21_v17 = vld [vmem:[%s148_s0 + $0x38] sm:$0xff] }
   0x4   :  { %v18_v10 = vld [vmem:[%s148_s0 + $0x20] sm:$0xff]  ;;  %v34_v15 = vmul.f32 %v72_v1, %v19_v11  ;;  %v35_v16 = vmul.f32 %v72_v1, %v20_v12  ;;  %v36_v21 = vmul.f32 %v72_v1, %v21_v17 }
   0x5   :  { %v44_v13 = vadd.f32 %v73_v2, %v29_v3  ;;  %v33_v14 = vmul.f32 %v72_v1, %v18_v10  ;;  %v45_v18 = vadd.f32 %v73_v2, %v30_v7  ;;  %v46_v19 = vadd.f32 %v73_v2, %v31_v8 }
   0x6   :  { %v47_v20 = vadd.f32 %v73_v2, %v32_v9  ;;  %v49_v24 = vadd.f32 %v73_v2, %v34_v15  ;;  %v50_v25 = vadd.f32 %v73_v2, %v35_v16  ;;  %v51_v29 = vadd.f32 %v73_v2, %v36_v21 }
   0x7   :  { %v52_v22 = vmax.f32 %v44_v13, 0.0  ;;  %v48_v23 = vadd.f32 %v73_v2, %v33_v14  ;;  %v53_v26 = vmax.f32 %v45_v18, 0.0  ;;  %v54_v27 = vmax.f32 %v46_v19, 0.0 }
   0x8   :  { %v55_v28 = vmax.f32 %v47_v20, 0.0  ;;  %v57_v31 = vmax.f32 %v49_v24, 0.0  ;;  %v58_v32 = vmax.f32 %v50_v25, 0.0  ;;  %v59_v33 = vmax.f32 %v51_v29, 0.0 }
   0x9   :  { %60 = vst [vmem:[%s151_s3] sm:$0xff] %v52_v22  ;;  %v56_v30 = vmax.f32 %v48_v23, 0.0  ;;  %61 = vst [vmem:[%s151_s3 + $0x8] sm:$0xff] %v53_v26 }
   0xa   :  { %62 = vst [vmem:[%s151_s3 + $0x10] sm:$0xff] %v54_v27  ;;  %63 = vst [vmem:[%s151_s3 + $0x18] sm:$0xff] %v55_v28 }
   0xb   :  { %64 = vst [vmem:[%s151_s3 + $0x20] sm:$0xff] %v56_v30  ;;  %65 = vst [vmem:[%s151_s3 + $0x28] sm:$0xff] %v57_v31 }
   0xc   :  { %66 = vst [vmem:[%s151_s3 + $0x30] sm:$0xff] %v58_v32  ;;  %67 = vst [vmem:[%s151_s3 + $0x38] sm:$0xff] %v59_v33 }

// kernel: _forward.46
= control target key start
LH: loop header
LB: loop body
LE: loop exit
PB: predicated region body
PF: predicated region fallthrough
CT: control target
= control target key end

     0   :  { %s196_s0 = inlined_call_operand.vmem [shape: f32[64,128], index: 0, kind: input, shape index: {}]   ;;  %s197_s1 = inlined_call_operand.vmem [shape: f32[1,128], index: 1, kind: input, shape index: {}]   ;;  %s198_s2 = inlined_call_operand.vmem [shape: f32[1,128], index: 2, kind: input, shape index: {}]   ;;  %s199_s3 = inlined_call_operand.vmem [shape: f32[64,128], index: 3, kind: input, shape index: {}]   ;;  %s200_s4 = inlined_call_operand.vmem [shape: f32[64,128], index: 4, kind: output, shape index: {}]  }
   0x1   :  { %v17_v0 = vld [vmem:[%s196_s0] sm:$0xff]  ;;  %v18_v4 = vld [vmem:[%s196_s0 + $0x8] sm:$0xff]  ;;  %v19_v7 = vld [vmem:[%s196_s0 + $0x10] sm:$0xff] }
   0x2   :  { %v91_v1 = vld [vmem:[%s197_s1] ss:$0 sm:$0xff]  ;;  %v20_v8 = vld [vmem:[%s196_s0 + $0x18] sm:$0xff]  ;;  %v56_v10 = vld [vmem:[%s199_s3 + $0x8] sm:$0xff] }
   0x3   :  { %v92_v2 = vld [vmem:[%s198_s2] ss:$0 sm:$0xff]  ;;  %v32_v3 = vmul.f32 %v91_v1, %v17_v0  ;;  %v33_v6 = vmul.f32 %v91_v1, %v18_v4  ;;  %v34_v11 = vmul.f32 %v91_v1, %v19_v7  ;;  %v57_v12 = vld [vmem:[%s199_s3 + $0x10] sm:$0xff]  ;;  %v35_v13 = vmul.f32 %v91_v1, %v20_v8  ;;  %v58_v16 = vld [vmem:[%s199_s3 + $0x18] sm:$0xff] }
   0x4   :  { %v55_v5 = vld [vmem:[%s199_s3] sm:$0xff]  ;;  %v22_v18 = vld [vmem:[%s196_s0 + $0x28] sm:$0xff]  ;;  %v23_v19 = vld [vmem:[%s196_s0 + $0x30] sm:$0xff] }
   0x5   :  { %v47_v9 = vadd.f32 %v92_v2, %v32_v3  ;;  %v21_v14 = vld [vmem:[%s196_s0 + $0x20] sm:$0xff]  ;;  %v48_v15 = vadd.f32 %v92_v2, %v33_v6  ;;  %v49_v21 = vadd.f32 %v92_v2, %v34_v11  ;;  %v50_v22 = vadd.f32 %v92_v2, %v35_v13  ;;  %v24_v25 = vld [vmem:[%s196_s0 + $0x38] sm:$0xff]  ;;  %v60_v28 = vld [vmem:[%s199_s3 + $0x28] sm:$0xff] }
   0x6   :  { %v36_v17 = vmul.f32 %v91_v1, %v21_v14  ;;  %v59_v23 = vld [vmem:[%s199_s3 + $0x20] sm:$0xff]  ;;  %v37_v24 = vmul.f32 %v91_v1, %v22_v18  ;;  %v38_v29 = vmul.f32 %v91_v1, %v23_v19  ;;  %v39_v30 = vmul.f32 %v91_v1, %v24_v25  ;;  %v61_v35 = vld [vmem:[%s199_s3 + $0x30] sm:$0xff]  ;;  %v62_v36 = vld [vmem:[%s199_s3 + $0x38] sm:$0xff] }
   0x7   :  { %v63_v20 = vadd.f32 %v55_v5, %v47_v9  ;;  %v64_v26 = vadd.f32 %v56_v10, %v48_v15  ;;  %v65_v32 = vadd.f32 %v57_v12, %v49_v21  ;;  %v66_v33 = vadd.f32 %v58_v16, %v50_v22 }
   0x8   :  { %v51_v27 = vadd.f32 %v92_v2, %v36_v17  ;;  %v52_v34 = vadd.f32 %v92_v2, %v37_v24  ;;  %v53_v39 = vadd.f32 %v92_v2, %v38_v29  ;;  %v54_v40 = vadd.f32 %v92_v2, %v39_v30 }
   0x9   :  { %v71_v31 = vmax.f32 %v63_v20, 0.0  ;;  %v72_v37 = vmax.f32 %v64_v26, 0.0  ;;  %v73_v41 = vmax.f32 %v65_v32, 0.0  ;;  %v74_v42 = vmax.f32 %v66_v33, 0.0 }
   0xa   :  { %v67_v38 = vadd.f32 %v59_v23, %v51_v27  ;;  %v68_v43 = vadd.f32 %v60_v28, %v52_v34  ;;  %v69_v45 = vadd.f32 %v61_v35, %v53_v39  ;;  %v70_v46 = vadd.f32 %v62_v36, %v54_v40 }
   0xb   :  { %79 = vst [vmem:[%s200_s4] sm:$0xff] %v71_v31  ;;  %80 = vst [vmem:[%s200_s4 + $0x8] sm:$0xff] %v72_v37 }
   0xc   :  { %v75_v44 = vmax.f32 %v67_v38, 0.0  ;;  %81 = vst [vmem:[%s200_s4 + $0x10] sm:$0xff] %v73_v41  ;;  %82 = vst [vmem:[%s200_s4 + $0x18] sm:$0xff] %v74_v42  ;;  %v76_v47 = vmax.f32 %v68_v43, 0.0  ;;  %v77_v48 = vmax.f32 %v69_v45, 0.0  ;;  %v78_v49 = vmax.f32 %v70_v46, 0.0 }
   0xe   :  { %83 = vst [vmem:[%s200_s4 + $0x20] sm:$0xff] %v75_v44  ;;  %84 = vst [vmem:[%s200_s4 + $0x28] sm:$0xff] %v76_v47 }
   0xf   :  { %85 = vst [vmem:[%s200_s4 + $0x30] sm:$0xff] %v77_v48  ;;  %86 = vst [vmem:[%s200_s4 + $0x38] sm:$0xff] %v78_v49 }

// kernel: _forward.54
= control target key start
LH: loop header
LB: loop body
LE: loop exit
PB: predicated region body
PF: predicated region fallthrough
CT: control target
= control target key end

     0   :  { %s429_s1 = inlined_call_operand.vmem [shape: bf16[256,128], index: 1, kind: input, shape index: {}]   ;;  %s430_s0 = inlined_call_operand.vmem [shape: bf16[32,256], index: 0, kind: input, shape index: {}]   ;;  %s431_s2 = inlined_call_operand.vmem [shape: f32[1,128], index: 2, kind: input, shape index: {}]   ;;  %s432_s3 = inlined_call_operand.vmem [shape: f32[32,128], index: 3, kind: output, shape index: {}]  }
   0x1   :  { %v312_v0 = vld [vmem:[%s429_s1 + $0x78] sm:$0xff]   ;;  %v314_v2 = vld [vmem:[%s429_s1 + $0x70] sm:$0xff]   ;;  %v316_v4 = vld [vmem:[%s429_s1 + $0x68] sm:$0xff]  }
   0x2   :  { %v313_v1 = vld [vmem:[%s429_s1 + $0x38] sm:$0xff]   ;;  %268 = vmatprep.subr.bf16.mxu0 %v312_v0  ;;  %296 = vmatprep.subr.bf16.mxu1 %v312_v0  ;;  %v315_v3 = vld [vmem:[%s429_s1 + $0x30] sm:$0xff]   ;;  %v317_v5 = vld [vmem:[%s429_s1 + $0x28] sm:$0xff]  }
   0x3   :  { %269 = vmatpush3.bf16.msra.mxu0 %v313_v1  ;;  %304 = vmatpush3.bf16.msra.mxu1 %v313_v1  ;;  %v318_v6 = vld [vmem:[%s429_s1 + $0x60] sm:$0xff]   ;;  %v320_v8 = vld [vmem:[%s429_s1 + $0x58] sm:$0xff]   ;;  %v322_v10 = vld [vmem:[%s429_s1 + $0x50] sm:$0xff]  }
   0x4   :  { %270 = vmatprep.subr.bf16.mxu0 %v314_v2  ;;  %297 = vmatprep.subr.bf16.mxu1 %v314_v2  ;;  %v319_v7 = vld [vmem:[%s429_s1 + $0x20] sm:$0xff]   ;;  %v321_v9 = vld [vmem:[%s429_s1 + $0x18] sm:$0xff]   ;;  %v323_v13 = vld [vmem:[%s429_s1 + $0x10] sm:$0xff]  }
   0x5   :  { %v330_v11 = vld [vmem:[%s430_s0 + $0x4] ss:$8 sps:$4 sm:$0xff]   ;;  %v333_v12 = vld [vmem:[%s430_s0 + $0x14] ss:$8 sps:$4 sm:$0xff]   ;;  %v328_v18 = vld [vmem:[%s430_s0] ss:$8 sps:$4 sm:$0xff]  }
   0x6   :  { %v324_v14 = vld [vmem:[%s429_s1 + $0x48] sm:$0xff]   ;;  %218 = vmatprep.mubr.bf16.mxu0 %v330_v11  ;;  %226 = vmatprep.mubr.bf16.mxu1 %v333_v12  ;;  %v326_v16 = vld [vmem:[%s429_s1 + $0x40] sm:$0xff]   ;;  %v331_v19 = vld [vmem:[%s430_s0 + $0x10] ss:$8 sps:$4 sm:$0xff]  }
   0x7   :  { %271 = vmatpush3.bf16.msra.mxu0 %v315_v3  ;;  %305 = vmatpush3.bf16.msra.mxu1 %v315_v3  ;;  %v325_v15 = vld [vmem:[%s429_s1 + $0x8] sm:$0xff]   ;;  %v327_v17 = vld [vmem:[%s429_s1] sm:$0xff]  }
   0x8   :  { %272 = vmatprep.subr.bf16.mxu0 %v316_v4  ;;  %298 = vmatprep.subr.bf16.mxu1 %v316_v4  ;;  %v247_v22 = vld [vmem:[%s431_s2] ss:$0 sm:$0xff] }
   0xb   :  { %273 = vmatpush3.bf16.msra.mxu0 %v317_v5  ;;  %306 = vmatpush3.bf16.msra.mxu1 %v317_v5 }
   0xc   :  { %274 = vmatprep.subr.bf16.mxu0 %v318_v6  ;;  %299 = vmatprep.subr.bf16.mxu1 %v318_v6 }
   0xf   :  { %275 = vmatpush3.bf16.msra.mxu0 %v319_v7  ;;  %307 = vmatpush3.bf16.msra.mxu1 %v319_v7 }
  0x10   :  { %276 = vmatprep.subr.bf16.mxu0 %v320_v8  ;;  %300 = vmatprep.subr.bf16.mxu1 %v320_v8 }
  0x13   :  { %277 = vmatpush3.bf16.msra.mxu0 %v321_v9  ;;  %308 = vmatpush3.bf16.msra.mxu1 %v321_v9 }
  0x14   :  { %278 = vmatprep.subr.bf16.mxu0 %v322_v10  ;;  %301 = vmatprep.subr.bf16.mxu1 %v322_v10 }
  0x17   :  { %279 = vmatpush3.bf16.msra.mxu0 %v323_v13  ;;  %309 = vmatpush3.bf16.msra.mxu1 %v323_v13 }
  0x18   :  { %280 = vmatprep.subr.bf16.mxu0 %v324_v14  ;;  %302 = vmatprep.subr.bf16.mxu1 %v324_v14 }
  0x1b   :  { %281 = vmatpush3.bf16.msra.mxu0 %v325_v15  ;;  %310 = vmatpush3.bf16.msra.mxu1 %v325_v15 }
  0x1c   :  { %282 = vmatprep.subr.bf16.mxu0 %v326_v16  ;;  %303 = vmatprep.subr.bf16.mxu1 %v326_v16 }
  0x1f   :  { %283 = vmatpush3.bf16.msra.mxu0 %v327_v17  ;;  %311 = vmatpush3.bf16.msra.mxu1 %v327_v17 }
  0x22   :  { %219 = vmatmul.mubr.bf16.vlgmr.msra.gmra.mxu0 %v328_v18  ;;  %227 = vmatmul.mubr.bf16.vlgmr.msra.gmra.mxu1 %v331_v19 }
  0xe2   :  { %v284_v20 = vpop.f32.mrf.mxu0  ;;  %v290_v21 = vpop.f32.mrf.mxu1 }
  0xe4   :  { %v285_v23 = vpop.f32.mrf.mxu0  ;;  %v291_v24 = vpop.f32.mrf.mxu1 }
  0xe5   :  { %v286_v25 = vadd.f32 %v285_v23, %v284_v20  ;;  %v292_v26 = vadd.f32 %v291_v24, %v290_v21 }
  0xe6   :  { %v287_v27 = vpop.f32.mrf.mxu0  ;;  %v293_v28 = vpop.f32.mrf.mxu1 }
  0xe7   :  { %v235_v29 = vadd.f32 %v286_v25, %v247_v22  ;;  %v237_v30 = vadd.f32 %v292_v26, %v247_v22 }
  0xe8   :  { %v288_v31 = vpop.f32.mrf.mxu0  ;;  %v294_v32 = vpop.f32.mrf.mxu1 }
  0xe9   :  { %239 = vst [vmem:[%s432_s3] sm:$0xff] %v235_v29  ;;  %241 = vst [vmem:[%s432_s3 + $0x10] sm:$0xff] %v237_v30  ;;  %v289_v33 = vadd.f32 %v288_v31, %v287_v27  ;;  %v295_v34 = vadd.f32 %v294_v32, %v293_v28 }
  0xeb   :  { %v236_v35 = vadd.f32 %v289_v33, %v247_v22  ;;  %v238_v36 = vadd.f32 %v295_v34, %v247_v22 }
  0xed   :  { %240 = vst [vmem:[%s432_s3 + $0x8] sm:$0xff] %v236_v35  ;;  %242 = vst [vmem:[%s432_s3 + $0x18] sm:$0xff] %v238_v36 }

// kernel: _forward.55
= control target key start
LH: loop header
LB: loop body
LE: loop exit
PB: predicated region body
PF: predicated region fallthrough
CT: control target
= control target key end

     0   :  { %s100_s0 = inlined_call_operand.vmem [shape: f32[32,128], index: 0, kind: input, shape index: {}]   ;;  %s101_s1 = inlined_call_operand.vmem [shape: f32[1,128], index: 1, kind: input, shape index: {}]   ;;  %s102_s2 = inlined_call_operand.vmem [shape: f32[1,128], index: 2, kind: input, shape index: {}]   ;;  %s103_s3 = inlined_call_operand.vmem [shape: f32[32,128], index: 3, kind: output, shape index: {}]  }
   0x1   :  { %v14_v0 = vld [vmem:[%s100_s0] sm:$0xff]  ;;  %v15_v4 = vld [vmem:[%s100_s0 + $0x8] sm:$0xff]  ;;  %v16_v5 = vld [vmem:[%s100_s0 + $0x10] sm:$0xff] }
   0x2   :  { %v48_v1 = vld [vmem:[%s101_s1] ss:$0 sm:$0xff]  ;;  %v17_v6 = vld [vmem:[%s100_s0 + $0x18] sm:$0xff] }
   0x3   :  { %v49_v2 = vld [vmem:[%s102_s2] ss:$0 sm:$0xff]  ;;  %v25_v3 = vmul.f32 %v48_v1, %v14_v0  ;;  %v26_v7 = vmul.f32 %v48_v1, %v15_v4  ;;  %v27_v8 = vmul.f32 %v48_v1, %v16_v5  ;;  %v28_v9 = vmul.f32 %v48_v1, %v17_v6 }
   0x5   :  { %v36_v10 = vadd.f32 %v49_v2, %v25_v3  ;;  %v37_v11 = vadd.f32 %v49_v2, %v26_v7  ;;  %v38_v12 = vadd.f32 %v49_v2, %v27_v8  ;;  %v39_v13 = vadd.f32 %v49_v2, %v28_v9 }
   0x7   :  { %40 = vst [vmem:[%s103_s3] sm:$0xff] %v36_v10  ;;  %41 = vst [vmem:[%s103_s3 + $0x8] sm:$0xff] %v37_v11 }
   0x8   :  { %42 = vst [vmem:[%s103_s3 + $0x10] sm:$0xff] %v38_v12  ;;  %43 = vst [vmem:[%s103_s3 + $0x18] sm:$0xff] %v39_v13 }

// kernel: _forward.51
= control target key start
LH: loop header
LB: loop body
LE: loop exit
PB: predicated region body
PF: predicated region fallthrough
CT: control target
= control target key end

     0   :  { %s845_s12 = smov 0   ;;  %s847_s13 = smov 0   ;;  %s974_s0 = inlined_call_operand.vmem [shape: bf16[32,768], index: 0, kind: input, shape index: {}]   ;;  %s975_s1 = inlined_call_operand.vmem [shape: bf16[768,128], index: 1, kind: input, shape index: {}]   ;;  %s976_s2 = inlined_call_operand.vmem [shape: f32[1,128], index: 2, kind: input, shape index: {}]   ;;  %s977_s3 = inlined_call_operand.vmem [shape: f32[32,128], index: 3, kind: output, shape index: {}]  }
   0x1   :  { %s849_s14 = smov 0   ;;  %s851_s15 = smov 0  }
   0x2   :  { %s853_s16 = smov 0  }
   0x3 LB: > { %s25_s17 = sadd.s32 1, %s819_s15  ;;  %p48_p1 = scmp.ne.s32.totalorder %s811_s13, %s807_s12  ;;  %s823_s16 = sphi %s853_s16, %s13_s16   ;;  %s819_s15 = sphi %s851_s15, %s981_s15   ;;  %s815_s14 = sphi %s849_s14, %s980_s14   ;;  %s811_s13 = sphi %s847_s13, %s979_s13   ;;  %s807_s12 = sphi %s845_s12, %s978_s12  }
   0x4   : > { %p26_p0 = scmp.ge.s32.totalorder %s25_s17, 3  ;;  %p49_p2 = scmp.eq.s32.totalorder %s823_s16, 0 }
   0x5   : > { %s41_s19 = sadd.s32 1, %s811_s13  ;;  %p644_p5 = scmp.ge.s32.totalorder %s823_s16, 3 }
   0x6   : > { %s983_s17 = smov (%p26_p0, %s25_s17), 0  ;;  %p50_p3 = por %p49_p2, %p48_p1 }
   0x7   : > { %s37_s18 = ssub.s32 %s819_s15, %s983_s17  ;;  %162 = sbr.rel (%p644_p5) target bundleno = 18 (0x12), region = 20 }
   0x8   : > { %p39_p4 = scmp.eq.s32.totalorder %s37_s18, 0 }
   0xa   : > { %s880_s20 = scalar_select %p39_p4, %s811_s13, %s41_s19  }
   0xc   : > { %165 = sbr.rel (!%p50_p3) target bundleno = 18 (0x12), region = 24  ;;  %s167_s21 = sand.u32 (%p50_p3), 1, %s811_s13  }
   0xd   : > { %s678_s22 = sshll.u32 (%p50_p3), %s819_s15, 3  ;;  %s645_s23 = sshll.u32 (%p50_p3), %s167_s21, 5 }
   0xe   : > { %s175_s26 = scalar_lea.vmem (%p50_p3), %s974_s0, %s678_s22  ;;  %s169_s27 = scalar_lea.vmem (%p50_p3), [#allocation2], %s645_s23 }
   0xf   : > { %v210_v0 = vld [vmem:[%s175_s26] sm:$0xff] (%p50_p3)  ;;  %v212_v1 = vld [vmem:[%s175_s26 + $0x18] sm:$0xff] (%p50_p3)  ;;  %v214_v2 = vld [vmem:[%s175_s26 + $0x30] sm:$0xff] (%p50_p3) }
  0x10   : > { %211 = vst [vmem:[%s169_s27] sm:$0xff] (%p50_p3), %v210_v0  ;;  %213 = vst [vmem:[%s169_s27 + $0x8] sm:$0xff] (%p50_p3), %v212_v1  ;;  %v216_v3 = vld [vmem:[%s175_s26 + $0x48] sm:$0xff] (%p50_p3) }
  0x11   : > { %215 = vst [vmem:[%s169_s27 + $0x10] sm:$0xff] %v214_v2  ;;  %217 = vst [vmem:[%s169_s27 + $0x18] sm:$0xff] %v216_v3 }
  0x12 PF: > { %p648_p6 = scmp.ge.s32.totalorder %s823_s16, 1  ;;  %p234_p7 = scmp.lt.s32.totalorder %s823_s16, 4 }
  0x14   : > { %p235_p8 = pnand %p648_p6, %p234_p7 }
  0x15   : > { %s241_s28 = sand.u32 (!%p235_p8), 1, %s807_s12   ;;  %s650_s29 = sshll.u32 (!%p235_p8), %s815_s14, 5 }
  0x16   : > { %238 = sbr.rel (%p235_p8) target bundleno = 272 (0x110), region = 66  ;;  %s649_s30 = sshll.u32 (!%p235_p8), %s241_s28, 5 }
  0x17   : > { %p281_p9 = scmp.lt.s32.totalorder (!%p235_p8), %s650_s29, 95  ;;  %s897_s8 = scalar_lea.vmem (!%p235_p8), [#allocation2], %s649_s30 }
  0x18   : > { %p652_p10 = scmp.ne.s32.totalorder (!%p235_p8), %s815_s14, 0 }
  0x1b   : > { %s985_s29 = smov (!%p281_p9, %s650_s29), 95  ;;  %305 = sbr.rel (%p652_p10) target bundleno = 35 (0x23), region = 74 }
  0x1c   : > { %s651_s4 = sshll.u32 %s985_s29, 2 }
  0x1d   : > { %s895_s7 = scalar_lea.vmem %s975_s1, %s651_s4 }
  0x20   : > { %v653_v4 = vld [vmem:[%s976_s2] ss:$0 sm:$0xff] }
  0x21   : > { %313 = vst [vmem:[%s977_s3] sm:$0xff] %v653_v4  ;;  %314 = vst [vmem:[%s977_s3 + $0x8] sm:$0xff] %v653_v4 }
  0x22   : > { %315 = vst [vmem:[%s977_s3 + $0x10] sm:$0xff] %v653_v4  ;;  %316 = vst [vmem:[%s977_s3 + $0x18] sm:$0xff] %v653_v4 }
  0x23 PF: > { %v763_v5 = vld [vmem:[%s895_s7 + $0x78] sm:$0xff]   ;;  %v765_v7 = vld [vmem:[%s895_s7 + $0x70] sm:$0xff]   ;;  %v767_v9 = vld [vmem:[%s895_s7 + $0x68] sm:$0xff]  }
  0x24   : > { %v764_v6 = vld [vmem:[%s895_s7 + $0x38] sm:$0xff]   ;;  %679 = vmatprep.subr.bf16.mxu0 %v763_v5  ;;  %707 = vmatprep.subr.bf16.mxu1 %v763_v5  ;;  %v766_v8 = vld [vmem:[%s895_s7 + $0x30] sm:$0xff]   ;;  %v768_v10 = vld [vmem:[%s895_s7 + $0x28] sm:$0xff]  }
  0x25   : > { %680 = vmatpush3.bf16.msra.mxu0 %v764_v6  ;;  %715 = vmatpush3.bf16.msra.mxu1 %v764_v6  ;;  %v769_v11 = vld [vmem:[%s895_s7 + $0x60] sm:$0xff]   ;;  %v771_v13 = vld [vmem:[%s895_s7 + $0x58] sm:$0xff]   ;;  %v773_v15 = vld [vmem:[%s895_s7 + $0x50] sm:$0xff]  }
  0x26   : > { %681 = vmatprep.subr.bf16.mxu0 %v765_v7  ;;  %708 = vmatprep.subr.bf16.mxu1 %v765_v7  ;;  %v770_v12 = vld [vmem:[%s895_s7 + $0x20] sm:$0xff]   ;;  %v772_v14 = vld [vmem:[%s895_s7 + $0x18] sm:$0xff]   ;;  %v774_v18 = vld [vmem:[%s895_s7 + $0x10] sm:$0xff]  }
  0x27   : > { %v781_v16 = vld [vmem:[%s897_s8 + $0x4] ss:$8 sps:$4 sm:$0xff]   ;;  %v784_v17 = vld [vmem:[%s897_s8 + $0x14] ss:$8 sps:$4 sm:$0xff]   ;;  %v779_v23 = vld [vmem:[%s897_s8] ss:$8 sps:$4 sm:$0xff]  }
  0x28   : > { %v775_v19 = vld [vmem:[%s895_s7 + $0x48] sm:$0xff]   ;;  %505 = vmatprep.mubr.bf16.mxu0 %v781_v16  ;;  %513 = vmatprep.mubr.bf16.mxu1 %v784_v17  ;;  %v777_v21 = vld [vmem:[%s895_s7 + $0x40] sm:$0xff]   ;;  %v782_v24 = vld [vmem:[%s897_s8 + $0x10] ss:$8 sps:$4 sm:$0xff]  }
  0x29   : > { %682 = vmatpush3.bf16.msra.mxu0 %v766_v8  ;;  %716 = vmatpush3.bf16.msra.mxu1 %v766_v8  ;;  %v776_v20 = vld [vmem:[%s895_s7 + $0x8] sm:$0xff]   ;;  %v778_v22 = vld [vmem:[%s895_s7] sm:$0xff]   ;;  %v319_v29 = vld [vmem:[%s977_s3 + $0x10] sm:$0xff] }
  0x2a   : > { %683 = vmatprep.subr.bf16.mxu0 %v767_v9  ;;  %709 = vmatprep.subr.bf16.mxu1 %v767_v9  ;;  %v317_v27 = vld [vmem:[%s977_s3] sm:$0xff]  ;;  %v318_v37 = vld [vmem:[%s977_s3 + $0x8] sm:$0xff]  ;;  %v320_v39 = vld [vmem:[%s977_s3 + $0x18] sm:$0xff] }
  0x2d   : > { %684 = vmatpush3.bf16.msra.mxu0 %v768_v10  ;;  %717 = vmatpush3.bf16.msra.mxu1 %v768_v10 }
  0x2e   : > { %685 = vmatprep.subr.bf16.mxu0 %v769_v11  ;;  %710 = vmatprep.subr.bf16.mxu1 %v769_v11 }
  0x31   : > { %686 = vmatpush3.bf16.msra.mxu0 %v770_v12  ;;  %718 = vmatpush3.bf16.msra.mxu1 %v770_v12 }
  0x32   : > { %687 = vmatprep.subr.bf16.mxu0 %v771_v13  ;;  %711 = vmatprep.subr.bf16.mxu1 %v771_v13 }
  0x35   : > { %688 = vmatpush3.bf16.msra.mxu0 %v772_v14  ;;  %719 = vmatpush3.bf16.msra.mxu1 %v772_v14 }
  0x36   : > { %689 = vmatprep.subr.bf16.mxu0 %v773_v15  ;;  %712 = vmatprep.subr.bf16.mxu1 %v773_v15 }
  0x39   : > { %690 = vmatpush3.bf16.msra.mxu0 %v774_v18  ;;  %720 = vmatpush3.bf16.msra.mxu1 %v774_v18 }
  0x3a   : > { %691 = vmatprep.subr.bf16.mxu0 %v775_v19  ;;  %713 = vmatprep.subr.bf16.mxu1 %v775_v19 }
  0x3d   : > { %692 = vmatpush3.bf16.msra.mxu0 %v776_v20  ;;  %721 = vmatpush3.bf16.msra.mxu1 %v776_v20 }
  0x3e   : > { %693 = vmatprep.subr.bf16.mxu0 %v777_v21  ;;  %714 = vmatprep.subr.bf16.mxu1 %v777_v21 }
  0x41   : > { %694 = vmatpush3.bf16.msra.mxu0 %v778_v22  ;;  %722 = vmatpush3.bf16.msra.mxu1 %v778_v22 }
  0x44   : > { %506 = vmatmul.mubr.bf16.vlgmr.msra.gmra.mxu0 %v779_v23  ;;  %514 = vmatmul.mubr.bf16.vlgmr.msra.gmra.mxu1 %v782_v24 }
 0x104   : > { %v695_v25 = vpop.f32.mrf.mxu0  ;;  %v701_v26 = vpop.f32.mrf.mxu1 }
 0x106   : > { %v696_v28 = vpop.f32.mrf.mxu0  ;;  %v702_v30 = vpop.f32.mrf.mxu1 }
 0x107   : > { %v697_v31 = vadd.f32 %v696_v28, %v695_v25  ;;  %v703_v32 = vadd.f32 %v702_v30, %v701_v26 }
 0x108   : > { %v698_v33 = vpop.f32.mrf.mxu0  ;;  %v704_v34 = vpop.f32.mrf.mxu1 }
 0x109   : > { %v522_v35 = vadd.f32 %v697_v31, %v317_v27  ;;  %v524_v36 = vadd.f32 %v703_v32, %v319_v29 }
 0x10a   : > { %v699_v38 = vpop.f32.mrf.mxu0  ;;  %v705_v40 = vpop.f32.mrf.mxu1 }
 0x10b   : > { %526 = vst [vmem:[%s977_s3] sm:$0xff] %v522_v35  ;;  %528 = vst [vmem:[%s977_s3 + $0x10] sm:$0xff] %v524_v36  ;;  %v700_v41 = vadd.f32 %v699_v38, %v698_v33  ;;  %v706_v42 = vadd.f32 %v705_v40, %v704_v34 }
 0x10d   : > { %v523_v43 = vadd.f32 %v700_v41, %v318_v37  ;;  %v525_v44 = vadd.f32 %v706_v42, %v320_v39 }
 0x10f   : > { %527 = vst [vmem:[%s977_s3 + $0x8] sm:$0xff] %v523_v43  ;;  %529 = vst [vmem:[%s977_s3 + $0x18] sm:$0xff] %v525_v44 }
 0x110 PF: > { %s13_s16 = sadd.s32 1, %s823_s16   ;;  %s978_s12 = smov %s811_s13 }
 0x111   : > { %p10_p11 = scmp.ge.s32.totalorder %s13_s16, 5   ;;  %s979_s13 = smov %s880_s20 }
 0x112   : > { %s980_s14 = smov %s819_s15  ;;  %s981_s15 = smov %s983_s17 }
 0x113   :  { %12 = sbr.rel (!%p10_p11) target bundleno = 3 (0x3), region = 115 }

// kernel: _forward.52
= control target key start
LH: loop header
LB: loop body
LE: loop exit
PB: predicated region body
PF: predicated region fallthrough
CT: control target
= control target key end

     0   :  { %s104_s0 = inlined_call_operand.vmem [shape: f32[32,128], index: 0, kind: input, shape index: {}]   ;;  %s105_s1 = inlined_call_operand.vmem [shape: f32[1,128], index: 1, kind: input, shape index: {}]   ;;  %s106_s2 = inlined_call_operand.vmem [shape: f32[1,128], index: 2, kind: input, shape index: {}]   ;;  %s107_s3 = inlined_call_operand.vmem [shape: f32[32,128], index: 3, kind: output, shape index: {}]  }
   0x1   :  { %v14_v0 = vld [vmem:[%s104_s0] sm:$0xff]  ;;  %v15_v4 = vld [vmem:[%s104_s0 + $0x8] sm:$0xff]  ;;  %v16_v5 = vld [vmem:[%s104_s0 + $0x10] sm:$0xff] }
   0x2   :  { %v52_v1 = vld [vmem:[%s105_s1] ss:$0 sm:$0xff]  ;;  %v17_v6 = vld [vmem:[%s104_s0 + $0x18] sm:$0xff] }
   0x3   :  { %v53_v2 = vld [vmem:[%s106_s2] ss:$0 sm:$0xff]  ;;  %v25_v3 = vmul.f32 %v52_v1, %v14_v0  ;;  %v26_v7 = vmul.f32 %v52_v1, %v15_v4  ;;  %v27_v8 = vmul.f32 %v52_v1, %v16_v5  ;;  %v28_v9 = vmul.f32 %v52_v1, %v17_v6 }
   0x5   :  { %v36_v10 = vadd.f32 %v53_v2, %v25_v3  ;;  %v37_v11 = vadd.f32 %v53_v2, %v26_v7  ;;  %v38_v12 = vadd.f32 %v53_v2, %v27_v8  ;;  %v39_v13 = vadd.f32 %v53_v2, %v28_v9 }
   0x7   :  { %v40_v14 = vmax.f32 %v36_v10, 0.0  ;;  %v41_v15 = vmax.f32 %v37_v11, 0.0  ;;  %v42_v16 = vmax.f32 %v38_v12, 0.0  ;;  %v43_v17 = vmax.f32 %v39_v13, 0.0 }
   0x9   :  { %44 = vst [vmem:[%s107_s3] sm:$0xff] %v40_v14  ;;  %45 = vst [vmem:[%s107_s3 + $0x8] sm:$0xff] %v41_v15 }
   0xa   :  { %46 = vst [vmem:[%s107_s3 + $0x10] sm:$0xff] %v42_v16  ;;  %47 = vst [vmem:[%s107_s3 + $0x18] sm:$0xff] %v43_v17 }

// kernel: _forward.56
= control target key start
LH: loop header
LB: loop body
LE: loop exit
PB: predicated region body
PF: predicated region fallthrough
CT: control target
= control target key end

     0   :  { %s132_s0 = inlined_call_operand.vmem [shape: f32[32,128], index: 0, kind: input, shape index: {}]   ;;  %s133_s1 = inlined_call_operand.vmem [shape: f32[1,128], index: 1, kind: input, shape index: {}]   ;;  %s134_s2 = inlined_call_operand.vmem [shape: f32[1,128], index: 2, kind: input, shape index: {}]   ;;  %s135_s3 = inlined_call_operand.vmem [shape: f32[32,128], index: 3, kind: input, shape index: {}]   ;;  %s136_s4 = inlined_call_operand.vmem [shape: f32[32,128], index: 4, kind: output, shape index: {}]  }
   0x1   :  { %v17_v0 = vld [vmem:[%s132_s0] sm:$0xff]  ;;  %v18_v4 = vld [vmem:[%s132_s0 + $0x8] sm:$0xff]  ;;  %v19_v7 = vld [vmem:[%s132_s0 + $0x10] sm:$0xff] }
   0x2   :  { %v63_v1 = vld [vmem:[%s133_s1] ss:$0 sm:$0xff]  ;;  %v20_v8 = vld [vmem:[%s132_s0 + $0x18] sm:$0xff]  ;;  %v44_v10 = vld [vmem:[%s135_s3 + $0x8] sm:$0xff] }
   0x3   :  { %v64_v2 = vld [vmem:[%s134_s2] ss:$0 sm:$0xff]  ;;  %v28_v3 = vmul.f32 %v63_v1, %v17_v0  ;;  %v29_v6 = vmul.f32 %v63_v1, %v18_v4  ;;  %v30_v11 = vmul.f32 %v63_v1, %v19_v7  ;;  %v31_v12 = vmul.f32 %v63_v1, %v20_v8  ;;  %v45_v14 = vld [vmem:[%s135_s3 + $0x10] sm:$0xff]  ;;  %v46_v15 = vld [vmem:[%s135_s3 + $0x18] sm:$0xff] }
   0x4   :  { %v43_v5 = vld [vmem:[%s135_s3] sm:$0xff] }
   0x5   :  { %v39_v9 = vadd.f32 %v64_v2, %v28_v3  ;;  %v40_v13 = vadd.f32 %v64_v2, %v29_v6  ;;  %v41_v17 = vadd.f32 %v64_v2, %v30_v11  ;;  %v42_v18 = vadd.f32 %v64_v2, %v31_v12 }
   0x7   :  { %v47_v16 = vadd.f32 %v43_v5, %v39_v9  ;;  %v48_v19 = vadd.f32 %v44_v10, %v40_v13  ;;  %v49_v21 = vadd.f32 %v45_v14, %v41_v17  ;;  %v50_v22 = vadd.f32 %v46_v15, %v42_v18 }
   0x9   :  { %v51_v20 = vmax.f32 %v47_v16, 0.0  ;;  %v52_v23 = vmax.f32 %v48_v19, 0.0  ;;  %v53_v24 = vmax.f32 %v49_v21, 0.0  ;;  %v54_v25 = vmax.f32 %v50_v22, 0.0 }
   0xb   :  { %55 = vst [vmem:[%s136_s4] sm:$0xff] %v51_v20  ;;  %56 = vst [vmem:[%s136_s4 + $0x8] sm:$0xff] %v52_v23 }
   0xc   :  { %57 = vst [vmem:[%s136_s4 + $0x10] sm:$0xff] %v53_v24  ;;  %58 = vst [vmem:[%s136_s4 + $0x18] sm:$0xff] %v54_v25 }

// kernel: _forward.53
= control target key start
LH: loop header
LB: loop body
LE: loop exit
PB: predicated region body
PF: predicated region fallthrough
CT: control target
= control target key end

     0   :  { %s845_s12 = smov 0   ;;  %s847_s13 = smov 0   ;;  %s974_s0 = inlined_call_operand.vmem [shape: bf16[32,1280], index: 0, kind: input, shape index: {}]   ;;  %s975_s1 = inlined_call_operand.vmem [shape: bf16[1280,128], index: 1, kind: input, shape index: {}]   ;;  %s976_s2 = inlined_call_operand.vmem [shape: f32[1,128], index: 2, kind: input, shape index: {}]   ;;  %s977_s3 = inlined_call_operand.vmem [shape: f32[32,128], index: 3, kind: output, shape index: {}]  }
   0x1   :  { %s849_s14 = smov 0   ;;  %s851_s15 = smov 0  }
   0x2   :  { %s853_s16 = smov 0  }
   0x3 LB: > { %s25_s17 = sadd.s32 1, %s819_s15  ;;  %p48_p1 = scmp.ne.s32.totalorder %s811_s13, %s807_s12  ;;  %s823_s16 = sphi %s853_s16, %s13_s16   ;;  %s819_s15 = sphi %s851_s15, %s981_s15   ;;  %s815_s14 = sphi %s849_s14, %s980_s14   ;;  %s811_s13 = sphi %s847_s13, %s979_s13   ;;  %s807_s12 = sphi %s845_s12, %s978_s12  }
   0x4   : > { %p26_p0 = scmp.ge.s32.totalorder %s25_s17, 5  ;;  %p49_p2 = scmp.eq.s32.totalorder %s823_s16, 0 }
   0x5   : > { %s41_s19 = sadd.s32 1, %s811_s13  ;;  %p644_p5 = scmp.ge.s32.totalorder %s823_s16, 5 }
   0x6   : > { %s983_s17 = smov (%p26_p0, %s25_s17), 0  ;;  %p50_p3 = por %p49_p2, %p48_p1 }
   0x7   : > { %s37_s18 = ssub.s32 %s819_s15, %s983_s17  ;;  %162 = sbr.rel (%p644_p5) target bundleno = 18 (0x12), region = 20 }
   0x8   : > { %p39_p4 = scmp.eq.s32.totalorder %s37_s18, 0 }
   0xa   : > { %s880_s20 = scalar_select %p39_p4, %s811_s13, %s41_s19  }
   0xc   : > { %165 = sbr.rel (!%p50_p3) target bundleno = 18 (0x12), region = 24  ;;  %s167_s21 = sand.u32 (%p50_p3), 1, %s811_s13  }
   0xd   : > { %s678_s22 = sshll.u32 (%p50_p3), %s819_s15, 3  ;;  %s645_s23 = sshll.u32 (%p50_p3), %s167_s21, 5 }
   0xe   : > { %s175_s26 = scalar_lea.vmem (%p50_p3), %s974_s0, %s678_s22  ;;  %s169_s27 = scalar_lea.vmem (%p50_p3), [#allocation2], %s645_s23 }
   0xf   : > { %v210_v0 = vld [vmem:[%s175_s26] sm:$0xff] (%p50_p3)  ;;  %v212_v1 = vld [vmem:[%s175_s26 + $0x28] sm:$0xff] (%p50_p3)  ;;  %v214_v2 = vld [vmem:[%s175_s26 + $0x50] sm:$0xff] (%p50_p3) }
  0x10   : > { %211 = vst [vmem:[%s169_s27] sm:$0xff] (%p50_p3), %v210_v0  ;;  %213 = vst [vmem:[%s169_s27 + $0x8] sm:$0xff] (%p50_p3), %v212_v1  ;;  %v216_v3 = vld [vmem:[%s175_s26 + $0x78] sm:$0xff] (%p50_p3) }
  0x11   : > { %215 = vst [vmem:[%s169_s27 + $0x10] sm:$0xff] %v214_v2  ;;  %217 = vst [vmem:[%s169_s27 + $0x18] sm:$0xff] %v216_v3 }
  0x12 PF: > { %p648_p6 = scmp.ge.s32.totalorder %s823_s16, 1  ;;  %p234_p7 = scmp.lt.s32.totalorder %s823_s16, 6 }
  0x14   : > { %p235_p8 = pnand %p648_p6, %p234_p7 }
  0x15   : > { %s241_s28 = sand.u32 (!%p235_p8), 1, %s807_s12   ;;  %s650_s29 = sshll.u32 (!%p235_p8), %s815_s14, 5 }
  0x16   : > { %238 = sbr.rel (%p235_p8) target bundleno = 272 (0x110), region = 66  ;;  %s649_s30 = sshll.u32 (!%p235_p8), %s241_s28, 5 }
  0x17   : > { %p281_p9 = scmp.lt.s32.totalorder (!%p235_p8), %s650_s29, 159  ;;  %s897_s8 = scalar_lea.vmem (!%p235_p8), [#allocation2], %s649_s30 }
  0x18   : > { %p652_p10 = scmp.ne.s32.totalorder (!%p235_p8), %s815_s14, 0 }
  0x1b   : > { %s985_s29 = smov (!%p281_p9, %s650_s29), 159  ;;  %305 = sbr.rel (%p652_p10) target bundleno = 35 (0x23), region = 74 }
  0x1c   : > { %s651_s4 = sshll.u32 %s985_s29, 2 }
  0x1d   : > { %s895_s7 = scalar_lea.vmem %s975_s1, %s651_s4 }
  0x20   : > { %v653_v4 = vld [vmem:[%s976_s2] ss:$0 sm:$0xff] }
  0x21   : > { %313 = vst [vmem:[%s977_s3] sm:$0xff] %v653_v4  ;;  %314 = vst [vmem:[%s977_s3 + $0x8] sm:$0xff] %v653_v4 }
  0x22   : > { %315 = vst [vmem:[%s977_s3 + $0x10] sm:$0xff] %v653_v4  ;;  %316 = vst [vmem:[%s977_s3 + $0x18] sm:$0xff] %v653_v4 }
  0x23 PF: > { %v763_v5 = vld [vmem:[%s895_s7 + $0x78] sm:$0xff]   ;;  %v765_v7 = vld [vmem:[%s895_s7 + $0x70] sm:$0xff]   ;;  %v767_v9 = vld [vmem:[%s895_s7 + $0x68] sm:$0xff]  }
  0x24   : > { %v764_v6 = vld [vmem:[%s895_s7 + $0x38] sm:$0xff]   ;;  %679 = vmatprep.subr.bf16.mxu0 %v763_v5  ;;  %707 = vmatprep.subr.bf16.mxu1 %v763_v5  ;;  %v766_v8 = vld [vmem:[%s895_s7 + $0x30] sm:$0xff]   ;;  %v768_v10 = vld [vmem:[%s895_s7 + $0x28] sm:$0xff]  }
  0x25   : > { %680 = vmatpush3.bf16.msra.mxu0 %v764_v6  ;;  %715 = vmatpush3.bf16.msra.mxu1 %v764_v6  ;;  %v769_v11 = vld [vmem:[%s895_s7 + $0x60] sm:$0xff]   ;;  %v771_v13 = vld [vmem:[%s895_s7 + $0x58] sm:$0xff]   ;;  %v773_v15 = vld [vmem:[%s895_s7 + $0x50] sm:$0xff]  }
  0x26   : > { %681 = vmatprep.subr.bf16.mxu0 %v765_v7  ;;  %708 = vmatprep.subr.bf16.mxu1 %v765_v7  ;;  %v770_v12 = vld [vmem:[%s895_s7 + $0x20] sm:$0xff]   ;;  %v772_v14 = vld [vmem:[%s895_s7 + $0x18] sm:$0xff]   ;;  %v774_v18 = vld [vmem:[%s895_s7 + $0x10] sm:$0xff]  }
  0x27   : > { %v781_v16 = vld [vmem:[%s897_s8 + $0x4] ss:$8 sps:$4 sm:$0xff]   ;;  %v784_v17 = vld [vmem:[%s897_s8 + $0x14] ss:$8 sps:$4 sm:$0xff]   ;;  %v779_v23 = vld [vmem:[%s897_s8] ss:$8 sps:$4 sm:$0xff]  }
  0x28   : > { %v775_v19 = vld [vmem:[%s895_s7 + $0x48] sm:$0xff]   ;;  %505 = vmatprep.mubr.bf16.mxu0 %v781_v16  ;;  %513 = vmatprep.mubr.bf16.mxu1 %v784_v17  ;;  %v777_v21 = vld [vmem:[%s895_s7 + $0x40] sm:$0xff]   ;;  %v782_v24 = vld [vmem:[%s897_s8 + $0x10] ss:$8 sps:$4 sm:$0xff]  }
  0x29   : > { %682 = vmatpush3.bf16.msra.mxu0 %v766_v8  ;;  %716 = vmatpush3.bf16.msra.mxu1 %v766_v8  ;;  %v776_v20 = vld [vmem:[%s895_s7 + $0x8] sm:$0xff]   ;;  %v778_v22 = vld [vmem:[%s895_s7] sm:$0xff]   ;;  %v319_v29 = vld [vmem:[%s977_s3 + $0x10] sm:$0xff] }
  0x2a   : > { %683 = vmatprep.subr.bf16.mxu0 %v767_v9  ;;  %709 = vmatprep.subr.bf16.mxu1 %v767_v9  ;;  %v317_v27 = vld [vmem:[%s977_s3] sm:$0xff]  ;;  %v318_v37 = vld [vmem:[%s977_s3 + $0x8] sm:$0xff]  ;;  %v320_v39 = vld [vmem:[%s977_s3 + $0x18] sm:$0xff] }
  0x2d   : > { %684 = vmatpush3.bf16.msra.mxu0 %v768_v10  ;;  %717 = vmatpush3.bf16.msra.mxu1 %v768_v10 }
  0x2e   : > { %685 = vmatprep.subr.bf16.mxu0 %v769_v11  ;;  %710 = vmatprep.subr.bf16.mxu1 %v769_v11 }
  0x31   : > { %686 = vmatpush3.bf16.msra.mxu0 %v770_v12  ;;  %718 = vmatpush3.bf16.msra.mxu1 %v770_v12 }
  0x32   : > { %687 = vmatprep.subr.bf16.mxu0 %v771_v13  ;;  %711 = vmatprep.subr.bf16.mxu1 %v771_v13 }
  0x35   : > { %688 = vmatpush3.bf16.msra.mxu0 %v772_v14  ;;  %719 = vmatpush3.bf16.msra.mxu1 %v772_v14 }
  0x36   : > { %689 = vmatprep.subr.bf16.mxu0 %v773_v15  ;;  %712 = vmatprep.subr.bf16.mxu1 %v773_v15 }
  0x39   : > { %690 = vmatpush3.bf16.msra.mxu0 %v774_v18  ;;  %720 = vmatpush3.bf16.msra.mxu1 %v774_v18 }
  0x3a   : > { %691 = vmatprep.subr.bf16.mxu0 %v775_v19  ;;  %713 = vmatprep.subr.bf16.mxu1 %v775_v19 }
  0x3d   : > { %692 = vmatpush3.bf16.msra.mxu0 %v776_v20  ;;  %721 = vmatpush3.bf16.msra.mxu1 %v776_v20 }
  0x3e   : > { %693 = vmatprep.subr.bf16.mxu0 %v777_v21  ;;  %714 = vmatprep.subr.bf16.mxu1 %v777_v21 }
  0x41   : > { %694 = vmatpush3.bf16.msra.mxu0 %v778_v22  ;;  %722 = vmatpush3.bf16.msra.mxu1 %v778_v22 }
  0x44   : > { %506 = vmatmul.mubr.bf16.vlgmr.msra.gmra.mxu0 %v779_v23  ;;  %514 = vmatmul.mubr.bf16.vlgmr.msra.gmra.mxu1 %v782_v24 }
 0x104   : > { %v695_v25 = vpop.f32.mrf.mxu0  ;;  %v701_v26 = vpop.f32.mrf.mxu1 }
 0x106   : > { %v696_v28 = vpop.f32.mrf.mxu0  ;;  %v702_v30 = vpop.f32.mrf.mxu1 }
 0x107   : > { %v697_v31 = vadd.f32 %v696_v28, %v695_v25  ;;  %v703_v32 = vadd.f32 %v702_v30, %v701_v26 }
 0x108   : > { %v698_v33 = vpop.f32.mrf.mxu0  ;;  %v704_v34 = vpop.f32.mrf.mxu1 }
 0x109   : > { %v522_v35 = vadd.f32 %v697_v31, %v317_v27  ;;  %v524_v36 = vadd.f32 %v703_v32, %v319_v29 }
 0x10a   : > { %v699_v38 = vpop.f32.mrf.mxu0  ;;  %v705_v40 = vpop.f32.mrf.mxu1 }
 0x10b   : > { %526 = vst [vmem:[%s977_s3] sm:$0xff] %v522_v35  ;;  %528 = vst [vmem:[%s977_s3 + $0x10] sm:$0xff] %v524_v36  ;;  %v700_v41 = vadd.f32 %v699_v38, %v698_v33  ;;  %v706_v42 = vadd.f32 %v705_v40, %v704_v34 }
 0x10d   : > { %v523_v43 = vadd.f32 %v700_v41, %v318_v37  ;;  %v525_v44 = vadd.f32 %v706_v42, %v320_v39 }
 0x10f   : > { %527 = vst [vmem:[%s977_s3 + $0x8] sm:$0xff] %v523_v43  ;;  %529 = vst [vmem:[%s977_s3 + $0x18] sm:$0xff] %v525_v44 }
 0x110 PF: > { %s13_s16 = sadd.s32 1, %s823_s16   ;;  %s978_s12 = smov %s811_s13 }
 0x111   : > { %p10_p11 = scmp.ge.s32.totalorder %s13_s16, 7   ;;  %s979_s13 = smov %s880_s20 }
 0x112   : > { %s980_s14 = smov %s819_s15  ;;  %s981_s15 = smov %s983_s17 }
 0x113   :  { %12 = sbr.rel (!%p10_p11) target bundleno = 3 (0x3), region = 115 }

// kernel: _forward.65
= control target key start
LH: loop header
LB: loop body
LE: loop exit
PB: predicated region body
PF: predicated region fallthrough
CT: control target
= control target key end

     0   :  { %v18_v0 = vlaneseq  ;;  %s88_s1 = inlined_call_operand.vmem [shape: f32[1,256], index: 1, kind: input, shape index: {}]   ;;  %s89_s2 = inlined_call_operand.vmem [shape: f32[1,256], index: 2, kind: input, shape index: {}]   ;;  %s90_s0 = inlined_call_operand.vmem [shape: f32[8,256], index: 0, kind: input, shape index: {}]   ;;  %s91_s3 = inlined_call_operand.vmem [shape: f32[8,256], index: 3, kind: output, shape index: {}]  }
   0x1   :  { %v16_v2 = vld [vmem:[%s88_s1] sm:$0x3]  ;;  %v15_v7 = vld [vmem:[%s90_s0 + $0x8] sm:$0xff] }
   0x2   :  { %v19_v1 = vshrl.u32 %v18_v0, 7  ;;  %v30_v3 = vld [vmem:[%s89_s2] sm:$0x3] }
   0x3   :  { %v14_v6 = vld [vmem:[%s90_s0] sm:$0xff] }
   0x4   :  { %v20_v4 = vsub.s32 0, %v19_v1  ;;  %v24_v5 = vsub.s32 1, %v19_v1 }
   0x6   :  { %v21_v8 = vrot.slane %v16_v2, %v20_v4  ;;  %v35_v9 = vrot.slane %v30_v3, %v20_v4  ;;  %v25_v10 = vrot.slane %v16_v2, %v24_v5  ;;  %v39_v11 = vrot.slane %v30_v3, %v24_v5 }
   0x8   :  { %v28_v12 = vmul.f32 %v21_v8, %v14_v6  ;;  %v29_v13 = vmul.f32 %v25_v10, %v15_v7 }
   0xa   :  { %v42_v14 = vadd.f32 %v35_v9, %v28_v12  ;;  %v43_v15 = vadd.f32 %v39_v11, %v29_v13 }
   0xc   :  { %44 = vst [vmem:[%s91_s3] sm:$0xff] %v42_v14  ;;  %45 = vst [vmem:[%s91_s3 + $0x8] sm:$0xff] %v43_v15 }

// kernel: _forward.64
= control target key start
LH: loop header
LB: loop body
LE: loop exit
PB: predicated region body
PF: predicated region fallthrough
CT: control target
= control target key end

     0   :  { %v20_v35 = vlaneseq  ;;  %s495_s1 = inlined_call_operand.vmem [shape: bf16[256,256], index: 1, kind: input, shape index: {}]   ;;  %s496_s0 = inlined_call_operand.vmem [shape: bf16[8,256], index: 0, kind: input, shape index: {}]   ;;  %s497_s2 = inlined_call_operand.vmem [shape: f32[1,256], index: 2, kind: input, shape index: {}]   ;;  %s498_s3 = inlined_call_operand.vmem [shape: f32[8,256], index: 3, kind: output, shape index: {}]  }
   0x1   :  { %v317_v0 = vld [vmem:[%s495_s1 + $0x74] ss:$8 sps:$4 sm:$0xff]   ;;  %v319_v1 = vld [vmem:[%s495_s1 + $0x70] ss:$8 sps:$4 sm:$0xff]   ;;  %v320_v2 = vld [vmem:[%s495_s1 + $0x64] ss:$8 sps:$4 sm:$0xff]  }
   0x2   :  { %234 = vmatprep.subr.bf16.mxu0 %v317_v0  ;;  %v322_v3 = vld [vmem:[%s495_s1 + $0x60] ss:$8 sps:$4 sm:$0xff]   ;;  %v323_v4 = vld [vmem:[%s495_s1 + $0x54] ss:$8 sps:$4 sm:$0xff]   ;;  %v325_v5 = vld [vmem:[%s495_s1 + $0x50] ss:$8 sps:$4 sm:$0xff]  }
   0x3   :  { %235 = vmatpush1.bf16.msra.mxu0 %v319_v1  ;;  %v326_v6 = vld [vmem:[%s495_s1 + $0x44] ss:$8 sps:$4 sm:$0xff]   ;;  %v328_v7 = vld [vmem:[%s495_s1 + $0x40] ss:$8 sps:$4 sm:$0xff]   ;;  %v329_v8 = vld [vmem:[%s495_s1 + $0x34] ss:$8 sps:$4 sm:$0xff]  }
   0x4   :  { %236 = vmatprep.subr.bf16.mxu0 %v320_v2  ;;  %v331_v9 = vld [vmem:[%s495_s1 + $0x30] ss:$8 sps:$4 sm:$0xff]   ;;  %v332_v10 = vld [vmem:[%s495_s1 + $0x24] ss:$8 sps:$4 sm:$0xff]   ;;  %v334_v11 = vld [vmem:[%s495_s1 + $0x20] ss:$8 sps:$4 sm:$0xff]  }
   0x5   :  { %v335_v12 = vld [vmem:[%s495_s1 + $0x14] ss:$8 sps:$4 sm:$0xff]   ;;  %v34_v13 = vld [vmem:[%s496_s0] sm:$0xff]  ;;  %v337_v15 = vld [vmem:[%s495_s1 + $0x10] ss:$8 sps:$4 sm:$0xff]   ;;  %v21_v36 = vshrl.u32 %v20_v35, 7 }
   0x6   :  { %v284_v14 = vcombine.high %v34_v13, %v34_v13  ;;  %v338_v16 = vld [vmem:[%s495_s1 + $0x4] ss:$8 sps:$4 sm:$0xff]   ;;  %v340_v17 = vld [vmem:[%s495_s1] ss:$8 sps:$4 sm:$0xff]   ;;  %v341_v18 = vld [vmem:[%s495_s1 + $0xf4] ss:$8 sps:$4 sm:$0xff]   ;;  %v283_v34 = vcombine.low %v34_v13, %v34_v13 }
   0x7   :  { %237 = vmatpush1.bf16.msra.mxu0 %v322_v3  ;;  %v343_v19 = vld [vmem:[%s495_s1 + $0xf0] ss:$8 sps:$4 sm:$0xff]   ;;  %v344_v20 = vld [vmem:[%s495_s1 + $0xe4] ss:$8 sps:$4 sm:$0xff]   ;;  %v346_v21 = vld [vmem:[%s495_s1 + $0xe0] ss:$8 sps:$4 sm:$0xff]  }
   0x8   :  { %238 = vmatprep.subr.bf16.mxu0 %v323_v4  ;;  %266 = vmatprep.mubr.bf16.mxu0 %v284_v14  ;;  %v347_v22 = vld [vmem:[%s495_s1 + $0xd4] ss:$8 sps:$4 sm:$0xff]   ;;  %v349_v23 = vld [vmem:[%s495_s1 + $0xd0] ss:$8 sps:$4 sm:$0xff]   ;;  %v350_v24 = vld [vmem:[%s495_s1 + $0xc4] ss:$8 sps:$4 sm:$0xff]  }
   0x9   :  { %v352_v25 = vld [vmem:[%s495_s1 + $0xc0] ss:$8 sps:$4 sm:$0xff]   ;;  %v353_v26 = vld [vmem:[%s495_s1 + $0xb4] ss:$8 sps:$4 sm:$0xff]   ;;  %v355_v27 = vld [vmem:[%s495_s1 + $0xb0] ss:$8 sps:$4 sm:$0xff]  }
   0xa   :  { %v356_v28 = vld [vmem:[%s495_s1 + $0xa4] ss:$8 sps:$4 sm:$0xff]   ;;  %v358_v29 = vld [vmem:[%s495_s1 + $0xa0] ss:$8 sps:$4 sm:$0xff]   ;;  %v359_v30 = vld [vmem:[%s495_s1 + $0x94] ss:$8 sps:$4 sm:$0xff]  }
   0xb   :  { %239 = vmatpush1.bf16.msra.mxu0 %v325_v5  ;;  %v361_v31 = vld [vmem:[%s495_s1 + $0x90] ss:$8 sps:$4 sm:$0xff]   ;;  %v362_v32 = vld [vmem:[%s495_s1 + $0x84] ss:$8 sps:$4 sm:$0xff]   ;;  %v364_v33 = vld [vmem:[%s495_s1 + $0x80] ss:$8 sps:$4 sm:$0xff]  }
   0xc   :  { %240 = vmatprep.subr.bf16.mxu0 %v326_v6  ;;  %v22_v37 = vsub.s32 0, %v21_v36  ;;  %v18_v38 = vld [vmem:[%s497_s2] sm:$0x3]  ;;  %v26_v39 = vsub.s32 1, %v21_v36 }
   0xe   :  { %v23_v40 = vrot.slane %v18_v38, %v22_v37  ;;  %v27_v41 = vrot.slane %v18_v38, %v26_v39 }
   0xf   :  { %241 = vmatpush1.bf16.msra.mxu0 %v328_v7 }
  0x10   :  { %242 = vmatprep.subr.bf16.mxu0 %v329_v8 }
  0x13   :  { %243 = vmatpush1.bf16.msra.mxu0 %v331_v9 }
  0x14   :  { %244 = vmatprep.subr.bf16.mxu0 %v332_v10 }
  0x17   :  { %245 = vmatpush1.bf16.msra.mxu0 %v334_v11 }
  0x18   :  { %246 = vmatprep.subr.bf16.mxu0 %v335_v12 }
  0x1b   :  { %247 = vmatpush1.bf16.msra.mxu0 %v337_v15 }
  0x1c   :  { %248 = vmatprep.subr.bf16.mxu0 %v338_v16 }
  0x1f   :  { %249 = vmatpush1.bf16.msra.mxu0 %v340_v17 }
  0x20   :  { %250 = vmatprep.subr.bf16.mxu0 %v341_v18 }
  0x23   :  { %251 = vmatpush2.bf16.msra.mxu0 %v343_v19 }
  0x24   :  { %252 = vmatprep.subr.bf16.mxu0 %v344_v20 }
  0x27   :  { %253 = vmatpush2.bf16.msra.mxu0 %v346_v21 }
  0x28   :  { %254 = vmatprep.subr.bf16.mxu0 %v347_v22 }
  0x2b   :  { %255 = vmatpush2.bf16.msra.mxu0 %v349_v23 }
  0x2c   :  { %256 = vmatprep.subr.bf16.mxu0 %v350_v24 }
  0x2f   :  { %257 = vmatpush2.bf16.msra.mxu0 %v352_v25 }
  0x30   :  { %258 = vmatprep.subr.bf16.mxu0 %v353_v26 }
  0x33   :  { %259 = vmatpush2.bf16.msra.mxu0 %v355_v27 }
  0x34   :  { %260 = vmatprep.subr.bf16.mxu0 %v356_v28 }
  0x37   :  { %261 = vmatpush2.bf16.msra.mxu0 %v358_v29 }
  0x38   :  { %262 = vmatprep.subr.bf16.mxu0 %v359_v30 }
  0x3b   :  { %263 = vmatpush2.bf16.msra.mxu0 %v361_v31 }
  0x3c   :  { %264 = vmatprep.subr.bf16.mxu0 %v362_v32 }
  0x3f   :  { %265 = vmatpush2.bf16.msra.mxu0 %v364_v33 }
  0x42   :  { %267 = vmatmul.mubr.bf16.vlgmr.msra.gmra.mxu0 %v283_v34 }
 0x102   :  { %v268_v42 = vpop.f32.mrf.mxu0 }
 0x103   :  { %v275_v43 = vadd.f32 %v268_v42, %v23_v40 }
 0x104   :  { %v270_v44 = vpop.f32.mrf.mxu0 }
 0x105   :  { %277 = vst [vmem:[%s498_s3] sm:$0xff] %v275_v43  ;;  %v276_v45 = vadd.f32 %v270_v44, %v27_v41 }
 0x106   :  { %v272_v46 = vpop.f32.mrf.mxu0 }
 0x107   :  { %278 = vst [vmem:[%s498_s3 + $0x8] sm:$0xff] %v276_v45 }
 0x108   :  { %v273_v47 = vpop.f32.mrf.mxu0 }

// kernel: _forward.62
= control target key start
LH: loop header
LB: loop body
LE: loop exit
PB: predicated region body
PF: predicated region fallthrough
CT: control target
= control target key end

     0   :  { %v18_v0 = vlaneseq  ;;  %s90_s1 = inlined_call_operand.vmem [shape: f32[1,256], index: 1, kind: input, shape index: {}]   ;;  %s91_s2 = inlined_call_operand.vmem [shape: f32[1,256], index: 2, kind: input, shape index: {}]   ;;  %s92_s0 = inlined_call_operand.vmem [shape: f32[8,256], index: 0, kind: input, shape index: {}]   ;;  %s93_s3 = inlined_call_operand.vmem [shape: f32[8,256], index: 3, kind: output, shape index: {}]  }
   0x1   :  { %v16_v2 = vld [vmem:[%s90_s1] sm:$0x3]  ;;  %v15_v7 = vld [vmem:[%s92_s0 + $0x8] sm:$0xff] }
   0x2   :  { %v19_v1 = vshrl.u32 %v18_v0, 7  ;;  %v30_v3 = vld [vmem:[%s91_s2] sm:$0x3] }
   0x3   :  { %v14_v6 = vld [vmem:[%s92_s0] sm:$0xff] }
   0x4   :  { %v20_v4 = vsub.s32 0, %v19_v1  ;;  %v24_v5 = vsub.s32 1, %v19_v1 }
   0x6   :  { %v21_v8 = vrot.slane %v16_v2, %v20_v4  ;;  %v35_v9 = vrot.slane %v30_v3, %v20_v4  ;;  %v25_v10 = vrot.slane %v16_v2, %v24_v5  ;;  %v39_v11 = vrot.slane %v30_v3, %v24_v5 }
   0x8   :  { %v28_v12 = vmul.f32 %v21_v8, %v14_v6  ;;  %v29_v13 = vmul.f32 %v25_v10, %v15_v7 }
   0xa   :  { %v42_v14 = vadd.f32 %v35_v9, %v28_v12  ;;  %v43_v15 = vadd.f32 %v39_v11, %v29_v13 }
   0xc   :  { %v44_v16 = vmax.f32 %v42_v14, 0.0  ;;  %v45_v17 = vmax.f32 %v43_v15, 0.0 }
   0xe   :  { %46 = vst [vmem:[%s93_s3] sm:$0xff] %v44_v16  ;;  %47 = vst [vmem:[%s93_s3 + $0x8] sm:$0xff] %v45_v17 }

// kernel: _forward.61
= control target key start
LH: loop header
LB: loop body
LE: loop exit
PB: predicated region body
PF: predicated region fallthrough
CT: control target
= control target key end

     0   :  { %s827_s12 = smov 0   ;;  %s829_s13 = smov 0   ;;  %s918_s0 = inlined_call_operand.vmem [shape: bf16[8,1280], index: 0, kind: input, shape index: {}]   ;;  %s919_s1 = inlined_call_operand.vmem [shape: bf16[1280,256], index: 1, kind: input, shape index: {}]   ;;  %s920_s2 = inlined_call_operand.vmem [shape: f32[1,256], index: 2, kind: input, shape index: {}]   ;;  %s921_s3 = inlined_call_operand.vmem [shape: f32[8,256], index: 3, kind: output, shape index: {}]  }
   0x1   :  { %s831_s14 = smov 0  }
   0x2 LB: > { %s25_s15 = sadd.s32 1, %s801_s13  ;;  %p663_p0 = scmp.ge.s32.totalorder %s805_s14, 1  ;;  %s805_s14 = sphi %s831_s14, %s13_s14   ;;  %s801_s13 = sphi %s829_s13, %s923_s13   ;;  %s797_s12 = sphi %s827_s12, %s922_s12  }
   0x3   : > { %p26_p1 = scmp.ge.s32.totalorder %s25_s15, 5  ;;  %p194_p2 = scmp.lt.s32.totalorder %s805_s14, 6 }
   0x5   : > { %s925_s15 = smov (%p26_p1, %s25_s15), 0  ;;  %p195_p3 = pnand %p663_p0, %p194_p2 }
   0x6   : > { %s664_s16 = sshll.u32 (!%p195_p3), %s797_s12, 1  ;;  %s666_s17 = sshll.u32 (!%p195_p3), %s797_s12, 5 }
   0x7   : > { %198 = sbr.rel (%p195_p3) target bundleno = 293 (0x125), region = 32  ;;  %p243_p4 = scmp.lt.s32.totalorder (!%p195_p3), %s664_s16, 9 }
   0x8   : > { %p252_p5 = scmp.lt.s32.totalorder (!%p195_p3), %s666_s17, 159  ;;  %p669_p6 = scmp.ne.s32.totalorder (!%p195_p3), %s797_s12, 0 }
   0xc   : > { %s927_s16 = smov (!%p243_p4, %s664_s16), 9  ;;  %s929_s17 = smov (!%p252_p5, %s666_s17), 159 }
   0xd   : > { %s665_s18 = sshll.u32 %s927_s16, 2  ;;  %s708_s22 = sshll.u32 %s929_s17, 3 }
   0xe   : > { %s848_s21 = scalar_lea.vmem %s918_s0, %s665_s18  ;;  %s853_s25 = scalar_lea.vmem %s919_s1, %s708_s22 }
   0xf   : > { %280 = sbr.rel (%p669_p6) target bundleno = 29 (0x1d), region = 36 }
  0x14   : > { %v283_v0 = vlaneseq  ;;  %v281_v2 = vld [vmem:[%s920_s2] sm:$0x3] }
  0x16   : > { %v284_v1 = vshrl.u32 %v283_v0, 7 }
  0x18   : > { %v285_v3 = vsub.s32 0, %v284_v1  ;;  %v289_v4 = vsub.s32 1, %v284_v1 }
  0x1a   : > { %v286_v5 = vrot.slane %v281_v2, %v285_v3  ;;  %v290_v6 = vrot.slane %v281_v2, %v289_v4 }
  0x1c   : > { %293 = vst [vmem:[%s921_s3] sm:$0xff] %v286_v5  ;;  %294 = vst [vmem:[%s921_s3 + $0x8] sm:$0xff] %v290_v6 }
  0x1d PF: > { %v733_v7 = vld [vmem:[%s853_s25 + $0x74] ss:$8 sps:$4 sm:$0xff]   ;;  %v735_v8 = vld [vmem:[%s853_s25 + $0x70] ss:$8 sps:$4 sm:$0xff]   ;;  %v736_v9 = vld [vmem:[%s853_s25 + $0x64] ss:$8 sps:$4 sm:$0xff]  }
  0x1e   : > { %497 = vmatprep.subr.bf16.mxu0 %v733_v7  ;;  %v738_v10 = vld [vmem:[%s853_s25 + $0x60] ss:$8 sps:$4 sm:$0xff]   ;;  %v739_v11 = vld [vmem:[%s853_s25 + $0x54] ss:$8 sps:$4 sm:$0xff]   ;;  %v741_v12 = vld [vmem:[%s853_s25 + $0x50] ss:$8 sps:$4 sm:$0xff]  }
  0x1f   : > { %498 = vmatpush1.bf16.msra.mxu0 %v735_v8  ;;  %v742_v13 = vld [vmem:[%s853_s25 + $0x44] ss:$8 sps:$4 sm:$0xff]   ;;  %v744_v14 = vld [vmem:[%s853_s25 + $0x40] ss:$8 sps:$4 sm:$0xff]   ;;  %v745_v15 = vld [vmem:[%s853_s25 + $0x34] ss:$8 sps:$4 sm:$0xff]  }
  0x20   : > { %499 = vmatprep.subr.bf16.mxu0 %v736_v9  ;;  %v747_v16 = vld [vmem:[%s853_s25 + $0x30] ss:$8 sps:$4 sm:$0xff]   ;;  %v748_v17 = vld [vmem:[%s853_s25 + $0x24] ss:$8 sps:$4 sm:$0xff]   ;;  %v750_v18 = vld [vmem:[%s853_s25 + $0x20] ss:$8 sps:$4 sm:$0xff]  }
  0x21   : > { %v751_v19 = vld [vmem:[%s853_s25 + $0x14] ss:$8 sps:$4 sm:$0xff]   ;;  %v297_v20 = vld [vmem:[%s848_s21] sm:$0xff]  ;;  %v753_v22 = vld [vmem:[%s853_s25 + $0x10] ss:$8 sps:$4 sm:$0xff]  }
  0x22   : > { %v671_v21 = vcombine.high %v297_v20, %v297_v20  ;;  %v754_v23 = vld [vmem:[%s853_s25 + $0x4] ss:$8 sps:$4 sm:$0xff]   ;;  %v756_v24 = vld [vmem:[%s853_s25] ss:$8 sps:$4 sm:$0xff]   ;;  %v757_v25 = vld [vmem:[%s853_s25 + $0xf4] ss:$8 sps:$4 sm:$0xff]   ;;  %v670_v41 = vcombine.low %v297_v20, %v297_v20 }
  0x23   : > { %500 = vmatpush1.bf16.msra.mxu0 %v738_v10  ;;  %v759_v26 = vld [vmem:[%s853_s25 + $0xf0] ss:$8 sps:$4 sm:$0xff]   ;;  %v760_v27 = vld [vmem:[%s853_s25 + $0xe4] ss:$8 sps:$4 sm:$0xff]   ;;  %v762_v28 = vld [vmem:[%s853_s25 + $0xe0] ss:$8 sps:$4 sm:$0xff]  }
  0x24   : > { %501 = vmatprep.subr.bf16.mxu0 %v739_v11  ;;  %529 = vmatprep.mubr.bf16.mxu0 %v671_v21  ;;  %v763_v29 = vld [vmem:[%s853_s25 + $0xd4] ss:$8 sps:$4 sm:$0xff]   ;;  %v765_v30 = vld [vmem:[%s853_s25 + $0xd0] ss:$8 sps:$4 sm:$0xff]   ;;  %v766_v31 = vld [vmem:[%s853_s25 + $0xc4] ss:$8 sps:$4 sm:$0xff]  }
  0x25   : > { %v768_v32 = vld [vmem:[%s853_s25 + $0xc0] ss:$8 sps:$4 sm:$0xff]   ;;  %v769_v33 = vld [vmem:[%s853_s25 + $0xb4] ss:$8 sps:$4 sm:$0xff]   ;;  %v771_v34 = vld [vmem:[%s853_s25 + $0xb0] ss:$8 sps:$4 sm:$0xff]  }
  0x26   : > { %v772_v35 = vld [vmem:[%s853_s25 + $0xa4] ss:$8 sps:$4 sm:$0xff]   ;;  %v774_v36 = vld [vmem:[%s853_s25 + $0xa0] ss:$8 sps:$4 sm:$0xff]   ;;  %v775_v37 = vld [vmem:[%s853_s25 + $0x94] ss:$8 sps:$4 sm:$0xff]  }
  0x27   : > { %502 = vmatpush1.bf16.msra.mxu0 %v741_v12  ;;  %v777_v38 = vld [vmem:[%s853_s25 + $0x90] ss:$8 sps:$4 sm:$0xff]   ;;  %v778_v39 = vld [vmem:[%s853_s25 + $0x84] ss:$8 sps:$4 sm:$0xff]   ;;  %v780_v40 = vld [vmem:[%s853_s25 + $0x80] ss:$8 sps:$4 sm:$0xff]  }
  0x28   : > { %503 = vmatprep.subr.bf16.mxu0 %v742_v13  ;;  %v295_v42 = vld [vmem:[%s921_s3] sm:$0xff]  ;;  %v296_v44 = vld [vmem:[%s921_s3 + $0x8] sm:$0xff] }
  0x2b   : > { %504 = vmatpush1.bf16.msra.mxu0 %v744_v14 }
  0x2c   : > { %505 = vmatprep.subr.bf16.mxu0 %v745_v15 }
  0x2f   : > { %506 = vmatpush1.bf16.msra.mxu0 %v747_v16 }
  0x30   : > { %507 = vmatprep.subr.bf16.mxu0 %v748_v17 }
  0x33   : > { %508 = vmatpush1.bf16.msra.mxu0 %v750_v18 }
  0x34   : > { %509 = vmatprep.subr.bf16.mxu0 %v751_v19 }
  0x37   : > { %510 = vmatpush1.bf16.msra.mxu0 %v753_v22 }
  0x38   : > { %511 = vmatprep.subr.bf16.mxu0 %v754_v23 }
  0x3b   : > { %512 = vmatpush1.bf16.msra.mxu0 %v756_v24 }
  0x3c   : > { %513 = vmatprep.subr.bf16.mxu0 %v757_v25 }
  0x3f   : > { %514 = vmatpush2.bf16.msra.mxu0 %v759_v26 }
  0x40   : > { %515 = vmatprep.subr.bf16.mxu0 %v760_v27 }
  0x43   : > { %516 = vmatpush2.bf16.msra.mxu0 %v762_v28 }
  0x44   : > { %517 = vmatprep.subr.bf16.mxu0 %v763_v29 }
  0x47   : > { %518 = vmatpush2.bf16.msra.mxu0 %v765_v30 }
  0x48   : > { %519 = vmatprep.subr.bf16.mxu0 %v766_v31 }
  0x4b   : > { %520 = vmatpush2.bf16.msra.mxu0 %v768_v32 }
  0x4c   : > { %521 = vmatprep.subr.bf16.mxu0 %v769_v33 }
  0x4f   : > { %522 = vmatpush2.bf16.msra.mxu0 %v771_v34 }
  0x50   : > { %523 = vmatprep.subr.bf16.mxu0 %v772_v35 }
  0x53   : > { %524 = vmatpush2.bf16.msra.mxu0 %v774_v36 }
  0x54   : > { %525 = vmatprep.subr.bf16.mxu0 %v775_v37 }
  0x57   : > { %526 = vmatpush2.bf16.msra.mxu0 %v777_v38 }
  0x58   : > { %527 = vmatprep.subr.bf16.mxu0 %v778_v39 }
  0x5b   : > { %528 = vmatpush2.bf16.msra.mxu0 %v780_v40 }
  0x5e   : > { %530 = vmatmul.mubr.bf16.vlgmr.msra.gmra.mxu0 %v670_v41 }
 0x11e   : > { %v531_v43 = vpop.f32.mrf.mxu0 }
 0x11f   : > { %v538_v45 = vadd.f32 %v531_v43, %v295_v42 }
 0x120   : > { %v533_v46 = vpop.f32.mrf.mxu0 }
 0x121   : > { %540 = vst [vmem:[%s921_s3] sm:$0xff] %v538_v45  ;;  %v539_v47 = vadd.f32 %v533_v46, %v296_v44 }
 0x122   : > { %v535_v48 = vpop.f32.mrf.mxu0 }
 0x123   : > { %541 = vst [vmem:[%s921_s3 + $0x8] sm:$0xff] %v539_v47 }
 0x124   : > { %v536_v49 = vpop.f32.mrf.mxu0 }
 0x125 PF: > { %s13_s14 = sadd.s32 1, %s805_s14   ;;  %s922_s12 = smov %s801_s13 }
 0x126   : > { %p10_p7 = scmp.ge.s32.totalorder %s13_s14, 7   ;;  %s923_s13 = smov %s925_s15 }
 0x128   :  { %12 = sbr.rel (!%p10_p7) target bundleno = 2 (0x2), region = 72 }

// kernel: _forward.66
= control target key start
LH: loop header
LB: loop body
LE: loop exit
PB: predicated region body
PF: predicated region fallthrough
CT: control target
= control target key end

     0   :  { %v21_v0 = vlaneseq  ;;  %s108_s1 = inlined_call_operand.vmem [shape: f32[1,256], index: 1, kind: input, shape index: {}]   ;;  %s109_s2 = inlined_call_operand.vmem [shape: f32[1,256], index: 2, kind: input, shape index: {}]   ;;  %s110_s0 = inlined_call_operand.vmem [shape: f32[8,256], index: 0, kind: input, shape index: {}]   ;;  %s111_s3 = inlined_call_operand.vmem [shape: f32[8,256], index: 3, kind: input, shape index: {}]   ;;  %s112_s4 = inlined_call_operand.vmem [shape: f32[8,256], index: 4, kind: output, shape index: {}]  }
   0x1   :  { %v19_v2 = vld [vmem:[%s108_s1] sm:$0x3]  ;;  %v18_v7 = vld [vmem:[%s110_s0 + $0x8] sm:$0xff] }
   0x2   :  { %v22_v1 = vshrl.u32 %v21_v0, 7  ;;  %v33_v3 = vld [vmem:[%s109_s2] sm:$0x3]  ;;  %v48_v15 = vld [vmem:[%s111_s3 + $0x8] sm:$0xff] }
   0x3   :  { %v17_v6 = vld [vmem:[%s110_s0] sm:$0xff] }
   0x4   :  { %v23_v4 = vsub.s32 0, %v22_v1  ;;  %v27_v5 = vsub.s32 1, %v22_v1  ;;  %v47_v14 = vld [vmem:[%s111_s3] sm:$0xff] }
   0x6   :  { %v24_v8 = vrot.slane %v19_v2, %v23_v4  ;;  %v38_v9 = vrot.slane %v33_v3, %v23_v4  ;;  %v28_v10 = vrot.slane %v19_v2, %v27_v5  ;;  %v42_v11 = vrot.slane %v33_v3, %v27_v5 }
   0x8   :  { %v31_v12 = vmul.f32 %v24_v8, %v17_v6  ;;  %v32_v13 = vmul.f32 %v28_v10, %v18_v7 }
   0xa   :  { %v45_v16 = vadd.f32 %v38_v9, %v31_v12  ;;  %v46_v17 = vadd.f32 %v42_v11, %v32_v13 }
   0xc   :  { %v49_v18 = vadd.f32 %v47_v14, %v45_v16  ;;  %v50_v19 = vadd.f32 %v48_v15, %v46_v17 }
   0xe   :  { %v51_v20 = vmax.f32 %v49_v18, 0.0  ;;  %v52_v21 = vmax.f32 %v50_v19, 0.0 }
  0x10   :  { %53 = vst [vmem:[%s112_s4] sm:$0xff] %v51_v20  ;;  %54 = vst [vmem:[%s112_s4 + $0x8] sm:$0xff] %v52_v21 }

// kernel: _forward.63
= control target key start
LH: loop header
LB: loop body
LE: loop exit
PB: predicated region body
PF: predicated region fallthrough
CT: control target
= control target key end

     0   :  { %s827_s12 = smov 0   ;;  %s829_s13 = smov 0   ;;  %s918_s0 = inlined_call_operand.vmem [shape: bf16[8,2304], index: 0, kind: input, shape index: {}]   ;;  %s919_s1 = inlined_call_operand.vmem [shape: bf16[2304,256], index: 1, kind: input, shape index: {}]   ;;  %s920_s2 = inlined_call_operand.vmem [shape: f32[1,256], index: 2, kind: input, shape index: {}]   ;;  %s921_s3 = inlined_call_operand.vmem [shape: f32[8,256], index: 3, kind: output, shape index: {}]  }
   0x1   :  { %s831_s14 = smov 0  }
   0x2 LB: > { %s25_s15 = sadd.s32 1, %s801_s13  ;;  %p663_p0 = scmp.ge.s32.totalorder %s805_s14, 1  ;;  %s805_s14 = sphi %s831_s14, %s13_s14   ;;  %s801_s13 = sphi %s829_s13, %s923_s13   ;;  %s797_s12 = sphi %s827_s12, %s922_s12  }
   0x3   : > { %p26_p1 = scmp.ge.s32.totalorder %s25_s15, 9  ;;  %p194_p2 = scmp.lt.s32.totalorder %s805_s14, 10 }
   0x5   : > { %s925_s15 = smov (%p26_p1, %s25_s15), 0  ;;  %p195_p3 = pnand %p663_p0, %p194_p2 }
   0x6   : > { %s664_s16 = sshll.u32 (!%p195_p3), %s797_s12, 1  ;;  %s666_s17 = sshll.u32 (!%p195_p3), %s797_s12, 5 }
   0x7   : > { %198 = sbr.rel (%p195_p3) target bundleno = 293 (0x125), region = 32  ;;  %p243_p4 = scmp.lt.s32.totalorder (!%p195_p3), %s664_s16, 17 }
   0x8   : > { %p252_p5 = scmp.lt.s32.totalorder (!%p195_p3), %s666_s17, 287  ;;  %p669_p6 = scmp.ne.s32.totalorder (!%p195_p3), %s797_s12, 0 }
   0xc   : > { %s927_s16 = smov (!%p243_p4, %s664_s16), 17  ;;  %s929_s17 = smov (!%p252_p5, %s666_s17), 287 }
   0xd   : > { %s665_s18 = sshll.u32 %s927_s16, 2  ;;  %s708_s22 = sshll.u32 %s929_s17, 3 }
   0xe   : > { %s848_s21 = scalar_lea.vmem %s918_s0, %s665_s18  ;;  %s853_s25 = scalar_lea.vmem %s919_s1, %s708_s22 }
   0xf   : > { %280 = sbr.rel (%p669_p6) target bundleno = 29 (0x1d), region = 36 }
  0x14   : > { %v283_v0 = vlaneseq  ;;  %v281_v2 = vld [vmem:[%s920_s2] sm:$0x3] }
  0x16   : > { %v284_v1 = vshrl.u32 %v283_v0, 7 }
  0x18   : > { %v285_v3 = vsub.s32 0, %v284_v1  ;;  %v289_v4 = vsub.s32 1, %v284_v1 }
  0x1a   : > { %v286_v5 = vrot.slane %v281_v2, %v285_v3  ;;  %v290_v6 = vrot.slane %v281_v2, %v289_v4 }
  0x1c   : > { %293 = vst [vmem:[%s921_s3] sm:$0xff] %v286_v5  ;;  %294 = vst [vmem:[%s921_s3 + $0x8] sm:$0xff] %v290_v6 }
  0x1d PF: > { %v733_v7 = vld [vmem:[%s853_s25 + $0x74] ss:$8 sps:$4 sm:$0xff]   ;;  %v735_v8 = vld [vmem:[%s853_s25 + $0x70] ss:$8 sps:$4 sm:$0xff]   ;;  %v736_v9 = vld [vmem:[%s853_s25 + $0x64] ss:$8 sps:$4 sm:$0xff]  }
  0x1e   : > { %497 = vmatprep.subr.bf16.mxu0 %v733_v7  ;;  %v738_v10 = vld [vmem:[%s853_s25 + $0x60] ss:$8 sps:$4 sm:$0xff]   ;;  %v739_v11 = vld [vmem:[%s853_s25 + $0x54] ss:$8 sps:$4 sm:$0xff]   ;;  %v741_v12 = vld [vmem:[%s853_s25 + $0x50] ss:$8 sps:$4 sm:$0xff]  }
  0x1f   : > { %498 = vmatpush1.bf16.msra.mxu0 %v735_v8  ;;  %v742_v13 = vld [vmem:[%s853_s25 + $0x44] ss:$8 sps:$4 sm:$0xff]   ;;  %v744_v14 = vld [vmem:[%s853_s25 + $0x40] ss:$8 sps:$4 sm:$0xff]   ;;  %v745_v15 = vld [vmem:[%s853_s25 + $0x34] ss:$8 sps:$4 sm:$0xff]  }
  0x20   : > { %499 = vmatprep.subr.bf16.mxu0 %v736_v9  ;;  %v747_v16 = vld [vmem:[%s853_s25 + $0x30] ss:$8 sps:$4 sm:$0xff]   ;;  %v748_v17 = vld [vmem:[%s853_s25 + $0x24] ss:$8 sps:$4 sm:$0xff]   ;;  %v750_v18 = vld [vmem:[%s853_s25 + $0x20] ss:$8 sps:$4 sm:$0xff]  }
  0x21   : > { %v751_v19 = vld [vmem:[%s853_s25 + $0x14] ss:$8 sps:$4 sm:$0xff]   ;;  %v297_v20 = vld [vmem:[%s848_s21] sm:$0xff]  ;;  %v753_v22 = vld [vmem:[%s853_s25 + $0x10] ss:$8 sps:$4 sm:$0xff]  }
  0x22   : > { %v671_v21 = vcombine.high %v297_v20, %v297_v20  ;;  %v754_v23 = vld [vmem:[%s853_s25 + $0x4] ss:$8 sps:$4 sm:$0xff]   ;;  %v756_v24 = vld [vmem:[%s853_s25] ss:$8 sps:$4 sm:$0xff]   ;;  %v757_v25 = vld [vmem:[%s853_s25 + $0xf4] ss:$8 sps:$4 sm:$0xff]   ;;  %v670_v41 = vcombine.low %v297_v20, %v297_v20 }
  0x23   : > { %500 = vmatpush1.bf16.msra.mxu0 %v738_v10  ;;  %v759_v26 = vld [vmem:[%s853_s25 + $0xf0] ss:$8 sps:$4 sm:$0xff]   ;;  %v760_v27 = vld [vmem:[%s853_s25 + $0xe4] ss:$8 sps:$4 sm:$0xff]   ;;  %v762_v28 = vld [vmem:[%s853_s25 + $0xe0] ss:$8 sps:$4 sm:$0xff]  }
  0x24   : > { %501 = vmatprep.subr.bf16.mxu0 %v739_v11  ;;  %529 = vmatprep.mubr.bf16.mxu0 %v671_v21  ;;  %v763_v29 = vld [vmem:[%s853_s25 + $0xd4] ss:$8 sps:$4 sm:$0xff]   ;;  %v765_v30 = vld [vmem:[%s853_s25 + $0xd0] ss:$8 sps:$4 sm:$0xff]   ;;  %v766_v31 = vld [vmem:[%s853_s25 + $0xc4] ss:$8 sps:$4 sm:$0xff]  }
  0x25   : > { %v768_v32 = vld [vmem:[%s853_s25 + $0xc0] ss:$8 sps:$4 sm:$0xff]   ;;  %v769_v33 = vld [vmem:[%s853_s25 + $0xb4] ss:$8 sps:$4 sm:$0xff]   ;;  %v771_v34 = vld [vmem:[%s853_s25 + $0xb0] ss:$8 sps:$4 sm:$0xff]  }
  0x26   : > { %v772_v35 = vld [vmem:[%s853_s25 + $0xa4] ss:$8 sps:$4 sm:$0xff]   ;;  %v774_v36 = vld [vmem:[%s853_s25 + $0xa0] ss:$8 sps:$4 sm:$0xff]   ;;  %v775_v37 = vld [vmem:[%s853_s25 + $0x94] ss:$8 sps:$4 sm:$0xff]  }
  0x27   : > { %502 = vmatpush1.bf16.msra.mxu0 %v741_v12  ;;  %v777_v38 = vld [vmem:[%s853_s25 + $0x90] ss:$8 sps:$4 sm:$0xff]   ;;  %v778_v39 = vld [vmem:[%s853_s25 + $0x84] ss:$8 sps:$4 sm:$0xff]   ;;  %v780_v40 = vld [vmem:[%s853_s25 + $0x80] ss:$8 sps:$4 sm:$0xff]  }
  0x28   : > { %503 = vmatprep.subr.bf16.mxu0 %v742_v13  ;;  %v295_v42 = vld [vmem:[%s921_s3] sm:$0xff]  ;;  %v296_v44 = vld [vmem:[%s921_s3 + $0x8] sm:$0xff] }
  0x2b   : > { %504 = vmatpush1.bf16.msra.mxu0 %v744_v14 }
  0x2c   : > { %505 = vmatprep.subr.bf16.mxu0 %v745_v15 }
  0x2f   : > { %506 = vmatpush1.bf16.msra.mxu0 %v747_v16 }
  0x30   : > { %507 = vmatprep.subr.bf16.mxu0 %v748_v17 }
  0x33   : > { %508 = vmatpush1.bf16.msra.mxu0 %v750_v18 }
  0x34   : > { %509 = vmatprep.subr.bf16.mxu0 %v751_v19 }
  0x37   : > { %510 = vmatpush1.bf16.msra.mxu0 %v753_v22 }
  0x38   : > { %511 = vmatprep.subr.bf16.mxu0 %v754_v23 }
  0x3b   : > { %512 = vmatpush1.bf16.msra.mxu0 %v756_v24 }
  0x3c   : > { %513 = vmatprep.subr.bf16.mxu0 %v757_v25 }
  0x3f   : > { %514 = vmatpush2.bf16.msra.mxu0 %v759_v26 }
  0x40   : > { %515 = vmatprep.subr.bf16.mxu0 %v760_v27 }
  0x43   : > { %516 = vmatpush2.bf16.msra.mxu0 %v762_v28 }
  0x44   : > { %517 = vmatprep.subr.bf16.mxu0 %v763_v29 }
  0x47   : > { %518 = vmatpush2.bf16.msra.mxu0 %v765_v30 }
  0x48   : > { %519 = vmatprep.subr.bf16.mxu0 %v766_v31 }
  0x4b   : > { %520 = vmatpush2.bf16.msra.mxu0 %v768_v32 }
  0x4c   : > { %521 = vmatprep.subr.bf16.mxu0 %v769_v33 }
  0x4f   : > { %522 = vmatpush2.bf16.msra.mxu0 %v771_v34 }
  0x50   : > { %523 = vmatprep.subr.bf16.mxu0 %v772_v35 }
  0x53   : > { %524 = vmatpush2.bf16.msra.mxu0 %v774_v36 }
  0x54   : > { %525 = vmatprep.subr.bf16.mxu0 %v775_v37 }
  0x57   : > { %526 = vmatpush2.bf16.msra.mxu0 %v777_v38 }
  0x58   : > { %527 = vmatprep.subr.bf16.mxu0 %v778_v39 }
  0x5b   : > { %528 = vmatpush2.bf16.msra.mxu0 %v780_v40 }
  0x5e   : > { %530 = vmatmul.mubr.bf16.vlgmr.msra.gmra.mxu0 %v670_v41 }
 0x11e   : > { %v531_v43 = vpop.f32.mrf.mxu0 }
 0x11f   : > { %v538_v45 = vadd.f32 %v531_v43, %v295_v42 }
 0x120   : > { %v533_v46 = vpop.f32.mrf.mxu0 }
 0x121   : > { %540 = vst [vmem:[%s921_s3] sm:$0xff] %v538_v45  ;;  %v539_v47 = vadd.f32 %v533_v46, %v296_v44 }
 0x122   : > { %v535_v48 = vpop.f32.mrf.mxu0 }
 0x123   : > { %541 = vst [vmem:[%s921_s3 + $0x8] sm:$0xff] %v539_v47 }
 0x124   : > { %v536_v49 = vpop.f32.mrf.mxu0 }
 0x125 PF: > { %s13_s14 = sadd.s32 1, %s805_s14   ;;  %s922_s12 = smov %s801_s13 }
 0x126   : > { %p10_p7 = scmp.ge.s32.totalorder %s13_s14, 11   ;;  %s923_s13 = smov %s925_s15 }
 0x128   :  { %12 = sbr.rel (!%p10_p7) target bundleno = 2 (0x2), region = 72 }

// kernel: _forward.71
= control target key start
LH: loop header
LB: loop body
LE: loop exit
PB: predicated region body
PF: predicated region fallthrough
CT: control target
= control target key end

     0   :  { %s1047_s12 = smov 0   ;;  %s1049_s13 = smov 0   ;;  %s1256_s0 = inlined_call_operand.vmem [shape: bf16[8,2304], index: 0, kind: input, shape index: {}]   ;;  %s1257_s1 = inlined_call_operand.vmem [shape: bf16[2304,512], index: 1, kind: input, shape index: {}]   ;;  %s1258_s2 = inlined_call_operand.vmem [shape: f32[1,512], index: 2, kind: input, shape index: {}]   ;;  %s1259_s3 = inlined_call_operand.vmem [shape: f32[8,512], index: 3, kind: output, shape index: {}]  }
   0x1   :  { %s1051_s14 = smov 0   ;;  %s1053_s15 = smov 0  }
   0x2   :  { %s1055_s16 = smov 0   ;;  %s1057_s17 = smov 0  }
   0x3   :  { %s1059_s18 = smov 0  }
   0x4 LB: > { %s25_s19 = sadd.s32 1, %s1017_s16  ;;  %s28_s20 = sadd.s32 1, %s1021_s17  ;;  %s1025_s18 = sphi %s1059_s18, %s13_s18   ;;  %s1021_s17 = sphi %s1057_s17, %s1265_s17   ;;  %s1017_s16 = sphi %s1055_s16, %s1264_s16   ;;  %s1013_s15 = sphi %s1053_s15, %s1263_s15   ;;  %s1009_s14 = sphi %s1051_s14, %s1262_s14   ;;  %s1005_s13 = sphi %s1049_s13, %s1261_s13   ;;  %s1001_s12 = sphi %s1047_s12, %s1260_s12  }
   0x5   : > { %p26_p0 = scmp.ge.s32.totalorder %s25_s19, 9  ;;  %p76_p1 = scmp.ne.s32.totalorder %s1005_s13, %s1001_s12 }
   0x6   : > { %p77_p2 = scmp.eq.s32.totalorder %s1025_s18, 0  ;;  %s69_s24 = sadd.s32 1, %s1005_s13 }
   0x7   : > { %s1267_s19 = smov (%p26_p0, %s25_s19), 0  ;;  %s1269_s20 = smov (!%p26_p0, %s28_s20), %s1021_s17 }
   0x8   : > { %p78_p3 = por %p77_p2, %p76_p1  ;;  %p30_p4 = scmp.ge.s32.totalorder %s1269_s20, 2 }
   0x9   : > { %s64_s21 = ssub.s32 %s1017_s16, %s1267_s19  ;;  %p814_p6 = scmp.ge.s32.totalorder %s1025_s18, 18 }
   0xa   : > { %s1271_s20 = smov (%p30_p4, %s1269_s20), 0 }
   0xb   : > { %s65_s22 = ssub.s32 %s1021_s17, %s1271_s20  ;;  %156 = sbr.rel (%p814_p6) target bundleno = 39 (0x27), region = 16 }
   0xc   : > { %s66_s23 = sor.u32 %s65_s22, %s64_s21 }
   0xd   : > { %p67_p5 = scmp.eq.s32.totalorder %s66_s23, 0 }
   0xf   : > { %s1098_s25 = scalar_select %p67_p5, %s1005_s13, %s69_s24  }
  0x10   : > { %172 = sbr.rel (!%p78_p3) target bundleno = 39 (0x27), region = 24  ;;  %s174_s26 = sand.u32 (%p78_p3), 1, %s1005_s13  }
  0x11   : > { %s817_s27 = sshll.u32 (%p78_p3), %s1021_s17, 1  ;;  %s815_s28 = sshll.u32 (%p78_p3), %s174_s26, 8 }
  0x12   : > { %s864_s29 = sshll.u32 (%p78_p3), %s1017_s16, 7  ;;  %s1112_s8 = scalar_lea.vmem (%p78_p3), [#allocation2], %s815_s28 }
  0x13   : > { %s180_s30 = sadd.s32 (%p78_p3), %s864_s29, %s817_s27 }
  0x14   : > { %s819_s4 = sshll.u32 (%p78_p3), %s180_s30, 2 }
  0x15   : > { %s1107_s7 = scalar_lea.vmem %s1257_s1, %s819_s4 }
  0x16   : > { %v273_v0 = vld [vmem:[%s1107_s7] sm:$0xff]  ;;  %v275_v1 = vld [vmem:[%s1107_s7 + $0x10] sm:$0xff] }
  0x17   : > { %v277_v2 = vld [vmem:[%s1107_s7 + $0x20] sm:$0xff]  ;;  %274 = vst [vmem:[%s1112_s8] sm:$0xff] %v273_v0  ;;  %276 = vst [vmem:[%s1112_s8 + $0x8] sm:$0xff] %v275_v1  ;;  %v279_v3 = vld [vmem:[%s1107_s7 + $0x30] sm:$0xff] }
  0x18   : > { %278 = vst [vmem:[%s1112_s8 + $0x10] sm:$0xff] %v277_v2  ;;  %v281_v4 = vld [vmem:[%s1107_s7 + $0x40] sm:$0xff]  ;;  %v283_v5 = vld [vmem:[%s1107_s7 + $0x50] sm:$0xff]  ;;  %280 = vst [vmem:[%s1112_s8 + $0x18] sm:$0xff] %v279_v3 }
  0x19   : > { %282 = vst [vmem:[%s1112_s8 + $0x20] sm:$0xff] %v281_v4  ;;  %284 = vst [vmem:[%s1112_s8 + $0x28] sm:$0xff] %v283_v5  ;;  %v285_v6 = vld [vmem:[%s1107_s7 + $0x60] sm:$0xff]  ;;  %v287_v7 = vld [vmem:[%s1107_s7 + $0x70] sm:$0xff] }
  0x1a   : > { %v289_v8 = vld [vmem:[%s1107_s7 + $0x80] sm:$0xff]  ;;  %286 = vst [vmem:[%s1112_s8 + $0x30] sm:$0xff] %v285_v6  ;;  %288 = vst [vmem:[%s1112_s8 + $0x38] sm:$0xff] %v287_v7  ;;  %v291_v9 = vld [vmem:[%s1107_s7 + $0x90] sm:$0xff] }
  0x1b   : > { %290 = vst [vmem:[%s1112_s8 + $0x40] sm:$0xff] %v289_v8  ;;  %v293_v10 = vld [vmem:[%s1107_s7 + $0xa0] sm:$0xff]  ;;  %v295_v11 = vld [vmem:[%s1107_s7 + $0xb0] sm:$0xff]  ;;  %292 = vst [vmem:[%s1112_s8 + $0x48] sm:$0xff] %v291_v9 }
  0x1c   : > { %294 = vst [vmem:[%s1112_s8 + $0x50] sm:$0xff] %v293_v10  ;;  %296 = vst [vmem:[%s1112_s8 + $0x58] sm:$0xff] %v295_v11  ;;  %v297_v12 = vld [vmem:[%s1107_s7 + $0xc0] sm:$0xff]  ;;  %v299_v13 = vld [vmem:[%s1107_s7 + $0xd0] sm:$0xff] }
  0x1d   : > { %v301_v14 = vld [vmem:[%s1107_s7 + $0xe0] sm:$0xff]  ;;  %298 = vst [vmem:[%s1112_s8 + $0x60] sm:$0xff] %v297_v12  ;;  %300 = vst [vmem:[%s1112_s8 + $0x68] sm:$0xff] %v299_v13  ;;  %v303_v15 = vld [vmem:[%s1107_s7 + $0xf0] sm:$0xff] }
  0x1e   : > { %302 = vst [vmem:[%s1112_s8 + $0x70] sm:$0xff] %v301_v14  ;;  %v305_v16 = vld [vmem:[%s1107_s7 + $0x100] sm:$0xff]  ;;  %v307_v17 = vld [vmem:[%s1107_s7 + $0x110] sm:$0xff]  ;;  %304 = vst [vmem:[%s1112_s8 + $0x78] sm:$0xff] %v303_v15 }
  0x1f   : > { %306 = vst [vmem:[%s1112_s8 + $0x80] sm:$0xff] %v305_v16  ;;  %308 = vst [vmem:[%s1112_s8 + $0x88] sm:$0xff] %v307_v17  ;;  %v309_v18 = vld [vmem:[%s1107_s7 + $0x120] sm:$0xff]  ;;  %v311_v19 = vld [vmem:[%s1107_s7 + $0x130] sm:$0xff] }
  0x20   : > { %v313_v20 = vld [vmem:[%s1107_s7 + $0x140] sm:$0xff]  ;;  %310 = vst [vmem:[%s1112_s8 + $0x90] sm:$0xff] %v309_v18  ;;  %312 = vst [vmem:[%s1112_s8 + $0x98] sm:$0xff] %v311_v19  ;;  %v315_v21 = vld [vmem:[%s1107_s7 + $0x150] sm:$0xff] }
  0x21   : > { %314 = vst [vmem:[%s1112_s8 + $0xa0] sm:$0xff] %v313_v20  ;;  %v317_v22 = vld [vmem:[%s1107_s7 + $0x160] sm:$0xff]  ;;  %v319_v23 = vld [vmem:[%s1107_s7 + $0x170] sm:$0xff]  ;;  %316 = vst [vmem:[%s1112_s8 + $0xa8] sm:$0xff] %v315_v21 }
  0x22   : > { %318 = vst [vmem:[%s1112_s8 + $0xb0] sm:$0xff] %v317_v22  ;;  %320 = vst [vmem:[%s1112_s8 + $0xb8] sm:$0xff] %v319_v23  ;;  %v321_v24 = vld [vmem:[%s1107_s7 + $0x180] sm:$0xff]  ;;  %v323_v25 = vld [vmem:[%s1107_s7 + $0x190] sm:$0xff] }
  0x23   : > { %v325_v26 = vld [vmem:[%s1107_s7 + $0x1a0] sm:$0xff]  ;;  %322 = vst [vmem:[%s1112_s8 + $0xc0] sm:$0xff] %v321_v24  ;;  %324 = vst [vmem:[%s1112_s8 + $0xc8] sm:$0xff] %v323_v25  ;;  %v327_v27 = vld [vmem:[%s1107_s7 + $0x1b0] sm:$0xff] }
  0x24   : > { %326 = vst [vmem:[%s1112_s8 + $0xd0] sm:$0xff] %v325_v26  ;;  %v329_v28 = vld [vmem:[%s1107_s7 + $0x1c0] sm:$0xff]  ;;  %v331_v29 = vld [vmem:[%s1107_s7 + $0x1d0] sm:$0xff]  ;;  %328 = vst [vmem:[%s1112_s8 + $0xd8] sm:$0xff] %v327_v27 }
  0x25   : > { %330 = vst [vmem:[%s1112_s8 + $0xe0] sm:$0xff] %v329_v28  ;;  %332 = vst [vmem:[%s1112_s8 + $0xe8] sm:$0xff] %v331_v29  ;;  %v333_v30 = vld [vmem:[%s1107_s7 + $0x1e0] sm:$0xff]  ;;  %v335_v31 = vld [vmem:[%s1107_s7 + $0x1f0] sm:$0xff] }
  0x26   : > { %334 = vst [vmem:[%s1112_s8 + $0xf0] sm:$0xff] %v333_v30  ;;  %336 = vst [vmem:[%s1112_s8 + $0xf8] sm:$0xff] %v335_v31 }
  0x27 PF: > { %p820_p7 = scmp.ge.s32.totalorder %s1025_s18, 1  ;;  %p349_p8 = scmp.lt.s32.totalorder %s1025_s18, 19 }
  0x29   : > { %p350_p9 = pnand %p820_p7, %p349_p8 }
  0x2a   : > { %s356_s9 = sand.u32 (!%p350_p9), 1, %s1001_s12   ;;  %s822_s10 = sshll.u32 (!%p350_p9), %s1009_s14, 1 }
  0x2b   : > { %353 = sbr.rel (%p350_p9) target bundleno = 329 (0x149), region = 66  ;;  %s821_s11 = sshll.u32 (!%p350_p9), %s356_s9, 8 }
  0x2c   : > { %p399_p10 = scmp.lt.s32.totalorder (!%p350_p9), %s822_s10, 17  ;;  %s824_s21 = sshll.u32 (!%p350_p9), %s1013_s15, 1 }
  0x2d   : > { %p409_p11 = scmp.lt.s32.totalorder (!%p350_p9), %s824_s21, 3  ;;  %s1193_s15 = scalar_lea.vmem (!%p350_p9), [#allocation2], %s821_s11 }
  0x2e   : > { %p827_p12 = scmp.ne.s32.totalorder (!%p350_p9), %s1009_s14, 0 }
  0x30   : > { %s1273_s10 = smov (!%p399_p10, %s822_s10), 17  ;;  %s1275_s21 = smov (!%p409_p11, %s824_s21), 3 }
  0x31   : > { %s823_s22 = sshll.u32 %s1273_s10, 2  ;;  %s411_s29 = scalar_lea.vmem %s1258_s2, %s1275_s21 }
  0x32   : > { %s1183_s26 = scalar_lea.vmem %s1256_s0, %s823_s22  ;;  %s826_s30 = sshll.u32 %s1275_s21, 3 }
  0x33   : > { %s1191_s5 = scalar_lea.vmem %s1259_s3, %s826_s30  ;;  %426 = sbr.rel (%p827_p12) target bundleno = 65 (0x41), region = 74 }
  0x38   : > { %v429_v32 = vlaneseq  ;;  %v427_v34 = vld [vmem:[%s411_s29] sm:$0x3] }
  0x3a   : > { %v430_v33 = vshrl.u32 %v429_v32, 7 }
  0x3c   : > { %v431_v35 = vsub.s32 0, %v430_v33  ;;  %v435_v36 = vsub.s32 1, %v430_v33 }
  0x3e   : > { %v432_v37 = vrot.slane %v427_v34, %v431_v35  ;;  %v436_v38 = vrot.slane %v427_v34, %v435_v36 }
  0x40   : > { %439 = vst [vmem:[%s1191_s5] sm:$0xff] %v432_v37  ;;  %440 = vst [vmem:[%s1191_s5 + $0x8] sm:$0xff] %v436_v38 }
  0x41 PF: > { %v921_v39 = vld [vmem:[%s1193_s15 + $0x74] ss:$8 sps:$4 sm:$0xff]   ;;  %v923_v40 = vld [vmem:[%s1193_s15 + $0x70] ss:$8 sps:$4 sm:$0xff]   ;;  %v924_v41 = vld [vmem:[%s1193_s15 + $0x64] ss:$8 sps:$4 sm:$0xff]  }
  0x42   : > { %643 = vmatprep.subr.bf16.mxu0 %v921_v39  ;;  %v926_v42 = vld [vmem:[%s1193_s15 + $0x60] ss:$8 sps:$4 sm:$0xff]   ;;  %v927_v43 = vld [vmem:[%s1193_s15 + $0x54] ss:$8 sps:$4 sm:$0xff]   ;;  %v929_v44 = vld [vmem:[%s1193_s15 + $0x50] ss:$8 sps:$4 sm:$0xff]  }
  0x43   : > { %644 = vmatpush1.bf16.msra.mxu0 %v923_v40  ;;  %v930_v45 = vld [vmem:[%s1193_s15 + $0x44] ss:$8 sps:$4 sm:$0xff]   ;;  %v932_v46 = vld [vmem:[%s1193_s15 + $0x40] ss:$8 sps:$4 sm:$0xff]   ;;  %v933_v47 = vld [vmem:[%s1193_s15 + $0x34] ss:$8 sps:$4 sm:$0xff]  }
  0x44   : > { %645 = vmatprep.subr.bf16.mxu0 %v924_v41  ;;  %v935_v48 = vld [vmem:[%s1193_s15 + $0x30] ss:$8 sps:$4 sm:$0xff]   ;;  %v936_v49 = vld [vmem:[%s1193_s15 + $0x24] ss:$8 sps:$4 sm:$0xff]   ;;  %v938_v50 = vld [vmem:[%s1193_s15 + $0x20] ss:$8 sps:$4 sm:$0xff]  }
  0x45   : > { %v939_v51 = vld [vmem:[%s1193_s15 + $0x14] ss:$8 sps:$4 sm:$0xff]   ;;  %v443_v52 = vld [vmem:[%s1183_s26] sm:$0xff]  ;;  %v941_v54 = vld [vmem:[%s1193_s15 + $0x10] ss:$8 sps:$4 sm:$0xff]  }
  0x46   : > { %v829_v53 = vcombine.high %v443_v52, %v443_v52  ;;  %v942_v55 = vld [vmem:[%s1193_s15 + $0x4] ss:$8 sps:$4 sm:$0xff]   ;;  %v944_v56 = vld [vmem:[%s1193_s15] ss:$8 sps:$4 sm:$0xff]   ;;  %v945_v57 = vld [vmem:[%s1193_s15 + $0xf4] ss:$8 sps:$4 sm:$0xff]   ;;  %v828_v9 = vcombine.low %v443_v52, %v443_v52 }
  0x47   : > { %646 = vmatpush1.bf16.msra.mxu0 %v926_v42  ;;  %v947_v58 = vld [vmem:[%s1193_s15 + $0xf0] ss:$8 sps:$4 sm:$0xff]   ;;  %v948_v59 = vld [vmem:[%s1193_s15 + $0xe4] ss:$8 sps:$4 sm:$0xff]   ;;  %v950_v60 = vld [vmem:[%s1193_s15 + $0xe0] ss:$8 sps:$4 sm:$0xff]  }
  0x48   : > { %647 = vmatprep.subr.bf16.mxu0 %v927_v43  ;;  %675 = vmatprep.mubr.bf16.mxu0 %v829_v53  ;;  %v951_v61 = vld [vmem:[%s1193_s15 + $0xd4] ss:$8 sps:$4 sm:$0xff]   ;;  %v953_v62 = vld [vmem:[%s1193_s15 + $0xd0] ss:$8 sps:$4 sm:$0xff]   ;;  %v954_v63 = vld [vmem:[%s1193_s15 + $0xc4] ss:$8 sps:$4 sm:$0xff]  }
  0x49   : > { %v956_v0 = vld [vmem:[%s1193_s15 + $0xc0] ss:$8 sps:$4 sm:$0xff]   ;;  %v957_v1 = vld [vmem:[%s1193_s15 + $0xb4] ss:$8 sps:$4 sm:$0xff]   ;;  %v959_v2 = vld [vmem:[%s1193_s15 + $0xb0] ss:$8 sps:$4 sm:$0xff]  }
  0x4a   : > { %v960_v3 = vld [vmem:[%s1193_s15 + $0xa4] ss:$8 sps:$4 sm:$0xff]   ;;  %v962_v4 = vld [vmem:[%s1193_s15 + $0xa0] ss:$8 sps:$4 sm:$0xff]   ;;  %v963_v5 = vld [vmem:[%s1193_s15 + $0x94] ss:$8 sps:$4 sm:$0xff]  }
  0x4b   : > { %648 = vmatpush1.bf16.msra.mxu0 %v929_v44  ;;  %v965_v6 = vld [vmem:[%s1193_s15 + $0x90] ss:$8 sps:$4 sm:$0xff]   ;;  %v966_v7 = vld [vmem:[%s1193_s15 + $0x84] ss:$8 sps:$4 sm:$0xff]   ;;  %v968_v8 = vld [vmem:[%s1193_s15 + $0x80] ss:$8 sps:$4 sm:$0xff]  }
  0x4c   : > { %649 = vmatprep.subr.bf16.mxu0 %v930_v45  ;;  %v441_v10 = vld [vmem:[%s1191_s5] sm:$0xff]  ;;  %v442_v12 = vld [vmem:[%s1191_s5 + $0x8] sm:$0xff] }
  0x4f   : > { %650 = vmatpush1.bf16.msra.mxu0 %v932_v46 }
  0x50   : > { %651 = vmatprep.subr.bf16.mxu0 %v933_v47 }
  0x53   : > { %652 = vmatpush1.bf16.msra.mxu0 %v935_v48 }
  0x54   : > { %653 = vmatprep.subr.bf16.mxu0 %v936_v49 }
  0x57   : > { %654 = vmatpush1.bf16.msra.mxu0 %v938_v50 }
  0x58   : > { %655 = vmatprep.subr.bf16.mxu0 %v939_v51 }
  0x5b   : > { %656 = vmatpush1.bf16.msra.mxu0 %v941_v54 }
  0x5c   : > { %657 = vmatprep.subr.bf16.mxu0 %v942_v55 }
  0x5f   : > { %658 = vmatpush1.bf16.msra.mxu0 %v944_v56 }
  0x60   : > { %659 = vmatprep.subr.bf16.mxu0 %v945_v57 }
  0x63   : > { %660 = vmatpush2.bf16.msra.mxu0 %v947_v58 }
  0x64   : > { %661 = vmatprep.subr.bf16.mxu0 %v948_v59 }
  0x67   : > { %662 = vmatpush2.bf16.msra.mxu0 %v950_v60 }
  0x68   : > { %663 = vmatprep.subr.bf16.mxu0 %v951_v61 }
  0x6b   : > { %664 = vmatpush2.bf16.msra.mxu0 %v953_v62 }
  0x6c   : > { %665 = vmatprep.subr.bf16.mxu0 %v954_v63 }
  0x6f   : > { %666 = vmatpush2.bf16.msra.mxu0 %v956_v0 }
  0x70   : > { %667 = vmatprep.subr.bf16.mxu0 %v957_v1 }
  0x73   : > { %668 = vmatpush2.bf16.msra.mxu0 %v959_v2 }
  0x74   : > { %669 = vmatprep.subr.bf16.mxu0 %v960_v3 }
  0x77   : > { %670 = vmatpush2.bf16.msra.mxu0 %v962_v4 }
  0x78   : > { %671 = vmatprep.subr.bf16.mxu0 %v963_v5 }
  0x7b   : > { %672 = vmatpush2.bf16.msra.mxu0 %v965_v6 }
  0x7c   : > { %673 = vmatprep.subr.bf16.mxu0 %v966_v7 }
  0x7f   : > { %674 = vmatpush2.bf16.msra.mxu0 %v968_v8 }
  0x82   : > { %676 = vmatmul.mubr.bf16.vlgmr.msra.gmra.mxu0 %v828_v9 }
 0x142   : > { %v677_v11 = vpop.f32.mrf.mxu0 }
 0x143   : > { %v684_v13 = vadd.f32 %v677_v11, %v441_v10 }
 0x144   : > { %v679_v14 = vpop.f32.mrf.mxu0 }
 0x145   : > { %v685_v15 = vadd.f32 %v679_v14, %v442_v12  ;;  %686 = vst [vmem:[%s1191_s5] sm:$0xff] %v684_v13 }
 0x146   : > { %v681_v16 = vpop.f32.mrf.mxu0 }
 0x147   : > { %687 = vst [vmem:[%s1191_s5 + $0x8] sm:$0xff] %v685_v15 }
 0x148   : > { %v682_v17 = vpop.f32.mrf.mxu0 }
 0x149 PF: > { %s13_s18 = sadd.s32 1, %s1025_s18   ;;  %s1260_s12 = smov %s1005_s13 }
 0x14a   : > { %p10_p13 = scmp.ge.s32.totalorder %s13_s18, 20   ;;  %s1261_s13 = smov %s1098_s25 }
 0x14b   : > { %s1262_s14 = smov %s1017_s16  ;;  %s1263_s15 = smov %s1021_s17 }
 0x14c   : > { %s1264_s16 = smov %s1267_s19  ;;  %s1265_s17 = smov %s1271_s20 }
 0x14d   :  { %12 = sbr.rel (!%p10_p13) target bundleno = 4 (0x4), region = 115 }

// kernel: _forward.72
= control target key start
LH: loop header
LB: loop body
LE: loop exit
PB: predicated region body
PF: predicated region fallthrough
CT: control target
= control target key end

     0   :  { %v17_v0 = vlaneseq  ;;  %v96_v1 = vmov 1983009808   ;;  %s129_s1 = inlined_call_operand.vmem [shape: f32[1,512], index: 1, kind: input, shape index: {}]   ;;  %s130_s2 = inlined_call_operand.vmem [shape: f32[1,512], index: 2, kind: input, shape index: {}]   ;;  %s131_s0 = inlined_call_operand.vmem [shape: f32[2,512], index: 0, kind: input, shape index: {}]   ;;  %s132_s3 = inlined_call_operand.vmem [shape: f32[2,512], index: 3, kind: output, shape index: {}]  }
   0x1   :  { %v36_v2 = vunpack.c.l.s4 %v96_v1  ;;  %v15_v4 = vld [vmem:[%s129_s1] sm:$0xf] }
   0x2   :  { %v18_v3 = vshrl.u32 %v17_v0, 7  ;;  %v52_v10 = vld [vmem:[%s130_s2] sm:$0xf] }
   0x3   :  { %v37_v5 = vunpack.c.0.s8 %v36_v2  ;;  %v14_v26 = vld [vmem:[%s131_s0] sm:$0xff] }
   0x4   :  { %v19_v6 = vsub.s32 0, %v18_v3  ;;  %v23_v7 = vsub.s32 1, %v18_v3  ;;  %v27_v8 = vsub.s32 2, %v18_v3  ;;  %v31_v9 = vsub.s32 3, %v18_v3 }
   0x5   :  { %v40_v11 = vsub.s32 %v37_v5, %v18_v3 }
   0x6   :  { %v20_v12 = vrot.slane %v15_v4, %v19_v6  ;;  %v24_v13 = vrot.slane %v15_v4, %v23_v7  ;;  %v28_v14 = vrot.slane %v15_v4, %v27_v8  ;;  %v32_v15 = vrot.slane %v15_v4, %v31_v9 }
   0x7   :  { %v57_v16 = vrot.slane %v52_v10, %v19_v6  ;;  %v61_v17 = vrot.slane %v52_v10, %v23_v7  ;;  %v65_v18 = vrot.slane %v52_v10, %v27_v8  ;;  %v69_v19 = vrot.slane %v52_v10, %v31_v9 }
   0x8   :  { %v33_v20 = vcombine.low %v20_v12, %v24_v13  ;;  %v34_v21 = vcombine.low %v28_v14, %v32_v15 }
   0x9   :  { %v70_v22 = vcombine.low %v57_v16, %v61_v17  ;;  %v71_v23 = vcombine.low %v65_v18, %v69_v19 }
   0xa   :  { %v41_v24 = vrot.slane %v33_v20, %v40_v11  ;;  %v48_v25 = vrot.slane %v34_v21, %v40_v11 }
   0xb   :  { %v78_v27 = vrot.slane %v70_v22, %v40_v11  ;;  %v85_v28 = vrot.slane %v71_v23, %v40_v11 }
   0xc   :  { %v49_v29 = vcombine.low %v41_v24, %v48_v25 }
   0xd   :  { %v86_v30 = vcombine.low %v78_v27, %v85_v28 }
   0xe   :  { %v51_v31 = vmul.f32 %v49_v29, %v14_v26 }
  0x10   :  { %v88_v32 = vadd.f32 %v86_v30, %v51_v31 }
  0x12   :  { %v89_v33 = vmax.f32 %v88_v32, 0.0 }
  0x14   :  { %90 = vst [vmem:[%s132_s3] sm:$0xff] %v89_v33 }

// kernel: _forward.73
= control target key start
LH: loop header
LB: loop body
LE: loop exit
PB: predicated region body
PF: predicated region fallthrough
CT: control target
= control target key end

     0   :  { %s1047_s12 = smov 0   ;;  %s1049_s13 = smov 0   ;;  %s1256_s0 = inlined_call_operand.vmem [shape: bf16[8,4608], index: 0, kind: input, shape index: {}]   ;;  %s1257_s1 = inlined_call_operand.vmem [shape: bf16[4608,512], index: 1, kind: input, shape index: {}]   ;;  %s1258_s2 = inlined_call_operand.vmem [shape: f32[1,512], index: 2, kind: input, shape index: {}]   ;;  %s1259_s3 = inlined_call_operand.vmem [shape: f32[8,512], index: 3, kind: output, shape index: {}]  }
   0x1   :  { %s1051_s14 = smov 0   ;;  %s1053_s15 = smov 0  }
   0x2   :  { %s1055_s16 = smov 0   ;;  %s1057_s17 = smov 0  }
   0x3   :  { %s1059_s18 = smov 0  }
   0x4 LB: > { %s25_s19 = sadd.s32 1, %s1017_s16  ;;  %s28_s20 = sadd.s32 1, %s1021_s17  ;;  %s1025_s18 = sphi %s1059_s18, %s13_s18   ;;  %s1021_s17 = sphi %s1057_s17, %s1265_s17   ;;  %s1017_s16 = sphi %s1055_s16, %s1264_s16   ;;  %s1013_s15 = sphi %s1053_s15, %s1263_s15   ;;  %s1009_s14 = sphi %s1051_s14, %s1262_s14   ;;  %s1005_s13 = sphi %s1049_s13, %s1261_s13   ;;  %s1001_s12 = sphi %s1047_s12, %s1260_s12  }
   0x5   : > { %p26_p0 = scmp.ge.s32.totalorder %s25_s19, 18  ;;  %p76_p1 = scmp.ne.s32.totalorder %s1005_s13, %s1001_s12 }
   0x6   : > { %p77_p2 = scmp.eq.s32.totalorder %s1025_s18, 0  ;;  %s69_s24 = sadd.s32 1, %s1005_s13 }
   0x7   : > { %s1267_s19 = smov (%p26_p0, %s25_s19), 0  ;;  %s1269_s20 = smov (!%p26_p0, %s28_s20), %s1021_s17 }
   0x8   : > { %p78_p3 = por %p77_p2, %p76_p1  ;;  %p30_p4 = scmp.ge.s32.totalorder %s1269_s20, 2 }
   0x9   : > { %s64_s21 = ssub.s32 %s1017_s16, %s1267_s19  ;;  %p814_p6 = scmp.ge.s32.totalorder %s1025_s18, 36 }
   0xa   : > { %s1271_s20 = smov (%p30_p4, %s1269_s20), 0 }
   0xb   : > { %s65_s22 = ssub.s32 %s1021_s17, %s1271_s20  ;;  %156 = sbr.rel (%p814_p6) target bundleno = 39 (0x27), region = 16 }
   0xc   : > { %s66_s23 = sor.u32 %s65_s22, %s64_s21 }
   0xd   : > { %p67_p5 = scmp.eq.s32.totalorder %s66_s23, 0 }
   0xf   : > { %s1098_s25 = scalar_select %p67_p5, %s1005_s13, %s69_s24  }
  0x10   : > { %172 = sbr.rel (!%p78_p3) target bundleno = 39 (0x27), region = 24  ;;  %s174_s26 = sand.u32 (%p78_p3), 1, %s1005_s13  }
  0x11   : > { %s817_s27 = sshll.u32 (%p78_p3), %s1021_s17, 1  ;;  %s815_s28 = sshll.u32 (%p78_p3), %s174_s26, 8 }
  0x12   : > { %s864_s29 = sshll.u32 (%p78_p3), %s1017_s16, 7  ;;  %s1112_s8 = scalar_lea.vmem (%p78_p3), [#allocation2], %s815_s28 }
  0x13   : > { %s180_s30 = sadd.s32 (%p78_p3), %s864_s29, %s817_s27 }
  0x14   : > { %s819_s4 = sshll.u32 (%p78_p3), %s180_s30, 2 }
  0x15   : > { %s1107_s7 = scalar_lea.vmem %s1257_s1, %s819_s4 }
  0x16   : > { %v273_v0 = vld [vmem:[%s1107_s7] sm:$0xff]  ;;  %v275_v1 = vld [vmem:[%s1107_s7 + $0x10] sm:$0xff] }
  0x17   : > { %v277_v2 = vld [vmem:[%s1107_s7 + $0x20] sm:$0xff]  ;;  %274 = vst [vmem:[%s1112_s8] sm:$0xff] %v273_v0  ;;  %276 = vst [vmem:[%s1112_s8 + $0x8] sm:$0xff] %v275_v1  ;;  %v279_v3 = vld [vmem:[%s1107_s7 + $0x30] sm:$0xff] }
  0x18   : > { %278 = vst [vmem:[%s1112_s8 + $0x10] sm:$0xff] %v277_v2  ;;  %v281_v4 = vld [vmem:[%s1107_s7 + $0x40] sm:$0xff]  ;;  %v283_v5 = vld [vmem:[%s1107_s7 + $0x50] sm:$0xff]  ;;  %280 = vst [vmem:[%s1112_s8 + $0x18] sm:$0xff] %v279_v3 }
  0x19   : > { %282 = vst [vmem:[%s1112_s8 + $0x20] sm:$0xff] %v281_v4  ;;  %284 = vst [vmem:[%s1112_s8 + $0x28] sm:$0xff] %v283_v5  ;;  %v285_v6 = vld [vmem:[%s1107_s7 + $0x60] sm:$0xff]  ;;  %v287_v7 = vld [vmem:[%s1107_s7 + $0x70] sm:$0xff] }
  0x1a   : > { %v289_v8 = vld [vmem:[%s1107_s7 + $0x80] sm:$0xff]  ;;  %286 = vst [vmem:[%s1112_s8 + $0x30] sm:$0xff] %v285_v6  ;;  %288 = vst [vmem:[%s1112_s8 + $0x38] sm:$0xff] %v287_v7  ;;  %v291_v9 = vld [vmem:[%s1107_s7 + $0x90] sm:$0xff] }
  0x1b   : > { %290 = vst [vmem:[%s1112_s8 + $0x40] sm:$0xff] %v289_v8  ;;  %v293_v10 = vld [vmem:[%s1107_s7 + $0xa0] sm:$0xff]  ;;  %v295_v11 = vld [vmem:[%s1107_s7 + $0xb0] sm:$0xff]  ;;  %292 = vst [vmem:[%s1112_s8 + $0x48] sm:$0xff] %v291_v9 }
  0x1c   : > { %294 = vst [vmem:[%s1112_s8 + $0x50] sm:$0xff] %v293_v10  ;;  %296 = vst [vmem:[%s1112_s8 + $0x58] sm:$0xff] %v295_v11  ;;  %v297_v12 = vld [vmem:[%s1107_s7 + $0xc0] sm:$0xff]  ;;  %v299_v13 = vld [vmem:[%s1107_s7 + $0xd0] sm:$0xff] }
  0x1d   : > { %v301_v14 = vld [vmem:[%s1107_s7 + $0xe0] sm:$0xff]  ;;  %298 = vst [vmem:[%s1112_s8 + $0x60] sm:$0xff] %v297_v12  ;;  %300 = vst [vmem:[%s1112_s8 + $0x68] sm:$0xff] %v299_v13  ;;  %v303_v15 = vld [vmem:[%s1107_s7 + $0xf0] sm:$0xff] }
  0x1e   : > { %302 = vst [vmem:[%s1112_s8 + $0x70] sm:$0xff] %v301_v14  ;;  %v305_v16 = vld [vmem:[%s1107_s7 + $0x100] sm:$0xff]  ;;  %v307_v17 = vld [vmem:[%s1107_s7 + $0x110] sm:$0xff]  ;;  %304 = vst [vmem:[%s1112_s8 + $0x78] sm:$0xff] %v303_v15 }
  0x1f   : > { %306 = vst [vmem:[%s1112_s8 + $0x80] sm:$0xff] %v305_v16  ;;  %308 = vst [vmem:[%s1112_s8 + $0x88] sm:$0xff] %v307_v17  ;;  %v309_v18 = vld [vmem:[%s1107_s7 + $0x120] sm:$0xff]  ;;  %v311_v19 = vld [vmem:[%s1107_s7 + $0x130] sm:$0xff] }
  0x20   : > { %v313_v20 = vld [vmem:[%s1107_s7 + $0x140] sm:$0xff]  ;;  %310 = vst [vmem:[%s1112_s8 + $0x90] sm:$0xff] %v309_v18  ;;  %312 = vst [vmem:[%s1112_s8 + $0x98] sm:$0xff] %v311_v19  ;;  %v315_v21 = vld [vmem:[%s1107_s7 + $0x150] sm:$0xff] }
  0x21   : > { %314 = vst [vmem:[%s1112_s8 + $0xa0] sm:$0xff] %v313_v20  ;;  %v317_v22 = vld [vmem:[%s1107_s7 + $0x160] sm:$0xff]  ;;  %v319_v23 = vld [vmem:[%s1107_s7 + $0x170] sm:$0xff]  ;;  %316 = vst [vmem:[%s1112_s8 + $0xa8] sm:$0xff] %v315_v21 }
  0x22   : > { %318 = vst [vmem:[%s1112_s8 + $0xb0] sm:$0xff] %v317_v22  ;;  %320 = vst [vmem:[%s1112_s8 + $0xb8] sm:$0xff] %v319_v23  ;;  %v321_v24 = vld [vmem:[%s1107_s7 + $0x180] sm:$0xff]  ;;  %v323_v25 = vld [vmem:[%s1107_s7 + $0x190] sm:$0xff] }
  0x23   : > { %v325_v26 = vld [vmem:[%s1107_s7 + $0x1a0] sm:$0xff]  ;;  %322 = vst [vmem:[%s1112_s8 + $0xc0] sm:$0xff] %v321_v24  ;;  %324 = vst [vmem:[%s1112_s8 + $0xc8] sm:$0xff] %v323_v25  ;;  %v327_v27 = vld [vmem:[%s1107_s7 + $0x1b0] sm:$0xff] }
  0x24   : > { %326 = vst [vmem:[%s1112_s8 + $0xd0] sm:$0xff] %v325_v26  ;;  %v329_v28 = vld [vmem:[%s1107_s7 + $0x1c0] sm:$0xff]  ;;  %v331_v29 = vld [vmem:[%s1107_s7 + $0x1d0] sm:$0xff]  ;;  %328 = vst [vmem:[%s1112_s8 + $0xd8] sm:$0xff] %v327_v27 }
  0x25   : > { %330 = vst [vmem:[%s1112_s8 + $0xe0] sm:$0xff] %v329_v28  ;;  %332 = vst [vmem:[%s1112_s8 + $0xe8] sm:$0xff] %v331_v29  ;;  %v333_v30 = vld [vmem:[%s1107_s7 + $0x1e0] sm:$0xff]  ;;  %v335_v31 = vld [vmem:[%s1107_s7 + $0x1f0] sm:$0xff] }
  0x26   : > { %334 = vst [vmem:[%s1112_s8 + $0xf0] sm:$0xff] %v333_v30  ;;  %336 = vst [vmem:[%s1112_s8 + $0xf8] sm:$0xff] %v335_v31 }
  0x27 PF: > { %p820_p7 = scmp.ge.s32.totalorder %s1025_s18, 1  ;;  %p349_p8 = scmp.lt.s32.totalorder %s1025_s18, 37 }
  0x29   : > { %p350_p9 = pnand %p820_p7, %p349_p8 }
  0x2a   : > { %s356_s9 = sand.u32 (!%p350_p9), 1, %s1001_s12   ;;  %s822_s10 = sshll.u32 (!%p350_p9), %s1009_s14, 1 }
  0x2b   : > { %353 = sbr.rel (%p350_p9) target bundleno = 329 (0x149), region = 66  ;;  %s821_s11 = sshll.u32 (!%p350_p9), %s356_s9, 8 }
  0x2c   : > { %p399_p10 = scmp.lt.s32.totalorder (!%p350_p9), %s822_s10, 35  ;;  %s824_s21 = sshll.u32 (!%p350_p9), %s1013_s15, 1 }
  0x2d   : > { %p409_p11 = scmp.lt.s32.totalorder (!%p350_p9), %s824_s21, 3  ;;  %s1193_s15 = scalar_lea.vmem (!%p350_p9), [#allocation2], %s821_s11 }
  0x2e   : > { %p827_p12 = scmp.ne.s32.totalorder (!%p350_p9), %s1009_s14, 0 }
  0x30   : > { %s1273_s10 = smov (!%p399_p10, %s822_s10), 35  ;;  %s1275_s21 = smov (!%p409_p11, %s824_s21), 3 }
  0x31   : > { %s823_s22 = sshll.u32 %s1273_s10, 2  ;;  %s411_s29 = scalar_lea.vmem %s1258_s2, %s1275_s21 }
  0x32   : > { %s1183_s26 = scalar_lea.vmem %s1256_s0, %s823_s22  ;;  %s826_s30 = sshll.u32 %s1275_s21, 3 }
  0x33   : > { %s1191_s5 = scalar_lea.vmem %s1259_s3, %s826_s30  ;;  %426 = sbr.rel (%p827_p12) target bundleno = 65 (0x41), region = 74 }
  0x38   : > { %v429_v32 = vlaneseq  ;;  %v427_v34 = vld [vmem:[%s411_s29] sm:$0x3] }
  0x3a   : > { %v430_v33 = vshrl.u32 %v429_v32, 7 }
  0x3c   : > { %v431_v35 = vsub.s32 0, %v430_v33  ;;  %v435_v36 = vsub.s32 1, %v430_v33 }
  0x3e   : > { %v432_v37 = vrot.slane %v427_v34, %v431_v35  ;;  %v436_v38 = vrot.slane %v427_v34, %v435_v36 }
  0x40   : > { %439 = vst [vmem:[%s1191_s5] sm:$0xff] %v432_v37  ;;  %440 = vst [vmem:[%s1191_s5 + $0x8] sm:$0xff] %v436_v38 }
  0x41 PF: > { %v921_v39 = vld [vmem:[%s1193_s15 + $0x74] ss:$8 sps:$4 sm:$0xff]   ;;  %v923_v40 = vld [vmem:[%s1193_s15 + $0x70] ss:$8 sps:$4 sm:$0xff]   ;;  %v924_v41 = vld [vmem:[%s1193_s15 + $0x64] ss:$8 sps:$4 sm:$0xff]  }
  0x42   : > { %643 = vmatprep.subr.bf16.mxu0 %v921_v39  ;;  %v926_v42 = vld [vmem:[%s1193_s15 + $0x60] ss:$8 sps:$4 sm:$0xff]   ;;  %v927_v43 = vld [vmem:[%s1193_s15 + $0x54] ss:$8 sps:$4 sm:$0xff]   ;;  %v929_v44 = vld [vmem:[%s1193_s15 + $0x50] ss:$8 sps:$4 sm:$0xff]  }
  0x43   : > { %644 = vmatpush1.bf16.msra.mxu0 %v923_v40  ;;  %v930_v45 = vld [vmem:[%s1193_s15 + $0x44] ss:$8 sps:$4 sm:$0xff]   ;;  %v932_v46 = vld [vmem:[%s1193_s15 + $0x40] ss:$8 sps:$4 sm:$0xff]   ;;  %v933_v47 = vld [vmem:[%s1193_s15 + $0x34] ss:$8 sps:$4 sm:$0xff]  }
  0x44   : > { %645 = vmatprep.subr.bf16.mxu0 %v924_v41  ;;  %v935_v48 = vld [vmem:[%s1193_s15 + $0x30] ss:$8 sps:$4 sm:$0xff]   ;;  %v936_v49 = vld [vmem:[%s1193_s15 + $0x24] ss:$8 sps:$4 sm:$0xff]   ;;  %v938_v50 = vld [vmem:[%s1193_s15 + $0x20] ss:$8 sps:$4 sm:$0xff]  }
  0x45   : > { %v939_v51 = vld [vmem:[%s1193_s15 + $0x14] ss:$8 sps:$4 sm:$0xff]   ;;  %v443_v52 = vld [vmem:[%s1183_s26] sm:$0xff]  ;;  %v941_v54 = vld [vmem:[%s1193_s15 + $0x10] ss:$8 sps:$4 sm:$0xff]  }
  0x46   : > { %v829_v53 = vcombine.high %v443_v52, %v443_v52  ;;  %v942_v55 = vld [vmem:[%s1193_s15 + $0x4] ss:$8 sps:$4 sm:$0xff]   ;;  %v944_v56 = vld [vmem:[%s1193_s15] ss:$8 sps:$4 sm:$0xff]   ;;  %v945_v57 = vld [vmem:[%s1193_s15 + $0xf4] ss:$8 sps:$4 sm:$0xff]   ;;  %v828_v9 = vcombine.low %v443_v52, %v443_v52 }
  0x47   : > { %646 = vmatpush1.bf16.msra.mxu0 %v926_v42  ;;  %v947_v58 = vld [vmem:[%s1193_s15 + $0xf0] ss:$8 sps:$4 sm:$0xff]   ;;  %v948_v59 = vld [vmem:[%s1193_s15 + $0xe4] ss:$8 sps:$4 sm:$0xff]   ;;  %v950_v60 = vld [vmem:[%s1193_s15 + $0xe0] ss:$8 sps:$4 sm:$0xff]  }
  0x48   : > { %647 = vmatprep.subr.bf16.mxu0 %v927_v43  ;;  %675 = vmatprep.mubr.bf16.mxu0 %v829_v53  ;;  %v951_v61 = vld [vmem:[%s1193_s15 + $0xd4] ss:$8 sps:$4 sm:$0xff]   ;;  %v953_v62 = vld [vmem:[%s1193_s15 + $0xd0] ss:$8 sps:$4 sm:$0xff]   ;;  %v954_v63 = vld [vmem:[%s1193_s15 + $0xc4] ss:$8 sps:$4 sm:$0xff]  }
  0x49   : > { %v956_v0 = vld [vmem:[%s1193_s15 + $0xc0] ss:$8 sps:$4 sm:$0xff]   ;;  %v957_v1 = vld [vmem:[%s1193_s15 + $0xb4] ss:$8 sps:$4 sm:$0xff]   ;;  %v959_v2 = vld [vmem:[%s1193_s15 + $0xb0] ss:$8 sps:$4 sm:$0xff]  }
  0x4a   : > { %v960_v3 = vld [vmem:[%s1193_s15 + $0xa4] ss:$8 sps:$4 sm:$0xff]   ;;  %v962_v4 = vld [vmem:[%s1193_s15 + $0xa0] ss:$8 sps:$4 sm:$0xff]   ;;  %v963_v5 = vld [vmem:[%s1193_s15 + $0x94] ss:$8 sps:$4 sm:$0xff]  }
  0x4b   : > { %648 = vmatpush1.bf16.msra.mxu0 %v929_v44  ;;  %v965_v6 = vld [vmem:[%s1193_s15 + $0x90] ss:$8 sps:$4 sm:$0xff]   ;;  %v966_v7 = vld [vmem:[%s1193_s15 + $0x84] ss:$8 sps:$4 sm:$0xff]   ;;  %v968_v8 = vld [vmem:[%s1193_s15 + $0x80] ss:$8 sps:$4 sm:$0xff]  }
  0x4c   : > { %649 = vmatprep.subr.bf16.mxu0 %v930_v45  ;;  %v441_v10 = vld [vmem:[%s1191_s5] sm:$0xff]  ;;  %v442_v12 = vld [vmem:[%s1191_s5 + $0x8] sm:$0xff] }
  0x4f   : > { %650 = vmatpush1.bf16.msra.mxu0 %v932_v46 }
  0x50   : > { %651 = vmatprep.subr.bf16.mxu0 %v933_v47 }
  0x53   : > { %652 = vmatpush1.bf16.msra.mxu0 %v935_v48 }
  0x54   : > { %653 = vmatprep.subr.bf16.mxu0 %v936_v49 }
  0x57   : > { %654 = vmatpush1.bf16.msra.mxu0 %v938_v50 }
  0x58   : > { %655 = vmatprep.subr.bf16.mxu0 %v939_v51 }
  0x5b   : > { %656 = vmatpush1.bf16.msra.mxu0 %v941_v54 }
  0x5c   : > { %657 = vmatprep.subr.bf16.mxu0 %v942_v55 }
  0x5f   : > { %658 = vmatpush1.bf16.msra.mxu0 %v944_v56 }
  0x60   : > { %659 = vmatprep.subr.bf16.mxu0 %v945_v57 }
  0x63   : > { %660 = vmatpush2.bf16.msra.mxu0 %v947_v58 }
  0x64   : > { %661 = vmatprep.subr.bf16.mxu0 %v948_v59 }
  0x67   : > { %662 = vmatpush2.bf16.msra.mxu0 %v950_v60 }
  0x68   : > { %663 = vmatprep.subr.bf16.mxu0 %v951_v61 }
  0x6b   : > { %664 = vmatpush2.bf16.msra.mxu0 %v953_v62 }
  0x6c   : > { %665 = vmatprep.subr.bf16.mxu0 %v954_v63 }
  0x6f   : > { %666 = vmatpush2.bf16.msra.mxu0 %v956_v0 }
  0x70   : > { %667 = vmatprep.subr.bf16.mxu0 %v957_v1 }
  0x73   : > { %668 = vmatpush2.bf16.msra.mxu0 %v959_v2 }
  0x74   : > { %669 = vmatprep.subr.bf16.mxu0 %v960_v3 }
  0x77   : > { %670 = vmatpush2.bf16.msra.mxu0 %v962_v4 }
  0x78   : > { %671 = vmatprep.subr.bf16.mxu0 %v963_v5 }
  0x7b   : > { %672 = vmatpush2.bf16.msra.mxu0 %v965_v6 }
  0x7c   : > { %673 = vmatprep.subr.bf16.mxu0 %v966_v7 }
  0x7f   : > { %674 = vmatpush2.bf16.msra.mxu0 %v968_v8 }
  0x82   : > { %676 = vmatmul.mubr.bf16.vlgmr.msra.gmra.mxu0 %v828_v9 }
 0x142   : > { %v677_v11 = vpop.f32.mrf.mxu0 }
 0x143   : > { %v684_v13 = vadd.f32 %v677_v11, %v441_v10 }
 0x144   : > { %v679_v14 = vpop.f32.mrf.mxu0 }
 0x145   : > { %v685_v15 = vadd.f32 %v679_v14, %v442_v12  ;;  %686 = vst [vmem:[%s1191_s5] sm:$0xff] %v684_v13 }
 0x146   : > { %v681_v16 = vpop.f32.mrf.mxu0 }
 0x147   : > { %687 = vst [vmem:[%s1191_s5 + $0x8] sm:$0xff] %v685_v15 }
 0x148   : > { %v682_v17 = vpop.f32.mrf.mxu0 }
 0x149 PF: > { %s13_s18 = sadd.s32 1, %s1025_s18   ;;  %s1260_s12 = smov %s1005_s13 }
 0x14a   : > { %p10_p13 = scmp.ge.s32.totalorder %s13_s18, 38   ;;  %s1261_s13 = smov %s1098_s25 }
 0x14b   : > { %s1262_s14 = smov %s1017_s16  ;;  %s1263_s15 = smov %s1021_s17 }
 0x14c   : > { %s1264_s16 = smov %s1267_s19  ;;  %s1265_s17 = smov %s1271_s20 }
 0x14d   :  { %12 = sbr.rel (!%p10_p13) target bundleno = 4 (0x4), region = 115 }

// kernel: _forward.74
= control target key start
LH: loop header
LB: loop body
LE: loop exit
PB: predicated region body
PF: predicated region fallthrough
CT: control target
= control target key end

     0   :  { %s1011_s12 = smov 0   ;;  %s1013_s13 = smov 0   ;;  %s1197_s0 = inlined_call_operand.vmem [shape: bf16[8,256], index: 0, kind: input, shape index: {}]   ;;  %s1198_s1 = inlined_call_operand.vmem [shape: bf16[256,512], index: 1, kind: input, shape index: {}]   ;;  %s1199_s2 = inlined_call_operand.vmem [shape: f32[1,512], index: 2, kind: input, shape index: {}]   ;;  %s1200_s3 = inlined_call_operand.vmem [shape: f32[8,512], index: 3, kind: output, shape index: {}]  }
   0x1   :  { %s1015_s14 = smov 0   ;;  %s1017_s15 = smov 0  }
   0x2   :  { %s1019_s16 = smov 0  }
   0x3 LB: > { %s28_s17 = sadd.s32 1, %s985_s15  ;;  %p76_p1 = scmp.ne.s32.totalorder %s977_s13, %s973_s12  ;;  %s989_s16 = sphi %s1019_s16, %s13_s16   ;;  %s985_s15 = sphi %s1017_s15, %s1204_s15   ;;  %s981_s14 = sphi %s1015_s14, %s1203_s14   ;;  %s977_s13 = sphi %s1013_s13, %s1202_s13   ;;  %s973_s12 = sphi %s1011_s12, %s1201_s12  }
   0x4   : > { %p30_p0 = scmp.ge.s32.totalorder %s28_s17, 2  ;;  %p77_p2 = scmp.eq.s32.totalorder %s989_s16, 0 }
   0x5   : > { %s69_s19 = sadd.s32 1, %s977_s13  ;;  %p815_p5 = scmp.ge.s32.totalorder %s989_s16, 2 }
   0x6   : > { %s1206_s17 = smov (%p30_p0, %s28_s17), 0  ;;  %p78_p3 = por %p77_p2, %p76_p1 }
   0x7   : > { %s65_s18 = ssub.s32 %s985_s15, %s1206_s17  ;;  %169 = sbr.rel (%p815_p5) target bundleno = 32 (0x20), region = 20 }
   0x8   : > { %p67_p4 = scmp.eq.s32.totalorder %s65_s18, 0 }
   0xa   : > { %s1046_s20 = scalar_select %p67_p4, %s977_s13, %s69_s19  }
   0xc   : > { %172 = sbr.rel (!%p78_p3) target bundleno = 32 (0x20), region = 24  ;;  %s174_s21 = sand.u32 (%p78_p3), 1, %s977_s13  }
   0xd   : > { %s860_s22 = sshll.u32 (%p78_p3), %s985_s15, 3  ;;  %s816_s23 = sshll.u32 (%p78_p3), %s174_s21, 8 }
   0xe   : > { %s1054_s26 = scalar_lea.vmem (%p78_p3), %s1198_s1, %s860_s22  ;;  %s1059_s27 = scalar_lea.vmem (%p78_p3), [#allocation2], %s816_s23 }
   0xf   : > { %v273_v0 = vld [vmem:[%s1054_s26] sm:$0xff] (%p78_p3)  ;;  %v275_v1 = vld [vmem:[%s1054_s26 + $0x10] sm:$0xff] (%p78_p3) }
  0x10   : > { %v277_v2 = vld [vmem:[%s1054_s26 + $0x20] sm:$0xff] (%p78_p3)  ;;  %274 = vst [vmem:[%s1059_s27] sm:$0xff] (%p78_p3), %v273_v0  ;;  %276 = vst [vmem:[%s1059_s27 + $0x8] sm:$0xff] (%p78_p3), %v275_v1  ;;  %v279_v3 = vld [vmem:[%s1054_s26 + $0x30] sm:$0xff] (%p78_p3) }
  0x11   : > { %278 = vst [vmem:[%s1059_s27 + $0x10] sm:$0xff] %v277_v2  ;;  %v281_v4 = vld [vmem:[%s1054_s26 + $0x40] sm:$0xff]  ;;  %v283_v5 = vld [vmem:[%s1054_s26 + $0x50] sm:$0xff]  ;;  %280 = vst [vmem:[%s1059_s27 + $0x18] sm:$0xff] %v279_v3 }
  0x12   : > { %282 = vst [vmem:[%s1059_s27 + $0x20] sm:$0xff] %v281_v4  ;;  %284 = vst [vmem:[%s1059_s27 + $0x28] sm:$0xff] %v283_v5  ;;  %v285_v6 = vld [vmem:[%s1054_s26 + $0x60] sm:$0xff]  ;;  %v287_v7 = vld [vmem:[%s1054_s26 + $0x70] sm:$0xff] }
  0x13   : > { %v289_v8 = vld [vmem:[%s1054_s26 + $0x80] sm:$0xff]  ;;  %286 = vst [vmem:[%s1059_s27 + $0x30] sm:$0xff] %v285_v6  ;;  %288 = vst [vmem:[%s1059_s27 + $0x38] sm:$0xff] %v287_v7  ;;  %v291_v9 = vld [vmem:[%s1054_s26 + $0x90] sm:$0xff] }
  0x14   : > { %290 = vst [vmem:[%s1059_s27 + $0x40] sm:$0xff] %v289_v8  ;;  %v293_v10 = vld [vmem:[%s1054_s26 + $0xa0] sm:$0xff]  ;;  %v295_v11 = vld [vmem:[%s1054_s26 + $0xb0] sm:$0xff]  ;;  %292 = vst [vmem:[%s1059_s27 + $0x48] sm:$0xff] %v291_v9 }
  0x15   : > { %294 = vst [vmem:[%s1059_s27 + $0x50] sm:$0xff] %v293_v10  ;;  %296 = vst [vmem:[%s1059_s27 + $0x58] sm:$0xff] %v295_v11  ;;  %v297_v12 = vld [vmem:[%s1054_s26 + $0xc0] sm:$0xff]  ;;  %v299_v13 = vld [vmem:[%s1054_s26 + $0xd0] sm:$0xff] }
  0x16   : > { %v301_v14 = vld [vmem:[%s1054_s26 + $0xe0] sm:$0xff]  ;;  %298 = vst [vmem:[%s1059_s27 + $0x60] sm:$0xff] %v297_v12  ;;  %300 = vst [vmem:[%s1059_s27 + $0x68] sm:$0xff] %v299_v13  ;;  %v303_v15 = vld [vmem:[%s1054_s26 + $0xf0] sm:$0xff] }
  0x17   : > { %302 = vst [vmem:[%s1059_s27 + $0x70] sm:$0xff] %v301_v14  ;;  %v305_v16 = vld [vmem:[%s1054_s26 + $0x100] sm:$0xff]  ;;  %v307_v17 = vld [vmem:[%s1054_s26 + $0x110] sm:$0xff]  ;;  %304 = vst [vmem:[%s1059_s27 + $0x78] sm:$0xff] %v303_v15 }
  0x18   : > { %306 = vst [vmem:[%s1059_s27 + $0x80] sm:$0xff] %v305_v16  ;;  %308 = vst [vmem:[%s1059_s27 + $0x88] sm:$0xff] %v307_v17  ;;  %v309_v18 = vld [vmem:[%s1054_s26 + $0x120] sm:$0xff]  ;;  %v311_v19 = vld [vmem:[%s1054_s26 + $0x130] sm:$0xff] }
  0x19   : > { %v313_v20 = vld [vmem:[%s1054_s26 + $0x140] sm:$0xff]  ;;  %310 = vst [vmem:[%s1059_s27 + $0x90] sm:$0xff] %v309_v18  ;;  %312 = vst [vmem:[%s1059_s27 + $0x98] sm:$0xff] %v311_v19  ;;  %v315_v21 = vld [vmem:[%s1054_s26 + $0x150] sm:$0xff] }
  0x1a   : > { %314 = vst [vmem:[%s1059_s27 + $0xa0] sm:$0xff] %v313_v20  ;;  %v317_v22 = vld [vmem:[%s1054_s26 + $0x160] sm:$0xff]  ;;  %v319_v23 = vld [vmem:[%s1054_s26 + $0x170] sm:$0xff]  ;;  %316 = vst [vmem:[%s1059_s27 + $0xa8] sm:$0xff] %v315_v21 }
  0x1b   : > { %318 = vst [vmem:[%s1059_s27 + $0xb0] sm:$0xff] %v317_v22  ;;  %320 = vst [vmem:[%s1059_s27 + $0xb8] sm:$0xff] %v319_v23  ;;  %v321_v24 = vld [vmem:[%s1054_s26 + $0x180] sm:$0xff]  ;;  %v323_v25 = vld [vmem:[%s1054_s26 + $0x190] sm:$0xff] }
  0x1c   : > { %v325_v26 = vld [vmem:[%s1054_s26 + $0x1a0] sm:$0xff]  ;;  %322 = vst [vmem:[%s1059_s27 + $0xc0] sm:$0xff] %v321_v24  ;;  %324 = vst [vmem:[%s1059_s27 + $0xc8] sm:$0xff] %v323_v25  ;;  %v327_v27 = vld [vmem:[%s1054_s26 + $0x1b0] sm:$0xff] }
  0x1d   : > { %326 = vst [vmem:[%s1059_s27 + $0xd0] sm:$0xff] %v325_v26  ;;  %v329_v28 = vld [vmem:[%s1054_s26 + $0x1c0] sm:$0xff]  ;;  %v331_v29 = vld [vmem:[%s1054_s26 + $0x1d0] sm:$0xff]  ;;  %328 = vst [vmem:[%s1059_s27 + $0xd8] sm:$0xff] %v327_v27 }
  0x1e   : > { %330 = vst [vmem:[%s1059_s27 + $0xe0] sm:$0xff] %v329_v28  ;;  %332 = vst [vmem:[%s1059_s27 + $0xe8] sm:$0xff] %v331_v29  ;;  %v333_v30 = vld [vmem:[%s1054_s26 + $0x1e0] sm:$0xff]  ;;  %v335_v31 = vld [vmem:[%s1054_s26 + $0x1f0] sm:$0xff] }
  0x1f   : > { %334 = vst [vmem:[%s1059_s27 + $0xf0] sm:$0xff] %v333_v30  ;;  %336 = vst [vmem:[%s1059_s27 + $0xf8] sm:$0xff] %v335_v31 }
  0x20 PF: > { %p819_p6 = scmp.ge.s32.totalorder %s989_s16, 1  ;;  %p349_p7 = scmp.lt.s32.totalorder %s989_s16, 3 }
  0x22   : > { %p350_p8 = pnand %p819_p6, %p349_p7 }
  0x23   : > { %s356_s28 = sand.u32 (!%p350_p8), 1, %s973_s12   ;;  %s821_s6 = sshll.u32 (!%p350_p8), %s981_s14, 1 }
  0x24   : > { %353 = sbr.rel (%p350_p8) target bundleno = 305 (0x131), region = 66  ;;  %s820_s4 = sshll.u32 (!%p350_p8), %s356_s28, 8 }
  0x25   : > { %s1132_s5 = scalar_lea.vmem (!%p350_p8), [#allocation2], %s820_s4  ;;  %p409_p9 = scmp.lt.s32.totalorder (!%p350_p8), %s821_s6, 3 }
  0x29   : > { %v1128_v32 = vld [vmem:[%s1197_s0] sm:$0xff]  ;;  %v901_v34 = vld [vmem:[%s1132_s5 + $0x74] ss:$8 sps:$4 sm:$0xff]   ;;  %v903_v35 = vld [vmem:[%s1132_s5 + $0x70] ss:$8 sps:$4 sm:$0xff]   ;;  %v429_v41 = vlaneseq  ;;  %s1208_s6 = smov (!%p409_p9, %s821_s6), 3 }
  0x2a   : > { %v825_v33 = vcombine.high %v1128_v32, %v1128_v32  ;;  %643 = vmatprep.subr.bf16.mxu0 %v901_v34  ;;  %v904_v36 = vld [vmem:[%s1132_s5 + $0x64] ss:$8 sps:$4 sm:$0xff]   ;;  %v906_v37 = vld [vmem:[%s1132_s5 + $0x60] ss:$8 sps:$4 sm:$0xff]   ;;  %v907_v38 = vld [vmem:[%s1132_s5 + $0x54] ss:$8 sps:$4 sm:$0xff]   ;;  %s411_s9 = scalar_lea.vmem %s1199_s2, %s1208_s6  ;;  %v824_v9 = vcombine.low %v1128_v32, %v1128_v32 }
  0x2b   : > { %644 = vmatpush1.bf16.msra.mxu0 %v903_v35  ;;  %v909_v39 = vld [vmem:[%s1132_s5 + $0x50] ss:$8 sps:$4 sm:$0xff]   ;;  %v910_v40 = vld [vmem:[%s1132_s5 + $0x44] ss:$8 sps:$4 sm:$0xff]   ;;  %v912_v42 = vld [vmem:[%s1132_s5 + $0x40] ss:$8 sps:$4 sm:$0xff]  }
  0x2c   : > { %675 = vmatprep.mubr.bf16.mxu0 %v825_v33  ;;  %645 = vmatprep.subr.bf16.mxu0 %v904_v36  ;;  %v913_v43 = vld [vmem:[%s1132_s5 + $0x34] ss:$8 sps:$4 sm:$0xff]   ;;  %v430_v44 = vshrl.u32 %v429_v41, 7  ;;  %v915_v45 = vld [vmem:[%s1132_s5 + $0x30] ss:$8 sps:$4 sm:$0xff]   ;;  %s823_s10 = sshll.u32 %s1208_s6, 3 }
  0x2d   : > { %v916_v46 = vld [vmem:[%s1132_s5 + $0x24] ss:$8 sps:$4 sm:$0xff]   ;;  %v918_v49 = vld [vmem:[%s1132_s5 + $0x20] ss:$8 sps:$4 sm:$0xff]   ;;  %v919_v50 = vld [vmem:[%s1132_s5 + $0x14] ss:$8 sps:$4 sm:$0xff]   ;;  %s1154_s14 = scalar_lea.vmem %s1200_s3, %s823_s10 }
  0x2e   : > { %v431_v47 = vsub.s32 0, %v430_v44  ;;  %v435_v48 = vsub.s32 1, %v430_v44  ;;  %v427_v51 = vld [vmem:[%s411_s9] sm:$0x3]  ;;  %v921_v54 = vld [vmem:[%s1132_s5 + $0x10] ss:$8 sps:$4 sm:$0xff]  }
  0x2f   : > { %646 = vmatpush1.bf16.msra.mxu0 %v906_v37  ;;  %v922_v55 = vld [vmem:[%s1132_s5 + $0x4] ss:$8 sps:$4 sm:$0xff]   ;;  %v924_v56 = vld [vmem:[%s1132_s5] ss:$8 sps:$4 sm:$0xff]   ;;  %v925_v57 = vld [vmem:[%s1132_s5 + $0xf4] ss:$8 sps:$4 sm:$0xff]  }
  0x30   : > { %647 = vmatprep.subr.bf16.mxu0 %v907_v38  ;;  %v432_v52 = vrot.slane %v427_v51, %v431_v47  ;;  %v436_v53 = vrot.slane %v427_v51, %v435_v48  ;;  %v927_v58 = vld [vmem:[%s1132_s5 + $0xf0] ss:$8 sps:$4 sm:$0xff]   ;;  %v928_v59 = vld [vmem:[%s1132_s5 + $0xe4] ss:$8 sps:$4 sm:$0xff]   ;;  %v930_v60 = vld [vmem:[%s1132_s5 + $0xe0] ss:$8 sps:$4 sm:$0xff]  }
  0x31   : > { %v931_v61 = vld [vmem:[%s1132_s5 + $0xd4] ss:$8 sps:$4 sm:$0xff]   ;;  %v933_v62 = vld [vmem:[%s1132_s5 + $0xd0] ss:$8 sps:$4 sm:$0xff]   ;;  %v934_v63 = vld [vmem:[%s1132_s5 + $0xc4] ss:$8 sps:$4 sm:$0xff]  }
  0x32   : > { %439 = vst [vmem:[%s1154_s14] sm:$0xff] %v432_v52  ;;  %440 = vst [vmem:[%s1154_s14 + $0x8] sm:$0xff] %v436_v53  ;;  %v936_v0 = vld [vmem:[%s1132_s5 + $0xc0] ss:$8 sps:$4 sm:$0xff]   ;;  %v937_v1 = vld [vmem:[%s1132_s5 + $0xb4] ss:$8 sps:$4 sm:$0xff]  }
  0x33   : > { %648 = vmatpush1.bf16.msra.mxu0 %v909_v39  ;;  %v939_v2 = vld [vmem:[%s1132_s5 + $0xb0] ss:$8 sps:$4 sm:$0xff]   ;;  %v940_v3 = vld [vmem:[%s1132_s5 + $0xa4] ss:$8 sps:$4 sm:$0xff]   ;;  %v942_v4 = vld [vmem:[%s1132_s5 + $0xa0] ss:$8 sps:$4 sm:$0xff]  }
  0x34   : > { %649 = vmatprep.subr.bf16.mxu0 %v910_v40  ;;  %v943_v5 = vld [vmem:[%s1132_s5 + $0x94] ss:$8 sps:$4 sm:$0xff]   ;;  %v945_v6 = vld [vmem:[%s1132_s5 + $0x90] ss:$8 sps:$4 sm:$0xff]   ;;  %v946_v7 = vld [vmem:[%s1132_s5 + $0x84] ss:$8 sps:$4 sm:$0xff]  }
  0x35   : > { %v948_v8 = vld [vmem:[%s1132_s5 + $0x80] ss:$8 sps:$4 sm:$0xff]  }
  0x37   : > { %650 = vmatpush1.bf16.msra.mxu0 %v912_v42 }
  0x38   : > { %651 = vmatprep.subr.bf16.mxu0 %v913_v43 }
  0x39   : > { %v441_v10 = vld [vmem:[%s1154_s14] sm:$0xff] }
  0x3b   : > { %652 = vmatpush1.bf16.msra.mxu0 %v915_v45 }
  0x3c   : > { %653 = vmatprep.subr.bf16.mxu0 %v916_v46 }
  0x3f   : > { %654 = vmatpush1.bf16.msra.mxu0 %v918_v49 }
  0x40   : > { %655 = vmatprep.subr.bf16.mxu0 %v919_v50 }
  0x43   : > { %656 = vmatpush1.bf16.msra.mxu0 %v921_v54 }
  0x44   : > { %657 = vmatprep.subr.bf16.mxu0 %v922_v55 }
  0x47   : > { %658 = vmatpush1.bf16.msra.mxu0 %v924_v56 }
  0x48   : > { %659 = vmatprep.subr.bf16.mxu0 %v925_v57 }
  0x4b   : > { %660 = vmatpush2.bf16.msra.mxu0 %v927_v58 }
  0x4c   : > { %661 = vmatprep.subr.bf16.mxu0 %v928_v59 }
  0x4f   : > { %662 = vmatpush2.bf16.msra.mxu0 %v930_v60 }
  0x50   : > { %663 = vmatprep.subr.bf16.mxu0 %v931_v61 }
  0x53   : > { %664 = vmatpush2.bf16.msra.mxu0 %v933_v62 }
  0x54   : > { %665 = vmatprep.subr.bf16.mxu0 %v934_v63 }
  0x57   : > { %666 = vmatpush2.bf16.msra.mxu0 %v936_v0 }
  0x58   : > { %667 = vmatprep.subr.bf16.mxu0 %v937_v1 }
  0x5b   : > { %668 = vmatpush2.bf16.msra.mxu0 %v939_v2 }
  0x5c   : > { %669 = vmatprep.subr.bf16.mxu0 %v940_v3 }
  0x5f   : > { %670 = vmatpush2.bf16.msra.mxu0 %v942_v4 }
  0x60   : > { %671 = vmatprep.subr.bf16.mxu0 %v943_v5 }
  0x63   : > { %672 = vmatpush2.bf16.msra.mxu0 %v945_v6 }
  0x64   : > { %673 = vmatprep.subr.bf16.mxu0 %v946_v7 }
  0x67   : > { %674 = vmatpush2.bf16.msra.mxu0 %v948_v8 }
  0x6a   : > { %676 = vmatmul.mubr.bf16.vlgmr.msra.gmra.mxu0 %v824_v9 }
 0x12a   : > { %v677_v11 = vpop.f32.mrf.mxu0 }
 0x12b   : > { %v684_v12 = vadd.f32 %v677_v11, %v441_v10 }
 0x12c   : > { %v679_v13 = vpop.f32.mrf.mxu0 }
 0x12d   : > { %v685_v14 = vadd.f32 %v679_v13, %v436_v53  ;;  %686 = vst [vmem:[%s1154_s14] sm:$0xff] %v684_v12 }
 0x12e   : > { %v681_v15 = vpop.f32.mrf.mxu0 }
 0x12f   : > { %687 = vst [vmem:[%s1154_s14 + $0x8] sm:$0xff] %v685_v14 }
 0x130   : > { %v682_v16 = vpop.f32.mrf.mxu0 }
 0x131 PF: > { %s13_s16 = sadd.s32 1, %s989_s16   ;;  %s1201_s12 = smov %s977_s13 }
 0x132   : > { %p10_p10 = scmp.ge.s32.totalorder %s13_s16, 4   ;;  %s1202_s13 = smov %s1046_s20 }
 0x133   : > { %s1203_s14 = smov %s985_s15  ;;  %s1204_s15 = smov %s1206_s17 }
 0x134   :  { %12 = sbr.rel (!%p10_p10) target bundleno = 3 (0x3), region = 115 }

// kernel: _forward.75
= control target key start
LH: loop header
LB: loop body
LE: loop exit
PB: predicated region body
PF: predicated region fallthrough
CT: control target
= control target key end

     0   :  { %v17_v0 = vlaneseq  ;;  %v95_v1 = vmov 1983009808   ;;  %s128_s1 = inlined_call_operand.vmem [shape: f32[1,512], index: 1, kind: input, shape index: {}]   ;;  %s129_s2 = inlined_call_operand.vmem [shape: f32[1,512], index: 2, kind: input, shape index: {}]   ;;  %s130_s0 = inlined_call_operand.vmem [shape: f32[2,512], index: 0, kind: input, shape index: {}]   ;;  %s131_s3 = inlined_call_operand.vmem [shape: f32[2,512], index: 3, kind: output, shape index: {}]  }
   0x1   :  { %v36_v2 = vunpack.c.l.s4 %v95_v1  ;;  %v15_v4 = vld [vmem:[%s128_s1] sm:$0xf] }
   0x2   :  { %v18_v3 = vshrl.u32 %v17_v0, 7  ;;  %v52_v10 = vld [vmem:[%s129_s2] sm:$0xf] }
   0x3   :  { %v37_v5 = vunpack.c.0.s8 %v36_v2  ;;  %v14_v26 = vld [vmem:[%s130_s0] sm:$0xff] }
   0x4   :  { %v19_v6 = vsub.s32 0, %v18_v3  ;;  %v23_v7 = vsub.s32 1, %v18_v3  ;;  %v27_v8 = vsub.s32 2, %v18_v3  ;;  %v31_v9 = vsub.s32 3, %v18_v3 }
   0x5   :  { %v40_v11 = vsub.s32 %v37_v5, %v18_v3 }
   0x6   :  { %v20_v12 = vrot.slane %v15_v4, %v19_v6  ;;  %v24_v13 = vrot.slane %v15_v4, %v23_v7  ;;  %v28_v14 = vrot.slane %v15_v4, %v27_v8  ;;  %v32_v15 = vrot.slane %v15_v4, %v31_v9 }
   0x7   :  { %v57_v16 = vrot.slane %v52_v10, %v19_v6  ;;  %v61_v17 = vrot.slane %v52_v10, %v23_v7  ;;  %v65_v18 = vrot.slane %v52_v10, %v27_v8  ;;  %v69_v19 = vrot.slane %v52_v10, %v31_v9 }
   0x8   :  { %v33_v20 = vcombine.low %v20_v12, %v24_v13  ;;  %v34_v21 = vcombine.low %v28_v14, %v32_v15 }
   0x9   :  { %v70_v22 = vcombine.low %v57_v16, %v61_v17  ;;  %v71_v23 = vcombine.low %v65_v18, %v69_v19 }
   0xa   :  { %v41_v24 = vrot.slane %v33_v20, %v40_v11  ;;  %v48_v25 = vrot.slane %v34_v21, %v40_v11 }
   0xb   :  { %v78_v27 = vrot.slane %v70_v22, %v40_v11  ;;  %v85_v28 = vrot.slane %v71_v23, %v40_v11 }
   0xc   :  { %v49_v29 = vcombine.low %v41_v24, %v48_v25 }
   0xd   :  { %v86_v30 = vcombine.low %v78_v27, %v85_v28 }
   0xe   :  { %v51_v31 = vmul.f32 %v49_v29, %v14_v26 }
  0x10   :  { %v88_v32 = vadd.f32 %v86_v30, %v51_v31 }
  0x12   :  { %89 = vst [vmem:[%s131_s3] sm:$0xff] %v88_v32 }

// kernel: _forward.76
= control target key start
LH: loop header
LB: loop body
LE: loop exit
PB: predicated region body
PF: predicated region fallthrough
CT: control target
= control target key end

     0   :  { %v20_v0 = vlaneseq  ;;  %v101_v1 = vmov 1983009808   ;;  %s142_s1 = inlined_call_operand.vmem [shape: f32[1,512], index: 1, kind: input, shape index: {}]   ;;  %s143_s2 = inlined_call_operand.vmem [shape: f32[1,512], index: 2, kind: input, shape index: {}]   ;;  %s144_s0 = inlined_call_operand.vmem [shape: f32[2,512], index: 0, kind: input, shape index: {}]   ;;  %s145_s3 = inlined_call_operand.vmem [shape: f32[2,512], index: 3, kind: input, shape index: {}]   ;;  %s146_s4 = inlined_call_operand.vmem [shape: f32[2,512], index: 4, kind: output, shape index: {}]  }
   0x1   :  { %v39_v2 = vunpack.c.l.s4 %v101_v1  ;;  %v18_v4 = vld [vmem:[%s142_s1] sm:$0xf] }
   0x2   :  { %v21_v3 = vshrl.u32 %v20_v0, 7  ;;  %v55_v10 = vld [vmem:[%s143_s2] sm:$0xf] }
   0x3   :  { %v40_v5 = vunpack.c.0.s8 %v39_v2  ;;  %v17_v26 = vld [vmem:[%s144_s0] sm:$0xff] }
   0x4   :  { %v22_v6 = vsub.s32 0, %v21_v3  ;;  %v26_v7 = vsub.s32 1, %v21_v3  ;;  %v30_v8 = vsub.s32 2, %v21_v3  ;;  %v34_v9 = vsub.s32 3, %v21_v3  ;;  %v92_v32 = vld [vmem:[%s145_s3] sm:$0xff] }
   0x5   :  { %v43_v11 = vsub.s32 %v40_v5, %v21_v3 }
   0x6   :  { %v23_v12 = vrot.slane %v18_v4, %v22_v6  ;;  %v27_v13 = vrot.slane %v18_v4, %v26_v7  ;;  %v31_v14 = vrot.slane %v18_v4, %v30_v8  ;;  %v35_v15 = vrot.slane %v18_v4, %v34_v9 }
   0x7   :  { %v60_v16 = vrot.slane %v55_v10, %v22_v6  ;;  %v64_v17 = vrot.slane %v55_v10, %v26_v7  ;;  %v68_v18 = vrot.slane %v55_v10, %v30_v8  ;;  %v72_v19 = vrot.slane %v55_v10, %v34_v9 }
   0x8   :  { %v36_v20 = vcombine.low %v23_v12, %v27_v13  ;;  %v37_v21 = vcombine.low %v31_v14, %v35_v15 }
   0x9   :  { %v73_v22 = vcombine.low %v60_v16, %v64_v17  ;;  %v74_v23 = vcombine.low %v68_v18, %v72_v19 }
   0xa   :  { %v44_v24 = vrot.slane %v36_v20, %v43_v11  ;;  %v51_v25 = vrot.slane %v37_v21, %v43_v11 }
   0xb   :  { %v81_v27 = vrot.slane %v73_v22, %v43_v11  ;;  %v88_v28 = vrot.slane %v74_v23, %v43_v11 }
   0xc   :  { %v52_v29 = vcombine.low %v44_v24, %v51_v25 }
   0xd   :  { %v89_v30 = vcombine.low %v81_v27, %v88_v28 }
   0xe   :  { %v54_v31 = vmul.f32 %v52_v29, %v17_v26 }
  0x10   :  { %v91_v33 = vadd.f32 %v89_v30, %v54_v31 }
  0x12   :  { %v93_v34 = vadd.f32 %v92_v32, %v91_v33 }
  0x14   :  { %v94_v35 = vmax.f32 %v93_v34, 0.0 }
  0x16   :  { %95 = vst [vmem:[%s146_s4] sm:$0xff] %v94_v35 }

// kernel: _forward.81
= control target key start
LH: loop header
LB: loop body
LE: loop exit
PB: predicated region body
PF: predicated region fallthrough
CT: control target
= control target key end

     0   :  { %s4180_s1 = inlined_call_operand.vmem [shape: bf16[512,1024], index: 1, kind: input, shape index: {}]   ;;  %s4181_s0 = inlined_call_operand.vmem [shape: bf16[8,512], index: 0, kind: input, shape index: {}]   ;;  %s4182_s3 = inlined_call_operand.vmem [shape: bf16[1024,128], index: 3, kind: input, shape index: {}]   ;;  %s4183_s2 = inlined_call_operand.vmem [shape: f32[1,1024], index: 2, kind: input, shape index: {}]   ;;  %s4184_s4 = inlined_call_operand.vmem [shape: f32[1,128], index: 4, kind: input, shape index: {}]   ;;  %s4185_s5 = inlined_call_operand.vmem [shape: f32[8,128], index: 5, kind: output, shape index: {}]  }
   0x1   :  { %v79_v0 = vld [vmem:[%s4180_s1 + $0x1c0] sm:$0xff]  ;;  %v3238_v54 = vld [vmem:[%s4181_s0 + $0x8] sm:$0xff] }
   0x2   :  { %v83_v1 = vld [vmem:[%s4180_s1 + $0x1e0] sm:$0xff]  ;;  %v3252_v59 = vcombine.high %v3238_v54, %v3238_v54 }
   0x3   :  { %v207_v2 = vld [vmem:[%s4180_s1 + $0x5c0] sm:$0xff]  ;;  %v2696_v3 = vcombine.high %v79_v0, %v83_v1  ;;  %v2695_v5 = vcombine.low %v79_v0, %v83_v1 }
   0x4   :  { %v211_v4 = vld [vmem:[%s4180_s1 + $0x5e0] sm:$0xff]  ;;  %1688 = vmatprep.mubr.bf16.mxu1 %v3252_v59 }
   0x5   :  { %v71_v6 = vld [vmem:[%s4180_s1 + $0x180] sm:$0xff]  ;;  %v2824_v8 = vcombine.high %v207_v2, %v211_v4  ;;  %v2823_v9 = vcombine.low %v207_v2, %v211_v4  ;;  %1615 = vmatprep.subr.bf16.mxu0 %v2696_v3 }
   0x6   :  { %v75_v7 = vld [vmem:[%s4180_s1 + $0x1a0] sm:$0xff]  ;;  %1616 = vmatpush1.bf16.msra.mxu0 %v2695_v5 }
   0x7   :  { %v2688_v10 = vcombine.high %v71_v6, %v75_v7  ;;  %v199_v11 = vld [vmem:[%s4180_s1 + $0x580] sm:$0xff]  ;;  %1656 = vmatprep.subr.bf16.mxu1 %v2824_v8  ;;  %v2687_v18 = vcombine.low %v71_v6, %v75_v7 }
   0x8   :  { %v203_v12 = vld [vmem:[%s4180_s1 + $0x5a0] sm:$0xff]  ;;  %1657 = vmatpush1.bf16.msra.mxu1 %v2823_v9 }
   0x9   :  { %v63_v13 = vld [vmem:[%s4180_s1 + $0x140] sm:$0xff]  ;;  %v2816_v14 = vcombine.high %v199_v11, %v203_v12  ;;  %1617 = vmatprep.subr.bf16.mxu0 %v2688_v10  ;;  %v2815_v19 = vcombine.low %v199_v11, %v203_v12 }
   0xa   :  { %v67_v15 = vld [vmem:[%s4180_s1 + $0x160] sm:$0xff]  ;;  %1618 = vmatpush1.bf16.msra.mxu0 %v2687_v18 }
   0xb   :  { %v191_v16 = vld [vmem:[%s4180_s1 + $0x540] sm:$0xff]  ;;  %v2680_v20 = vcombine.high %v63_v13, %v67_v15  ;;  %1658 = vmatprep.subr.bf16.mxu1 %v2816_v14  ;;  %v2679_v26 = vcombine.low %v63_v13, %v67_v15 }
   0xc   :  { %v195_v17 = vld [vmem:[%s4180_s1 + $0x560] sm:$0xff]  ;;  %1659 = vmatpush1.bf16.msra.mxu1 %v2815_v19 }
   0xd   :  { %v2808_v21 = vcombine.high %v191_v16, %v195_v17  ;;  %v55_v22 = vld [vmem:[%s4180_s1 + $0x100] sm:$0xff]  ;;  %1619 = vmatprep.subr.bf16.mxu0 %v2680_v20  ;;  %v2807_v27 = vcombine.low %v191_v16, %v195_v17 }
   0xe   :  { %v59_v23 = vld [vmem:[%s4180_s1 + $0x120] sm:$0xff]  ;;  %1620 = vmatpush1.bf16.msra.mxu0 %v2679_v26 }
   0xf   :  { %v183_v24 = vld [vmem:[%s4180_s1 + $0x500] sm:$0xff]  ;;  %v2672_v28 = vcombine.high %v55_v22, %v59_v23  ;;  %1660 = vmatprep.subr.bf16.mxu1 %v2808_v21  ;;  %v2671_v34 = vcombine.low %v55_v22, %v59_v23 }
  0x10   :  { %v187_v25 = vld [vmem:[%s4180_s1 + $0x520] sm:$0xff]  ;;  %1661 = vmatpush1.bf16.msra.mxu1 %v2807_v27 }
  0x11   :  { %v2800_v29 = vcombine.high %v183_v24, %v187_v25  ;;  %v47_v30 = vld [vmem:[%s4180_s1 + $0xc0] sm:$0xff]  ;;  %1621 = vmatprep.subr.bf16.mxu0 %v2672_v28  ;;  %v2799_v35 = vcombine.low %v183_v24, %v187_v25 }
  0x12   :  { %v51_v31 = vld [vmem:[%s4180_s1 + $0xe0] sm:$0xff]  ;;  %1622 = vmatpush1.bf16.msra.mxu0 %v2671_v34 }
  0x13   :  { %v175_v32 = vld [vmem:[%s4180_s1 + $0x4c0] sm:$0xff]  ;;  %v2664_v36 = vcombine.high %v47_v30, %v51_v31  ;;  %1662 = vmatprep.subr.bf16.mxu1 %v2800_v29  ;;  %v2663_v42 = vcombine.low %v47_v30, %v51_v31 }
  0x14   :  { %v179_v33 = vld [vmem:[%s4180_s1 + $0x4e0] sm:$0xff]  ;;  %1663 = vmatpush1.bf16.msra.mxu1 %v2799_v35 }
  0x15   :  { %v2792_v37 = vcombine.high %v175_v32, %v179_v33  ;;  %v39_v38 = vld [vmem:[%s4180_s1 + $0x80] sm:$0xff]  ;;  %1623 = vmatprep.subr.bf16.mxu0 %v2664_v36  ;;  %v2791_v43 = vcombine.low %v175_v32, %v179_v33 }
  0x16   :  { %v43_v39 = vld [vmem:[%s4180_s1 + $0xa0] sm:$0xff]  ;;  %1624 = vmatpush1.bf16.msra.mxu0 %v2663_v42 }
  0x17   :  { %v167_v40 = vld [vmem:[%s4180_s1 + $0x480] sm:$0xff]  ;;  %v2656_v44 = vcombine.high %v39_v38, %v43_v39  ;;  %1664 = vmatprep.subr.bf16.mxu1 %v2792_v37  ;;  %v2655_v50 = vcombine.low %v39_v38, %v43_v39 }
  0x18   :  { %v171_v41 = vld [vmem:[%s4180_s1 + $0x4a0] sm:$0xff]  ;;  %1665 = vmatpush1.bf16.msra.mxu1 %v2791_v43 }
  0x19   :  { %v2784_v45 = vcombine.high %v167_v40, %v171_v41  ;;  %v31_v46 = vld [vmem:[%s4180_s1 + $0x40] sm:$0xff]  ;;  %1625 = vmatprep.subr.bf16.mxu0 %v2656_v44  ;;  %v2783_v51 = vcombine.low %v167_v40, %v171_v41 }
  0x1a   :  { %v35_v47 = vld [vmem:[%s4180_s1 + $0x60] sm:$0xff]  ;;  %1626 = vmatpush1.bf16.msra.mxu0 %v2655_v50 }
  0x1b   :  { %v159_v48 = vld [vmem:[%s4180_s1 + $0x440] sm:$0xff]  ;;  %v2648_v52 = vcombine.high %v31_v46, %v35_v47  ;;  %1666 = vmatprep.subr.bf16.mxu1 %v2784_v45  ;;  %v2647_v62 = vcombine.low %v31_v46, %v35_v47 }
  0x1c   :  { %v163_v49 = vld [vmem:[%s4180_s1 + $0x460] sm:$0xff]  ;;  %1667 = vmatpush1.bf16.msra.mxu1 %v2783_v51 }
  0x1d   :  { %v3233_v53 = vld [vmem:[%s4181_s0] sm:$0xff]  ;;  %v2776_v55 = vcombine.high %v159_v48, %v163_v49  ;;  %1627 = vmatprep.subr.bf16.mxu0 %v2648_v52  ;;  %v2775_v63 = vcombine.low %v159_v48, %v163_v49 }
  0x1e   :  { %v23_v56 = vld [vmem:[%s4180_s1] sm:$0xff]  ;;  %v3248_v58 = vcombine.high %v3233_v53, %v3233_v53  ;;  %1628 = vmatpush1.bf16.msra.mxu0 %v2647_v62 }
  0x1f   :  { %v27_v57 = vld [vmem:[%s4180_s1 + $0x20] sm:$0xff]  ;;  %1668 = vmatprep.subr.bf16.mxu1 %v2776_v55 }
  0x20   :  { %v151_v60 = vld [vmem:[%s4180_s1 + $0x400] sm:$0xff]  ;;  %1647 = vmatprep.mubr.bf16.mxu0 %v3248_v58  ;;  %v2640_v0 = vcombine.high %v23_v56, %v27_v57  ;;  %v2639_v6 = vcombine.low %v23_v56, %v27_v57  ;;  %1669 = vmatpush1.bf16.msra.mxu1 %v2775_v63 }
  0x21   :  { %v155_v61 = vld [vmem:[%s4180_s1 + $0x420] sm:$0xff] }
  0x22   :  { %v2768_v1 = vcombine.high %v151_v60, %v155_v61  ;;  %v143_v2 = vld [vmem:[%s4180_s1 + $0x3c0] sm:$0xff]  ;;  %1629 = vmatprep.subr.bf16.mxu0 %v2640_v0  ;;  %v2767_v7 = vcombine.low %v151_v60, %v155_v61 }
  0x23   :  { %v147_v3 = vld [vmem:[%s4180_s1 + $0x3e0] sm:$0xff]  ;;  %1630 = vmatpush1.bf16.msra.mxu0 %v2639_v6  ;;  %v80_v6 = vld [vmem:[%s4180_s1 + $0x1c8] sm:$0xff] }
  0x24   :  { %v271_v4 = vld [vmem:[%s4180_s1 + $0x7c0] sm:$0xff]  ;;  %v2760_v8 = vcombine.high %v143_v2, %v147_v3  ;;  %1670 = vmatprep.subr.bf16.mxu1 %v2768_v1  ;;  %v2759_v14 = vcombine.low %v143_v2, %v147_v3 }
  0x25   :  { %v275_v5 = vld [vmem:[%s4180_s1 + $0x7e0] sm:$0xff]  ;;  %1671 = vmatpush1.bf16.msra.mxu1 %v2767_v7  ;;  %v84_v7 = vld [vmem:[%s4180_s1 + $0x1e8] sm:$0xff] }
  0x26   :  { %v2888_v9 = vcombine.high %v271_v4, %v275_v5  ;;  %v135_v10 = vld [vmem:[%s4180_s1 + $0x380] sm:$0xff]  ;;  %1631 = vmatprep.subr.bf16.mxu0 %v2760_v8  ;;  %v2887_v15 = vcombine.low %v271_v4, %v275_v5  ;;  %v208_v8 = vld [vmem:[%s4180_s1 + $0x5c8] sm:$0xff] }
  0x27   :  { %v139_v11 = vld [vmem:[%s4180_s1 + $0x3a0] sm:$0xff]  ;;  %1632 = vmatpush2.bf16.msra.mxu0 %v2759_v14  ;;  %v72_v14 = vld [vmem:[%s4180_s1 + $0x188] sm:$0xff] }
  0x28   :  { %v263_v12 = vld [vmem:[%s4180_s1 + $0x780] sm:$0xff]  ;;  %v2752_v16 = vcombine.high %v135_v10, %v139_v11  ;;  %1672 = vmatprep.subr.bf16.mxu1 %v2888_v9  ;;  %v2751_v22 = vcombine.low %v135_v10, %v139_v11  ;;  %v212_v9 = vld [vmem:[%s4180_s1 + $0x5e8] sm:$0xff] }
  0x29   :  { %v267_v13 = vld [vmem:[%s4180_s1 + $0x7a0] sm:$0xff]  ;;  %1673 = vmatpush2.bf16.msra.mxu1 %v2887_v15  ;;  %v76_v15 = vld [vmem:[%s4180_s1 + $0x1a8] sm:$0xff] }
  0x2a   :  { %v2880_v17 = vcombine.high %v263_v12, %v267_v13  ;;  %v127_v18 = vld [vmem:[%s4180_s1 + $0x340] sm:$0xff]  ;;  %1633 = vmatprep.subr.bf16.mxu0 %v2752_v16  ;;  %v2879_v23 = vcombine.low %v263_v12, %v267_v13  ;;  %v2698_v12 = vcombine.high %v80_v6, %v84_v7  ;;  %v2826_v13 = vcombine.high %v208_v8, %v212_v9 }
  0x2b   :  { %v131_v19 = vld [vmem:[%s4180_s1 + $0x360] sm:$0xff]  ;;  %1634 = vmatpush2.bf16.msra.mxu0 %v2751_v22  ;;  %v3378_v16 = vcombine.low %v3233_v53, %v3233_v53  ;;  %v2690_v22 = vcombine.high %v72_v14, %v76_v15 }
  0x2c   :  { %v255_v20 = vld [vmem:[%s4180_s1 + $0x740] sm:$0xff]  ;;  %v2744_v24 = vcombine.high %v127_v18, %v131_v19  ;;  %1674 = vmatprep.subr.bf16.mxu1 %v2880_v17  ;;  %v2743_v30 = vcombine.low %v127_v18, %v131_v19  ;;  %v200_v17 = vld [vmem:[%s4180_s1 + $0x588] sm:$0xff]  ;;  %v3388_v19 = vcombine.low %v3238_v54, %v3238_v54 }
  0x2d   :  { %v259_v21 = vld [vmem:[%s4180_s1 + $0x760] sm:$0xff]  ;;  %1675 = vmatpush2.bf16.msra.mxu1 %v2879_v23  ;;  %v204_v18 = vld [vmem:[%s4180_s1 + $0x5a8] sm:$0xff] }
  0x2e   :  { %v2872_v25 = vcombine.high %v255_v20, %v259_v21  ;;  %v119_v26 = vld [vmem:[%s4180_s1 + $0x300] sm:$0xff]  ;;  %1635 = vmatprep.subr.bf16.mxu0 %v2744_v24  ;;  %v2871_v31 = vcombine.low %v255_v20, %v259_v21  ;;  %v2697_v20 = vcombine.low %v80_v6, %v84_v7  ;;  %v2825_v21 = vcombine.low %v208_v8, %v212_v9  ;;  %v64_v23 = vld [vmem:[%s4180_s1 + $0x148] sm:$0xff] }
  0x2f   :  { %v123_v27 = vld [vmem:[%s4180_s1 + $0x320] sm:$0xff]  ;;  %1636 = vmatpush2.bf16.msra.mxu0 %v2743_v30  ;;  %v2818_v53 = vcombine.high %v200_v17, %v204_v18  ;;  %v68_v24 = vld [vmem:[%s4180_s1 + $0x168] sm:$0xff] }
  0x30   :  { %v247_v28 = vld [vmem:[%s4180_s1 + $0x700] sm:$0xff]  ;;  %v2736_v32 = vcombine.high %v119_v26, %v123_v27  ;;  %1676 = vmatprep.subr.bf16.mxu1 %v2872_v25  ;;  %v2735_v38 = vcombine.low %v119_v26, %v123_v27  ;;  %v192_v54 = vld [vmem:[%s4180_s1 + $0x548] sm:$0xff]  ;;  %v2689_v26 = vcombine.low %v72_v14, %v76_v15  ;;  %v2817_v27 = vcombine.low %v200_v17, %v204_v18 }
  0x31   :  { %v251_v29 = vld [vmem:[%s4180_s1 + $0x720] sm:$0xff]  ;;  %1677 = vmatpush2.bf16.msra.mxu1 %v2871_v31  ;;  %v196_v25 = vld [vmem:[%s4180_s1 + $0x568] sm:$0xff] }
  0x32   :  { %v2864_v33 = vcombine.high %v247_v28, %v251_v29  ;;  %v111_v34 = vld [vmem:[%s4180_s1 + $0x2c0] sm:$0xff]  ;;  %1637 = vmatprep.subr.bf16.mxu0 %v2736_v32  ;;  %v2863_v39 = vcombine.low %v247_v28, %v251_v29  ;;  %v2682_v28 = vcombine.high %v64_v23, %v68_v24  ;;  %v2810_v29 = vcombine.high %v192_v54, %v196_v25  ;;  %v56_v30 = vld [vmem:[%s4180_s1 + $0x108] sm:$0xff] }
  0x33   :  { %v115_v35 = vld [vmem:[%s4180_s1 + $0x2e0] sm:$0xff]  ;;  %1638 = vmatpush2.bf16.msra.mxu0 %v2735_v38  ;;  %v60_v31 = vld [vmem:[%s4180_s1 + $0x128] sm:$0xff] }
  0x34   :  { %v239_v36 = vld [vmem:[%s4180_s1 + $0x6c0] sm:$0xff]  ;;  %v2728_v40 = vcombine.high %v111_v34, %v115_v35  ;;  %1678 = vmatprep.subr.bf16.mxu1 %v2864_v33  ;;  %v2727_v46 = vcombine.low %v111_v34, %v115_v35  ;;  %v184_v32 = vld [vmem:[%s4180_s1 + $0x508] sm:$0xff]  ;;  %v2681_v34 = vcombine.low %v64_v23, %v68_v24  ;;  %v2809_v35 = vcombine.low %v192_v54, %v196_v25 }
  0x35   :  { %v243_v37 = vld [vmem:[%s4180_s1 + $0x6e0] sm:$0xff]  ;;  %1679 = vmatpush2.bf16.msra.mxu1 %v2863_v39  ;;  %v188_v33 = vld [vmem:[%s4180_s1 + $0x528] sm:$0xff] }
  0x36   :  { %v2856_v41 = vcombine.high %v239_v36, %v243_v37  ;;  %v103_v42 = vld [vmem:[%s4180_s1 + $0x280] sm:$0xff]  ;;  %1639 = vmatprep.subr.bf16.mxu0 %v2728_v40  ;;  %v2855_v47 = vcombine.low %v239_v36, %v243_v37  ;;  %v2674_v36 = vcombine.high %v56_v30, %v60_v31  ;;  %v2802_v37 = vcombine.high %v184_v32, %v188_v33  ;;  %v48_v38 = vld [vmem:[%s4180_s1 + $0xc8] sm:$0xff] }
  0x37   :  { %v107_v43 = vld [vmem:[%s4180_s1 + $0x2a0] sm:$0xff]  ;;  %1640 = vmatpush2.bf16.msra.mxu0 %v2727_v46  ;;  %v52_v39 = vld [vmem:[%s4180_s1 + $0xe8] sm:$0xff] }
  0x38   :  { %v231_v44 = vld [vmem:[%s4180_s1 + $0x680] sm:$0xff]  ;;  %v2720_v48 = vcombine.high %v103_v42, %v107_v43  ;;  %1680 = vmatprep.subr.bf16.mxu1 %v2856_v41  ;;  %v2719_v56 = vcombine.low %v103_v42, %v107_v43  ;;  %v176_v40 = vld [vmem:[%s4180_s1 + $0x4c8] sm:$0xff]  ;;  %v2673_v42 = vcombine.low %v56_v30, %v60_v31  ;;  %v2801_v43 = vcombine.low %v184_v32, %v188_v33 }
  0x39   :  { %v235_v45 = vld [vmem:[%s4180_s1 + $0x6a0] sm:$0xff]  ;;  %1681 = vmatpush2.bf16.msra.mxu1 %v2855_v47  ;;  %v180_v41 = vld [vmem:[%s4180_s1 + $0x4e8] sm:$0xff] }
  0x3a   :  { %v2848_v49 = vcombine.high %v231_v44, %v235_v45  ;;  %v95_v50 = vld [vmem:[%s4180_s1 + $0x240] sm:$0xff]  ;;  %1641 = vmatprep.subr.bf16.mxu0 %v2720_v48  ;;  %v2847_v57 = vcombine.low %v231_v44, %v235_v45  ;;  %v2666_v44 = vcombine.high %v48_v38, %v52_v39  ;;  %v2794_v45 = vcombine.high %v176_v40, %v180_v41  ;;  %v40_v46 = vld [vmem:[%s4180_s1 + $0x88] sm:$0xff] }
  0x3b   :  { %v99_v51 = vld [vmem:[%s4180_s1 + $0x260] sm:$0xff]  ;;  %1642 = vmatpush2.bf16.msra.mxu0 %v2719_v56  ;;  %v44_v47 = vld [vmem:[%s4180_s1 + $0xa8] sm:$0xff] }
  0x3c   :  { %v223_v52 = vld [vmem:[%s4180_s1 + $0x640] sm:$0xff]  ;;  %v2712_v60 = vcombine.high %v95_v50, %v99_v51  ;;  %1682 = vmatprep.subr.bf16.mxu1 %v2848_v49  ;;  %v2711_v2 = vcombine.low %v95_v50, %v99_v51  ;;  %v168_v48 = vld [vmem:[%s4180_s1 + $0x488] sm:$0xff]  ;;  %v2665_v50 = vcombine.low %v48_v38, %v52_v39  ;;  %v2793_v51 = vcombine.low %v176_v40, %v180_v41 }
  0x3d   :  { %v227_v55 = vld [vmem:[%s4180_s1 + $0x660] sm:$0xff]  ;;  %1683 = vmatpush2.bf16.msra.mxu1 %v2847_v57  ;;  %v172_v49 = vld [vmem:[%s4180_s1 + $0x4a8] sm:$0xff] }
  0x3e   :  { %v2840_v61 = vcombine.high %v223_v52, %v227_v55  ;;  %v87_v62 = vld [vmem:[%s4180_s1 + $0x200] sm:$0xff]  ;;  %1643 = vmatprep.subr.bf16.mxu0 %v2712_v60  ;;  %v2839_v3 = vcombine.low %v223_v52, %v227_v55  ;;  %v2658_v52 = vcombine.high %v40_v46, %v44_v47  ;;  %v2786_v55 = vcombine.high %v168_v48, %v172_v49  ;;  %v32_v56 = vld [vmem:[%s4180_s1 + $0x48] sm:$0xff] }
  0x3f   :  { %v91_v63 = vld [vmem:[%s4180_s1 + $0x220] sm:$0xff]  ;;  %1644 = vmatpush2.bf16.msra.mxu0 %v2711_v2  ;;  %v36_v57 = vld [vmem:[%s4180_s1 + $0x68] sm:$0xff] }
  0x40   :  { %v215_v0 = vld [vmem:[%s4180_s1 + $0x600] sm:$0xff]  ;;  %v2704_v4 = vcombine.high %v87_v62, %v91_v63  ;;  %1684 = vmatprep.subr.bf16.mxu1 %v2840_v61  ;;  %v2703_v10 = vcombine.low %v87_v62, %v91_v63  ;;  %v160_v60 = vld [vmem:[%s4180_s1 + $0x448] sm:$0xff]  ;;  %v2657_v62 = vcombine.low %v40_v46, %v44_v47  ;;  %v2785_v63 = vcombine.low %v168_v48, %v172_v49 }
  0x41   :  { %v219_v1 = vld [vmem:[%s4180_s1 + $0x620] sm:$0xff]  ;;  %1685 = vmatpush2.bf16.msra.mxu1 %v2839_v3  ;;  %v164_v61 = vld [vmem:[%s4180_s1 + $0x468] sm:$0xff]  ;;  %v2649_v6 = vcombine.low %v32_v56, %v36_v57 }
  0x42   :  { %v2832_v5 = vcombine.high %v215_v0, %v219_v1  ;;  %1645 = vmatprep.subr.bf16.mxu0 %v2704_v4  ;;  %v2831_v11 = vcombine.low %v215_v0, %v219_v1  ;;  %v2650_v0 = vcombine.high %v32_v56, %v36_v57  ;;  %v2778_v1 = vcombine.high %v160_v60, %v164_v61  ;;  %v24_v2 = vld [vmem:[%s4180_s1 + $0x8] sm:$0xff] }
  0x43   :  { %1646 = vmatpush2.bf16.msra.mxu0 %v2703_v10  ;;  %v28_v3 = vld [vmem:[%s4180_s1 + $0x28] sm:$0xff]  ;;  %v2777_v7 = vcombine.low %v160_v60, %v164_v61 }
  0x44   :  { %1686 = vmatprep.subr.bf16.mxu1 %v2832_v5  ;;  %1697 = vmatprep.subr.bf16.mxu0 %v2698_v12  ;;  %v152_v4 = vld [vmem:[%s4180_s1 + $0x408] sm:$0xff]  ;;  %v2642_v8 = vcombine.high %v24_v2, %v28_v3  ;;  %v2641_v14 = vcombine.low %v24_v2, %v28_v3 }
  0x45   :  { %1687 = vmatpush2.bf16.msra.mxu1 %v2831_v11  ;;  %v156_v5 = vld [vmem:[%s4180_s1 + $0x428] sm:$0xff] }
  0x46   :  { %1738 = vmatprep.subr.bf16.mxu1 %v2826_v13  ;;  %1648 = vmatmul.mubr.bf16.vlgmr.msra.gmra.mxu0 %v3378_v16  ;;  %v2770_v9 = vcombine.high %v152_v4, %v156_v5  ;;  %v144_v10 = vld [vmem:[%s4180_s1 + $0x3c8] sm:$0xff]  ;;  %v2769_v15 = vcombine.low %v152_v4, %v156_v5 }
  0x47   :  { %1698 = vmatpush1.bf16.msra.mxu0 %v2697_v20  ;;  %1729 = vmatprep.mubr.bf16.mxu0 %v3248_v58  ;;  %v148_v11 = vld [vmem:[%s4180_s1 + $0x3e8] sm:$0xff] }
  0x48   :  { %1689 = vmatmul.mubr.bf16.vlgmr.msra.gmra.mxu1 %v3388_v19  ;;  %1699 = vmatprep.subr.bf16.mxu0 %v2690_v22  ;;  %v272_v12 = vld [vmem:[%s4180_s1 + $0x7c8] sm:$0xff]  ;;  %v2762_v17 = vcombine.high %v144_v10, %v148_v11  ;;  %v2761_v23 = vcombine.low %v144_v10, %v148_v11 }
  0x49   :  { %1739 = vmatpush1.bf16.msra.mxu1 %v2825_v21  ;;  %1770 = vmatprep.mubr.bf16.mxu1 %v3252_v59  ;;  %v276_v13 = vld [vmem:[%s4180_s1 + $0x7e8] sm:$0xff] }
  0x4a   :  { %1740 = vmatprep.subr.bf16.mxu1 %v2818_v53  ;;  %v2890_v18 = vcombine.high %v272_v12, %v276_v13  ;;  %v136_v20 = vld [vmem:[%s4180_s1 + $0x388] sm:$0xff]  ;;  %v2889_v24 = vcombine.low %v272_v12, %v276_v13 }
  0x4b   :  { %1700 = vmatpush1.bf16.msra.mxu0 %v2689_v26  ;;  %v140_v21 = vld [vmem:[%s4180_s1 + $0x3a8] sm:$0xff] }
  0x4c   :  { %1701 = vmatprep.subr.bf16.mxu0 %v2682_v28  ;;  %v264_v22 = vld [vmem:[%s4180_s1 + $0x788] sm:$0xff]  ;;  %v2754_v54 = vcombine.high %v136_v20, %v140_v21  ;;  %v2753_v30 = vcombine.low %v136_v20, %v140_v21 }
  0x4d   :  { %1741 = vmatpush1.bf16.msra.mxu1 %v2817_v27  ;;  %v268_v53 = vld [vmem:[%s4180_s1 + $0x7a8] sm:$0xff] }
  0x4e   :  { %1742 = vmatprep.subr.bf16.mxu1 %v2810_v29  ;;  %v2882_v25 = vcombine.high %v264_v22, %v268_v53  ;;  %v128_v26 = vld [vmem:[%s4180_s1 + $0x348] sm:$0xff]  ;;  %v2881_v31 = vcombine.low %v264_v22, %v268_v53 }
  0x4f   :  { %1702 = vmatpush1.bf16.msra.mxu0 %v2681_v34  ;;  %v132_v27 = vld [vmem:[%s4180_s1 + $0x368] sm:$0xff] }
  0x50   :  { %1703 = vmatprep.subr.bf16.mxu0 %v2674_v36  ;;  %v256_v28 = vld [vmem:[%s4180_s1 + $0x748] sm:$0xff]  ;;  %v2746_v32 = vcombine.high %v128_v26, %v132_v27  ;;  %v2745_v38 = vcombine.low %v128_v26, %v132_v27 }
  0x51   :  { %1743 = vmatpush1.bf16.msra.mxu1 %v2809_v35  ;;  %v260_v29 = vld [vmem:[%s4180_s1 + $0x768] sm:$0xff] }
  0x52   :  { %1744 = vmatprep.subr.bf16.mxu1 %v2802_v37  ;;  %v2874_v33 = vcombine.high %v256_v28, %v260_v29  ;;  %v120_v34 = vld [vmem:[%s4180_s1 + $0x308] sm:$0xff]  ;;  %v2873_v39 = vcombine.low %v256_v28, %v260_v29  ;;  %v65_v29 = vld [vmem:[%s4180_s1 + $0x150] sm:$0xff] }
  0x53   :  { %1704 = vmatpush1.bf16.msra.mxu0 %v2673_v42  ;;  %v124_v35 = vld [vmem:[%s4180_s1 + $0x328] sm:$0xff] }
  0x54   :  { %1705 = vmatprep.subr.bf16.mxu0 %v2666_v44  ;;  %v248_v36 = vld [vmem:[%s4180_s1 + $0x708] sm:$0xff]  ;;  %v2738_v40 = vcombine.high %v120_v34, %v124_v35  ;;  %v2737_v46 = vcombine.low %v120_v34, %v124_v35  ;;  %v57_v35 = vld [vmem:[%s4180_s1 + $0x110] sm:$0xff] }
  0x55   :  { %1745 = vmatpush1.bf16.msra.mxu1 %v2801_v43  ;;  %v252_v37 = vld [vmem:[%s4180_s1 + $0x728] sm:$0xff] }
  0x56   :  { %1746 = vmatprep.subr.bf16.mxu1 %v2794_v45  ;;  %v2866_v41 = vcombine.high %v248_v36, %v252_v37  ;;  %v112_v42 = vld [vmem:[%s4180_s1 + $0x2c8] sm:$0xff]  ;;  %v2865_v47 = vcombine.low %v248_v36, %v252_v37  ;;  %v61_v36 = vld [vmem:[%s4180_s1 + $0x130] sm:$0xff] }
  0x57   :  { %1706 = vmatpush1.bf16.msra.mxu0 %v2665_v50  ;;  %v116_v43 = vld [vmem:[%s4180_s1 + $0x2e8] sm:$0xff] }
  0x58   :  { %1707 = vmatprep.subr.bf16.mxu0 %v2658_v52  ;;  %v240_v44 = vld [vmem:[%s4180_s1 + $0x6c8] sm:$0xff]  ;;  %v2730_v48 = vcombine.high %v112_v42, %v116_v43  ;;  %v2729_v56 = vcombine.low %v112_v42, %v116_v43  ;;  %v49_v43 = vld [vmem:[%s4180_s1 + $0xd0] sm:$0xff] }
  0x59   :  { %1747 = vmatpush1.bf16.msra.mxu1 %v2793_v51  ;;  %v244_v45 = vld [vmem:[%s4180_s1 + $0x6e8] sm:$0xff] }
  0x5a   :  { %1748 = vmatprep.subr.bf16.mxu1 %v2786_v55  ;;  %v2858_v49 = vcombine.high %v240_v44, %v244_v45  ;;  %v104_v50 = vld [vmem:[%s4180_s1 + $0x288] sm:$0xff]  ;;  %v2857_v57 = vcombine.low %v240_v44, %v244_v45  ;;  %v53_v44 = vld [vmem:[%s4180_s1 + $0xf0] sm:$0xff] }
  0x5b   :  { %1708 = vmatpush1.bf16.msra.mxu0 %v2657_v62  ;;  %v108_v51 = vld [vmem:[%s4180_s1 + $0x2a8] sm:$0xff] }
  0x5c   :  { %1709 = vmatprep.subr.bf16.mxu0 %v2650_v0  ;;  %v232_v52 = vld [vmem:[%s4180_s1 + $0x688] sm:$0xff]  ;;  %v2722_v60 = vcombine.high %v104_v50, %v108_v51  ;;  %v2721_v2 = vcombine.low %v104_v50, %v108_v51  ;;  %v2675_v50 = vcombine.low %v57_v35, %v61_v36  ;;  %v41_v51 = vld [vmem:[%s4180_s1 + $0x90] sm:$0xff] }
  0x5d   :  { %1749 = vmatpush1.bf16.msra.mxu1 %v2785_v63  ;;  %v236_v55 = vld [vmem:[%s4180_s1 + $0x6a8] sm:$0xff] }
  0x5e   :  { %1750 = vmatprep.subr.bf16.mxu1 %v2778_v1  ;;  %v2850_v61 = vcombine.high %v232_v52, %v236_v55  ;;  %v96_v62 = vld [vmem:[%s4180_s1 + $0x248] sm:$0xff]  ;;  %v2849_v3 = vcombine.low %v232_v52, %v236_v55  ;;  %v45_v52 = vld [vmem:[%s4180_s1 + $0xb0] sm:$0xff] }
  0x5f   :  { %1710 = vmatpush1.bf16.msra.mxu0 %v2649_v6  ;;  %v100_v63 = vld [vmem:[%s4180_s1 + $0x268] sm:$0xff] }
  0x60   :  { %1711 = vmatprep.subr.bf16.mxu0 %v2642_v8  ;;  %v224_v0 = vld [vmem:[%s4180_s1 + $0x648] sm:$0xff]  ;;  %v2714_v4 = vcombine.high %v96_v62, %v100_v63  ;;  %v2713_v10 = vcombine.low %v96_v62, %v100_v63  ;;  %v2667_v62 = vcombine.low %v49_v43, %v53_v44  ;;  %v33_v63 = vld [vmem:[%s4180_s1 + $0x50] sm:$0xff] }
  0x61   :  { %1751 = vmatpush1.bf16.msra.mxu1 %v2777_v7  ;;  %v228_v1 = vld [vmem:[%s4180_s1 + $0x668] sm:$0xff] }
  0x62   :  { %1752 = vmatprep.subr.bf16.mxu1 %v2770_v9  ;;  %v2842_v5 = vcombine.high %v224_v0, %v228_v1  ;;  %v88_v6 = vld [vmem:[%s4180_s1 + $0x208] sm:$0xff]  ;;  %v2841_v11 = vcombine.low %v224_v0, %v228_v1  ;;  %v37_v0 = vld [vmem:[%s4180_s1 + $0x70] sm:$0xff] }
  0x63   :  { %1712 = vmatpush1.bf16.msra.mxu0 %v2641_v14  ;;  %v92_v7 = vld [vmem:[%s4180_s1 + $0x228] sm:$0xff]  ;;  %v81_v14 = vld [vmem:[%s4180_s1 + $0x1d0] sm:$0xff] }
  0x64   :  { %1713 = vmatprep.subr.bf16.mxu0 %v2762_v17  ;;  %v216_v8 = vld [vmem:[%s4180_s1 + $0x608] sm:$0xff]  ;;  %v2706_v12 = vcombine.high %v88_v6, %v92_v7  ;;  %v209_v17 = vld [vmem:[%s4180_s1 + $0x5d0] sm:$0xff]  ;;  %v2705_v20 = vcombine.low %v88_v6, %v92_v7  ;;  %v2659_v6 = vcombine.low %v41_v51, %v45_v52 }
  0x65   :  { %1753 = vmatpush1.bf16.msra.mxu1 %v2769_v15  ;;  %v220_v9 = vld [vmem:[%s4180_s1 + $0x628] sm:$0xff]  ;;  %v85_v15 = vld [vmem:[%s4180_s1 + $0x1f0] sm:$0xff] }
  0x66   :  { %1754 = vmatprep.subr.bf16.mxu1 %v2890_v18  ;;  %v2834_v13 = vcombine.high %v216_v8, %v220_v9  ;;  %v213_v18 = vld [vmem:[%s4180_s1 + $0x5f0] sm:$0xff]  ;;  %v2833_v21 = vcombine.low %v216_v8, %v220_v9  ;;  %v2700_v22 = vcombine.high %v81_v14, %v85_v15  ;;  %v2699_v26 = vcombine.low %v81_v14, %v85_v15 }
  0x67   :  { %1714 = vmatpush2.bf16.msra.mxu0 %v2761_v23  ;;  %v2828_v53 = vcombine.high %v209_v17, %v213_v18  ;;  %v73_v23 = vld [vmem:[%s4180_s1 + $0x190] sm:$0xff]  ;;  %v2827_v27 = vcombine.low %v209_v17, %v213_v18  ;;  %v2651_v14 = vcombine.low %v33_v63, %v37_v0 }
  0x68   :  { %1715 = vmatprep.subr.bf16.mxu0 %v2754_v54  ;;  %v201_v54 = vld [vmem:[%s4180_s1 + $0x590] sm:$0xff] }
  0x69   :  { %1755 = vmatpush2.bf16.msra.mxu1 %v2889_v24  ;;  %v77_v24 = vld [vmem:[%s4180_s1 + $0x1b0] sm:$0xff] }
  0x6a   :  { %1756 = vmatprep.subr.bf16.mxu1 %v2882_v25  ;;  %v205_v25 = vld [vmem:[%s4180_s1 + $0x5b0] sm:$0xff]  ;;  %v2692_v28 = vcombine.high %v73_v23, %v77_v24  ;;  %v2691_v34 = vcombine.low %v73_v23, %v77_v24 }
  0x6b   :  { %1716 = vmatpush2.bf16.msra.mxu0 %v2753_v30  ;;  %v69_v30 = vld [vmem:[%s4180_s1 + $0x170] sm:$0xff]  ;;  %v2819_v37 = vcombine.low %v201_v54, %v205_v25 }
  0x6c   :  { %1717 = vmatprep.subr.bf16.mxu0 %v2746_v32  ;;  %v193_v32 = vld [vmem:[%s4180_s1 + $0x550] sm:$0xff]  ;;  %v2683_v42 = vcombine.low %v65_v29, %v69_v30 }
  0x6d   :  { %1757 = vmatpush2.bf16.msra.mxu1 %v2881_v31  ;;  %v2820_v31 = vcombine.high %v201_v54, %v205_v25  ;;  %v25_v7 = vld [vmem:[%s4180_s1 + $0x10] sm:$0xff] }
  0x6e   :  { %1758 = vmatprep.subr.bf16.mxu1 %v2874_v33  ;;  %v197_v33 = vld [vmem:[%s4180_s1 + $0x570] sm:$0xff] }
  0x6f   :  { %1718 = vmatpush2.bf16.msra.mxu0 %v2745_v38  ;;  %v2684_v38 = vcombine.high %v65_v29, %v69_v30  ;;  %v2811_v45 = vcombine.low %v193_v32, %v197_v33  ;;  %v29_v8 = vld [vmem:[%s4180_s1 + $0x30] sm:$0xff] }
  0x70   :  { %1719 = vmatprep.subr.bf16.mxu0 %v2738_v40  ;;  %v185_v40 = vld [vmem:[%s4180_s1 + $0x510] sm:$0xff]  ;;  %v2643_v23 = vcombine.low %v25_v7, %v29_v8 }
  0x71   :  { %1759 = vmatpush2.bf16.msra.mxu1 %v2873_v39  ;;  %v2812_v39 = vcombine.high %v193_v32, %v197_v33  ;;  %v145_v15 = vld [vmem:[%s4180_s1 + $0x3d0] sm:$0xff] }
  0x72   :  { %1760 = vmatprep.subr.bf16.mxu1 %v2866_v41  ;;  %v189_v41 = vld [vmem:[%s4180_s1 + $0x530] sm:$0xff] }
  0x73   :  { %1720 = vmatpush2.bf16.msra.mxu0 %v2737_v46  ;;  %v2676_v46 = vcombine.high %v57_v35, %v61_v36  ;;  %v2803_v55 = vcombine.low %v185_v40, %v189_v41  ;;  %v149_v17 = vld [vmem:[%s4180_s1 + $0x3f0] sm:$0xff] }
  0x74   :  { %1721 = vmatprep.subr.bf16.mxu0 %v2730_v48  ;;  %v177_v48 = vld [vmem:[%s4180_s1 + $0x4d0] sm:$0xff]  ;;  %v2763_v30 = vcombine.low %v145_v15, %v149_v17 }
  0x75   :  { %1761 = vmatpush2.bf16.msra.mxu1 %v2865_v47  ;;  %v2804_v47 = vcombine.high %v185_v40, %v189_v41  ;;  %v137_v24 = vld [vmem:[%s4180_s1 + $0x390] sm:$0xff] }
  0x76   :  { %1762 = vmatprep.subr.bf16.mxu1 %v2858_v49  ;;  %v181_v49 = vld [vmem:[%s4180_s1 + $0x4f0] sm:$0xff] }
  0x77   :  { %1722 = vmatpush2.bf16.msra.mxu0 %v2729_v56  ;;  %v2668_v56 = vcombine.high %v49_v43, %v53_v44  ;;  %v2795_v1 = vcombine.low %v177_v48, %v181_v49  ;;  %v141_v54 = vld [vmem:[%s4180_s1 + $0x3b0] sm:$0xff] }
  0x78   :  { %1723 = vmatprep.subr.bf16.mxu0 %v2722_v60  ;;  %v173_v60 = vld [vmem:[%s4180_s1 + $0x4b0] sm:$0xff] }
  0x79   :  { %1763 = vmatpush2.bf16.msra.mxu1 %v2857_v57  ;;  %v169_v57 = vld [vmem:[%s4180_s1 + $0x490] sm:$0xff] }
  0x7a   :  { %1764 = vmatprep.subr.bf16.mxu1 %v2850_v61  ;;  %v2796_v61 = vcombine.high %v177_v48, %v181_v49  ;;  %v2787_v9 = vcombine.low %v169_v57, %v173_v60  ;;  %v133_v32 = vld [vmem:[%s4180_s1 + $0x370] sm:$0xff] }
  0x7b   :  { %1724 = vmatpush2.bf16.msra.mxu0 %v2721_v2  ;;  %v2660_v2 = vcombine.high %v41_v51, %v45_v52  ;;  %v257_v36 = vld [vmem:[%s4180_s1 + $0x750] sm:$0xff] }
  0x7c   :  { %1725 = vmatprep.subr.bf16.mxu0 %v2714_v4  ;;  %v165_v4 = vld [vmem:[%s4180_s1 + $0x470] sm:$0xff] }
  0x7d   :  { %1765 = vmatpush2.bf16.msra.mxu1 %v2849_v3  ;;  %v161_v3 = vld [vmem:[%s4180_s1 + $0x450] sm:$0xff] }
  0x7e   :  { %1766 = vmatprep.subr.bf16.mxu1 %v2842_v5  ;;  %v2788_v5 = vcombine.high %v169_v57, %v173_v60  ;;  %v2779_v18 = vcombine.low %v161_v3, %v165_v4  ;;  %v121_v41 = vld [vmem:[%s4180_s1 + $0x310] sm:$0xff] }
  0x7f   :  { %1726 = vmatpush2.bf16.msra.mxu0 %v2713_v10  ;;  %v2652_v10 = vcombine.high %v33_v63, %v37_v0  ;;  %v125_v43 = vld [vmem:[%s4180_s1 + $0x330] sm:$0xff] }
  0x80   :  { %1727 = vmatprep.subr.bf16.mxu0 %v2706_v12  ;;  %v157_v12 = vld [vmem:[%s4180_s1 + $0x430] sm:$0xff] }
  0x81   :  { %1767 = vmatpush2.bf16.msra.mxu1 %v2841_v11  ;;  %v153_v11 = vld [vmem:[%s4180_s1 + $0x410] sm:$0xff] }
  0x82   :  { %1768 = vmatprep.subr.bf16.mxu1 %v2834_v13  ;;  %v2780_v13 = vcombine.high %v161_v3, %v165_v4  ;;  %v2771_v25 = vcombine.low %v153_v11, %v157_v12  ;;  %v249_v44 = vld [vmem:[%s4180_s1 + $0x710] sm:$0xff] }
  0x83   :  { %1728 = vmatpush2.bf16.msra.mxu0 %v2705_v20  ;;  %v2644_v20 = vcombine.high %v25_v7, %v29_v8  ;;  %v117_v48 = vld [vmem:[%s4180_s1 + $0x2f0] sm:$0xff] }
  0x84   :  { %1779 = vmatprep.subr.bf16.mxu0 %v2700_v22  ;;  %v277_v22 = vld [vmem:[%s4180_s1 + $0x7f0] sm:$0xff] }
  0x85   :  { %1769 = vmatpush2.bf16.msra.mxu1 %v2833_v21  ;;  %v273_v21 = vld [vmem:[%s4180_s1 + $0x7d0] sm:$0xff] }
  0x86   :  { %1820 = vmatprep.subr.bf16.mxu1 %v2828_v53  ;;  %1730 = vmatmul.mubr.bf16.vlgmr.msra.gmra.mxu0 %v3378_v16  ;;  %v2772_v53 = vcombine.high %v153_v11, %v157_v12  ;;  %v2892_v29 = vcombine.high %v273_v21, %v277_v22  ;;  %v2891_v33 = vcombine.low %v273_v21, %v277_v22  ;;  %v241_v51 = vld [vmem:[%s4180_s1 + $0x6d0] sm:$0xff] }
  0x87   :  { %1780 = vmatpush1.bf16.msra.mxu0 %v2699_v26  ;;  %1811 = vmatprep.mubr.bf16.mxu0 %v3248_v58  ;;  %v2764_v26 = vcombine.high %v145_v15, %v149_v17  ;;  %v245_v52 = vld [vmem:[%s4180_s1 + $0x6f0] sm:$0xff] }
  0x88   :  { %1771 = vmatmul.mubr.bf16.vlgmr.msra.gmra.mxu1 %v3388_v19  ;;  %1781 = vmatprep.subr.bf16.mxu0 %v2692_v28  ;;  %v269_v28 = vld [vmem:[%s4180_s1 + $0x7b0] sm:$0xff] }
  0x89   :  { %1821 = vmatpush1.bf16.msra.mxu1 %v2827_v27  ;;  %1852 = vmatprep.mubr.bf16.mxu1 %v3252_v59  ;;  %v265_v27 = vld [vmem:[%s4180_s1 + $0x790] sm:$0xff] }
  0x8a   :  { %1822 = vmatprep.subr.bf16.mxu1 %v2820_v31  ;;  %v129_v31 = vld [vmem:[%s4180_s1 + $0x350] sm:$0xff]  ;;  %v2884_v35 = vcombine.high %v265_v27, %v269_v28 }
  0x8b   :  { %1782 = vmatpush1.bf16.msra.mxu0 %v2691_v34  ;;  %v2756_v34 = vcombine.high %v137_v24, %v141_v54  ;;  %v2748_v40 = vcombine.high %v129_v31, %v133_v32  ;;  %v105_v57 = vld [vmem:[%s4180_s1 + $0x290] sm:$0xff] }
  0x8c   :  { %1783 = vmatprep.subr.bf16.mxu0 %v2684_v38  ;;  %v2755_v38 = vcombine.low %v137_v24, %v141_v54  ;;  %v109_v60 = vld [vmem:[%s4180_s1 + $0x2b0] sm:$0xff]  ;;  %v86_v24 = vld [vmem:[%s4180_s1 + $0x1f8] sm:$0xff] }
  0x8d   :  { %1823 = vmatpush1.bf16.msra.mxu1 %v2819_v37  ;;  %v261_v37 = vld [vmem:[%s4180_s1 + $0x770] sm:$0xff]  ;;  %v210_v54 = vld [vmem:[%s4180_s1 + $0x5d8] sm:$0xff] }
  0x8e   :  { %1824 = vmatprep.subr.bf16.mxu1 %v2812_v39  ;;  %v2883_v39 = vcombine.low %v265_v27, %v269_v28  ;;  %v2875_v49 = vcombine.low %v257_v36, %v261_v37  ;;  %v233_v63 = vld [vmem:[%s4180_s1 + $0x690] sm:$0xff] }
  0x8f   :  { %1784 = vmatpush1.bf16.msra.mxu0 %v2683_v42  ;;  %v2876_v42 = vcombine.high %v257_v36, %v261_v37  ;;  %v237_v0 = vld [vmem:[%s4180_s1 + $0x6b0] sm:$0xff] }
  0x90   :  { %1785 = vmatprep.subr.bf16.mxu0 %v2676_v46  ;;  %v2747_v46 = vcombine.low %v129_v31, %v133_v32  ;;  %v97_v3 = vld [vmem:[%s4180_s1 + $0x250] sm:$0xff]  ;;  %v2851_v11 = vcombine.low %v233_v63, %v237_v0  ;;  %v78_v31 = vld [vmem:[%s4180_s1 + $0x1b8] sm:$0xff] }
  0x91   :  { %1825 = vmatpush1.bf16.msra.mxu1 %v2811_v45  ;;  %v253_v45 = vld [vmem:[%s4180_s1 + $0x730] sm:$0xff]  ;;  %v202_v32 = vld [vmem:[%s4180_s1 + $0x598] sm:$0xff] }
  0x92   :  { %1826 = vmatprep.subr.bf16.mxu1 %v2804_v47  ;;  %v113_v47 = vld [vmem:[%s4180_s1 + $0x2d0] sm:$0xff] }
  0x93   :  { %1786 = vmatpush1.bf16.msra.mxu0 %v2675_v50  ;;  %v2740_v50 = vcombine.high %v121_v41, %v125_v43  ;;  %v101_v4 = vld [vmem:[%s4180_s1 + $0x270] sm:$0xff] }
  0x94   :  { %1787 = vmatprep.subr.bf16.mxu0 %v2668_v56  ;;  %v2739_v56 = vcombine.low %v121_v41, %v125_v43  ;;  %v225_v7 = vld [vmem:[%s4180_s1 + $0x650] sm:$0xff]  ;;  %v2716_v12 = vcombine.high %v97_v3, %v101_v4  ;;  %v198_v41 = vld [vmem:[%s4180_s1 + $0x578] sm:$0xff] }
  0x95   :  { %1827 = vmatpush1.bf16.msra.mxu1 %v2803_v55  ;;  %v2868_v55 = vcombine.high %v249_v44, %v253_v45  ;;  %v229_v8 = vld [vmem:[%s4180_s1 + $0x670] sm:$0xff] }
  0x96   :  { %1828 = vmatprep.subr.bf16.mxu1 %v2796_v61  ;;  %v2867_v61 = vcombine.low %v249_v44, %v253_v45  ;;  %v93_v15 = vld [vmem:[%s4180_s1 + $0x230] sm:$0xff]  ;;  %v2843_v21 = vcombine.low %v225_v7, %v229_v8 }
  0x97   :  { %1788 = vmatpush1.bf16.msra.mxu0 %v2667_v62  ;;  %v2732_v62 = vcombine.high %v113_v47, %v117_v48  ;;  %v217_v17 = vld [vmem:[%s4180_s1 + $0x610] sm:$0xff] }
  0x98   :  { %1789 = vmatprep.subr.bf16.mxu0 %v2660_v2  ;;  %v2731_v2 = vcombine.low %v113_v47, %v117_v48  ;;  %v62_v47 = vld [vmem:[%s4180_s1 + $0x138] sm:$0xff] }
  0x99   :  { %1829 = vmatpush1.bf16.msra.mxu1 %v2795_v1  ;;  %v2860_v1 = vcombine.high %v241_v51, %v245_v52  ;;  %v186_v48 = vld [vmem:[%s4180_s1 + $0x518] sm:$0xff] }
  0x9a   :  { %1830 = vmatprep.subr.bf16.mxu1 %v2788_v5  ;;  %v2859_v5 = vcombine.low %v241_v51, %v245_v52 }
  0x9b   :  { %1790 = vmatpush1.bf16.msra.mxu0 %v2659_v6  ;;  %v2724_v6 = vcombine.high %v105_v57, %v109_v60 }
  0x9c   :  { %1791 = vmatprep.subr.bf16.mxu0 %v2652_v10  ;;  %v2723_v10 = vcombine.low %v105_v57, %v109_v60  ;;  %v182_v57 = vld [vmem:[%s4180_s1 + $0x4f8] sm:$0xff] }
  0x9d   :  { %1831 = vmatpush1.bf16.msra.mxu1 %v2787_v9  ;;  %v2852_v9 = vcombine.high %v233_v63, %v237_v0  ;;  %v42_v0 = vld [vmem:[%s4180_s1 + $0x98] sm:$0xff] }
  0x9e   :  { %1832 = vmatprep.subr.bf16.mxu1 %v2780_v13  ;;  %v2844_v13 = vcombine.high %v225_v7, %v229_v8  ;;  %v34_v8 = vld [vmem:[%s4180_s1 + $0x58] sm:$0xff] }
  0x9f   :  { %1792 = vmatpush1.bf16.msra.mxu0 %v2651_v14  ;;  %v89_v14 = vld [vmem:[%s4180_s1 + $0x210] sm:$0xff] }
  0xa0   :  { %1793 = vmatprep.subr.bf16.mxu0 %v2644_v20  ;;  %v2715_v20 = vcombine.low %v97_v3, %v101_v4  ;;  %v2708_v22 = vcombine.high %v89_v14, %v93_v15  ;;  %v174_v3 = vld [vmem:[%s4180_s1 + $0x4b8] sm:$0xff] }
  0xa1   :  { %1833 = vmatpush1.bf16.msra.mxu1 %v2779_v18  ;;  %v221_v18 = vld [vmem:[%s4180_s1 + $0x630] sm:$0xff] }
  0xa2   :  { %1834 = vmatprep.subr.bf16.mxu1 %v2772_v53  ;;  %v2836_v53 = vcombine.high %v217_v17, %v221_v18  ;;  %v2835_v27 = vcombine.low %v217_v17, %v221_v18  ;;  %v26_v17 = vld [vmem:[%s4180_s1 + $0x18] sm:$0xff] }
  0xa3   :  { %1794 = vmatpush1.bf16.msra.mxu0 %v2643_v23  ;;  %v82_v23 = vld [vmem:[%s4180_s1 + $0x1d8] sm:$0xff] }
  0xa4   :  { %1795 = vmatprep.subr.bf16.mxu0 %v2764_v26  ;;  %v2707_v26 = vcombine.low %v89_v14, %v93_v15  ;;  %v2702_v28 = vcombine.high %v82_v23, %v86_v24  ;;  %v30_v18 = vld [vmem:[%s4180_s1 + $0x38] sm:$0xff] }
  0xa5   :  { %1835 = vmatpush1.bf16.msra.mxu1 %v2771_v25  ;;  %v214_v25 = vld [vmem:[%s4180_s1 + $0x5f8] sm:$0xff] }
  0xa6   :  { %1836 = vmatprep.subr.bf16.mxu1 %v2892_v29  ;;  %v2830_v29 = vcombine.high %v210_v54, %v214_v25 }
  0xa7   :  { %1796 = vmatpush2.bf16.msra.mxu0 %v2763_v30  ;;  %v74_v30 = vld [vmem:[%s4180_s1 + $0x198] sm:$0xff] }
  0xa8   :  { %1797 = vmatprep.subr.bf16.mxu0 %v2756_v34  ;;  %v2701_v34 = vcombine.low %v82_v23, %v86_v24  ;;  %v2694_v36 = vcombine.high %v74_v30, %v78_v31  ;;  %v2646_v23 = vcombine.high %v26_v17, %v30_v18 }
  0xa9   :  { %1837 = vmatpush2.bf16.msra.mxu1 %v2891_v33  ;;  %v206_v33 = vld [vmem:[%s4180_s1 + $0x5b8] sm:$0xff] }
  0xaa   :  { %1838 = vmatprep.subr.bf16.mxu1 %v2884_v35  ;;  %v2829_v35 = vcombine.low %v210_v54, %v214_v25  ;;  %v2822_v37 = vcombine.high %v202_v32, %v206_v33  ;;  %v2821_v43 = vcombine.low %v202_v32, %v206_v33  ;;  %v146_v54 = vld [vmem:[%s4180_s1 + $0x3d8] sm:$0xff] }
  0xab   :  { %1798 = vmatpush2.bf16.msra.mxu0 %v2755_v38  ;;  %v66_v38 = vld [vmem:[%s4180_s1 + $0x158] sm:$0xff] }
  0xac   :  { %1799 = vmatprep.subr.bf16.mxu0 %v2748_v40  ;;  %v194_v40 = vld [vmem:[%s4180_s1 + $0x558] sm:$0xff] }
  0xad   :  { %1839 = vmatpush2.bf16.msra.mxu1 %v2883_v39  ;;  %v70_v39 = vld [vmem:[%s4180_s1 + $0x178] sm:$0xff]  ;;  %v2814_v45 = vcombine.high %v194_v40, %v198_v41  ;;  %v2813_v51 = vcombine.low %v194_v40, %v198_v41 }
  0xae   :  { %1840 = vmatprep.subr.bf16.mxu1 %v2876_v42  ;;  %v2693_v42 = vcombine.low %v74_v30, %v78_v31  ;;  %v2686_v44 = vcombine.high %v66_v38, %v70_v39  ;;  %v150_v25 = vld [vmem:[%s4180_s1 + $0x3f8] sm:$0xff] }
  0xaf   :  { %1800 = vmatpush2.bf16.msra.mxu0 %v2747_v46  ;;  %v58_v46 = vld [vmem:[%s4180_s1 + $0x118] sm:$0xff]  ;;  %v2766_v30 = vcombine.high %v146_v54, %v150_v25 }
  0xb0   :  { %1801 = vmatprep.subr.bf16.mxu0 %v2740_v50  ;;  %v2685_v50 = vcombine.low %v66_v38, %v70_v39  ;;  %v2678_v52 = vcombine.high %v58_v46, %v62_v47  ;;  %v2677_v60 = vcombine.low %v58_v46, %v62_v47  ;;  %v138_v32 = vld [vmem:[%s4180_s1 + $0x398] sm:$0xff] }
  0xb1   :  { %1841 = vmatpush2.bf16.msra.mxu1 %v2875_v49  ;;  %v190_v49 = vld [vmem:[%s4180_s1 + $0x538] sm:$0xff] }
  0xb2   :  { %1842 = vmatprep.subr.bf16.mxu1 %v2868_v55  ;;  %v2806_v55 = vcombine.high %v186_v48, %v190_v49  ;;  %v142_v33 = vld [vmem:[%s4180_s1 + $0x3b8] sm:$0xff] }
  0xb3   :  { %1802 = vmatpush2.bf16.msra.mxu0 %v2739_v56  ;;  %v54_v56 = vld [vmem:[%s4180_s1 + $0xf8] sm:$0xff]  ;;  %v2758_v38 = vcombine.high %v138_v32, %v142_v33 }
  0xb4   :  { %1803 = vmatprep.subr.bf16.mxu0 %v2732_v62  ;;  %v130_v40 = vld [vmem:[%s4180_s1 + $0x358] sm:$0xff] }
  0xb5   :  { %1843 = vmatpush2.bf16.msra.mxu1 %v2867_v61  ;;  %v2805_v61 = vcombine.low %v186_v48, %v190_v49  ;;  %v134_v41 = vld [vmem:[%s4180_s1 + $0x378] sm:$0xff] }
  0xb6   :  { %1844 = vmatprep.subr.bf16.mxu1 %v2860_v1  ;;  %v46_v1 = vld [vmem:[%s4180_s1 + $0xb8] sm:$0xff]  ;;  %v2750_v46 = vcombine.high %v130_v40, %v134_v41 }
  0xb7   :  { %1804 = vmatpush2.bf16.msra.mxu0 %v2731_v2  ;;  %v170_v2 = vld [vmem:[%s4180_s1 + $0x498] sm:$0xff] }
  0xb8   :  { %1805 = vmatprep.subr.bf16.mxu0 %v2724_v6  ;;  %v2662_v6 = vcombine.high %v42_v0, %v46_v1  ;;  %v2790_v7 = vcombine.high %v170_v2, %v174_v3  ;;  %v122_v48 = vld [vmem:[%s4180_s1 + $0x318] sm:$0xff] }
  0xb9   :  { %1845 = vmatpush2.bf16.msra.mxu1 %v2859_v5  ;;  %v126_v49 = vld [vmem:[%s4180_s1 + $0x338] sm:$0xff] }
  0xba   :  { %1846 = vmatprep.subr.bf16.mxu1 %v2852_v9  ;;  %v38_v9 = vld [vmem:[%s4180_s1 + $0x78] sm:$0xff] }
  0xbb   :  { %1806 = vmatpush2.bf16.msra.mxu0 %v2723_v10  ;;  %v162_v10 = vld [vmem:[%s4180_s1 + $0x458] sm:$0xff]  ;;  %v2654_v14 = vcombine.high %v34_v8, %v38_v9 }
  0xbc   :  { %1807 = vmatprep.subr.bf16.mxu0 %v2716_v12  ;;  %v2661_v12 = vcombine.low %v42_v0, %v46_v1 }
  0xbd   :  { %1847 = vmatpush2.bf16.msra.mxu1 %v2851_v11  ;;  %v166_v11 = vld [vmem:[%s4180_s1 + $0x478] sm:$0xff] }
  0xbe   :  { %1848 = vmatprep.subr.bf16.mxu1 %v2844_v13  ;;  %v2789_v13 = vcombine.low %v170_v2, %v174_v3  ;;  %v2782_v15 = vcombine.high %v162_v10, %v166_v11  ;;  %v106_v2 = vld [vmem:[%s4180_s1 + $0x298] sm:$0xff] }
  0xbf   :  { %1808 = vmatpush2.bf16.msra.mxu0 %v2715_v20  ;;  %v154_v20 = vld [vmem:[%s4180_s1 + $0x418] sm:$0xff] }
  0xc0   :  { %1809 = vmatprep.subr.bf16.mxu0 %v2708_v22  ;;  %v2653_v22 = vcombine.low %v34_v8, %v38_v9  ;;  %v110_v3 = vld [vmem:[%s4180_s1 + $0x2b8] sm:$0xff] }
  0xc1   :  { %1849 = vmatpush2.bf16.msra.mxu1 %v2843_v21  ;;  %v158_v21 = vld [vmem:[%s4180_s1 + $0x438] sm:$0xff]  ;;  %v2726_v8 = vcombine.high %v106_v2, %v110_v3 }
  0xc2   :  { %1850 = vmatprep.subr.bf16.mxu1 %v2836_v53  ;;  %v2781_v53 = vcombine.low %v162_v10, %v166_v11  ;;  %v2774_v24 = vcombine.high %v154_v20, %v158_v21  ;;  %v98_v10 = vld [vmem:[%s4180_s1 + $0x258] sm:$0xff] }
  0xc3   :  { %1810 = vmatpush2.bf16.msra.mxu0 %v2707_v26  ;;  %v274_v26 = vld [vmem:[%s4180_s1 + $0x7d8] sm:$0xff] }
  0xc4   :  { %1861 = vmatprep.subr.bf16.mxu0 %v2702_v28  ;;  %v2645_v28 = vcombine.low %v26_v17, %v30_v18  ;;  %v102_v11 = vld [vmem:[%s4180_s1 + $0x278] sm:$0xff] }
  0xc5   :  { %1851 = vmatpush2.bf16.msra.mxu1 %v2835_v27  ;;  %v278_v27 = vld [vmem:[%s4180_s1 + $0x7f8] sm:$0xff]  ;;  %v2718_v17 = vcombine.high %v98_v10, %v102_v11 }
  0xc6   :  { %1902 = vmatprep.subr.bf16.mxu1 %v2830_v29  ;;  %1812 = vmatmul.mubr.bf16.vlgmr.msra.gmra.mxu0 %v3378_v16  ;;  %v2773_v29 = vcombine.low %v154_v20, %v158_v21  ;;  %v2894_v31 = vcombine.high %v274_v26, %v278_v27  ;;  %v90_v20 = vld [vmem:[%s4180_s1 + $0x218] sm:$0xff] }
  0xc7   :  { %1862 = vmatpush1.bf16.msra.mxu0 %v2701_v34  ;;  %1893 = vmatprep.mubr.bf16.mxu0 %v3248_v58  ;;  %v50_v58 = vld [vmem:[%s4180_s1 + $0xd8] sm:$0xff] }
  0xc8   :  { %1853 = vmatmul.mubr.bf16.vlgmr.msra.gmra.mxu1 %v3388_v19  ;;  %1863 = vmatprep.subr.bf16.mxu0 %v2694_v36  ;;  %v2670_v62 = vcombine.high %v50_v58, %v54_v56  ;;  %v2669_v4 = vcombine.low %v50_v58, %v54_v56  ;;  %v266_v34 = vld [vmem:[%s4180_s1 + $0x798] sm:$0xff]  ;;  %v2765_v36 = vcombine.low %v146_v54, %v150_v25 }
  0xc9   :  { %1903 = vmatpush1.bf16.msra.mxu1 %v2829_v35  ;;  %1934 = vmatprep.mubr.bf16.mxu1 %v3252_v59  ;;  %v178_v59 = vld [vmem:[%s4180_s1 + $0x4d8] sm:$0xff]  ;;  %v2742_v58 = vcombine.high %v122_v48, %v126_v49 }
  0xca   :  { %1904 = vmatprep.subr.bf16.mxu1 %v2822_v37  ;;  %v2798_v63 = vcombine.high %v178_v59, %v182_v57  ;;  %v2797_v5 = vcombine.low %v178_v59, %v182_v57  ;;  %v270_v35 = vld [vmem:[%s4180_s1 + $0x7b8] sm:$0xff]  ;;  %v2893_v37 = vcombine.low %v274_v26, %v278_v27 }
  0xcb   :  { %1864 = vmatpush1.bf16.msra.mxu0 %v2693_v42  ;;  %v2886_v39 = vcombine.high %v266_v34, %v270_v35  ;;  %v258_v42 = vld [vmem:[%s4180_s1 + $0x758] sm:$0xff] }
  0xcc   :  { %1865 = vmatprep.subr.bf16.mxu0 %v2686_v44  ;;  %v2757_v44 = vcombine.low %v138_v32, %v142_v33  ;;  %v114_v59 = vld [vmem:[%s4180_s1 + $0x2d8] sm:$0xff]  ;;  %v3966_v33 = vld [vmem:[%s4183_s2] sm:$0xff] }
  0xcd   :  { %1905 = vmatpush1.bf16.msra.mxu1 %v2821_v43  ;;  %v262_v43 = vld [vmem:[%s4180_s1 + $0x778] sm:$0xff] }
  0xce   :  { %1906 = vmatprep.subr.bf16.mxu1 %v2814_v45  ;;  %v2885_v45 = vcombine.low %v266_v34, %v270_v35  ;;  %v2878_v47 = vcombine.high %v258_v42, %v262_v43  ;;  %v118_v57 = vld [vmem:[%s4180_s1 + $0x2f8] sm:$0xff]  ;;  %v3054_v35 = vld [vmem:[%s4182_s3 + $0x70] sm:$0xff]  }
  0xcf   :  { %1866 = vmatpush1.bf16.msra.mxu0 %v2685_v50  ;;  %v250_v50 = vld [vmem:[%s4180_s1 + $0x718] sm:$0xff]  ;;  %v2734_v0 = vcombine.high %v114_v59, %v118_v57 }
  0xd0   :  { %1867 = vmatprep.subr.bf16.mxu0 %v2678_v52  ;;  %v2749_v52 = vcombine.low %v130_v40, %v134_v41  ;;  %v94_v21 = vld [vmem:[%s4180_s1 + $0x238] sm:$0xff]  ;;  %v3055_v41 = vld [vmem:[%s4182_s3 + $0x30] sm:$0xff]  }
  0xd1   :  { %1907 = vmatpush1.bf16.msra.mxu1 %v2813_v51  ;;  %v254_v51 = vld [vmem:[%s4180_s1 + $0x738] sm:$0xff]  ;;  %v2710_v25 = vcombine.high %v90_v20, %v94_v21 }
  0xd2   :  { %1908 = vmatprep.subr.bf16.mxu1 %v2806_v55  ;;  %v2877_v55 = vcombine.low %v258_v42, %v262_v43  ;;  %v2870_v56 = vcombine.high %v250_v50, %v254_v51  ;;  %v3068_v32 = vld [vmem:[%s4182_s3 + $0xf8] sm:$0xff]   ;;  %v3056_v43 = vld [vmem:[%s4182_s3 + $0x68] sm:$0xff]  }
  0xd3   :  { %1868 = vmatpush1.bf16.msra.mxu0 %v2677_v60  ;;  %v242_v60 = vld [vmem:[%s4180_s1 + $0x6d8] sm:$0xff] }
  0xd4   :  { %1869 = vmatprep.subr.bf16.mxu0 %v2670_v62  ;;  %v2741_v62 = vcombine.low %v122_v48, %v126_v49  ;;  %v3053_v34 = vld [vmem:[%s4182_s3 + $0x38] sm:$0xff]   ;;  %v3057_v49 = vld [vmem:[%s4182_s3 + $0x28] sm:$0xff]  }
  0xd5   :  { %1909 = vmatpush1.bf16.msra.mxu1 %v2805_v61  ;;  %v246_v61 = vld [vmem:[%s4180_s1 + $0x6f8] sm:$0xff] }
  0xd6   :  { %1910 = vmatprep.subr.bf16.mxu1 %v2798_v63  ;;  %v2869_v63 = vcombine.low %v250_v50, %v254_v51  ;;  %v2862_v1 = vcombine.high %v242_v60, %v246_v61  ;;  %v3058_v51 = vld [vmem:[%s4182_s3 + $0x60] sm:$0xff]  }
  0xd7   :  { %1870 = vmatpush1.bf16.msra.mxu0 %v2669_v4  ;;  %v234_v4 = vld [vmem:[%s4180_s1 + $0x698] sm:$0xff] }
  0xd8   :  { %1871 = vmatprep.subr.bf16.mxu0 %v2662_v6  ;;  %v2733_v6 = vcombine.low %v114_v59, %v118_v57  ;;  %v3059_v59 = vld [vmem:[%s4182_s3 + $0x20] sm:$0xff]   ;;  %v3060_v57 = vld [vmem:[%s4182_s3 + $0x58] sm:$0xff]  }
  0xd9   :  { %1911 = vmatpush1.bf16.msra.mxu1 %v2797_v5  ;;  %v238_v5 = vld [vmem:[%s4180_s1 + $0x6b8] sm:$0xff] }
  0xda   :  { %1912 = vmatprep.subr.bf16.mxu1 %v2790_v7  ;;  %v2861_v7 = vcombine.low %v242_v60, %v246_v61  ;;  %v2854_v9 = vcombine.high %v234_v4, %v238_v5  ;;  %v3075_v60 = vld [vmem:[%s4182_s3 + $0xa0] sm:$0xff]   ;;  %v3076_v61 = vld [vmem:[%s4182_s3 + $0xd8] sm:$0xff]  }
  0xdb   :  { %1872 = vmatpush1.bf16.msra.mxu0 %v2661_v12  ;;  %v226_v12 = vld [vmem:[%s4180_s1 + $0x658] sm:$0xff] }
  0xdc   :  { %1873 = vmatprep.subr.bf16.mxu0 %v2654_v14  ;;  %v2725_v14 = vcombine.low %v106_v2, %v110_v3  ;;  %v3078_v2 = vld [vmem:[%s4182_s3 + $0xd0] sm:$0xff]  }
  0xdd   :  { %1913 = vmatpush1.bf16.msra.mxu1 %v2789_v13  ;;  %v230_v13 = vld [vmem:[%s4180_s1 + $0x678] sm:$0xff]  ;;  %v3063_v3 = vld [vmem:[%s4182_s3 + $0x10] sm:$0xff]  }
  0xde   :  { %1914 = vmatprep.subr.bf16.mxu1 %v2782_v15  ;;  %v2853_v15 = vcombine.low %v234_v4, %v238_v5  ;;  %v2846_v18 = vcombine.high %v226_v12, %v230_v13  ;;  %v2845_v54 = vcombine.low %v226_v12, %v230_v13  ;;  %v3064_v5 = vld [vmem:[%s4182_s3 + $0x48] sm:$0xff]   ;;  %v3082_v12 = vld [vmem:[%s4182_s3 + $0xc0] sm:$0xff]  }
  0xdf   :  { %1874 = vmatpush1.bf16.msra.mxu0 %v2653_v22  ;;  %v281_v22 = vlaneseq  ;;  %v3067_v13 = vld [vmem:[%s4182_s3] sm:$0xff]  }
  0xe0   :  { %1875 = vmatprep.subr.bf16.mxu0 %v2646_v23  ;;  %v222_v23 = vld [vmem:[%s4180_s1 + $0x638] sm:$0xff] }
  0xe1   :  { %1915 = vmatpush1.bf16.msra.mxu1 %v2781_v53  ;;  %v218_v53 = vld [vmem:[%s4180_s1 + $0x618] sm:$0xff]  ;;  %v3954_v27 = vshrl.u32 %v281_v22, 7  ;;  %v3086_v22 = vld [vmem:[%s4182_s3 + $0x170] sm:$0xff]  }
  0xe2   :  { %1916 = vmatprep.subr.bf16.mxu1 %v2774_v24  ;;  %v2717_v24 = vcombine.low %v98_v10, %v102_v11  ;;  %v2838_v26 = vcombine.high %v218_v53, %v222_v23  ;;  %v3066_v10 = vld [vmem:[%s4182_s3 + $0x40] sm:$0xff]   ;;  %v3081_v11 = vld [vmem:[%s4182_s3 + $0x88] sm:$0xff]  }
  0xe3   :  { %1876 = vmatpush1.bf16.msra.mxu0 %v2645_v28  ;;  %v2709_v28 = vcombine.low %v90_v20, %v94_v21  ;;  %v3085_v20 = vld [vmem:[%s4182_s3 + $0x138] sm:$0xff]  }
  0xe4   :  { %1877 = vmatprep.subr.bf16.mxu0 %v2766_v30  ;;  %v3052_v30 = vld [vmem:[%s4182_s3 + $0x78] sm:$0xff]  }
  0xe5   :  { %1917 = vmatpush1.bf16.msra.mxu1 %v2773_v29  ;;  %v2837_v29 = vcombine.low %v218_v53, %v222_v23  ;;  %v3087_v53 = vld [vmem:[%s4182_s3 + $0x130] sm:$0xff]   ;;  %v3088_v23 = vld [vmem:[%s4182_s3 + $0x168] sm:$0xff]  }
  0xe6   :  { %1918 = vmatprep.subr.bf16.mxu1 %v2894_v31  ;;  %v287_v31 = vsub.s32 1, %v3954_v27 }
  0xe7   :  { %1878 = vmatpush2.bf16.msra.mxu0 %v2765_v36  ;;  %v3069_v36 = vld [vmem:[%s4182_s3 + $0xb8] sm:$0xff]  }
  0xe8   :  { %1879 = vmatprep.subr.bf16.mxu0 %v2758_v38  ;;  %v3070_v38 = vld [vmem:[%s4182_s3 + $0xf0] sm:$0xff]  }
  0xe9   :  { %1919 = vmatpush2.bf16.msra.mxu1 %v2893_v37  ;;  %v288_v37 = vrot.slane %v3966_v33, %v287_v31  ;;  %v3096_v31 = vld [vmem:[%s4182_s3 + $0x148] sm:$0xff]  }
  0xea   :  { %1920 = vmatprep.subr.bf16.mxu1 %v2886_v39 }
  0xeb   :  { %1880 = vmatpush2.bf16.msra.mxu0 %v2757_v44 }
  0xec   :  { %1881 = vmatprep.subr.bf16.mxu0 %v2750_v46 }
  0xed   :  { %1921 = vmatpush2.bf16.msra.mxu1 %v2885_v45 }
  0xee   :  { %1922 = vmatprep.subr.bf16.mxu1 %v2878_v47 }
  0xef   :  { %1882 = vmatpush2.bf16.msra.mxu0 %v2749_v52  ;;  %v3073_v52 = vld [vmem:[%s4182_s3 + $0xa8] sm:$0xff]  }
  0xf0   :  { %1883 = vmatprep.subr.bf16.mxu0 %v2742_v58 }
  0xf1   :  { %1923 = vmatpush2.bf16.msra.mxu1 %v2877_v55 }
  0xf2   :  { %1924 = vmatprep.subr.bf16.mxu1 %v2870_v56  ;;  %v3074_v56 = vld [vmem:[%s4182_s3 + $0xe0] sm:$0xff]  }
  0xf3   :  { %1884 = vmatpush2.bf16.msra.mxu0 %v2741_v62  ;;  %v3061_v62 = vld [vmem:[%s4182_s3 + $0x18] sm:$0xff]  }
  0xf4   :  { %1885 = vmatprep.subr.bf16.mxu0 %v2734_v0  ;;  %v3062_v0 = vld [vmem:[%s4182_s3 + $0x50] sm:$0xff]  }
  0xf5   :  { %1925 = vmatpush2.bf16.msra.mxu1 %v2869_v63  ;;  %v283_v63 = vsub.s32 0, %v3954_v27 }
  0xf6   :  { %1926 = vmatprep.subr.bf16.mxu1 %v2862_v1  ;;  %v3077_v1 = vld [vmem:[%s4182_s3 + $0x98] sm:$0xff]  }
  0xf7   :  { %1886 = vmatpush2.bf16.msra.mxu0 %v2733_v6  ;;  %v284_v4 = vrot.slane %v3966_v33, %v283_v63  ;;  %v3079_v6 = vld [vmem:[%s4182_s3 + $0x90] sm:$0xff]  }
  0xf8   :  { %1887 = vmatprep.subr.bf16.mxu0 %v2726_v8  ;;  %v3065_v8 = vld [vmem:[%s4182_s3 + $0x8] sm:$0xff]   ;;  %v3110_v63 = vld [vmem:[%s4182_s3 + $0x1d0] sm:$0xff]  }
  0xf9   :  { %1927 = vmatpush2.bf16.msra.mxu1 %v2861_v7  ;;  %v3080_v7 = vld [vmem:[%s4182_s3 + $0xc8] sm:$0xff]  }
  0xfa   :  { %1928 = vmatprep.subr.bf16.mxu1 %v2854_v9 }
  0xfb   :  { %1888 = vmatpush2.bf16.msra.mxu0 %v2725_v14 }
  0xfc   :  { %1889 = vmatprep.subr.bf16.mxu0 %v2718_v17  ;;  %v3084_v17 = vld [vmem:[%s4182_s3 + $0x178] sm:$0xff]  }
  0xfd   :  { %1929 = vmatpush2.bf16.msra.mxu1 %v2853_v15  ;;  %v3083_v15 = vld [vmem:[%s4182_s3 + $0x80] sm:$0xff]  }
  0xfe   :  { %1930 = vmatprep.subr.bf16.mxu1 %v2846_v18  ;;  %v3100_v18 = vld [vmem:[%s4182_s3 + $0x1f8] sm:$0xff]  }
  0xff   :  { %1890 = vmatpush2.bf16.msra.mxu0 %v2717_v24  ;;  %v3089_v24 = vld [vmem:[%s4182_s3 + $0x128] sm:$0xff]  }
 0x100   :  { %1891 = vmatprep.subr.bf16.mxu0 %v2710_v25  ;;  %v3091_v25 = vld [vmem:[%s4182_s3 + $0x120] sm:$0xff]  }
 0x101   :  { %1931 = vmatpush2.bf16.msra.mxu1 %v2845_v54  ;;  %v3090_v54 = vld [vmem:[%s4182_s3 + $0x160] sm:$0xff]  }
 0x102   :  { %1932 = vmatprep.subr.bf16.mxu1 %v2838_v26  ;;  %v3092_v26 = vld [vmem:[%s4182_s3 + $0x158] sm:$0xff]  }
 0x103   :  { %1892 = vmatpush2.bf16.msra.mxu0 %v2709_v28  ;;  %v3093_v28 = vld [vmem:[%s4182_s3 + $0x118] sm:$0xff]  }
 0x104   :  { %2960 = vmatprep.subr.bf16.mxu0 %v3052_v30  ;;  %v3095_v30 = vld [vmem:[%s4182_s3 + $0x110] sm:$0xff]  }
 0x105   :  { %1933 = vmatpush2.bf16.msra.mxu1 %v2837_v29  ;;  %v3094_v29 = vld [vmem:[%s4182_s3 + $0x150] sm:$0xff]  }
 0x106   :  { %2982 = vmatprep.subr.bf16.mxu1 %v3068_v32  ;;  %v1649_v39 = vpop.f32.mrf.mxu0  ;;  %1894 = vmatmul.mubr.bf16.vlgmr.msra.gmra.mxu0 %v3378_v16  ;;  %v3071_v16 = vld [vmem:[%s4182_s3 + $0xb0] sm:$0xff]   ;;  %v3097_v32 = vld [vmem:[%s4182_s3 + $0x108] sm:$0xff]  }
 0x107   :  { %2961 = vmatpush3.bf16.msra.mxu0 %v3053_v34  ;;  %v1650_v9 = vadd.f32 %v1649_v39, %v284_v4  ;;  %v3098_v34 = vld [vmem:[%s4182_s3 + $0x140] sm:$0xff]  }
 0x108   :  { %v3982_v40 = vpop.f32.mrf.mxu1  ;;  %1935 = vmatmul.mubr.bf16.vlgmr.msra.gmra.mxu1 %v3388_v19  ;;  %v1651_v42 = vpop.f32.mrf.mxu0  ;;  %2962 = vmatprep.subr.bf16.mxu0 %v3054_v35  ;;  %v3072_v19 = vld [vmem:[%s4182_s3 + $0xe8] sm:$0xff]   ;;  %v291_v35 = vsub.s32 2, %v3954_v27  ;;  %v3115_v4 = vld [vmem:[%s4182_s3 + $0x180] sm:$0xff]  }
 0x109   :  { %2983 = vmatpush3.bf16.msra.mxu1 %v3069_v36  ;;  %v1652_v44 = vadd.f32 %v1651_v42, %v288_v37  ;;  %v1691_v14 = vadd.f32 %v3982_v40, %v1650_v9  ;;  %v3099_v36 = vld [vmem:[%s4182_s3 + $0x100] sm:$0xff]   ;;  %v295_v37 = vsub.s32 3, %v3954_v27 }
 0x10a   :  { %v1692_v45 = vpop.f32.mrf.mxu1  ;;  %2984 = vmatprep.subr.bf16.mxu1 %v3070_v38  ;;  %v1653_v46 = vpop.f32.mrf.mxu0  ;;  %v292_v38 = vrot.slane %v3966_v33, %v291_v35 }
 0x10b   :  { %v1693_v47 = vadd.f32 %v1692_v45, %v1652_v44  ;;  %2963 = vmatpush3.bf16.msra.mxu0 %v3055_v41  ;;  %v1943_v21 = vpack.c.bf16 %v1691_v14, %v1691_v14  ;;  %v296_v39 = vrot.slane %v3966_v33, %v295_v37 }
 0x10c   :  { %v1694_v48 = vpop.f32.mrf.mxu1  ;;  %v1654_v50 = vpop.f32.mrf.mxu0  ;;  %2964 = vmatprep.subr.bf16.mxu0 %v3056_v43 }
 0x10d   :  { %2985 = vmatpush3.bf16.msra.mxu1 %v3071_v16  ;;  %v1944_v55 = vpack.c.bf16 %v1693_v47, %v1693_v47 }
 0x10e   :  { %v1695_v58 = vpop.f32.mrf.mxu1  ;;  %2986 = vmatprep.subr.bf16.mxu1 %v3072_v19 }
 0x10f   :  { %2965 = vmatpush3.bf16.msra.mxu0 %v3057_v49  ;;  %2502 = vmatprep.mubr.bf16.mxu0 %v1944_v55  ;;  %v3102_v55 = vld [vmem:[%s4182_s3 + $0x1f0] sm:$0xff]  }
 0x110   :  { %2966 = vmatprep.subr.bf16.mxu0 %v3058_v51  ;;  %v3101_v51 = vld [vmem:[%s4182_s3 + $0x1b8] sm:$0xff]   ;;  %v3103_v58 = vld [vmem:[%s4182_s3 + $0x1b0] sm:$0xff]  }
 0x111   :  { %2987 = vmatpush3.bf16.msra.mxu1 %v3073_v52 }
 0x112   :  { %2988 = vmatprep.subr.bf16.mxu1 %v3074_v56  ;;  %v3104_v56 = vld [vmem:[%s4182_s3 + $0x1e8] sm:$0xff]  }
 0x113   :  { %2967 = vmatpush3.bf16.msra.mxu0 %v3059_v59  ;;  %v3105_v59 = vld [vmem:[%s4182_s3 + $0x1a8] sm:$0xff]  }
 0x114   :  { %2968 = vmatprep.subr.bf16.mxu0 %v3060_v57  ;;  %v3106_v57 = vld [vmem:[%s4182_s3 + $0x1e0] sm:$0xff]  }
 0x115   :  { %2989 = vmatpush3.bf16.msra.mxu1 %v3075_v60  ;;  %v3107_v60 = vld [vmem:[%s4182_s3 + $0x1a0] sm:$0xff]  }
 0x116   :  { %2990 = vmatprep.subr.bf16.mxu1 %v3076_v61  ;;  %v3108_v61 = vld [vmem:[%s4182_s3 + $0x1d8] sm:$0xff]  }
 0x117   :  { %2969 = vmatpush3.bf16.msra.mxu0 %v3061_v62  ;;  %v3109_v62 = vld [vmem:[%s4182_s3 + $0x198] sm:$0xff]  }
 0x118   :  { %2970 = vmatprep.subr.bf16.mxu0 %v3062_v0  ;;  %v3111_v0 = vld [vmem:[%s4182_s3 + $0x190] sm:$0xff]  }
 0x119   :  { %2991 = vmatpush3.bf16.msra.mxu1 %v3077_v1  ;;  %v3112_v1 = vld [vmem:[%s4182_s3 + $0x1c8] sm:$0xff]  }
 0x11a   :  { %2992 = vmatprep.subr.bf16.mxu1 %v3078_v2  ;;  %v3113_v2 = vld [vmem:[%s4182_s3 + $0x188] sm:$0xff]  }
 0x11b   :  { %2971 = vmatpush3.bf16.msra.mxu0 %v3063_v3  ;;  %v3114_v3 = vld [vmem:[%s4182_s3 + $0x1c0] sm:$0xff]  }
 0x11c   :  { %2972 = vmatprep.subr.bf16.mxu0 %v3064_v5  ;;  %v299_v5 = vsub.s32 4, %v3954_v27 }
 0x11d   :  { %2993 = vmatpush3.bf16.msra.mxu1 %v3079_v6  ;;  %v303_v6 = vsub.s32 5, %v3954_v27 }
 0x11e   :  { %2994 = vmatprep.subr.bf16.mxu1 %v3080_v7  ;;  %v300_v7 = vrot.slane %v3966_v33, %v299_v5 }
 0x11f   :  { %2973 = vmatpush3.bf16.msra.mxu0 %v3065_v8  ;;  %v304_v8 = vrot.slane %v3966_v33, %v303_v6 }
 0x120   :  { %2974 = vmatprep.subr.bf16.mxu0 %v3066_v10 }
 0x121   :  { %2995 = vmatpush3.bf16.msra.mxu1 %v3081_v11 }
 0x122   :  { %2996 = vmatprep.subr.bf16.mxu1 %v3082_v12 }
 0x123   :  { %2975 = vmatpush3.bf16.msra.mxu0 %v3067_v13 }
 0x124   :  { %3004 = vmatprep.subr.bf16.mxu0 %v3084_v17 }
 0x125   :  { %2997 = vmatpush3.bf16.msra.mxu1 %v3083_v15 }
 0x126   :  { %3026 = vmatprep.subr.bf16.mxu1 %v3100_v18  ;;  %2503 = vmatmul.mubr.bf16.vlgmr.msra.gmra.mxu0 %v1943_v21 }
 0x127   :  { %3005 = vmatpush3.bf16.msra.mxu0 %v3085_v20 }
 0x128   :  { %3006 = vmatprep.subr.bf16.mxu0 %v3086_v22 }
 0x12b   :  { %3007 = vmatpush3.bf16.msra.mxu0 %v3087_v53 }
 0x12c   :  { %3008 = vmatprep.subr.bf16.mxu0 %v3088_v23 }
 0x12f   :  { %3009 = vmatpush3.bf16.msra.mxu0 %v3089_v24  ;;  %v307_v24 = vsub.s32 6, %v3954_v27 }
 0x130   :  { %3010 = vmatprep.subr.bf16.mxu0 %v3090_v54  ;;  %v311_v54 = vsub.s32 7, %v3954_v27 }
 0x133   :  { %3011 = vmatpush3.bf16.msra.mxu0 %v3091_v25  ;;  %v308_v25 = vrot.slane %v3966_v33, %v307_v24 }
 0x134   :  { %3012 = vmatprep.subr.bf16.mxu0 %v3092_v26  ;;  %v312_v26 = vrot.slane %v3966_v33, %v311_v54 }
 0x137   :  { %3013 = vmatpush3.bf16.msra.mxu0 %v3093_v28 }
 0x138   :  { %3014 = vmatprep.subr.bf16.mxu0 %v3094_v29 }
 0x13b   :  { %3015 = vmatpush3.bf16.msra.mxu0 %v3095_v30 }
 0x13c   :  { %3016 = vmatprep.subr.bf16.mxu0 %v3096_v31 }
 0x13f   :  { %3017 = vmatpush3.bf16.msra.mxu0 %v3097_v32 }
 0x140   :  { %3018 = vmatprep.subr.bf16.mxu0 %v3098_v34 }
 0x143   :  { %3019 = vmatpush3.bf16.msra.mxu0 %v3099_v36 }
 0x146   :  { %v1731_v40 = vpop.f32.mrf.mxu0 }
 0x147   :  { %v1732_v41 = vadd.f32 %v1731_v40, %v292_v38 }
 0x148   :  { %v1772_v42 = vpop.f32.mrf.mxu1  ;;  %v1733_v43 = vpop.f32.mrf.mxu0 }
 0x149   :  { %v1734_v16 = vadd.f32 %v1733_v43, %v296_v39  ;;  %v1773_v45 = vadd.f32 %v1772_v42, %v1732_v41 }
 0x14a   :  { %v1774_v44 = vpop.f32.mrf.mxu1  ;;  %v1735_v19 = vpop.f32.mrf.mxu0 }
 0x14b   :  { %v1775_v46 = vadd.f32 %v1774_v44, %v1734_v16  ;;  %v1945_v52 = vpack.c.bf16 %v1773_v45, %v1773_v45  ;;  %v2895_v45 = vld [vmem:[%s4184_s4] ss:$0 sm:$0xff] }
 0x14c   :  { %v1776_v47 = vpop.f32.mrf.mxu1  ;;  %v1736_v48 = vpop.f32.mrf.mxu0 }
 0x14d   :  { %v1946_v49 = vpack.c.bf16 %v1775_v46, %v1775_v46 }
 0x14e   :  { %v1777_v50 = vpop.f32.mrf.mxu1 }
 0x14f   :  { %2542 = vmatprep.mubr.bf16.mxu1 %v1946_v49 }
 0x150   :  { %2543 = vmatmul.mubr.bf16.vlgmr.msra.gmra.mxu1 %v1945_v52 }
 0x151   :  { %3027 = vmatpush3.bf16.msra.mxu1 %v3101_v51 }
 0x152   :  { %3028 = vmatprep.subr.bf16.mxu1 %v3102_v55 }
 0x155   :  { %3029 = vmatpush3.bf16.msra.mxu1 %v3103_v58 }
 0x156   :  { %3030 = vmatprep.subr.bf16.mxu1 %v3104_v56 }
 0x159   :  { %3031 = vmatpush3.bf16.msra.mxu1 %v3105_v59 }
 0x15a   :  { %3032 = vmatprep.subr.bf16.mxu1 %v3106_v57 }
 0x15d   :  { %3033 = vmatpush3.bf16.msra.mxu1 %v3107_v60 }
 0x15e   :  { %3034 = vmatprep.subr.bf16.mxu1 %v3108_v61 }
 0x161   :  { %3035 = vmatpush3.bf16.msra.mxu1 %v3109_v62 }
 0x162   :  { %3036 = vmatprep.subr.bf16.mxu1 %v3110_v63 }
 0x165   :  { %3037 = vmatpush3.bf16.msra.mxu1 %v3111_v0 }
 0x166   :  { %3038 = vmatprep.subr.bf16.mxu1 %v3112_v1 }
 0x169   :  { %3039 = vmatpush3.bf16.msra.mxu1 %v3113_v2 }
 0x16a   :  { %3040 = vmatprep.subr.bf16.mxu1 %v3114_v3 }
 0x16d   :  { %3041 = vmatpush3.bf16.msra.mxu1 %v3115_v4 }
 0x186   :  { %v1813_v9 = vpop.f32.mrf.mxu0 }
 0x187   :  { %v1814_v10 = vadd.f32 %v1813_v9, %v300_v7 }
 0x188   :  { %v1854_v11 = vpop.f32.mrf.mxu1  ;;  %v1815_v12 = vpop.f32.mrf.mxu0 }
 0x189   :  { %v1816_v13 = vadd.f32 %v1815_v12, %v304_v8  ;;  %v1855_v15 = vadd.f32 %v1854_v11, %v1814_v10 }
 0x18a   :  { %v1856_v14 = vpop.f32.mrf.mxu1  ;;  %v1817_v17 = vpop.f32.mrf.mxu0 }
 0x18b   :  { %v1857_v18 = vadd.f32 %v1856_v14, %v1816_v13  ;;  %v1947_v23 = vpack.c.bf16 %v1855_v15, %v1855_v15 }
 0x18c   :  { %v1858_v20 = vpop.f32.mrf.mxu1  ;;  %v1818_v21 = vpop.f32.mrf.mxu0 }
 0x18d   :  { %v1948_v22 = vpack.c.bf16 %v1857_v18, %v1857_v18 }
 0x18e   :  { %v1859_v53 = vpop.f32.mrf.mxu1 }
 0x18f   :  { %2582 = vmatprep.mubr.bf16.mxu0 %v1948_v22 }
 0x190   :  { %2583 = vmatmul.mubr.bf16.vlgmr.msra.gmra.mxu0 %v1947_v23 }
 0x1c6   :  { %v1895_v28 = vpop.f32.mrf.mxu0 }
 0x1c7   :  { %v1896_v29 = vadd.f32 %v1895_v28, %v308_v25 }
 0x1c8   :  { %v1936_v30 = vpop.f32.mrf.mxu1  ;;  %v1897_v31 = vpop.f32.mrf.mxu0 }
 0x1c9   :  { %v1898_v32 = vadd.f32 %v1897_v31, %v312_v26  ;;  %v1937_v35 = vadd.f32 %v1936_v30, %v1896_v29 }
 0x1ca   :  { %v1938_v34 = vpop.f32.mrf.mxu1  ;;  %v1899_v36 = vpop.f32.mrf.mxu0 }
 0x1cb   :  { %v1939_v37 = vadd.f32 %v1938_v34, %v1898_v32  ;;  %v1949_v42 = vpack.c.bf16 %v1937_v35, %v1937_v35 }
 0x1cc   :  { %v1940_v38 = vpop.f32.mrf.mxu1  ;;  %v1900_v39 = vpop.f32.mrf.mxu0 }
 0x1cd   :  { %v1950_v40 = vpack.c.bf16 %v1939_v37, %v1939_v37 }
 0x1ce   :  { %v1941_v41 = vpop.f32.mrf.mxu1 }
 0x1cf   :  { %2622 = vmatprep.mubr.bf16.mxu1 %v1950_v40 }
 0x1d0   :  { %2623 = vmatmul.mubr.bf16.vlgmr.msra.gmra.mxu1 %v1949_v42 }
 0x1e6   :  { %v2976_v27 = vpop.f32.mrf.mxu0 }
 0x1e8   :  { %v2977_v43 = vpop.f32.mrf.mxu0 }
 0x1e9   :  { %v2978_v16 = vadd.f32 %v2977_v43, %v2976_v27 }
 0x1ea   :  { %v2979_v33 = vpop.f32.mrf.mxu0 }
 0x1eb   :  { %v2505_v47 = vadd.f32 %v2978_v16, %v2895_v45 }
 0x1ec   :  { %v2980_v44 = vpop.f32.mrf.mxu0 }
 0x210   :  { %v2998_v19 = vpop.f32.mrf.mxu1 }
 0x212   :  { %v2999_v46 = vpop.f32.mrf.mxu1 }
 0x213   :  { %v3000_v48 = vadd.f32 %v2999_v46, %v2998_v19 }
 0x214   :  { %v3001_v49 = vpop.f32.mrf.mxu1 }
 0x215   :  { %v2545_v50 = vadd.f32 %v3000_v48, %v2505_v47 }
 0x216   :  { %v3002_v51 = vpop.f32.mrf.mxu1 }
 0x250   :  { %v3020_v52 = vpop.f32.mrf.mxu0 }
 0x252   :  { %v3021_v55 = vpop.f32.mrf.mxu0 }
 0x253   :  { %v3022_v58 = vadd.f32 %v3021_v55, %v3020_v52 }
 0x254   :  { %v3023_v56 = vpop.f32.mrf.mxu0 }
 0x255   :  { %v2585_v59 = vadd.f32 %v3022_v58, %v2545_v50 }
 0x256   :  { %v3024_v57 = vpop.f32.mrf.mxu0 }
 0x290   :  { %v3042_v60 = vpop.f32.mrf.mxu1 }
 0x292   :  { %v3043_v61 = vpop.f32.mrf.mxu1 }
 0x293   :  { %v3044_v62 = vadd.f32 %v3043_v61, %v3042_v60 }
 0x294   :  { %v3045_v63 = vpop.f32.mrf.mxu1 }
 0x295   :  { %v2625_v0 = vadd.f32 %v3044_v62, %v2585_v59 }
 0x296   :  { %v3046_v1 = vpop.f32.mrf.mxu1 }
 0x297   :  { %2630 = vst [vmem:[%s4185_s5] sm:$0xff] %v2625_v0 }

</bundles_post_ra>
